<compile_context>
chip_gen: v7x
topology: tpu7x:2x2x1
jax: 0.10.0
libtpu: 0.0.40
codegen_flags: <defaults>
</compile_context>

<pallas_src>
import functools
import math

import jax
import jax.numpy as jnp
from jax import lax
from jax.experimental import pallas as pl
from jax.experimental.pallas import tpu as pltpu

# ----------------------------- configuration --------------------------------
BATCH = 2
NUM_CLASS = 4
DATASET_D = 3          # xyz coordinate channels
DATASET_C = 2          # extra feature channels
N_POINTS = 64
SA1 = dict(npoint=32, radius=0.4, nsample=16)
SA2 = dict(npoint=8, radius=0.8, nsample=8)
BN_EPS = 1e-5

# TODO(synk): group_conv=True grouped 1x1 convolutions are not implemented; the
# reference is reproduced for the default group_conv=False (groups=1) path.
# TODO(synk): BatchNorm is applied in eval mode (running stats folded into the
# weights/bias); Dropout(0.5) is identity in eval mode.


# ----------------------------- Pallas kernels --------------------------------
def _mlp_chain_kernel(*refs, num_layers):
    """x -> [ReLU(x @ w_l + b_l)]_l chained in VMEM. refs = (x, (w,b)*L, out)."""
    x_ref = refs[0]
    o_ref = refs[-1]
    h = x_ref[...]
    for l in range(num_layers):
        w = refs[1 + 2 * l][...]
        b = refs[2 + 2 * l][...]
        h = jnp.maximum(jnp.dot(h, w, preferred_element_type=jnp.float32) + b, 0.0)
    o_ref[...] = h


def fused_mlp(x, layers):
    """Fused stack of 1x1-conv(+folded BN)+ReLU layers: [M,Cin] -> [M,Cout]."""
    m, cin = x.shape
    folded = [(w * scale[None, :], shift.reshape(1, -1)) for (w, scale, shift) in layers]
    cout = folded[-1][0].shape[1]
    args = [x.astype(jnp.float32)]
    in_specs = [pl.BlockSpec((m, cin), lambda i: (0, 0))]
    flops, prev = 0, cin
    for wf, bf in folded:
        args += [wf.astype(jnp.float32), bf.astype(jnp.float32)]
        in_specs += [pl.BlockSpec(wf.shape, lambda i: (0, 0)),
                     pl.BlockSpec(bf.shape, lambda i: (0, 0))]
        flops += 2 * m * prev * wf.shape[1]
        prev = wf.shape[1]
    bytes_accessed = 4 * (x.size + sum(wf.size + bf.size for wf, bf in folded) + m * cout)
    return pl.pallas_call(
        functools.partial(_mlp_chain_kernel, num_layers=len(folded)),
        out_shape=jax.ShapeDtypeStruct((m, cout), jnp.float32),
        grid=(1,),
        in_specs=in_specs,
        out_specs=pl.BlockSpec((m, cout), lambda i: (0, 0)),
        compiler_params=pltpu.CompilerParams(dimension_semantics=("arbitrary",)),
        cost_estimate=pl.CostEstimate(flops=int(flops), transcendentals=0,
                                      bytes_accessed=int(bytes_accessed)),
    )(*args)


def _sa_mlp_pool_kernel(*refs, num_layers, nsample):
    """SA MLP + nsample max-pool.  x_ref: [K, G, Cin]; out: [G, Cout]."""
    x_ref = refs[0]
    o_ref = refs[-1]
    ws = [refs[1 + 2 * l][...] for l in range(num_layers)]
    bs = [refs[2 + 2 * l][...] for l in range(num_layers)]
    acc = None
    for k in range(nsample):                       # static unroll (K = 16 or 8)
        h = x_ref[k]                               # [G, Cin]
        for l in range(num_layers):
            h = jnp.maximum(
                jnp.dot(h, ws[l], preferred_element_type=jnp.float32) + bs[l], 0.0)
        acc = h if acc is None else jnp.maximum(acc, h)
    o_ref[...] = acc


def fused_sa_mlp_pool(x, layers):
    """x: [K, G, Cin] -> max over K of the fused MLP, shape [G, Cout]."""
    k, g, cin = x.shape
    folded = [(w * scale[None, :], shift.reshape(1, -1)) for (w, scale, shift) in layers]
    cout = folded[-1][0].shape[1]
    args = [x.astype(jnp.float32)]
    in_specs = [pl.BlockSpec((k, g, cin), lambda i: (0, 0, 0))]
    flops, prev = 0, cin
    for wf, bf in folded:
        args += [wf.astype(jnp.float32), bf.astype(jnp.float32)]
        in_specs += [pl.BlockSpec(wf.shape, lambda i: (0, 0)),
                     pl.BlockSpec(bf.shape, lambda i: (0, 0))]
        flops += 2 * k * g * prev * wf.shape[1]
        prev = wf.shape[1]
    bytes_accessed = 4 * (x.size + sum(wf.size + bf.size for wf, bf in folded) + g * cout)
    return pl.pallas_call(
        functools.partial(_sa_mlp_pool_kernel, num_layers=len(folded), nsample=k),
        out_shape=jax.ShapeDtypeStruct((g, cout), jnp.float32),
        grid=(1,),
        in_specs=in_specs,
        out_specs=pl.BlockSpec((g, cout), lambda i: (0, 0)),
        compiler_params=pltpu.CompilerParams(dimension_semantics=("arbitrary",)),
        cost_estimate=pl.CostEstimate(flops=int(flops), transcendentals=0,
                                      bytes_accessed=int(bytes_accessed)),
    )(*args)


def _sqdist_kernel(a_ref, b_ref, o_ref, *, batch, clamp):
    for i in range(batch):                         # static unroll (B = 2)
        a = a_ref[i]                               # [N, C]
        b = b_ref[i]                               # [M, C]
        gram = jnp.dot(a, b.T, preferred_element_type=jnp.float32)
        asq = jnp.sum(a * a, axis=1, keepdims=True)
        bsq = jnp.sum(b * b, axis=1, keepdims=True)
        d = asq - 2.0 * gram + bsq.T               # |a_i - b_j|^2
        if clamp:
            d = jnp.maximum(d, 0.0)
        o_ref[i] = d


def pallas_sqdist(a, b, clamp=False):
    """Pairwise squared distances, whole batch in one grid step."""
    bsz, n, c = a.shape
    m = b.shape[1]
    return pl.pallas_call(
        functools.partial(_sqdist_kernel, batch=bsz, clamp=clamp),
        out_shape=jax.ShapeDtypeStruct((bsz, n, m), jnp.float32),
        grid=(1,),
        in_specs=[pl.BlockSpec((bsz, n, c), lambda i: (0, 0, 0)),
                  pl.BlockSpec((bsz, m, c), lambda i: (0, 0, 0))],
        out_specs=pl.BlockSpec((bsz, n, m), lambda i: (0, 0, 0)),
        compiler_params=pltpu.CompilerParams(dimension_semantics=("arbitrary",)),
        cost_estimate=pl.CostEstimate(
            flops=int(2 * bsz * n * m * c + 3 * bsz * n * m),
            transcendentals=0,
            bytes_accessed=int(4 * (a.size + b.size + bsz * n * m))),
    )(a.astype(jnp.float32), b.astype(jnp.float32))


def _head_kernel(feat_ref, wsim_ref, bsim_ref, wcf_ref, bcf_ref, w1_ref, b1_ref,
                 wsem_ref, bsem_ref, w2_ref, b2_ref,
                 sim_ref, cf_ref, sem_ref, *, batch):
    """Fused head: conv_sim + sqdist-clamp, conv_cf/bn1/conv1+sigmoid,
    conv_sem/bn2/conv2+log_softmax — one launch, three outputs."""
    wsim, bsim = wsim_ref[...], bsim_ref[...]
    wcf, bcf = wcf_ref[...], bcf_ref[...]
    w1, b1 = w1_ref[...], b1_ref[...]
    wsem, bsem = wsem_ref[...], bsem_ref[...]
    w2, b2 = w2_ref[...], b2_ref[...]
    for bi in range(batch):                        # static unroll (B = 2)
        f = feat_ref[bi]                           # [N, 16]
        # similarity branch: sim = clamp(A - 2 F F^T + A^T, 0)
        fs = jnp.dot(f, wsim, preferred_element_type=jnp.float32) + bsim
        gram = jnp.dot(fs, fs.T, preferred_element_type=jnp.float32)
        asq = jnp.sum(fs * fs, axis=1, keepdims=True)
        sim_ref[bi] = jnp.maximum(asq - 2.0 * gram + asq.T, 0.0)
        # confidence branch (Dropout identity in eval)
        xc = jnp.maximum(jnp.dot(f, wcf, preferred_element_type=jnp.float32) + bcf, 0.0)
        cf_ref[bi] = jax.nn.sigmoid(
            jnp.dot(xc, w1, preferred_element_type=jnp.float32) + b1)
        # semantic branch
        xs = jnp.maximum(jnp.dot(f, wsem, preferred_element_type=jnp.float32) + bsem, 0.0)
        logits = jnp.dot(xs, w2, preferred_element_type=jnp.float32) + b2
        m = jnp.max(logits, axis=-1, keepdims=True)
        lse = m + jnp.log(jnp.sum(jnp.exp(logits - m), axis=-1, keepdims=True))
        sem_ref[bi] = logits - lse


def head_forward(params, l0_points):
    """l0_points: [B, N, 16] -> (sim [B,N,N], cf [B,N], sem [B,N,num_class])."""
    bsz, n, c0 = l0_points.shape

    def fold(p):
        w, scale, shift = p
        return w * scale[None, :], shift.reshape(1, -1)

    wsim, bsim = fold(params["conv_sim"])
    wcf, bcf = fold(params["conv_cf_bn1"])
    w1, b1 = fold(params["conv1"])
    wsem, bsem = fold(params["conv_sem_bn2"])
    w2, b2 = fold(params["conv2"])
    weights = [wsim, bsim, wcf, bcf, w1, b1, wsem, bsem, w2, b2]

    in_specs = [pl.BlockSpec((bsz, n, c0), lambda i: (0, 0, 0))]
    in_specs += [pl.BlockSpec(tuple(w.shape), lambda i: (0, 0)) for w in weights]
    flops = (2 * bsz * n * (c0 * (16 + 16 + 16) + 16 * 1 + 16 * NUM_CLASS)
             + 2 * bsz * n * n * 16)
    bytes_accessed = 4 * (bsz * n * c0 + sum(int(w.size) for w in weights)
                          + bsz * n * n + bsz * n + bsz * n * NUM_CLASS)

    sim, cf, sem = pl.pallas_call(
        functools.partial(_head_kernel, batch=bsz),
        out_shape=(jax.ShapeDtypeStruct((bsz, n, n), jnp.float32),
                   jax.ShapeDtypeStruct((bsz, n, 1), jnp.float32),
                   jax.ShapeDtypeStruct((bsz, n, NUM_CLASS), jnp.float32)),
        grid=(1,),
        in_specs=in_specs,
        out_specs=(pl.BlockSpec((bsz, n, n), lambda i: (0, 0, 0)),
                   pl.BlockSpec((bsz, n, 1), lambda i: (0, 0, 0)),
                   pl.BlockSpec((bsz, n, NUM_CLASS), lambda i: (0, 0, 0))),
        compiler_params=pltpu.CompilerParams(dimension_semantics=("arbitrary",)),
        cost_estimate=pl.CostEstimate(flops=int(flops),
                                      transcendentals=int(bsz * n * (NUM_CLASS + 2)),
                                      bytes_accessed=int(bytes_accessed)),
    )(l0_points.astype(jnp.float32), *[w.astype(jnp.float32) for w in weights])
    return sim, cf[..., 0], sem


# ----------------------------- JAX glue (sampling / grouping) ----------------
def index_points(points, idx):
    bsz = points.shape[0]
    batch = jnp.arange(bsz).reshape((bsz,) + (1,) * (idx.ndim - 1))
    return points[batch, idx]


def farthest_point_sample(xyz, npoint):
    # TODO(synk): FPS is an inherently sequential argmax loop; kept in JAX.
    bsz, n, _ = xyz.shape

    def body(i, carry):
        centroids, distance, farthest = carry
        centroids = centroids.at[:, i].set(farthest)
        centroid = xyz[jnp.arange(bsz), farthest][:, None, :]       # [B,1,3]
        dist = jnp.sum((xyz - centroid) ** 2, axis=-1)
        distance = jnp.minimum(distance, dist)
        farthest = jnp.argmax(distance, axis=-1).astype(jnp.int32)
        return centroids, distance, farthest

    centroids = jnp.zeros((bsz, npoint), jnp.int32)
    distance = jnp.full((bsz, n), 1e10, jnp.float32)
    farthest = jnp.zeros((bsz,), jnp.int32)   # deterministic seed (torch uses randint)
    centroids, _, _ = lax.fori_loop(0, npoint, body, (centroids, distance, farthest))
    return centroids


def query_ball_point(radius, nsample, xyz, new_xyz):
    # TODO(synk): sort-based ball query (gather + sort) kept in XLA.
    bsz, n, _ = xyz.shape
    s = new_xyz.shape[1]
    sqrdists = pallas_sqdist(new_xyz, xyz)                         # [B,S,N]
    group_idx = jnp.broadcast_to(jnp.arange(n, dtype=jnp.int32), (bsz, s, n))
    group_idx = jnp.where(sqrdists > radius ** 2, jnp.int32(n), group_idx)
    group_idx = jnp.sort(group_idx, axis=-1)[:, :, :nsample]
    group_first = group_idx[:, :, :1]
    group_idx = jnp.where(group_idx == n,
                          jnp.broadcast_to(group_first, group_idx.shape),
                          group_idx)
    return group_idx


def sa_forward(layer_params, cfg, xyz, points):
    """PointNetSetAbstraction: [B,N,D],[B,N,C] -> [B,S,D],[B,S,Cout]."""
    fps_idx = farthest_point_sample(xyz, cfg["npoint"])
    new_xyz = index_points(xyz, fps_idx)                           # [B,S,D]
    idx = query_ball_point(cfg["radius"], cfg["nsample"], xyz, new_xyz)
    grouped_xyz = index_points(xyz, idx) - new_xyz[:, :, None, :]  # [B,S,K,D]
    grouped_pts = index_points(points, idx)                        # [B,S,K,C]
    new_points = jnp.concatenate([grouped_xyz, grouped_pts], axis=-1)
    bsz, s, k, c = new_points.shape
    x = jnp.transpose(new_points, (2, 0, 1, 3)).reshape(k, bsz * s, c)   # [K,G,C]
    pooled = fused_sa_mlp_pool(x, layer_params)                    # [G, Cout]
    return new_xyz, pooled.reshape(bsz, s, -1)


def fp_forward(layer_params, xyz1, xyz2, points1, points2):
    """PointNetFeaturePropagation: 3-NN interpolation + fused pointwise MLP."""
    bsz, n, _ = xyz1.shape
    s = xyz2.shape[1]
    if s == 1:
        interpolated = jnp.tile(points2, (1, n, 1))
    else:
        dists = pallas_sqdist(xyz1, xyz2)                          # [B,N,S]
        idx = jnp.argsort(dists, axis=-1)[:, :, :3]
        d3 = jnp.take_along_axis(dists, idx, axis=-1)
        recip = 1.0 / (d3 + 1e-8)
        weight = recip / jnp.sum(recip, axis=-1, keepdims=True)
        interpolated = jnp.sum(index_points(points2, idx) * weight[..., None], axis=2)
    if points1 is not None:
        new_points = jnp.concatenate([points1, interpolated], axis=-1)
    else:
        new_points = interpolated
    x = new_points.reshape(bsz * n, new_points.shape[-1])
    out = fused_mlp(x, layer_params)
    return out.reshape(bsz, n, -1)


# ----------------------------- parameters ------------------------------------
def _conv_bn_params(key, cin, cout):
    ks = jax.random.split(key, 6)
    w = jax.random.normal(ks[0], (cin, cout), jnp.float32) / math.sqrt(cin)
    b = 0.05 * jax.random.normal(ks[1], (cout,), jnp.float32)
    gamma = 1.0 + 0.1 * jax.random.normal(ks[2], (cout,), jnp.float32)
    beta = 0.05 * jax.random.normal(ks[3], (cout,), jnp.float32)
    running_mean = 0.05 * jax.random.normal(ks[4], (cout,), jnp.float32)
    running_var = 0.9 + 0.1 * jax.random.uniform(ks[5], (cout,), jnp.float32)
    scale = gamma / jnp.sqrt(running_var + BN_EPS)
    shift = (b - running_mean) * scale + beta
    return (w, scale, shift)


def _conv_params(key, cin, cout):
    k1, k2 = jax.random.split(key)
    w = jax.random.normal(k1, (cin, cout), jnp.float32) / math.sqrt(cin)
    b = 0.05 * jax.random.normal(k2, (cout,), jnp.float32)
    return (w, jnp.ones((cout,), jnp.float32), b)   # scale=1, shift=bias


def init_params(key):
    keys = iter(jax.random.split(key, 32))
    params = {}

    def mlp(cin, widths):
        layers = []
        for cout in widths:
            layers.append(_conv_bn_params(next(keys), cin, cout))
            cin = cout
        return layers

    params["sa1"] = mlp(DATASET_C + DATASET_D, [SA1["nsample"], 32, 64])
    params["sa2"] = mlp(64 + DATASET_D, [64, 128, 256])
    params["fp2"] = mlp(256 + 64, [64, 32])
    params["fp1"] = mlp(32 + DATASET_C, [32, 32, 16])
    params["conv_sim"] = _conv_params(next(keys), 16, 16)
    params["conv_cf_bn1"] = _conv_bn_params(next(keys), 16, 16)
    params["conv1"] = _conv_params(next(keys), 16, 1)
    params["conv_sem_bn2"] = _conv_bn_params(next(keys), 16, 16)
    params["conv2"] = _conv_params(next(keys), 16, NUM_CLASS)
    return params


# ----------------------------- full forward ----------------------------------
def forward(params, xyz):
    # xyz: [B, DATASET_D + DATASET_C, N]  (channels-first, as in PyTorch)
    pts = jnp.transpose(xyz, (0, 2, 1))                            # [B,N,D+C]
    l0_xyz = pts[..., :DATASET_D]
    l0_points = pts[..., DATASET_D:]
    l1_xyz, l1_points = sa_forward(params["sa1"], SA1, l0_xyz, l0_points)
    l2_xyz, l2_points = sa_forward(params["sa2"], SA2, l1_xyz, l1_points)
    l1_points = fp_forward(params["fp2"], l1_xyz, l2_xyz, l1_points, l2_points)
    l0_points = fp_forward(params["fp1"], l0_xyz, l1_xyz, l0_points, l1_points)
    # fused head: sim / confidence / semantic branches in one Pallas call
    sim_mat, cf_mat, sem_mat = head_forward(params, l0_points)     # [B,N,16] feat
    return sim_mat, cf_mat, sem_mat


# ----------------------------- main -------------------------------------------
if __name__ == "__main__":
    key = jax.random.PRNGKey(0)
    kp, kc, kf = jax.random.split(key, 3)
    params = init_params(kp)
    coords = jax.random.uniform(kc, (BATCH, DATASET_D, N_POINTS), jnp.float32)
    extra = jax.random.normal(kf, (BATCH, DATASET_C, N_POINTS), jnp.float32)
    xyz = jnp.concatenate([coords, extra], axis=1)                 # [2, 5, 64]

    fwd = jax.jit(forward)
    sim_mat, cf_mat, sem_mat = fwd(params, xyz)
    jax.block_until_ready((sim_mat, cf_mat, sem_mat))

    assert sim_mat.shape == (BATCH, N_POINTS, N_POINTS)
    assert cf_mat.shape == (BATCH, N_POINTS)
    assert sem_mat.shape == (BATCH, N_POINTS, NUM_CLASS)
    assert bool(jnp.all(jnp.isfinite(sim_mat)))
    assert bool(jnp.all(jnp.isfinite(cf_mat)))
    assert bool(jnp.all(jnp.isfinite(sem_mat)))
    print("KERNEL_OK")
</pallas_src>

<mosaic_0001>
module attributes {stable_mosaic.version = 11 : i64} {
  func.func @_sqdist_kernel(%arg0: i32, %arg1: memref<2x32x3xf32, #tpu.memory_space<vmem>>, %arg2: memref<2x64x3xf32, #tpu.memory_space<vmem>>, %arg3: memref<2x32x64xf32, #tpu.memory_space<vmem>>) attributes {dimension_semantics = [#tpu.dimension_semantics<arbitrary>], iteration_bounds = array<i64: 1>, scalar_prefetch = 0 : i64, scratch_operands = 0 : i64, tpu.core_type = #tpu.core_type<tc>, window_params = [{pipeline_mode = #tpu.pipeline_mode<synchronous>, transform_indices = @transform_0, window_bounds = array<i64: 2, 32, 3>}, {pipeline_mode = #tpu.pipeline_mode<synchronous>, transform_indices = @transform_1, window_bounds = array<i64: 2, 64, 3>}, {pipeline_mode = #tpu.pipeline_mode<synchronous>, transform_indices = @transform_2, window_bounds = array<i64: 2, 32, 64>}]} {
    %c0 = arith.constant 0 : index
    %c0_0 = arith.constant 0 : index
    %c0_1 = arith.constant 0 : index
    %0 = vector.load %arg1[%c0, %c0_0, %c0_1] : memref<2x32x3xf32, #tpu.memory_space<vmem>>, vector<1x32x3xf32>
    %1 = vector.shape_cast %0 : vector<1x32x3xf32> to vector<32x3xf32>
    %c0_2 = arith.constant 0 : index
    %c0_3 = arith.constant 0 : index
    %c0_4 = arith.constant 0 : index
    %2 = vector.load %arg2[%c0_2, %c0_3, %c0_4] : memref<2x64x3xf32, #tpu.memory_space<vmem>>, vector<1x64x3xf32>
    %3 = vector.shape_cast %2 : vector<1x64x3xf32> to vector<64x3xf32>
    %4 = tpu.transpose %3, [1, 0] : vector<64x3xf32> -> vector<3x64xf32>
    %cst = arith.constant dense<0.000000e+00> : vector<32x64xf32>
    %5 = tpu.matmul %1, %4, %cst {dimension_numbers = #tpu.dot_dimension_numbers<[1], [0], [0], [1], [0, 0, 1, 1], [], []>} : vector<32x3xf32>, vector<3x64xf32>, vector<32x64xf32> -> vector<32x64xf32>
    %6 = arith.mulf %1, %1 : vector<32x3xf32>
    %cst_5 = arith.constant dense<0.000000e+00> : vector<32xf32>
    %7 = vector.multi_reduction <add>, %6, %cst_5 [1] : vector<32x3xf32> to vector<32xf32>
    %8 = vector.shape_cast %7 : vector<32xf32> to vector<32x1xf32>
    %9 = arith.mulf %3, %3 : vector<64x3xf32>
    %cst_6 = arith.constant dense<0.000000e+00> : vector<64xf32>
    %10 = vector.multi_reduction <add>, %9, %cst_6 [1] : vector<64x3xf32> to vector<64xf32>
    %11 = vector.shape_cast %10 : vector<64xf32> to vector<64x1xf32>
    %cst_7 = arith.constant 2.000000e+00 : f32
    %12 = vector.broadcast %cst_7 : f32 to vector<32x64xf32>
    %13 = arith.mulf %12, %5 : vector<32x64xf32>
    %14 = vector.broadcast %8 : vector<32x1xf32> to vector<32x64xf32>
    %15 = arith.subf %14, %13 : vector<32x64xf32>
    %16 = tpu.transpose %11, [1, 0] : vector<64x1xf32> -> vector<1x64xf32>
    %17 = vector.broadcast %16 : vector<1x64xf32> to vector<32x64xf32>
    %18 = arith.addf %15, %17 : vector<32x64xf32>
    %c0_8 = arith.constant 0 : index
    %c0_9 = arith.constant 0 : index
    %c0_10 = arith.constant 0 : index
    %19 = vector.load %arg3[%c0_8, %c0_9, %c0_10] : memref<2x32x64xf32, #tpu.memory_space<vmem>>, vector<1x32x64xf32>
    %20 = vector.shape_cast %19 : vector<1x32x64xf32> to vector<32x64xf32>
    %21 = vector.shape_cast %18 : vector<32x64xf32> to vector<1x32x64xf32>
    tpu.vector_store %arg3[%c0_8, %c0_9, %c0_10], %21 {strides = array<i32>} : memref<2x32x64xf32, #tpu.memory_space<vmem>>, vector<1x32x64xf32>,
    %c1 = arith.constant 1 : index
    %c0_11 = arith.constant 0 : index
    %c0_12 = arith.constant 0 : index
    %22 = vector.load %arg1[%c1, %c0_11, %c0_12] : memref<2x32x3xf32, #tpu.memory_space<vmem>>, vector<1x32x3xf32>
    %23 = vector.shape_cast %22 : vector<1x32x3xf32> to vector<32x3xf32>
    %c1_13 = arith.constant 1 : index
    %c0_14 = arith.constant 0 : index
    %c0_15 = arith.constant 0 : index
    %24 = vector.load %arg2[%c1_13, %c0_14, %c0_15] : memref<2x64x3xf32, #tpu.memory_space<vmem>>, vector<1x64x3xf32>
    %25 = vector.shape_cast %24 : vector<1x64x3xf32> to vector<64x3xf32>
    %26 = tpu.transpose %25, [1, 0] : vector<64x3xf32> -> vector<3x64xf32>
    %cst_16 = arith.constant dense<0.000000e+00> : vector<32x64xf32>
    %27 = tpu.matmul %23, %26, %cst_16 {dimension_numbers = #tpu.dot_dimension_numbers<[1], [0], [0], [1], [0, 0, 1, 1], [], []>} : vector<32x3xf32>, vector<3x64xf32>, vector<32x64xf32> -> vector<32x64xf32>
    %28 = arith.mulf %23, %23 : vector<32x3xf32>
    %cst_17 = arith.constant dense<0.000000e+00> : vector<32xf32>
    %29 = vector.multi_reduction <add>, %28, %cst_17 [1] : vector<32x3xf32> to vector<32xf32>
    %30 = vector.shape_cast %29 : vector<32xf32> to vector<32x1xf32>
    %31 = arith.mulf %25, %25 : vector<64x3xf32>
    %cst_18 = arith.constant dense<0.000000e+00> : vector<64xf32>
    %32 = vector.multi_reduction <add>, %31, %cst_18 [1] : vector<64x3xf32> to vector<64xf32>
    %33 = vector.shape_cast %32 : vector<64xf32> to vector<64x1xf32>
    %cst_19 = arith.constant 2.000000e+00 : f32
    %34 = vector.broadcast %cst_19 : f32 to vector<32x64xf32>
    %35 = arith.mulf %34, %27 : vector<32x64xf32>
    %36 = vector.broadcast %30 : vector<32x1xf32> to vector<32x64xf32>
    %37 = arith.subf %36, %35 : vector<32x64xf32>
    %38 = tpu.transpose %33, [1, 0] : vector<64x1xf32> -> vector<1x64xf32>
    %39 = vector.broadcast %38 : vector<1x64xf32> to vector<32x64xf32>
    %40 = arith.addf %37, %39 : vector<32x64xf32>
    %c1_20 = arith.constant 1 : index
    %c0_21 = arith.constant 0 : index
    %c0_22 = arith.constant 0 : index
    %41 = vector.load %arg3[%c1_20, %c0_21, %c0_22] : memref<2x32x64xf32, #tpu.memory_space<vmem>>, vector<1x32x64xf32>
    %42 = vector.shape_cast %41 : vector<1x32x64xf32> to vector<32x64xf32>
    %43 = vector.shape_cast %40 : vector<32x64xf32> to vector<1x32x64xf32>
    tpu.vector_store %arg3[%c1_20, %c0_21, %c0_22], %43 {strides = array<i32>} : memref<2x32x64xf32, #tpu.memory_space<vmem>>, vector<1x32x64xf32>,
    return
  }
  func.func @transform_0(%arg0: i32) -> (i32, i32, i32) {
    %c0_i32 = arith.constant 0 : i32
    %c0_i32_0 = arith.constant 0 : i32
    %c0_i32_1 = arith.constant 0 : i32
    %c0_i32_2 = arith.constant 0 : i32
    return %c0_i32, %c0_i32_0, %c0_i32_1 : i32, i32, i32
  }
  func.func @transform_1(%arg0: i32) -> (i32, i32, i32) {
    %c0_i32 = arith.constant 0 : i32
    %c0_i32_0 = arith.constant 0 : i32
    %c0_i32_1 = arith.constant 0 : i32
    %c0_i32_2 = arith.constant 0 : i32
    return %c0_i32, %c0_i32_0, %c0_i32_1 : i32, i32, i32
  }
  func.func @transform_2(%arg0: i32) -> (i32, i32, i32) {
    %c0_i32 = arith.constant 0 : i32
    %c0_i32_0 = arith.constant 0 : i32
    %c0_i32_1 = arith.constant 0 : i32
    %c0_i32_2 = arith.constant 0 : i32
    return %c0_i32, %c0_i32_0, %c0_i32_1 : i32, i32, i32
  }
}

module attributes {stable_mosaic.version = 11 : i64} {
  func.func @_sa_mlp_pool_kernel(%arg0: i32, %arg1: memref<16x64x5xf32, #tpu.memory_space<vmem>>, %arg2: memref<5x16xf32, #tpu.memory_space<vmem>>, %arg3: memref<1x16xf32, #tpu.memory_space<vmem>>, %arg4: memref<16x32xf32, #tpu.memory_space<vmem>>, %arg5: memref<1x32xf32, #tpu.memory_space<vmem>>, %arg6: memref<32x64xf32, #tpu.memory_space<vmem>>, %arg7: memref<1x64xf32, #tpu.memory_space<vmem>>, %arg8: memref<64x64xf32, #tpu.memory_space<vmem>>) attributes {dimension_semantics = [#tpu.dimension_semantics<arbitrary>], iteration_bounds = array<i64: 1>, scalar_prefetch = 0 : i64, scratch_operands = 0 : i64, tpu.core_type = #tpu.core_type<tc>, window_params = [{pipeline_mode = #tpu.pipeline_mode<synchronous>, transform_indices = @transform_0, window_bounds = array<i64: 16, 64, 5>}, {pipeline_mode = #tpu.pipeline_mode<synchronous>, transform_indices = @transform_1, window_bounds = array<i64: 5, 16>}, {pipeline_mode = #tpu.pipeline_mode<synchronous>, transform_indices = @transform_2, window_bounds = array<i64: 1, 16>}, {pipeline_mode = #tpu.pipeline_mode<synchronous>, transform_indices = @transform_3, window_bounds = array<i64: 16, 32>}, {pipeline_mode = #tpu.pipeline_mode<synchronous>, transform_indices = @transform_4, window_bounds = array<i64: 1, 32>}, {pipeline_mode = #tpu.pipeline_mode<synchronous>, transform_indices = @transform_5, window_bounds = array<i64: 32, 64>}, {pipeline_mode = #tpu.pipeline_mode<synchronous>, transform_indices = @transform_6, window_bounds = array<i64: 1, 64>}, {pipeline_mode = #tpu.pipeline_mode<synchronous>, transform_indices = @transform_7, window_bounds = array<i64: 64, 64>}]} {
    %c0 = arith.constant 0 : index
    %c0_0 = arith.constant 0 : index
    %0 = vector.load %arg2[%c0, %c0_0] : memref<5x16xf32, #tpu.memory_space<vmem>>, vector<5x16xf32>
    %c0_1 = arith.constant 0 : index
    %c0_2 = arith.constant 0 : index
    %1 = vector.load %arg4[%c0_1, %c0_2] : memref<16x32xf32, #tpu.memory_space<vmem>>, vector<16x32xf32>
    %c0_3 = arith.constant 0 : index
    %c0_4 = arith.constant 0 : index
    %2 = vector.load %arg6[%c0_3, %c0_4] : memref<32x64xf32, #tpu.memory_space<vmem>>, vector<32x64xf32>
    %c0_5 = arith.constant 0 : index
    %c0_6 = arith.constant 0 : index
    %3 = vector.load %arg3[%c0_5, %c0_6] : memref<1x16xf32, #tpu.memory_space<vmem>>, vector<1x16xf32>
    %c0_7 = arith.constant 0 : index
    %c0_8 = arith.constant 0 : index
    %4 = vector.load %arg5[%c0_7, %c0_8] : memref<1x32xf32, #tpu.memory_space<vmem>>, vector<1x32xf32>
    %c0_9 = arith.constant 0 : index
    %c0_10 = arith.constant 0 : index
    %5 = vector.load %arg7[%c0_9, %c0_10] : memref<1x64xf32, #tpu.memory_space<vmem>>, vector<1x64xf32>
    %c0_11 = arith.constant 0 : index
    %c0_12 = arith.constant 0 : index
    %c0_13 = arith.constant 0 : index
    %6 = vector.load %arg1[%c0_11, %c0_12, %c0_13] : memref<16x64x5xf32, #tpu.memory_space<vmem>>, vector<1x64x5xf32>
    %7 = vector.shape_cast %6 : vector<1x64x5xf32> to vector<64x5xf32>
    %cst = arith.constant dense<0.000000e+00> : vector<64x16xf32>
    %8 = tpu.matmul %7, %0, %cst {dimension_numbers = #tpu.dot_dimension_numbers<[1], [0], [0], [1], [0, 0, 1, 1], [], []>} : vector<64x5xf32>, vector<5x16xf32>, vector<64x16xf32> -> vector<64x16xf32>
    %9 = vector.broadcast %3 : vector<1x16xf32> to vector<64x16xf32>
    %10 = arith.addf %8, %9 : vector<64x16xf32>
    %cst_14 = arith.constant 0.000000e+00 : f32
    %11 = vector.broadcast %cst_14 : f32 to vector<64x16xf32>
    %12 = arith.maximumf %10, %11 : vector<64x16xf32>
    %cst_15 = arith.constant dense<0.000000e+00> : vector<64x32xf32>
    %13 = tpu.matmul %12, %1, %cst_15 {dimension_numbers = #tpu.dot_dimension_numbers<[1], [0], [0], [1], [0, 0, 1, 1], [], []>} : vector<64x16xf32>, vector<16x32xf32>, vector<64x32xf32> -> vector<64x32xf32>
    %14 = vector.broadcast %4 : vector<1x32xf32> to vector<64x32xf32>
    %15 = arith.addf %13, %14 : vector<64x32xf32>
    %cst_16 = arith.constant 0.000000e+00 : f32
    %16 = vector.broadcast %cst_16 : f32 to vector<64x32xf32>
    %17 = arith.maximumf %15, %16 : vector<64x32xf32>
    %cst_17 = arith.constant dense<0.000000e+00> : vector<64x64xf32>
    %18 = tpu.matmul %17, %2, %cst_17 {dimension_numbers = #tpu.dot_dimension_numbers<[1], [0], [0], [1], [0, 0, 1, 1], [], []>} : vector<64x32xf32>, vector<32x64xf32>, vector<64x64xf32> -> vector<64x64xf32>
    %19 = vector.broadcast %5 : vector<1x64xf32> to vector<64x64xf32>
    %20 = arith.addf %18, %19 : vector<64x64xf32>
    %cst_18 = arith.constant 0.000000e+00 : f32
    %21 = vector.broadcast %cst_18 : f32 to vector<64x64xf32>
    %22 = arith.maximumf %20, %21 : vector<64x64xf32>
    %c1 = arith.constant 1 : index
    %c0_19 = arith.constant 0 : index
    %c0_20 = arith.constant 0 : index
    %23 = vector.load %arg1[%c1, %c0_19, %c0_20] : memref<16x64x5xf32, #tpu.memory_space<vmem>>, vector<1x64x5xf32>
    %24 = vector.shape_cast %23 : vector<1x64x5xf32> to vector<64x5xf32>
    %cst_21 = arith.constant dense<0.000000e+00> : vector<64x16xf32>
    %25 = tpu.matmul %24, %0, %cst_21 {dimension_numbers = #tpu.dot_dimension_numbers<[1], [0], [0], [1], [0, 0, 1, 1], [], []>} : vector<64x5xf32>, vector<5x16xf32>, vector<64x16xf32> -> vector<64x16xf32>
    %26 = vector.broadcast %3 : vector<1x16xf32> to vector<64x16xf32>
    %27 = arith.addf %25, %26 : vector<64x16xf32>
    %cst_22 = arith.constant 0.000000e+00 : f32
    %28 = vector.broadcast %cst_22 : f32 to vector<64x16xf32>
    %29 = arith.maximumf %27, %28 : vector<64x16xf32>
    %cst_23 = arith.constant dense<0.000000e+00> : vector<64x32xf32>
    %30 = tpu.matmul %29, %1, %cst_23 {dimension_numbers = #tpu.dot_dimension_numbers<[1], [0], [0], [1], [0, 0, 1, 1], [], []>} : vector<64x16xf32>, vector<16x32xf32>, vector<64x32xf32> -> vector<64x32xf32>
    %31 = vector.broadcast %4 : vector<1x32xf32> to vector<64x32xf32>
    %32 = arith.addf %30, %31 : vector<64x32xf32>
    %cst_24 = arith.constant 0.000000e+00 : f32
    %33 = vector.broadcast %cst_24 : f32 to vector<64x32xf32>
    %34 = arith.maximumf %32, %33 : vector<64x32xf32>
    %cst_25 = arith.constant dense<0.000000e+00> : vector<64x64xf32>
    %35 = tpu.matmul %34, %2, %cst_25 {dimension_numbers = #tpu.dot_dimension_numbers<[1], [0], [0], [1], [0, 0, 1, 1], [], []>} : vector<64x32xf32>, vector<32x64xf32>, vector<64x64xf32> -> vector<64x64xf32>
    %36 = vector.broadcast %5 : vector<1x64xf32> to vector<64x64xf32>
    %37 = arith.addf %35, %36 : vector<64x64xf32>
    %cst_26 = arith.constant 0.000000e+00 : f32
    %38 = vector.broadcast %cst_26 : f32 to vector<64x64xf32>
    %39 = arith.maximumf %37, %38 : vector<64x64xf32>
    %40 = arith.maximumf %22, %39 : vector<64x64xf32>
    %c2 = arith.constant 2 : index
    %c0_27 = arith.constant 0 : index
    %c0_28 = arith.constant 0 : index
    %41 = vector.load %arg1[%c2, %c0_27, %c0_28] : memref<16x64x5xf32, #tpu.memory_space<vmem>>, vector<1x64x5xf32>
    %42 = vector.shape_cast %41 : vector<1x64x5xf32> to vector<64x5xf32>
    %cst_29 = arith.constant dense<0.000000e+00> : vector<64x16xf32>
    %43 = tpu.matmul %42, %0, %cst_29 {dimension_numbers = #tpu.dot_dimension_numbers<[1], [0], [0], [1], [0, 0, 1, 1], [], []>} : vector<64x5xf32>, vector<5x16xf32>, vector<64x16xf32> -> vector<64x16xf32>
    %44 = vector.broadcast %3 : vector<1x16xf32> to vector<64x16xf32>
    %45 = arith.addf %43, %44 : vector<64x16xf32>
    %cst_30 = arith.constant 0.000000e+00 : f32
    %46 = vector.broadcast %cst_30 : f32 to vector<64x16xf32>
    %47 = arith.maximumf %45, %46 : vector<64x16xf32>
    %cst_31 = arith.constant dense<0.000000e+00> : vector<64x32xf32>
    %48 = tpu.matmul %47, %1, %cst_31 {dimension_numbers = #tpu.dot_dimension_numbers<[1], [0], [0], [1], [0, 0, 1, 1], [], []>} : vector<64x16xf32>, vector<16x32xf32>, vector<64x32xf32> -> vector<64x32xf32>
    %49 = vector.broadcast %4 : vector<1x32xf32> to vector<64x32xf32>
    %50 = arith.addf %48, %49 : vector<64x32xf32>
    %cst_32 = arith.constant 0.000000e+00 : f32
    %51 = vector.broadcast %cst_32 : f32 to vector<64x32xf32>
    %52 = arith.maximumf %50, %51 : vector<64x32xf32>
    %cst_33 = arith.constant dense<0.000000e+00> : vector<64x64xf32>
    %53 = tpu.matmul %52, %2, %cst_33 {dimension_numbers = #tpu.dot_dimension_numbers<[1], [0], [0], [1], [0, 0, 1, 1], [], []>} : vector<64x32xf32>, vector<32x64xf32>, vector<64x64xf32> -> vector<64x64xf32>
    %54 = vector.broadcast %5 : vector<1x64xf32> to vector<64x64xf32>
    %55 = arith.addf %53, %54 : vector<64x64xf32>
    %cst_34 = arith.constant 0.000000e+00 : f32
    %56 = vector.broadcast %cst_34 : f32 to vector<64x64xf32>
    %57 = arith.maximumf %55, %56 : vector<64x64xf32>
    %58 = arith.maximumf %40, %57 : vector<64x64xf32>
    %c3 = arith.constant 3 : index
    %c0_35 = arith.constant 0 : index
    %c0_36 = arith.constant 0 : index
    %59 = vector.load %arg1[%c3, %c0_35, %c0_36] : memref<16x64x5xf32, #tpu.memory_space<vmem>>, vector<1x64x5xf32>
    %60 = vector.shape_cast %59 : vector<1x64x5xf32> to vector<64x5xf32>
    %cst_37 = arith.constant dense<0.000000e+00> : vector<64x16xf32>
    %61 = tpu.matmul %60, %0, %cst_37 {dimension_numbers = #tpu.dot_dimension_numbers<[1], [0], [0], [1], [0, 0, 1, 1], [], []>} : vector<64x5xf32>, vector<5x16xf32>, vector<64x16xf32> -> vector<64x16xf32>
    %62 = vector.broadcast %3 : vector<1x16xf32> to vector<64x16xf32>
    %63 = arith.addf %61, %62 : vector<64x16xf32>
    %cst_38 = arith.constant 0.000000e+00 : f32
    %64 = vector.broadcast %cst_38 : f32 to vector<64x16xf32>
    %65 = arith.maximumf %63, %64 : vector<64x16xf32>
    %cst_39 = arith.constant dense<0.000000e+00> : vector<64x32xf32>
    %66 = tpu.matmul %65, %1, %cst_39 {dimension_numbers = #tpu.dot_dimension_numbers<[1], [0], [0], [1], [0, 0, 1, 1], [], []>} : vector<64x16xf32>, vector<16x32xf32>, vector<64x32xf32> -> vector<64x32xf32>
    %67 = vector.broadcast %4 : vector<1x32xf32> to vector<64x32xf32>
    %68 = arith.addf %66, %67 : vector<64x32xf32>
    %cst_40 = arith.constant 0.000000e+00 : f32
    %69 = vector.broadcast %cst_40 : f32 to vector<64x32xf32>
    %70 = arith.maximumf %68, %69 : vector<64x32xf32>
    %cst_41 = arith.constant dense<0.000000e+00> : vector<64x64xf32>
    %71 = tpu.matmul %70, %2, %cst_41 {dimension_numbers = #tpu.dot_dimension_numbers<[1], [0], [0], [1], [0, 0, 1, 1], [], []>} : vector<64x32xf32>, vector<32x64xf32>, vector<64x64xf32> -> vector<64x64xf32>
    %72 = vector.broadcast %5 : vector<1x64xf32> to vector<64x64xf32>
    %73 = arith.addf %71, %72 : vector<64x64xf32>
    %cst_42 = arith.constant 0.000000e+00 : f32
    %74 = vector.broadcast %cst_42 : f32 to vector<64x64xf32>
    %75 = arith.maximumf %73, %74 : vector<64x64xf32>
    %76 = arith.maximumf %58, %75 : vector<64x64xf32>
    %c4 = arith.constant 4 : index
    %c0_43 = arith.constant 0 : index
    %c0_44 = arith.constant 0 : index
    %77 = vector.load %arg1[%c4, %c0_43, %c0_44] : memref<16x64x5xf32, #tpu.memory_space<vmem>>, vector<1x64x5xf32>
    %78 = vector.shape_cast %77 : vector<1x64x5xf32> to vector<64x5xf32>
    %cst_45 = arith.constant dense<0.000000e+00> : vector<64x16xf32>
    %79 = tpu.matmul %78, %0, %cst_45 {dimension_numbers = #tpu.dot_dimension_numbers<[1], [0], [0], [1], [0, 0, 1, 1], [], []>} : vector<64x5xf32>, vector<5x16xf32>, vector<64x16xf32> -> vector<64x16xf32>
    %80 = vector.broadcast %3 : vector<1x16xf32> to vector<64x16xf32>
    %81 = arith.addf %79, %80 : vector<64x16xf32>
    %cst_46 = arith.constant 0.000000e+00 : f32
    %82 = vector.broadcast %cst_46 : f32 to vector<64x16xf32>
    %83 = arith.maximumf %81, %82 : vector<64x16xf32>
    %cst_47 = arith.constant dense<0.000000e+00> : vector<64x32xf32>
    %84 = tpu.matmul %83, %1, %cst_47 {dimension_numbers = #tpu.dot_dimension_numbers<[1], [0], [0], [1], [0, 0, 1, 1], [], []>} : vector<64x16xf32>, vector<16x32xf32>, vector<64x32xf32> -> vector<64x32xf32>
    %85 = vector.broadcast %4 : vector<1x32xf32> to vector<64x32xf32>
    %86 = arith.addf %84, %85 : vector<64x32xf32>
    %cst_48 = arith.constant 0.000000e+00 : f32
    %87 = vector.broadcast %cst_48 : f32 to vector<64x32xf32>
    %88 = arith.maximumf %86, %87 : vector<64x32xf32>
    %cst_49 = arith.constant dense<0.000000e+00> : vector<64x64xf32>
    %89 = tpu.matmul %88, %2, %cst_49 {dimension_numbers = #tpu.dot_dimension_numbers<[1], [0], [0], [1], [0, 0, 1, 1], [], []>} : vector<64x32xf32>, vector<32x64xf32>, vector<64x64xf32> -> vector<64x64xf32>
    %90 = vector.broadcast %5 : vector<1x64xf32> to vector<64x64xf32>
    %91 = arith.addf %89, %90 : vector<64x64xf32>
    %cst_50 = arith.constant 0.000000e+00 : f32
    %92 = vector.broadcast %cst_50 : f32 to vector<64x64xf32>
    %93 = arith.maximumf %91, %92 : vector<64x64xf32>
    %94 = arith.maximumf %76, %93 : vector<64x64xf32>
    %c5 = arith.constant 5 : index
    %c0_51 = arith.constant 0 : index
    %c0_52 = arith.constant 0 : index
    %95 = vector.load %arg1[%c5, %c0_51, %c0_52] : memref<16x64x5xf32, #tpu.memory_space<vmem>>, vector<1x64x5xf32>
    %96 = vector.shape_cast %95 : vector<1x64x5xf32> to vector<64x5xf32>
    %cst_53 = arith.constant dense<0.000000e+00> : vector<64x16xf32>
    %97 = tpu.matmul %96, %0, %cst_53 {dimension_numbers = #tpu.dot_dimension_numbers<[1], [0], [0], [1], [0, 0, 1, 1], [], []>} : vector<64x5xf32>, vector<5x16xf32>, vector<64x16xf32> -> vector<64x16xf32>
    %98 = vector.broadcast %3 : vector<1x16xf32> to vector<64x16xf32>
    %99 = arith.addf %97, %98 : vector<64x16xf32>
    %cst_54 = arith.constant 0.000000e+00 : f32
    %100 = vector.broadcast %cst_54 : f32 to vector<64x16xf32>
    %101 = arith.maximumf %99, %100 : vector<64x16xf32>
    %cst_55 = arith.constant dense<0.000000e+00> : vector<64x32xf32>
    %102 = tpu.matmul %101, %1, %cst_55 {dimension_numbers = #tpu.dot_dimension_numbers<[1], [0], [0], [1], [0, 0, 1, 1], [], []>} : vector<64x16xf32>, vector<16x32xf32>, vector<64x32xf32> -> vector<64x32xf32>
    %103 = vector.broadcast %4 : vector<1x32xf32> to vector<64x32xf32>
    %104 = arith.addf %102, %103 : vector<64x32xf32>
    %cst_56 = arith.constant 0.000000e+00 : f32
    %105 = vector.broadcast %cst_56 : f32 to vector<64x32xf32>
    %106 = arith.maximumf %104, %105 : vector<64x32xf32>
    %cst_57 = arith.constant dense<0.000000e+00> : vector<64x64xf32>
    %107 = tpu.matmul %106, %2, %cst_57 {dimension_numbers = #tpu.dot_dimension_numbers<[1], [0], [0], [1], [0, 0, 1, 1], [], []>} : vector<64x32xf32>, vector<32x64xf32>, vector<64x64xf32> -> vector<64x64xf32>
    %108 = vector.broadcast %5 : vector<1x64xf32> to vector<64x64xf32>
    %109 = arith.addf %107, %108 : vector<64x64xf32>
    %cst_58 = arith.constant 0.000000e+00 : f32
    %110 = vector.broadcast %cst_58 : f32 to vector<64x64xf32>
    %111 = arith.maximumf %109, %110 : vector<64x64xf32>
    %112 = arith.maximumf %94, %111 : vector<64x64xf32>
    %c6 = arith.constant 6 : index
    %c0_59 = arith.constant 0 : index
    %c0_60 = arith.constant 0 : index
    %113 = vector.load %arg1[%c6, %c0_59, %c0_60] : memref<16x64x5xf32, #tpu.memory_space<vmem>>, vector<1x64x5xf32>
    %114 = vector.shape_cast %113 : vector<1x64x5xf32> to vector<64x5xf32>
    %cst_61 = arith.constant dense<0.000000e+00> : vector<64x16xf32>
    %115 = tpu.matmul %114, %0, %cst_61 {dimension_numbers = #tpu.dot_dimension_numbers<[1], [0], [0], [1], [0, 0, 1, 1], [], []>} : vector<64x5xf32>, vector<5x16xf32>, vector<64x16xf32> -> vector<64x16xf32>
    %116 = vector.broadcast %3 : vector<1x16xf32> to vector<64x16xf32>
    %117 = arith.addf %115, %116 : vector<64x16xf32>
    %cst_62 = arith.constant 0.000000e+00 : f32
    %118 = vector.broadcast %cst_62 : f32 to vector<64x16xf32>
    %119 = arith.maximumf %117, %118 : vector<64x16xf32>
    %cst_63 = arith.constant dense<0.000000e+00> : vector<64x32xf32>
    %120 = tpu.matmul %119, %1, %cst_63 {dimension_numbers = #tpu.dot_dimension_numbers<[1], [0], [0], [1], [0, 0, 1, 1], [], []>} : vector<64x16xf32>, vector<16x32xf32>, vector<64x32xf32> -> vector<64x32xf32>
    %121 = vector.broadcast %4 : vector<1x32xf32> to vector<64x32xf32>
    %122 = arith.addf %120, %121 : vector<64x32xf32>
    %cst_64 = arith.constant 0.000000e+00 : f32
    %123 = vector.broadcast %cst_64 : f32 to vector<64x32xf32>
    %124 = arith.maximumf %122, %123 : vector<64x32xf32>
    %cst_65 = arith.constant dense<0.000000e+00> : vector<64x64xf32>
    %125 = tpu.matmul %124, %2, %cst_65 {dimension_numbers = #tpu.dot_dimension_numbers<[1], [0], [0], [1], [0, 0, 1, 1], [], []>} : vector<64x32xf32>, vector<32x64xf32>, vector<64x64xf32> -> vector<64x64xf32>
    %126 = vector.broadcast %5 : vector<1x64xf32> to vector<64x64xf32>
    %127 = arith.addf %125, %126 : vector<64x64xf32>
    %cst_66 = arith.constant 0.000000e+00 : f32
    %128 = vector.broadcast %cst_66 : f32 to vector<64x64xf32>
    %129 = arith.maximumf %127, %128 : vector<64x64xf32>
    %130 = arith.maximumf %112, %129 : vector<64x64xf32>
    %c7 = arith.constant 7 : index
    %c0_67 = arith.constant 0 : index
    %c0_68 = arith.constant 0 : index
    %131 = vector.load %arg1[%c7, %c0_67, %c0_68] : memref<16x64x5xf32, #tpu.memory_space<vmem>>, vector<1x64x5xf32>
    %132 = vector.shape_cast %131 : vector<1x64x5xf32> to vector<64x5xf32>
    %cst_69 = arith.constant dense<0.000000e+00> : vector<64x16xf32>
    %133 = tpu.matmul %132, %0, %cst_69 {dimension_numbers = #tpu.dot_dimension_numbers<[1], [0], [0], [1], [0, 0, 1, 1], [], []>} : vector<64x5xf32>, vector<5x16xf32>, vector<64x16xf32> -> vector<64x16xf32>
    %134 = vector.broadcast %3 : vector<1x16xf32> to vector<64x16xf32>
    %135 = arith.addf %133, %134 : vector<64x16xf32>
    %cst_70 = arith.constant 0.000000e+00 : f32
    %136 = vector.broadcast %cst_70 : f32 to vector<64x16xf32>
    %137 = arith.maximumf %135, %136 : vector<64x16xf32>
    %cst_71 = arith.constant dense<0.000000e+00> : vector<64x32xf32>
    %138 = tpu.matmul %137, %1, %cst_71 {dimension_numbers = #tpu.dot_dimension_numbers<[1], [0], [0], [1], [0, 0, 1, 1], [], []>} : vector<64x16xf32>, vector<16x32xf32>, vector<64x32xf32> -> vector<64x32xf32>
    %139 = vector.broadcast %4 : vector<1x32xf32> to vector<64x32xf32>
    %140 = arith.addf %138, %139 : vector<64x32xf32>
    %cst_72 = arith.constant 0.000000e+00 : f32
    %141 = vector.broadcast %cst_72 : f32 to vector<64x32xf32>
    %142 = arith.maximumf %140, %141 : vector<64x32xf32>
    %cst_73 = arith.constant dense<0.000000e+00> : vector<64x64xf32>
    %143 = tpu.matmul %142, %2, %cst_73 {dimension_numbers = #tpu.dot_dimension_numbers<[1], [0], [0], [1], [0, 0, 1, 1], [], []>} : vector<64x32xf32>, vector<32x64xf32>, vector<64x64xf32> -> vector<64x64xf32>
    %144 = vector.broadcast %5 : vector<1x64xf32> to vector<64x64xf32>
    %145 = arith.addf %143, %144 : vector<64x64xf32>
    %cst_74 = arith.constant 0.000000e+00 : f32
    %146 = vector.broadcast %cst_74 : f32 to vector<64x64xf32>
    %147 = arith.maximumf %145, %146 : vector<64x64xf32>
    %148 = arith.maximumf %130, %147 : vector<64x64xf32>
    %c8 = arith.constant 8 : index
    %c0_75 = arith.constant 0 : index
    %c0_76 = arith.constant 0 : index
    %149 = vector.load %arg1[%c8, %c0_75, %c0_76] : memref<16x64x5xf32, #tpu.memory_space<vmem>>, vector<1x64x5xf32>
    %150 = vector.shape_cast %149 : vector<1x64x5xf32> to vector<64x5xf32>
    %cst_77 = arith.constant dense<0.000000e+00> : vector<64x16xf32>
    %151 = tpu.matmul %150, %0, %cst_77 {dimension_numbers = #tpu.dot_dimension_numbers<[1], [0], [0], [1], [0, 0, 1, 1], [], []>} : vector<64x5xf32>, vector<5x16xf32>, vector<64x16xf32> -> vector<64x16xf32>
    %152 = vector.broadcast %3 : vector<1x16xf32> to vector<64x16xf32>
    %153 = arith.addf %151, %152 : vector<64x16xf32>
    %cst_78 = arith.constant 0.000000e+00 : f32
    %154 = vector.broadcast %cst_78 : f32 to vector<64x16xf32>
    %155 = arith.maximumf %153, %154 : vector<64x16xf32>
    %cst_79 = arith.constant dense<0.000000e+00> : vector<64x32xf32>
    %156 = tpu.matmul %155, %1, %cst_79 {dimension_numbers = #tpu.dot_dimension_numbers<[1], [0], [0], [1], [0, 0, 1, 1], [], []>} : vector<64x16xf32>, vector<16x32xf32>, vector<64x32xf32> -> vector<64x32xf32>
    %157 = vector.broadcast %4 : vector<1x32xf32> to vector<64x32xf32>
    %158 = arith.addf %156, %157 : vector<64x32xf32>
    %cst_80 = arith.constant 0.000000e+00 : f32
    %159 = vector.broadcast %cst_80 : f32 to vector<64x32xf32>
    %160 = arith.maximumf %158, %159 : vector<64x32xf32>
    %cst_81 = arith.constant dense<0.000000e+00> : vector<64x64xf32>
    %161 = tpu.matmul %160, %2, %cst_81 {dimension_numbers = #tpu.dot_dimension_numbers<[1], [0], [0], [1], [0, 0, 1, 1], [], []>} : vector<64x32xf32>, vector<32x64xf32>, vector<64x64xf32> -> vector<64x64xf32>
    %162 = vector.broadcast %5 : vector<1x64xf32> to vector<64x64xf32>
    %163 = arith.addf %161, %162 : vector<64x64xf32>
    %cst_82 = arith.constant 0.000000e+00 : f32
    %164 = vector.broadcast %cst_82 : f32 to vector<64x64xf32>
    %165 = arith.maximumf %163, %164 : vector<64x64xf32>
    %166 = arith.maximumf %148, %165 : vector<64x64xf32>
    %c9 = arith.constant 9 : index
    %c0_83 = arith.constant 0 : index
    %c0_84 = arith.constant 0 : index
    %167 = vector.load %arg1[%c9, %c0_83, %c0_84] : memref<16x64x5xf32, #tpu.memory_space<vmem>>, vector<1x64x5xf32>
    %168 = vector.shape_cast %167 : vector<1x64x5xf32> to vector<64x5xf32>
    %cst_85 = arith.constant dense<0.000000e+00> : vector<64x16xf32>
    %169 = tpu.matmul %168, %0, %cst_85 {dimension_numbers = #tpu.dot_dimension_numbers<[1], [0], [0], [1], [0, 0, 1, 1], [], []>} : vector<64x5xf32>, vector<5x16xf32>, vector<64x16xf32> -> vector<64x16xf32>
    %170 = vector.broadcast %3 : vector<1x16xf32> to vector<64x16xf32>
    %171 = arith.addf %169, %170 : vector<64x16xf32>
    %cst_86 = arith.constant 0.000000e+00 : f32
    %172 = vector.broadcast %cst_86 : f32 to vector<64x16xf32>
    %173 = arith.maximumf %171, %172 : vector<64x16xf32>
    %cst_87 = arith.constant dense<0.000000e+00> : vector<64x32xf32>
    %174 = tpu.matmul %173, %1, %cst_87 {dimension_numbers = #tpu.dot_dimension_numbers<[1], [0], [0], [1], [0, 0, 1, 1], [], []>} : vector<64x16xf32>, vector<16x32xf32>, vector<64x32xf32> -> vector<64x32xf32>
    %175 = vector.broadcast %4 : vector<1x32xf32> to vector<64x32xf32>
    %176 = arith.addf %174, %175 : vector<64x32xf32>
    %cst_88 = arith.constant 0.000000e+00 : f32
    %177 = vector.broadcast %cst_88 : f32 to vector<64x32xf32>
    %178 = arith.maximumf %176, %177 : vector<64x32xf32>
    %cst_89 = arith.constant dense<0.000000e+00> : vector<64x64xf32>
    %179 = tpu.matmul %178, %2, %cst_89 {dimension_numbers = #tpu.dot_dimension_numbers<[1], [0], [0], [1], [0, 0, 1, 1], [], []>} : vector<64x32xf32>, vector<32x64xf32>, vector<64x64xf32> -> vector<64x64xf32>
    %180 = vector.broadcast %5 : vector<1x64xf32> to vector<64x64xf32>
    %181 = arith.addf %179, %180 : vector<64x64xf32>
    %cst_90 = arith.constant 0.000000e+00 : f32
    %182 = vector.broadcast %cst_90 : f32 to vector<64x64xf32>
    %183 = arith.maximumf %181, %182 : vector<64x64xf32>
    %184 = arith.maximumf %166, %183 : vector<64x64xf32>
    %c10 = arith.constant 10 : index
    %c0_91 = arith.constant 0 : index
    %c0_92 = arith.constant 0 : index
    %185 = vector.load %arg1[%c10, %c0_91, %c0_92] : memref<16x64x5xf32, #tpu.memory_space<vmem>>, vector<1x64x5xf32>
    %186 = vector.shape_cast %185 : vector<1x64x5xf32> to vector<64x5xf32>
    %cst_93 = arith.constant dense<0.000000e+00> : vector<64x16xf32>
    %187 = tpu.matmul %186, %0, %cst_93 {dimension_numbers = #tpu.dot_dimension_numbers<[1], [0], [0], [1], [0, 0, 1, 1], [], []>} : vector<64x5xf32>, vector<5x16xf32>, vector<64x16xf32> -> vector<64x16xf32>
    %188 = vector.broadcast %3 : vector<1x16xf32> to vector<64x16xf32>
    %189 = arith.addf %187, %188 : vector<64x16xf32>
    %cst_94 = arith.constant 0.000000e+00 : f32
    %190 = vector.broadcast %cst_94 : f32 to vector<64x16xf32>
    %191 = arith.maximumf %189, %190 : vector<64x16xf32>
    %cst_95 = arith.constant dense<0.000000e+00> : vector<64x32xf32>
    %192 = tpu.matmul %191, %1, %cst_95 {dimension_numbers = #tpu.dot_dimension_numbers<[1], [0], [0], [1], [0, 0, 1, 1], [], []>} : vector<64x16xf32>, vector<16x32xf32>, vector<64x32xf32> -> vector<64x32xf32>
    %193 = vector.broadcast %4 : vector<1x32xf32> to vector<64x32xf32>
    %194 = arith.addf %192, %193 : vector<64x32xf32>
    %cst_96 = arith.constant 0.000000e+00 : f32
    %195 = vector.broadcast %cst_96 : f32 to vector<64x32xf32>
    %196 = arith.maximumf %194, %195 : vector<64x32xf32>
    %cst_97 = arith.constant dense<0.000000e+00> : vector<64x64xf32>
    %197 = tpu.matmul %196, %2, %cst_97 {dimension_numbers = #tpu.dot_dimension_numbers<[1], [0], [0], [1], [0, 0, 1, 1], [], []>} : vector<64x32xf32>, vector<32x64xf32>, vector<64x64xf32> -> vector<64x64xf32>
    %198 = vector.broadcast %5 : vector<1x64xf32> to vector<64x64xf32>
    %199 = arith.addf %197, %198 : vector<64x64xf32>
    %cst_98 = arith.constant 0.000000e+00 : f32
    %200 = vector.broadcast %cst_98 : f32 to vector<64x64xf32>
    %201 = arith.maximumf %199, %200 : vector<64x64xf32>
    %202 = arith.maximumf %184, %201 : vector<64x64xf32>
    %c11 = arith.constant 11 : index
    %c0_99 = arith.constant 0 : index
    %c0_100 = arith.constant 0 : index
    %203 = vector.load %arg1[%c11, %c0_99, %c0_100] : memref<16x64x5xf32, #tpu.memory_space<vmem>>, vector<1x64x5xf32>
    %204 = vector.shape_cast %203 : vector<1x64x5xf32> to vector<64x5xf32>
    %cst_101 = arith.constant dense<0.000000e+00> : vector<64x16xf32>
    %205 = tpu.matmul %204, %0, %cst_101 {dimension_numbers = #tpu.dot_dimension_numbers<[1], [0], [0], [1], [0, 0, 1, 1], [], []>} : vector<64x5xf32>, vector<5x16xf32>, vector<64x16xf32> -> vector<64x16xf32>
    %206 = vector.broadcast %3 : vector<1x16xf32> to vector<64x16xf32>
    %207 = arith.addf %205, %206 : vector<64x16xf32>
    %cst_102 = arith.constant 0.000000e+00 : f32
    %208 = vector.broadcast %cst_102 : f32 to vector<64x16xf32>
    %209 = arith.maximumf %207, %208 : vector<64x16xf32>
    %cst_103 = arith.constant dense<0.000000e+00> : vector<64x32xf32>
    %210 = tpu.matmul %209, %1, %cst_103 {dimension_numbers = #tpu.dot_dimension_numbers<[1], [0], [0], [1], [0, 0, 1, 1], [], []>} : vector<64x16xf32>, vector<16x32xf32>, vector<64x32xf32> -> vector<64x32xf32>
    %211 = vector.broadcast %4 : vector<1x32xf32> to vector<64x32xf32>
    %212 = arith.addf %210, %211 : vector<64x32xf32>
    %cst_104 = arith.constant 0.000000e+00 : f32
    %213 = vector.broadcast %cst_104 : f32 to vector<64x32xf32>
    %214 = arith.maximumf %212, %213 : vector<64x32xf32>
    %cst_105 = arith.constant dense<0.000000e+00> : vector<64x64xf32>
    %215 = tpu.matmul %214, %2, %cst_105 {dimension_numbers = #tpu.dot_dimension_numbers<[1], [0], [0], [1], [0, 0, 1, 1], [], []>} : vector<64x32xf32>, vector<32x64xf32>, vector<64x64xf32> -> vector<64x64xf32>
    %216 = vector.broadcast %5 : vector<1x64xf32> to vector<64x64xf32>
    %217 = arith.addf %215, %216 : vector<64x64xf32>
    %cst_106 = arith.constant 0.000000e+00 : f32
    %218 = vector.broadcast %cst_106 : f32 to vector<64x64xf32>
    %219 = arith.maximumf %217, %218 : vector<64x64xf32>
    %220 = arith.maximumf %202, %219 : vector<64x64xf32>
    %c12 = arith.constant 12 : index
    %c0_107 = arith.constant 0 : index
    %c0_108 = arith.constant 0 : index
    %221 = vector.load %arg1[%c12, %c0_107, %c0_108] : memref<16x64x5xf32, #tpu.memory_space<vmem>>, vector<1x64x5xf32>
    %222 = vector.shape_cast %221 : vector<1x64x5xf32> to vector<64x5xf32>
    %cst_109 = arith.constant dense<0.000000e+00> : vector<64x16xf32>
    %223 = tpu.matmul %222, %0, %cst_109 {dimension_numbers = #tpu.dot_dimension_numbers<[1], [0], [0], [1], [0, 0, 1, 1], [], []>} : vector<64x5xf32>, vector<5x16xf32>, vector<64x16xf32> -> vector<64x16xf32>
    %224 = vector.broadcast %3 : vector<1x16xf32> to vector<64x16xf32>
    %225 = arith.addf %223, %224 : vector<64x16xf32>
    %cst_110 = arith.constant 0.000000e+00 : f32
    %226 = vector.broadcast %cst_110 : f32 to vector<64x16xf32>
    %227 = arith.maximumf %225, %226 : vector<64x16xf32>
    %cst_111 = arith.constant dense<0.000000e+00> : vector<64x32xf32>
    %228 = tpu.matmul %227, %1, %cst_111 {dimension_numbers = #tpu.dot_dimension_numbers<[1], [0], [0], [1], [0, 0, 1, 1], [], []>} : vector<64x16xf32>, vector<16x32xf32>, vector<64x32xf32> -> vector<64x32xf32>
    %229 = vector.broadcast %4 : vector<1x32xf32> to vector<64x32xf32>
    %230 = arith.addf %228, %229 : vector<64x32xf32>
    %cst_112 = arith.constant 0.000000e+00 : f32
    %231 = vector.broadcast %cst_112 : f32 to vector<64x32xf32>
    %232 = arith.maximumf %230, %231 : vector<64x32xf32>
    %cst_113 = arith.constant dense<0.000000e+00> : vector<64x64xf32>
    %233 = tpu.matmul %232, %2, %cst_113 {dimension_numbers = #tpu.dot_dimension_numbers<[1], [0], [0], [1], [0, 0, 1, 1], [], []>} : vector<64x32xf32>, vector<32x64xf32>, vector<64x64xf32> -> vector<64x64xf32>
    %234 = vector.broadcast %5 : vector<1x64xf32> to vector<64x64xf32>
    %235 = arith.addf %233, %234 : vector<64x64xf32>
    %cst_114 = arith.constant 0.000000e+00 : f32
    %236 = vector.broadcast %cst_114 : f32 to vector<64x64xf32>
    %237 = arith.maximumf %235, %236 : vector<64x64xf32>
    %238 = arith.maximumf %220, %237 : vector<64x64xf32>
    %c13 = arith.constant 13 : index
    %c0_115 = arith.constant 0 : index
    %c0_116 = arith.constant 0 : index
    %239 = vector.load %arg1[%c13, %c0_115, %c0_116] : memref<16x64x5xf32, #tpu.memory_space<vmem>>, vector<1x64x5xf32>
    %240 = vector.shape_cast %239 : vector<1x64x5xf32> to vector<64x5xf32>
    %cst_117 = arith.constant dense<0.000000e+00> : vector<64x16xf32>
    %241 = tpu.matmul %240, %0, %cst_117 {dimension_numbers = #tpu.dot_dimension_numbers<[1], [0], [0], [1], [0, 0, 1, 1], [], []>} : vector<64x5xf32>, vector<5x16xf32>, vector<64x16xf32> -> vector<64x16xf32>
    %242 = vector.broadcast %3 : vector<1x16xf32> to vector<64x16xf32>
    %243 = arith.addf %241, %242 : vector<64x16xf32>
    %cst_118 = arith.constant 0.000000e+00 : f32
    %244 = vector.broadcast %cst_118 : f32 to vector<64x16xf32>
    %245 = arith.maximumf %243, %244 : vector<64x16xf32>
    %cst_119 = arith.constant dense<0.000000e+00> : vector<64x32xf32>
    %246 = tpu.matmul %245, %1, %cst_119 {dimension_numbers = #tpu.dot_dimension_numbers<[1], [0], [0], [1], [0, 0, 1, 1], [], []>} : vector<64x16xf32>, vector<16x32xf32>, vector<64x32xf32> -> vector<64x32xf32>
    %247 = vector.broadcast %4 : vector<1x32xf32> to vector<64x32xf32>
    %248 = arith.addf %246, %247 : vector<64x32xf32>
    %cst_120 = arith.constant 0.000000e+00 : f32
    %249 = vector.broadcast %cst_120 : f32 to vector<64x32xf32>
    %250 = arith.maximumf %248, %249 : vector<64x32xf32>
    %cst_121 = arith.constant dense<0.000000e+00> : vector<64x64xf32>
    %251 = tpu.matmul %250, %2, %cst_121 {dimension_numbers = #tpu.dot_dimension_numbers<[1], [0], [0], [1], [0, 0, 1, 1], [], []>} : vector<64x32xf32>, vector<32x64xf32>, vector<64x64xf32> -> vector<64x64xf32>
    %252 = vector.broadcast %5 : vector<1x64xf32> to vector<64x64xf32>
    %253 = arith.addf %251, %252 : vector<64x64xf32>
    %cst_122 = arith.constant 0.000000e+00 : f32
    %254 = vector.broadcast %cst_122 : f32 to vector<64x64xf32>
    %255 = arith.maximumf %253, %254 : vector<64x64xf32>
    %256 = arith.maximumf %238, %255 : vector<64x64xf32>
    %c14 = arith.constant 14 : index
    %c0_123 = arith.constant 0 : index
    %c0_124 = arith.constant 0 : index
    %257 = vector.load %arg1[%c14, %c0_123, %c0_124] : memref<16x64x5xf32, #tpu.memory_space<vmem>>, vector<1x64x5xf32>
    %258 = vector.shape_cast %257 : vector<1x64x5xf32> to vector<64x5xf32>
    %cst_125 = arith.constant dense<0.000000e+00> : vector<64x16xf32>
    %259 = tpu.matmul %258, %0, %cst_125 {dimension_numbers = #tpu.dot_dimension_numbers<[1], [0], [0], [1], [0, 0, 1, 1], [], []>} : vector<64x5xf32>, vector<5x16xf32>, vector<64x16xf32> -> vector<64x16xf32>
    %260 = vector.broadcast %3 : vector<1x16xf32> to vector<64x16xf32>
    %261 = arith.addf %259, %260 : vector<64x16xf32>
    %cst_126 = arith.constant 0.000000e+00 : f32
    %262 = vector.broadcast %cst_126 : f32 to vector<64x16xf32>
    %263 = arith.maximumf %261, %262 : vector<64x16xf32>
    %cst_127 = arith.constant dense<0.000000e+00> : vector<64x32xf32>
    %264 = tpu.matmul %263, %1, %cst_127 {dimension_numbers = #tpu.dot_dimension_numbers<[1], [0], [0], [1], [0, 0, 1, 1], [], []>} : vector<64x16xf32>, vector<16x32xf32>, vector<64x32xf32> -> vector<64x32xf32>
    %265 = vector.broadcast %4 : vector<1x32xf32> to vector<64x32xf32>
    %266 = arith.addf %264, %265 : vector<64x32xf32>
    %cst_128 = arith.constant 0.000000e+00 : f32
    %267 = vector.broadcast %cst_128 : f32 to vector<64x32xf32>
    %268 = arith.maximumf %266, %267 : vector<64x32xf32>
    %cst_129 = arith.constant dense<0.000000e+00> : vector<64x64xf32>
    %269 = tpu.matmul %268, %2, %cst_129 {dimension_numbers = #tpu.dot_dimension_numbers<[1], [0], [0], [1], [0, 0, 1, 1], [], []>} : vector<64x32xf32>, vector<32x64xf32>, vector<64x64xf32> -> vector<64x64xf32>
    %270 = vector.broadcast %5 : vector<1x64xf32> to vector<64x64xf32>
    %271 = arith.addf %269, %270 : vector<64x64xf32>
    %cst_130 = arith.constant 0.000000e+00 : f32
    %272 = vector.broadcast %cst_130 : f32 to vector<64x64xf32>
    %273 = arith.maximumf %271, %272 : vector<64x64xf32>
    %274 = arith.maximumf %256, %273 : vector<64x64xf32>
    %c15 = arith.constant 15 : index
    %c0_131 = arith.constant 0 : index
    %c0_132 = arith.constant 0 : index
    %275 = vector.load %arg1[%c15, %c0_131, %c0_132] : memref<16x64x5xf32, #tpu.memory_space<vmem>>, vector<1x64x5xf32>
    %276 = vector.shape_cast %275 : vector<1x64x5xf32> to vector<64x5xf32>
    %cst_133 = arith.constant dense<0.000000e+00> : vector<64x16xf32>
    %277 = tpu.matmul %276, %0, %cst_133 {dimension_numbers = #tpu.dot_dimension_numbers<[1], [0], [0], [1], [0, 0, 1, 1], [], []>} : vector<64x5xf32>, vector<5x16xf32>, vector<64x16xf32> -> vector<64x16xf32>
    %278 = vector.broadcast %3 : vector<1x16xf32> to vector<64x16xf32>
    %279 = arith.addf %277, %278 : vector<64x16xf32>
    %cst_134 = arith.constant 0.000000e+00 : f32
    %280 = vector.broadcast %cst_134 : f32 to vector<64x16xf32>
    %281 = arith.maximumf %279, %280 : vector<64x16xf32>
    %cst_135 = arith.constant dense<0.000000e+00> : vector<64x32xf32>
    %282 = tpu.matmul %281, %1, %cst_135 {dimension_numbers = #tpu.dot_dimension_numbers<[1], [0], [0], [1], [0, 0, 1, 1], [], []>} : vector<64x16xf32>, vector<16x32xf32>, vector<64x32xf32> -> vector<64x32xf32>
    %283 = vector.broadcast %4 : vector<1x32xf32> to vector<64x32xf32>
    %284 = arith.addf %282, %283 : vector<64x32xf32>
    %cst_136 = arith.constant 0.000000e+00 : f32
    %285 = vector.broadcast %cst_136 : f32 to vector<64x32xf32>
    %286 = arith.maximumf %284, %285 : vector<64x32xf32>
    %cst_137 = arith.constant dense<0.000000e+00> : vector<64x64xf32>
    %287 = tpu.matmul %286, %2, %cst_137 {dimension_numbers = #tpu.dot_dimension_numbers<[1], [0], [0], [1], [0, 0, 1, 1], [], []>} : vector<64x32xf32>, vector<32x64xf32>, vector<64x64xf32> -> vector<64x64xf32>
    %288 = vector.broadcast %5 : vector<1x64xf32> to vector<64x64xf32>
    %289 = arith.addf %287, %288 : vector<64x64xf32>
    %cst_138 = arith.constant 0.000000e+00 : f32
    %290 = vector.broadcast %cst_138 : f32 to vector<64x64xf32>
    %291 = arith.maximumf %289, %290 : vector<64x64xf32>
    %292 = arith.maximumf %274, %291 : vector<64x64xf32>
    %c0_139 = arith.constant 0 : index
    %c0_140 = arith.constant 0 : index
    %293 = vector.load %arg8[%c0_139, %c0_140] : memref<64x64xf32, #tpu.memory_space<vmem>>, vector<64x64xf32>
    tpu.vector_store %arg8[%c0_139, %c0_140], %292 {strides = array<i32>} : memref<64x64xf32, #tpu.memory_space<vmem>>, vector<64x64xf32>,
    return
  }
  func.func @transform_0(%arg0: i32) -> (i32, i32, i32) {
    %c0_i32 = arith.constant 0 : i32
    %c0_i32_0 = arith.constant 0 : i32
    %c0_i32_1 = arith.constant 0 : i32
    %c0_i32_2 = arith.constant 0 : i32
    return %c0_i32, %c0_i32_0, %c0_i32_1 : i32, i32, i32
  }
  func.func @transform_1(%arg0: i32) -> (i32, i32) {
    %c0_i32 = arith.constant 0 : i32
    %c0_i32_0 = arith.constant 0 : i32
    %c0_i32_1 = arith.constant 0 : i32
    return %c0_i32, %c0_i32_0 : i32, i32
  }
  func.func @transform_2(%arg0: i32) -> (i32, i32) {
    %c0_i32 = arith.constant 0 : i32
    %c0_i32_0 = arith.constant 0 : i32
    %c0_i32_1 = arith.constant 0 : i32
    return %c0_i32, %c0_i32_0 : i32, i32
  }
  func.func @transform_3(%arg0: i32) -> (i32, i32) {
    %c0_i32 = arith.constant 0 : i32
    %c0_i32_0 = arith.constant 0 : i32
    %c0_i32_1 = arith.constant 0 : i32
    return %c0_i32, %c0_i32_0 : i32, i32
  }
  func.func @transform_4(%arg0: i32) -> (i32, i32) {
    %c0_i32 = arith.constant 0 : i32
    %c0_i32_0 = arith.constant 0 : i32
    %c0_i32_1 = arith.constant 0 : i32
    return %c0_i32, %c0_i32_0 : i32, i32
  }
  func.func @transform_5(%arg0: i32) -> (i32, i32) {
    %c0_i32 = arith.constant 0 : i32
    %c0_i32_0 = arith.constant 0 : i32
    %c0_i32_1 = arith.constant 0 : i32
    return %c0_i32, %c0_i32_0 : i32, i32
  }
  func.func @transform_6(%arg0: i32) -> (i32, i32) {
    %c0_i32 = arith.constant 0 : i32
    %c0_i32_0 = arith.constant 0 : i32
    %c0_i32_1 = arith.constant 0 : i32
    return %c0_i32, %c0_i32_0 : i32, i32
  }
  func.func @transform_7(%arg0: i32) -> (i32, i32) {
    %c0_i32 = arith.constant 0 : i32
    %c0_i32_0 = arith.constant 0 : i32
    %c0_i32_1 = arith.constant 0 : i32
    return %c0_i32, %c0_i32_0 : i32, i32
  }
}

module attributes {stable_mosaic.version = 11 : i64} {
  func.func @_sqdist_kernel(%arg0: i32, %arg1: memref<2x8x3xf32, #tpu.memory_space<vmem>>, %arg2: memref<2x32x3xf32, #tpu.memory_space<vmem>>, %arg3: memref<2x8x32xf32, #tpu.memory_space<vmem>>) attributes {dimension_semantics = [#tpu.dimension_semantics<arbitrary>], iteration_bounds = array<i64: 1>, scalar_prefetch = 0 : i64, scratch_operands = 0 : i64, tpu.core_type = #tpu.core_type<tc>, window_params = [{pipeline_mode = #tpu.pipeline_mode<synchronous>, transform_indices = @transform_0, window_bounds = array<i64: 2, 8, 3>}, {pipeline_mode = #tpu.pipeline_mode<synchronous>, transform_indices = @transform_1, window_bounds = array<i64: 2, 32, 3>}, {pipeline_mode = #tpu.pipeline_mode<synchronous>, transform_indices = @transform_2, window_bounds = array<i64: 2, 8, 32>}]} {
    %c0 = arith.constant 0 : index
    %c0_0 = arith.constant 0 : index
    %c0_1 = arith.constant 0 : index
    %0 = vector.load %arg1[%c0, %c0_0, %c0_1] : memref<2x8x3xf32, #tpu.memory_space<vmem>>, vector<1x8x3xf32>
    %1 = vector.shape_cast %0 : vector<1x8x3xf32> to vector<8x3xf32>
    %c0_2 = arith.constant 0 : index
    %c0_3 = arith.constant 0 : index
    %c0_4 = arith.constant 0 : index
    %2 = vector.load %arg2[%c0_2, %c0_3, %c0_4] : memref<2x32x3xf32, #tpu.memory_space<vmem>>, vector<1x32x3xf32>
    %3 = vector.shape_cast %2 : vector<1x32x3xf32> to vector<32x3xf32>
    %4 = tpu.transpose %3, [1, 0] : vector<32x3xf32> -> vector<3x32xf32>
    %cst = arith.constant dense<0.000000e+00> : vector<8x32xf32>
    %5 = tpu.matmul %1, %4, %cst {dimension_numbers = #tpu.dot_dimension_numbers<[1], [0], [0], [1], [0, 0, 1, 1], [], []>} : vector<8x3xf32>, vector<3x32xf32>, vector<8x32xf32> -> vector<8x32xf32>
    %6 = arith.mulf %1, %1 : vector<8x3xf32>
    %cst_5 = arith.constant dense<0.000000e+00> : vector<8xf32>
    %7 = vector.multi_reduction <add>, %6, %cst_5 [1] : vector<8x3xf32> to vector<8xf32>
    %8 = vector.shape_cast %7 : vector<8xf32> to vector<8x1xf32>
    %9 = arith.mulf %3, %3 : vector<32x3xf32>
    %cst_6 = arith.constant dense<0.000000e+00> : vector<32xf32>
    %10 = vector.multi_reduction <add>, %9, %cst_6 [1] : vector<32x3xf32> to vector<32xf32>
    %11 = vector.shape_cast %10 : vector<32xf32> to vector<32x1xf32>
    %cst_7 = arith.constant 2.000000e+00 : f32
    %12 = vector.broadcast %cst_7 : f32 to vector<8x32xf32>
    %13 = arith.mulf %12, %5 : vector<8x32xf32>
    %14 = vector.broadcast %8 : vector<8x1xf32> to vector<8x32xf32>
    %15 = arith.subf %14, %13 : vector<8x32xf32>
    %16 = tpu.transpose %11, [1, 0] : vector<32x1xf32> -> vector<1x32xf32>
    %17 = vector.broadcast %16 : vector<1x32xf32> to vector<8x32xf32>
    %18 = arith.addf %15, %17 : vector<8x32xf32>
    %c0_8 = arith.constant 0 : index
    %c0_9 = arith.constant 0 : index
    %c0_10 = arith.constant 0 : index
    %19 = vector.load %arg3[%c0_8, %c0_9, %c0_10] : memref<2x8x32xf32, #tpu.memory_space<vmem>>, vector<1x8x32xf32>
    %20 = vector.shape_cast %19 : vector<1x8x32xf32> to vector<8x32xf32>
    %21 = vector.shape_cast %18 : vector<8x32xf32> to vector<1x8x32xf32>
    tpu.vector_store %arg3[%c0_8, %c0_9, %c0_10], %21 {strides = array<i32>} : memref<2x8x32xf32, #tpu.memory_space<vmem>>, vector<1x8x32xf32>,
    %c1 = arith.constant 1 : index
    %c0_11 = arith.constant 0 : index
    %c0_12 = arith.constant 0 : index
    %22 = vector.load %arg1[%c1, %c0_11, %c0_12] : memref<2x8x3xf32, #tpu.memory_space<vmem>>, vector<1x8x3xf32>
    %23 = vector.shape_cast %22 : vector<1x8x3xf32> to vector<8x3xf32>
    %c1_13 = arith.constant 1 : index
    %c0_14 = arith.constant 0 : index
    %c0_15 = arith.constant 0 : index
    %24 = vector.load %arg2[%c1_13, %c0_14, %c0_15] : memref<2x32x3xf32, #tpu.memory_space<vmem>>, vector<1x32x3xf32>
    %25 = vector.shape_cast %24 : vector<1x32x3xf32> to vector<32x3xf32>
    %26 = tpu.transpose %25, [1, 0] : vector<32x3xf32> -> vector<3x32xf32>
    %cst_16 = arith.constant dense<0.000000e+00> : vector<8x32xf32>
    %27 = tpu.matmul %23, %26, %cst_16 {dimension_numbers = #tpu.dot_dimension_numbers<[1], [0], [0], [1], [0, 0, 1, 1], [], []>} : vector<8x3xf32>, vector<3x32xf32>, vector<8x32xf32> -> vector<8x32xf32>
    %28 = arith.mulf %23, %23 : vector<8x3xf32>
    %cst_17 = arith.constant dense<0.000000e+00> : vector<8xf32>
    %29 = vector.multi_reduction <add>, %28, %cst_17 [1] : vector<8x3xf32> to vector<8xf32>
    %30 = vector.shape_cast %29 : vector<8xf32> to vector<8x1xf32>
    %31 = arith.mulf %25, %25 : vector<32x3xf32>
    %cst_18 = arith.constant dense<0.000000e+00> : vector<32xf32>
    %32 = vector.multi_reduction <add>, %31, %cst_18 [1] : vector<32x3xf32> to vector<32xf32>
    %33 = vector.shape_cast %32 : vector<32xf32> to vector<32x1xf32>
    %cst_19 = arith.constant 2.000000e+00 : f32
    %34 = vector.broadcast %cst_19 : f32 to vector<8x32xf32>
    %35 = arith.mulf %34, %27 : vector<8x32xf32>
    %36 = vector.broadcast %30 : vector<8x1xf32> to vector<8x32xf32>
    %37 = arith.subf %36, %35 : vector<8x32xf32>
    %38 = tpu.transpose %33, [1, 0] : vector<32x1xf32> -> vector<1x32xf32>
    %39 = vector.broadcast %38 : vector<1x32xf32> to vector<8x32xf32>
    %40 = arith.addf %37, %39 : vector<8x32xf32>
    %c1_20 = arith.constant 1 : index
    %c0_21 = arith.constant 0 : index
    %c0_22 = arith.constant 0 : index
    %41 = vector.load %arg3[%c1_20, %c0_21, %c0_22] : memref<2x8x32xf32, #tpu.memory_space<vmem>>, vector<1x8x32xf32>
    %42 = vector.shape_cast %41 : vector<1x8x32xf32> to vector<8x32xf32>
    %43 = vector.shape_cast %40 : vector<8x32xf32> to vector<1x8x32xf32>
    tpu.vector_store %arg3[%c1_20, %c0_21, %c0_22], %43 {strides = array<i32>} : memref<2x8x32xf32, #tpu.memory_space<vmem>>, vector<1x8x32xf32>,
    return
  }
  func.func @transform_0(%arg0: i32) -> (i32, i32, i32) {
    %c0_i32 = arith.constant 0 : i32
    %c0_i32_0 = arith.constant 0 : i32
    %c0_i32_1 = arith.constant 0 : i32
    %c0_i32_2 = arith.constant 0 : i32
    return %c0_i32, %c0_i32_0, %c0_i32_1 : i32, i32, i32
  }
  func.func @transform_1(%arg0: i32) -> (i32, i32, i32) {
    %c0_i32 = arith.constant 0 : i32
    %c0_i32_0 = arith.constant 0 : i32
    %c0_i32_1 = arith.constant 0 : i32
    %c0_i32_2 = arith.constant 0 : i32
    return %c0_i32, %c0_i32_0, %c0_i32_1 : i32, i32, i32
  }
  func.func @transform_2(%arg0: i32) -> (i32, i32, i32) {
    %c0_i32 = arith.constant 0 : i32
    %c0_i32_0 = arith.constant 0 : i32
    %c0_i32_1 = arith.constant 0 : i32
    %c0_i32_2 = arith.constant 0 : i32
    return %c0_i32, %c0_i32_0, %c0_i32_1 : i32, i32, i32
  }
}

module attributes {stable_mosaic.version = 11 : i64} {
  func.func @_sqdist_kernel(%arg0: i32, %arg1: memref<2x32x3xf32, #tpu.memory_space<vmem>>, %arg2: memref<2x8x3xf32, #tpu.memory_space<vmem>>, %arg3: memref<2x32x8xf32, #tpu.memory_space<vmem>>) attributes {dimension_semantics = [#tpu.dimension_semantics<arbitrary>], iteration_bounds = array<i64: 1>, scalar_prefetch = 0 : i64, scratch_operands = 0 : i64, tpu.core_type = #tpu.core_type<tc>, window_params = [{pipeline_mode = #tpu.pipeline_mode<synchronous>, transform_indices = @transform_0, window_bounds = array<i64: 2, 32, 3>}, {pipeline_mode = #tpu.pipeline_mode<synchronous>, transform_indices = @transform_1, window_bounds = array<i64: 2, 8, 3>}, {pipeline_mode = #tpu.pipeline_mode<synchronous>, transform_indices = @transform_2, window_bounds = array<i64: 2, 32, 8>}]} {
    %c0 = arith.constant 0 : index
    %c0_0 = arith.constant 0 : index
    %c0_1 = arith.constant 0 : index
    %0 = vector.load %arg1[%c0, %c0_0, %c0_1] : memref<2x32x3xf32, #tpu.memory_space<vmem>>, vector<1x32x3xf32>
    %1 = vector.shape_cast %0 : vector<1x32x3xf32> to vector<32x3xf32>
    %c0_2 = arith.constant 0 : index
    %c0_3 = arith.constant 0 : index
    %c0_4 = arith.constant 0 : index
    %2 = vector.load %arg2[%c0_2, %c0_3, %c0_4] : memref<2x8x3xf32, #tpu.memory_space<vmem>>, vector<1x8x3xf32>
    %3 = vector.shape_cast %2 : vector<1x8x3xf32> to vector<8x3xf32>
    %4 = tpu.transpose %3, [1, 0] : vector<8x3xf32> -> vector<3x8xf32>
    %cst = arith.constant dense<0.000000e+00> : vector<32x8xf32>
    %5 = tpu.matmul %1, %4, %cst {dimension_numbers = #tpu.dot_dimension_numbers<[1], [0], [0], [1], [0, 0, 1, 1], [], []>} : vector<32x3xf32>, vector<3x8xf32>, vector<32x8xf32> -> vector<32x8xf32>
    %6 = arith.mulf %1, %1 : vector<32x3xf32>
    %cst_5 = arith.constant dense<0.000000e+00> : vector<32xf32>
    %7 = vector.multi_reduction <add>, %6, %cst_5 [1] : vector<32x3xf32> to vector<32xf32>
    %8 = vector.shape_cast %7 : vector<32xf32> to vector<32x1xf32>
    %9 = arith.mulf %3, %3 : vector<8x3xf32>
    %cst_6 = arith.constant dense<0.000000e+00> : vector<8xf32>
    %10 = vector.multi_reduction <add>, %9, %cst_6 [1] : vector<8x3xf32> to vector<8xf32>
    %11 = vector.shape_cast %10 : vector<8xf32> to vector<8x1xf32>
    %cst_7 = arith.constant 2.000000e+00 : f32
    %12 = vector.broadcast %cst_7 : f32 to vector<32x8xf32>
    %13 = arith.mulf %12, %5 : vector<32x8xf32>
    %14 = vector.broadcast %8 : vector<32x1xf32> to vector<32x8xf32>
    %15 = arith.subf %14, %13 : vector<32x8xf32>
    %16 = tpu.transpose %11, [1, 0] : vector<8x1xf32> -> vector<1x8xf32>
    %17 = vector.broadcast %16 : vector<1x8xf32> to vector<32x8xf32>
    %18 = arith.addf %15, %17 : vector<32x8xf32>
    %c0_8 = arith.constant 0 : index
    %c0_9 = arith.constant 0 : index
    %c0_10 = arith.constant 0 : index
    %19 = vector.load %arg3[%c0_8, %c0_9, %c0_10] : memref<2x32x8xf32, #tpu.memory_space<vmem>>, vector<1x32x8xf32>
    %20 = vector.shape_cast %19 : vector<1x32x8xf32> to vector<32x8xf32>
    %21 = vector.shape_cast %18 : vector<32x8xf32> to vector<1x32x8xf32>
    tpu.vector_store %arg3[%c0_8, %c0_9, %c0_10], %21 {strides = array<i32>} : memref<2x32x8xf32, #tpu.memory_space<vmem>>, vector<1x32x8xf32>,
    %c1 = arith.constant 1 : index
    %c0_11 = arith.constant 0 : index
    %c0_12 = arith.constant 0 : index
    %22 = vector.load %arg1[%c1, %c0_11, %c0_12] : memref<2x32x3xf32, #tpu.memory_space<vmem>>, vector<1x32x3xf32>
    %23 = vector.shape_cast %22 : vector<1x32x3xf32> to vector<32x3xf32>
    %c1_13 = arith.constant 1 : index
    %c0_14 = arith.constant 0 : index
    %c0_15 = arith.constant 0 : index
    %24 = vector.load %arg2[%c1_13, %c0_14, %c0_15] : memref<2x8x3xf32, #tpu.memory_space<vmem>>, vector<1x8x3xf32>
    %25 = vector.shape_cast %24 : vector<1x8x3xf32> to vector<8x3xf32>
    %26 = tpu.transpose %25, [1, 0] : vector<8x3xf32> -> vector<3x8xf32>
    %cst_16 = arith.constant dense<0.000000e+00> : vector<32x8xf32>
    %27 = tpu.matmul %23, %26, %cst_16 {dimension_numbers = #tpu.dot_dimension_numbers<[1], [0], [0], [1], [0, 0, 1, 1], [], []>} : vector<32x3xf32>, vector<3x8xf32>, vector<32x8xf32> -> vector<32x8xf32>
    %28 = arith.mulf %23, %23 : vector<32x3xf32>
    %cst_17 = arith.constant dense<0.000000e+00> : vector<32xf32>
    %29 = vector.multi_reduction <add>, %28, %cst_17 [1] : vector<32x3xf32> to vector<32xf32>
    %30 = vector.shape_cast %29 : vector<32xf32> to vector<32x1xf32>
    %31 = arith.mulf %25, %25 : vector<8x3xf32>
    %cst_18 = arith.constant dense<0.000000e+00> : vector<8xf32>
    %32 = vector.multi_reduction <add>, %31, %cst_18 [1] : vector<8x3xf32> to vector<8xf32>
    %33 = vector.shape_cast %32 : vector<8xf32> to vector<8x1xf32>
    %cst_19 = arith.constant 2.000000e+00 : f32
    %34 = vector.broadcast %cst_19 : f32 to vector<32x8xf32>
    %35 = arith.mulf %34, %27 : vector<32x8xf32>
    %36 = vector.broadcast %30 : vector<32x1xf32> to vector<32x8xf32>
    %37 = arith.subf %36, %35 : vector<32x8xf32>
    %38 = tpu.transpose %33, [1, 0] : vector<8x1xf32> -> vector<1x8xf32>
    %39 = vector.broadcast %38 : vector<1x8xf32> to vector<32x8xf32>
    %40 = arith.addf %37, %39 : vector<32x8xf32>
    %c1_20 = arith.constant 1 : index
    %c0_21 = arith.constant 0 : index
    %c0_22 = arith.constant 0 : index
    %41 = vector.load %arg3[%c1_20, %c0_21, %c0_22] : memref<2x32x8xf32, #tpu.memory_space<vmem>>, vector<1x32x8xf32>
    %42 = vector.shape_cast %41 : vector<1x32x8xf32> to vector<32x8xf32>
    %43 = vector.shape_cast %40 : vector<32x8xf32> to vector<1x32x8xf32>
    tpu.vector_store %arg3[%c1_20, %c0_21, %c0_22], %43 {strides = array<i32>} : memref<2x32x8xf32, #tpu.memory_space<vmem>>, vector<1x32x8xf32>,
    return
  }
  func.func @transform_0(%arg0: i32) -> (i32, i32, i32) {
    %c0_i32 = arith.constant 0 : i32
    %c0_i32_0 = arith.constant 0 : i32
    %c0_i32_1 = arith.constant 0 : i32
    %c0_i32_2 = arith.constant 0 : i32
    return %c0_i32, %c0_i32_0, %c0_i32_1 : i32, i32, i32
  }
  func.func @transform_1(%arg0: i32) -> (i32, i32, i32) {
    %c0_i32 = arith.constant 0 : i32
    %c0_i32_0 = arith.constant 0 : i32
    %c0_i32_1 = arith.constant 0 : i32
    %c0_i32_2 = arith.constant 0 : i32
    return %c0_i32, %c0_i32_0, %c0_i32_1 : i32, i32, i32
  }
  func.func @transform_2(%arg0: i32) -> (i32, i32, i32) {
    %c0_i32 = arith.constant 0 : i32
    %c0_i32_0 = arith.constant 0 : i32
    %c0_i32_1 = arith.constant 0 : i32
    %c0_i32_2 = arith.constant 0 : i32
    return %c0_i32, %c0_i32_0, %c0_i32_1 : i32, i32, i32
  }
}

module attributes {stable_mosaic.version = 11 : i64} {
  func.func @_sa_mlp_pool_kernel(%arg0: i32, %arg1: memref<8x16x67xf32, #tpu.memory_space<vmem>>, %arg2: memref<67x64xf32, #tpu.memory_space<vmem>>, %arg3: memref<1x64xf32, #tpu.memory_space<vmem>>, %arg4: memref<64x128xf32, #tpu.memory_space<vmem>>, %arg5: memref<1x128xf32, #tpu.memory_space<vmem>>, %arg6: memref<128x256xf32, #tpu.memory_space<vmem>>, %arg7: memref<1x256xf32, #tpu.memory_space<vmem>>, %arg8: memref<16x256xf32, #tpu.memory_space<vmem>>) attributes {dimension_semantics = [#tpu.dimension_semantics<arbitrary>], iteration_bounds = array<i64: 1>, scalar_prefetch = 0 : i64, scratch_operands = 0 : i64, tpu.core_type = #tpu.core_type<tc>, window_params = [{pipeline_mode = #tpu.pipeline_mode<synchronous>, transform_indices = @transform_0, window_bounds = array<i64: 8, 16, 67>}, {pipeline_mode = #tpu.pipeline_mode<synchronous>, transform_indices = @transform_1, window_bounds = array<i64: 67, 64>}, {pipeline_mode = #tpu.pipeline_mode<synchronous>, transform_indices = @transform_2, window_bounds = array<i64: 1, 64>}, {pipeline_mode = #tpu.pipeline_mode<synchronous>, transform_indices = @transform_3, window_bounds = array<i64: 64, 128>}, {pipeline_mode = #tpu.pipeline_mode<synchronous>, transform_indices = @transform_4, window_bounds = array<i64: 1, 128>}, {pipeline_mode = #tpu.pipeline_mode<synchronous>, transform_indices = @transform_5, window_bounds = array<i64: 128, 256>}, {pipeline_mode = #tpu.pipeline_mode<synchronous>, transform_indices = @transform_6, window_bounds = array<i64: 1, 256>}, {pipeline_mode = #tpu.pipeline_mode<synchronous>, transform_indices = @transform_7, window_bounds = array<i64: 16, 256>}]} {
    %c0 = arith.constant 0 : index
    %c0_0 = arith.constant 0 : index
    %0 = vector.load %arg2[%c0, %c0_0] : memref<67x64xf32, #tpu.memory_space<vmem>>, vector<67x64xf32>
    %c0_1 = arith.constant 0 : index
    %c0_2 = arith.constant 0 : index
    %1 = vector.load %arg4[%c0_1, %c0_2] : memref<64x128xf32, #tpu.memory_space<vmem>>, vector<64x128xf32>
    %c0_3 = arith.constant 0 : index
    %c0_4 = arith.constant 0 : index
    %2 = vector.load %arg6[%c0_3, %c0_4] : memref<128x256xf32, #tpu.memory_space<vmem>>, vector<128x256xf32>
    %c0_5 = arith.constant 0 : index
    %c0_6 = arith.constant 0 : index
    %3 = vector.load %arg3[%c0_5, %c0_6] : memref<1x64xf32, #tpu.memory_space<vmem>>, vector<1x64xf32>
    %c0_7 = arith.constant 0 : index
    %c0_8 = arith.constant 0 : index
    %4 = vector.load %arg5[%c0_7, %c0_8] : memref<1x128xf32, #tpu.memory_space<vmem>>, vector<1x128xf32>
    %c0_9 = arith.constant 0 : index
    %c0_10 = arith.constant 0 : index
    %5 = vector.load %arg7[%c0_9, %c0_10] : memref<1x256xf32, #tpu.memory_space<vmem>>, vector<1x256xf32>
    %c0_11 = arith.constant 0 : index
    %c0_12 = arith.constant 0 : index
    %c0_13 = arith.constant 0 : index
    %6 = vector.load %arg1[%c0_11, %c0_12, %c0_13] : memref<8x16x67xf32, #tpu.memory_space<vmem>>, vector<1x16x67xf32>
    %7 = vector.shape_cast %6 : vector<1x16x67xf32> to vector<16x67xf32>
    %cst = arith.constant dense<0.000000e+00> : vector<16x64xf32>
    %8 = tpu.matmul %7, %0, %cst {dimension_numbers = #tpu.dot_dimension_numbers<[1], [0], [0], [1], [0, 0, 1, 1], [], []>} : vector<16x67xf32>, vector<67x64xf32>, vector<16x64xf32> -> vector<16x64xf32>
    %9 = vector.broadcast %3 : vector<1x64xf32> to vector<16x64xf32>
    %10 = arith.addf %8, %9 : vector<16x64xf32>
    %cst_14 = arith.constant 0.000000e+00 : f32
    %11 = vector.broadcast %cst_14 : f32 to vector<16x64xf32>
    %12 = arith.maximumf %10, %11 : vector<16x64xf32>
    %cst_15 = arith.constant dense<0.000000e+00> : vector<16x128xf32>
    %13 = tpu.matmul %12, %1, %cst_15 {dimension_numbers = #tpu.dot_dimension_numbers<[1], [0], [0], [1], [0, 0, 1, 1], [], []>} : vector<16x64xf32>, vector<64x128xf32>, vector<16x128xf32> -> vector<16x128xf32>
    %14 = vector.broadcast %4 : vector<1x128xf32> to vector<16x128xf32>
    %15 = arith.addf %13, %14 : vector<16x128xf32>
    %cst_16 = arith.constant 0.000000e+00 : f32
    %16 = vector.broadcast %cst_16 : f32 to vector<16x128xf32>
    %17 = arith.maximumf %15, %16 : vector<16x128xf32>
    %cst_17 = arith.constant dense<0.000000e+00> : vector<16x256xf32>
    %18 = tpu.matmul %17, %2, %cst_17 {dimension_numbers = #tpu.dot_dimension_numbers<[1], [0], [0], [1], [0, 0, 1, 1], [], []>} : vector<16x128xf32>, vector<128x256xf32>, vector<16x256xf32> -> vector<16x256xf32>
    %19 = vector.broadcast %5 : vector<1x256xf32> to vector<16x256xf32>
    %20 = arith.addf %18, %19 : vector<16x256xf32>
    %cst_18 = arith.constant 0.000000e+00 : f32
    %21 = vector.broadcast %cst_18 : f32 to vector<16x256xf32>
    %22 = arith.maximumf %20, %21 : vector<16x256xf32>
    %c1 = arith.constant 1 : index
    %c0_19 = arith.constant 0 : index
    %c0_20 = arith.constant 0 : index
    %23 = vector.load %arg1[%c1, %c0_19, %c0_20] : memref<8x16x67xf32, #tpu.memory_space<vmem>>, vector<1x16x67xf32>
    %24 = vector.shape_cast %23 : vector<1x16x67xf32> to vector<16x67xf32>
    %cst_21 = arith.constant dense<0.000000e+00> : vector<16x64xf32>
    %25 = tpu.matmul %24, %0, %cst_21 {dimension_numbers = #tpu.dot_dimension_numbers<[1], [0], [0], [1], [0, 0, 1, 1], [], []>} : vector<16x67xf32>, vector<67x64xf32>, vector<16x64xf32> -> vector<16x64xf32>
    %26 = vector.broadcast %3 : vector<1x64xf32> to vector<16x64xf32>
    %27 = arith.addf %25, %26 : vector<16x64xf32>
    %cst_22 = arith.constant 0.000000e+00 : f32
    %28 = vector.broadcast %cst_22 : f32 to vector<16x64xf32>
    %29 = arith.maximumf %27, %28 : vector<16x64xf32>
    %cst_23 = arith.constant dense<0.000000e+00> : vector<16x128xf32>
    %30 = tpu.matmul %29, %1, %cst_23 {dimension_numbers = #tpu.dot_dimension_numbers<[1], [0], [0], [1], [0, 0, 1, 1], [], []>} : vector<16x64xf32>, vector<64x128xf32>, vector<16x128xf32> -> vector<16x128xf32>
    %31 = vector.broadcast %4 : vector<1x128xf32> to vector<16x128xf32>
    %32 = arith.addf %30, %31 : vector<16x128xf32>
    %cst_24 = arith.constant 0.000000e+00 : f32
    %33 = vector.broadcast %cst_24 : f32 to vector<16x128xf32>
    %34 = arith.maximumf %32, %33 : vector<16x128xf32>
    %cst_25 = arith.constant dense<0.000000e+00> : vector<16x256xf32>
    %35 = tpu.matmul %34, %2, %cst_25 {dimension_numbers = #tpu.dot_dimension_numbers<[1], [0], [0], [1], [0, 0, 1, 1], [], []>} : vector<16x128xf32>, vector<128x256xf32>, vector<16x256xf32> -> vector<16x256xf32>
    %36 = vector.broadcast %5 : vector<1x256xf32> to vector<16x256xf32>
    %37 = arith.addf %35, %36 : vector<16x256xf32>
    %cst_26 = arith.constant 0.000000e+00 : f32
    %38 = vector.broadcast %cst_26 : f32 to vector<16x256xf32>
    %39 = arith.maximumf %37, %38 : vector<16x256xf32>
    %40 = arith.maximumf %22, %39 : vector<16x256xf32>
    %c2 = arith.constant 2 : index
    %c0_27 = arith.constant 0 : index
    %c0_28 = arith.constant 0 : index
    %41 = vector.load %arg1[%c2, %c0_27, %c0_28] : memref<8x16x67xf32, #tpu.memory_space<vmem>>, vector<1x16x67xf32>
    %42 = vector.shape_cast %41 : vector<1x16x67xf32> to vector<16x67xf32>
    %cst_29 = arith.constant dense<0.000000e+00> : vector<16x64xf32>
    %43 = tpu.matmul %42, %0, %cst_29 {dimension_numbers = #tpu.dot_dimension_numbers<[1], [0], [0], [1], [0, 0, 1, 1], [], []>} : vector<16x67xf32>, vector<67x64xf32>, vector<16x64xf32> -> vector<16x64xf32>
    %44 = vector.broadcast %3 : vector<1x64xf32> to vector<16x64xf32>
    %45 = arith.addf %43, %44 : vector<16x64xf32>
    %cst_30 = arith.constant 0.000000e+00 : f32
    %46 = vector.broadcast %cst_30 : f32 to vector<16x64xf32>
    %47 = arith.maximumf %45, %46 : vector<16x64xf32>
    %cst_31 = arith.constant dense<0.000000e+00> : vector<16x128xf32>
    %48 = tpu.matmul %47, %1, %cst_31 {dimension_numbers = #tpu.dot_dimension_numbers<[1], [0], [0], [1], [0, 0, 1, 1], [], []>} : vector<16x64xf32>, vector<64x128xf32>, vector<16x128xf32> -> vector<16x128xf32>
    %49 = vector.broadcast %4 : vector<1x128xf32> to vector<16x128xf32>
    %50 = arith.addf %48, %49 : vector<16x128xf32>
    %cst_32 = arith.constant 0.000000e+00 : f32
    %51 = vector.broadcast %cst_32 : f32 to vector<16x128xf32>
    %52 = arith.maximumf %50, %51 : vector<16x128xf32>
    %cst_33 = arith.constant dense<0.000000e+00> : vector<16x256xf32>
    %53 = tpu.matmul %52, %2, %cst_33 {dimension_numbers = #tpu.dot_dimension_numbers<[1], [0], [0], [1], [0, 0, 1, 1], [], []>} : vector<16x128xf32>, vector<128x256xf32>, vector<16x256xf32> -> vector<16x256xf32>
    %54 = vector.broadcast %5 : vector<1x256xf32> to vector<16x256xf32>
    %55 = arith.addf %53, %54 : vector<16x256xf32>
    %cst_34 = arith.constant 0.000000e+00 : f32
    %56 = vector.broadcast %cst_34 : f32 to vector<16x256xf32>
    %57 = arith.maximumf %55, %56 : vector<16x256xf32>
    %58 = arith.maximumf %40, %57 : vector<16x256xf32>
    %c3 = arith.constant 3 : index
    %c0_35 = arith.constant 0 : index
    %c0_36 = arith.constant 0 : index
    %59 = vector.load %arg1[%c3, %c0_35, %c0_36] : memref<8x16x67xf32, #tpu.memory_space<vmem>>, vector<1x16x67xf32>
    %60 = vector.shape_cast %59 : vector<1x16x67xf32> to vector<16x67xf32>
    %cst_37 = arith.constant dense<0.000000e+00> : vector<16x64xf32>
    %61 = tpu.matmul %60, %0, %cst_37 {dimension_numbers = #tpu.dot_dimension_numbers<[1], [0], [0], [1], [0, 0, 1, 1], [], []>} : vector<16x67xf32>, vector<67x64xf32>, vector<16x64xf32> -> vector<16x64xf32>
    %62 = vector.broadcast %3 : vector<1x64xf32> to vector<16x64xf32>
    %63 = arith.addf %61, %62 : vector<16x64xf32>
    %cst_38 = arith.constant 0.000000e+00 : f32
    %64 = vector.broadcast %cst_38 : f32 to vector<16x64xf32>
    %65 = arith.maximumf %63, %64 : vector<16x64xf32>
    %cst_39 = arith.constant dense<0.000000e+00> : vector<16x128xf32>
    %66 = tpu.matmul %65, %1, %cst_39 {dimension_numbers = #tpu.dot_dimension_numbers<[1], [0], [0], [1], [0, 0, 1, 1], [], []>} : vector<16x64xf32>, vector<64x128xf32>, vector<16x128xf32> -> vector<16x128xf32>
    %67 = vector.broadcast %4 : vector<1x128xf32> to vector<16x128xf32>
    %68 = arith.addf %66, %67 : vector<16x128xf32>
    %cst_40 = arith.constant 0.000000e+00 : f32
    %69 = vector.broadcast %cst_40 : f32 to vector<16x128xf32>
    %70 = arith.maximumf %68, %69 : vector<16x128xf32>
    %cst_41 = arith.constant dense<0.000000e+00> : vector<16x256xf32>
    %71 = tpu.matmul %70, %2, %cst_41 {dimension_numbers = #tpu.dot_dimension_numbers<[1], [0], [0], [1], [0, 0, 1, 1], [], []>} : vector<16x128xf32>, vector<128x256xf32>, vector<16x256xf32> -> vector<16x256xf32>
    %72 = vector.broadcast %5 : vector<1x256xf32> to vector<16x256xf32>
    %73 = arith.addf %71, %72 : vector<16x256xf32>
    %cst_42 = arith.constant 0.000000e+00 : f32
    %74 = vector.broadcast %cst_42 : f32 to vector<16x256xf32>
    %75 = arith.maximumf %73, %74 : vector<16x256xf32>
    %76 = arith.maximumf %58, %75 : vector<16x256xf32>
    %c4 = arith.constant 4 : index
    %c0_43 = arith.constant 0 : index
    %c0_44 = arith.constant 0 : index
    %77 = vector.load %arg1[%c4, %c0_43, %c0_44] : memref<8x16x67xf32, #tpu.memory_space<vmem>>, vector<1x16x67xf32>
    %78 = vector.shape_cast %77 : vector<1x16x67xf32> to vector<16x67xf32>
    %cst_45 = arith.constant dense<0.000000e+00> : vector<16x64xf32>
    %79 = tpu.matmul %78, %0, %cst_45 {dimension_numbers = #tpu.dot_dimension_numbers<[1], [0], [0], [1], [0, 0, 1, 1], [], []>} : vector<16x67xf32>, vector<67x64xf32>, vector<16x64xf32> -> vector<16x64xf32>
    %80 = vector.broadcast %3 : vector<1x64xf32> to vector<16x64xf32>
    %81 = arith.addf %79, %80 : vector<16x64xf32>
    %cst_46 = arith.constant 0.000000e+00 : f32
    %82 = vector.broadcast %cst_46 : f32 to vector<16x64xf32>
    %83 = arith.maximumf %81, %82 : vector<16x64xf32>
    %cst_47 = arith.constant dense<0.000000e+00> : vector<16x128xf32>
    %84 = tpu.matmul %83, %1, %cst_47 {dimension_numbers = #tpu.dot_dimension_numbers<[1], [0], [0], [1], [0, 0, 1, 1], [], []>} : vector<16x64xf32>, vector<64x128xf32>, vector<16x128xf32> -> vector<16x128xf32>
    %85 = vector.broadcast %4 : vector<1x128xf32> to vector<16x128xf32>
    %86 = arith.addf %84, %85 : vector<16x128xf32>
    %cst_48 = arith.constant 0.000000e+00 : f32
    %87 = vector.broadcast %cst_48 : f32 to vector<16x128xf32>
    %88 = arith.maximumf %86, %87 : vector<16x128xf32>
    %cst_49 = arith.constant dense<0.000000e+00> : vector<16x256xf32>
    %89 = tpu.matmul %88, %2, %cst_49 {dimension_numbers = #tpu.dot_dimension_numbers<[1], [0], [0], [1], [0, 0, 1, 1], [], []>} : vector<16x128xf32>, vector<128x256xf32>, vector<16x256xf32> -> vector<16x256xf32>
    %90 = vector.broadcast %5 : vector<1x256xf32> to vector<16x256xf32>
    %91 = arith.addf %89, %90 : vector<16x256xf32>
    %cst_50 = arith.constant 0.000000e+00 : f32
    %92 = vector.broadcast %cst_50 : f32 to vector<16x256xf32>
    %93 = arith.maximumf %91, %92 : vector<16x256xf32>
    %94 = arith.maximumf %76, %93 : vector<16x256xf32>
    %c5 = arith.constant 5 : index
    %c0_51 = arith.constant 0 : index
    %c0_52 = arith.constant 0 : index
    %95 = vector.load %arg1[%c5, %c0_51, %c0_52] : memref<8x16x67xf32, #tpu.memory_space<vmem>>, vector<1x16x67xf32>
    %96 = vector.shape_cast %95 : vector<1x16x67xf32> to vector<16x67xf32>
    %cst_53 = arith.constant dense<0.000000e+00> : vector<16x64xf32>
    %97 = tpu.matmul %96, %0, %cst_53 {dimension_numbers = #tpu.dot_dimension_numbers<[1], [0], [0], [1], [0, 0, 1, 1], [], []>} : vector<16x67xf32>, vector<67x64xf32>, vector<16x64xf32> -> vector<16x64xf32>
    %98 = vector.broadcast %3 : vector<1x64xf32> to vector<16x64xf32>
    %99 = arith.addf %97, %98 : vector<16x64xf32>
    %cst_54 = arith.constant 0.000000e+00 : f32
    %100 = vector.broadcast %cst_54 : f32 to vector<16x64xf32>
    %101 = arith.maximumf %99, %100 : vector<16x64xf32>
    %cst_55 = arith.constant dense<0.000000e+00> : vector<16x128xf32>
    %102 = tpu.matmul %101, %1, %cst_55 {dimension_numbers = #tpu.dot_dimension_numbers<[1], [0], [0], [1], [0, 0, 1, 1], [], []>} : vector<16x64xf32>, vector<64x128xf32>, vector<16x128xf32> -> vector<16x128xf32>
    %103 = vector.broadcast %4 : vector<1x128xf32> to vector<16x128xf32>
    %104 = arith.addf %102, %103 : vector<16x128xf32>
    %cst_56 = arith.constant 0.000000e+00 : f32
    %105 = vector.broadcast %cst_56 : f32 to vector<16x128xf32>
    %106 = arith.maximumf %104, %105 : vector<16x128xf32>
    %cst_57 = arith.constant dense<0.000000e+00> : vector<16x256xf32>
    %107 = tpu.matmul %106, %2, %cst_57 {dimension_numbers = #tpu.dot_dimension_numbers<[1], [0], [0], [1], [0, 0, 1, 1], [], []>} : vector<16x128xf32>, vector<128x256xf32>, vector<16x256xf32> -> vector<16x256xf32>
    %108 = vector.broadcast %5 : vector<1x256xf32> to vector<16x256xf32>
    %109 = arith.addf %107, %108 : vector<16x256xf32>
    %cst_58 = arith.constant 0.000000e+00 : f32
    %110 = vector.broadcast %cst_58 : f32 to vector<16x256xf32>
    %111 = arith.maximumf %109, %110 : vector<16x256xf32>
    %112 = arith.maximumf %94, %111 : vector<16x256xf32>
    %c6 = arith.constant 6 : index
    %c0_59 = arith.constant 0 : index
    %c0_60 = arith.constant 0 : index
    %113 = vector.load %arg1[%c6, %c0_59, %c0_60] : memref<8x16x67xf32, #tpu.memory_space<vmem>>, vector<1x16x67xf32>
    %114 = vector.shape_cast %113 : vector<1x16x67xf32> to vector<16x67xf32>
    %cst_61 = arith.constant dense<0.000000e+00> : vector<16x64xf32>
    %115 = tpu.matmul %114, %0, %cst_61 {dimension_numbers = #tpu.dot_dimension_numbers<[1], [0], [0], [1], [0, 0, 1, 1], [], []>} : vector<16x67xf32>, vector<67x64xf32>, vector<16x64xf32> -> vector<16x64xf32>
    %116 = vector.broadcast %3 : vector<1x64xf32> to vector<16x64xf32>
    %117 = arith.addf %115, %116 : vector<16x64xf32>
    %cst_62 = arith.constant 0.000000e+00 : f32
    %118 = vector.broadcast %cst_62 : f32 to vector<16x64xf32>
    %119 = arith.maximumf %117, %118 : vector<16x64xf32>
    %cst_63 = arith.constant dense<0.000000e+00> : vector<16x128xf32>
    %120 = tpu.matmul %119, %1, %cst_63 {dimension_numbers = #tpu.dot_dimension_numbers<[1], [0], [0], [1], [0, 0, 1, 1], [], []>} : vector<16x64xf32>, vector<64x128xf32>, vector<16x128xf32> -> vector<16x128xf32>
    %121 = vector.broadcast %4 : vector<1x128xf32> to vector<16x128xf32>
    %122 = arith.addf %120, %121 : vector<16x128xf32>
    %cst_64 = arith.constant 0.000000e+00 : f32
    %123 = vector.broadcast %cst_64 : f32 to vector<16x128xf32>
    %124 = arith.maximumf %122, %123 : vector<16x128xf32>
    %cst_65 = arith.constant dense<0.000000e+00> : vector<16x256xf32>
    %125 = tpu.matmul %124, %2, %cst_65 {dimension_numbers = #tpu.dot_dimension_numbers<[1], [0], [0], [1], [0, 0, 1, 1], [], []>} : vector<16x128xf32>, vector<128x256xf32>, vector<16x256xf32> -> vector<16x256xf32>
    %126 = vector.broadcast %5 : vector<1x256xf32> to vector<16x256xf32>
    %127 = arith.addf %125, %126 : vector<16x256xf32>
    %cst_66 = arith.constant 0.000000e+00 : f32
    %128 = vector.broadcast %cst_66 : f32 to vector<16x256xf32>
    %129 = arith.maximumf %127, %128 : vector<16x256xf32>
    %130 = arith.maximumf %112, %129 : vector<16x256xf32>
    %c7 = arith.constant 7 : index
    %c0_67 = arith.constant 0 : index
    %c0_68 = arith.constant 0 : index
    %131 = vector.load %arg1[%c7, %c0_67, %c0_68] : memref<8x16x67xf32, #tpu.memory_space<vmem>>, vector<1x16x67xf32>
    %132 = vector.shape_cast %131 : vector<1x16x67xf32> to vector<16x67xf32>
    %cst_69 = arith.constant dense<0.000000e+00> : vector<16x64xf32>
    %133 = tpu.matmul %132, %0, %cst_69 {dimension_numbers = #tpu.dot_dimension_numbers<[1], [0], [0], [1], [0, 0, 1, 1], [], []>} : vector<16x67xf32>, vector<67x64xf32>, vector<16x64xf32> -> vector<16x64xf32>
    %134 = vector.broadcast %3 : vector<1x64xf32> to vector<16x64xf32>
    %135 = arith.addf %133, %134 : vector<16x64xf32>
    %cst_70 = arith.constant 0.000000e+00 : f32
    %136 = vector.broadcast %cst_70 : f32 to vector<16x64xf32>
    %137 = arith.maximumf %135, %136 : vector<16x64xf32>
    %cst_71 = arith.constant dense<0.000000e+00> : vector<16x128xf32>
    %138 = tpu.matmul %137, %1, %cst_71 {dimension_numbers = #tpu.dot_dimension_numbers<[1], [0], [0], [1], [0, 0, 1, 1], [], []>} : vector<16x64xf32>, vector<64x128xf32>, vector<16x128xf32> -> vector<16x128xf32>
    %139 = vector.broadcast %4 : vector<1x128xf32> to vector<16x128xf32>
    %140 = arith.addf %138, %139 : vector<16x128xf32>
    %cst_72 = arith.constant 0.000000e+00 : f32
    %141 = vector.broadcast %cst_72 : f32 to vector<16x128xf32>
    %142 = arith.maximumf %140, %141 : vector<16x128xf32>
    %cst_73 = arith.constant dense<0.000000e+00> : vector<16x256xf32>
    %143 = tpu.matmul %142, %2, %cst_73 {dimension_numbers = #tpu.dot_dimension_numbers<[1], [0], [0], [1], [0, 0, 1, 1], [], []>} : vector<16x128xf32>, vector<128x256xf32>, vector<16x256xf32> -> vector<16x256xf32>
    %144 = vector.broadcast %5 : vector<1x256xf32> to vector<16x256xf32>
    %145 = arith.addf %143, %144 : vector<16x256xf32>
    %cst_74 = arith.constant 0.000000e+00 : f32
    %146 = vector.broadcast %cst_74 : f32 to vector<16x256xf32>
    %147 = arith.maximumf %145, %146 : vector<16x256xf32>
    %148 = arith.maximumf %130, %147 : vector<16x256xf32>
    %c0_75 = arith.constant 0 : index
    %c0_76 = arith.constant 0 : index
    %149 = vector.load %arg8[%c0_75, %c0_76] : memref<16x256xf32, #tpu.memory_space<vmem>>, vector<16x256xf32>
    tpu.vector_store %arg8[%c0_75, %c0_76], %148 {strides = array<i32>} : memref<16x256xf32, #tpu.memory_space<vmem>>, vector<16x256xf32>,
    return
  }
  func.func @transform_0(%arg0: i32) -> (i32, i32, i32) {
    %c0_i32 = arith.constant 0 : i32
    %c0_i32_0 = arith.constant 0 : i32
    %c0_i32_1 = arith.constant 0 : i32
    %c0_i32_2 = arith.constant 0 : i32
    return %c0_i32, %c0_i32_0, %c0_i32_1 : i32, i32, i32
  }
  func.func @transform_1(%arg0: i32) -> (i32, i32) {
    %c0_i32 = arith.constant 0 : i32
    %c0_i32_0 = arith.constant 0 : i32
    %c0_i32_1 = arith.constant 0 : i32
    return %c0_i32, %c0_i32_0 : i32, i32
  }
  func.func @transform_2(%arg0: i32) -> (i32, i32) {
    %c0_i32 = arith.constant 0 : i32
    %c0_i32_0 = arith.constant 0 : i32
    %c0_i32_1 = arith.constant 0 : i32
    return %c0_i32, %c0_i32_0 : i32, i32
  }
  func.func @transform_3(%arg0: i32) -> (i32, i32) {
    %c0_i32 = arith.constant 0 : i32
    %c0_i32_0 = arith.constant 0 : i32
    %c0_i32_1 = arith.constant 0 : i32
    return %c0_i32, %c0_i32_0 : i32, i32
  }
  func.func @transform_4(%arg0: i32) -> (i32, i32) {
    %c0_i32 = arith.constant 0 : i32
    %c0_i32_0 = arith.constant 0 : i32
    %c0_i32_1 = arith.constant 0 : i32
    return %c0_i32, %c0_i32_0 : i32, i32
  }
  func.func @transform_5(%arg0: i32) -> (i32, i32) {
    %c0_i32 = arith.constant 0 : i32
    %c0_i32_0 = arith.constant 0 : i32
    %c0_i32_1 = arith.constant 0 : i32
    return %c0_i32, %c0_i32_0 : i32, i32
  }
  func.func @transform_6(%arg0: i32) -> (i32, i32) {
    %c0_i32 = arith.constant 0 : i32
    %c0_i32_0 = arith.constant 0 : i32
    %c0_i32_1 = arith.constant 0 : i32
    return %c0_i32, %c0_i32_0 : i32, i32
  }
  func.func @transform_7(%arg0: i32) -> (i32, i32) {
    %c0_i32 = arith.constant 0 : i32
    %c0_i32_0 = arith.constant 0 : i32
    %c0_i32_1 = arith.constant 0 : i32
    return %c0_i32, %c0_i32_0 : i32, i32
  }
}

module attributes {stable_mosaic.version = 11 : i64} {
  func.func @_mlp_chain_kernel(%arg0: i32, %arg1: memref<64x320xf32, #tpu.memory_space<vmem>>, %arg2: memref<320x64xf32, #tpu.memory_space<vmem>>, %arg3: memref<1x64xf32, #tpu.memory_space<vmem>>, %arg4: memref<64x32xf32, #tpu.memory_space<vmem>>, %arg5: memref<1x32xf32, #tpu.memory_space<vmem>>, %arg6: memref<64x32xf32, #tpu.memory_space<vmem>>) attributes {dimension_semantics = [#tpu.dimension_semantics<arbitrary>], iteration_bounds = array<i64: 1>, scalar_prefetch = 0 : i64, scratch_operands = 0 : i64, tpu.core_type = #tpu.core_type<tc>, window_params = [{pipeline_mode = #tpu.pipeline_mode<synchronous>, transform_indices = @transform_0, window_bounds = array<i64: 64, 320>}, {pipeline_mode = #tpu.pipeline_mode<synchronous>, transform_indices = @transform_1, window_bounds = array<i64: 320, 64>}, {pipeline_mode = #tpu.pipeline_mode<synchronous>, transform_indices = @transform_2, window_bounds = array<i64: 1, 64>}, {pipeline_mode = #tpu.pipeline_mode<synchronous>, transform_indices = @transform_3, window_bounds = array<i64: 64, 32>}, {pipeline_mode = #tpu.pipeline_mode<synchronous>, transform_indices = @transform_4, window_bounds = array<i64: 1, 32>}, {pipeline_mode = #tpu.pipeline_mode<synchronous>, transform_indices = @transform_5, window_bounds = array<i64: 64, 32>}]} {
    %c0 = arith.constant 0 : index
    %c0_0 = arith.constant 0 : index
    %0 = vector.load %arg1[%c0, %c0_0] : memref<64x320xf32, #tpu.memory_space<vmem>>, vector<64x320xf32>
    %c0_1 = arith.constant 0 : index
    %c0_2 = arith.constant 0 : index
    %1 = vector.load %arg2[%c0_1, %c0_2] : memref<320x64xf32, #tpu.memory_space<vmem>>, vector<320x64xf32>
    %c0_3 = arith.constant 0 : index
    %c0_4 = arith.constant 0 : index
    %2 = vector.load %arg3[%c0_3, %c0_4] : memref<1x64xf32, #tpu.memory_space<vmem>>, vector<1x64xf32>
    %cst = arith.constant dense<0.000000e+00> : vector<64x64xf32>
    %3 = tpu.matmul %0, %1, %cst {dimension_numbers = #tpu.dot_dimension_numbers<[1], [0], [0], [1], [0, 0, 1, 1], [], []>} : vector<64x320xf32>, vector<320x64xf32>, vector<64x64xf32> -> vector<64x64xf32>
    %4 = vector.broadcast %2 : vector<1x64xf32> to vector<64x64xf32>
    %5 = arith.addf %3, %4 : vector<64x64xf32>
    %cst_5 = arith.constant 0.000000e+00 : f32
    %6 = vector.broadcast %cst_5 : f32 to vector<64x64xf32>
    %7 = arith.maximumf %5, %6 : vector<64x64xf32>
    %c0_6 = arith.constant 0 : index
    %c0_7 = arith.constant 0 : index
    %8 = vector.load %arg4[%c0_6, %c0_7] : memref<64x32xf32, #tpu.memory_space<vmem>>, vector<64x32xf32>
    %c0_8 = arith.constant 0 : index
    %c0_9 = arith.constant 0 : index
    %9 = vector.load %arg5[%c0_8, %c0_9] : memref<1x32xf32, #tpu.memory_space<vmem>>, vector<1x32xf32>
    %cst_10 = arith.constant dense<0.000000e+00> : vector<64x32xf32>
    %10 = tpu.matmul %7, %8, %cst_10 {dimension_numbers = #tpu.dot_dimension_numbers<[1], [0], [0], [1], [0, 0, 1, 1], [], []>} : vector<64x64xf32>, vector<64x32xf32>, vector<64x32xf32> -> vector<64x32xf32>
    %11 = vector.broadcast %9 : vector<1x32xf32> to vector<64x32xf32>
    %12 = arith.addf %10, %11 : vector<64x32xf32>
    %cst_11 = arith.constant 0.000000e+00 : f32
    %13 = vector.broadcast %cst_11 : f32 to vector<64x32xf32>
    %14 = arith.maximumf %12, %13 : vector<64x32xf32>
    %c0_12 = arith.constant 0 : index
    %c0_13 = arith.constant 0 : index
    %15 = vector.load %arg6[%c0_12, %c0_13] : memref<64x32xf32, #tpu.memory_space<vmem>>, vector<64x32xf32>
    tpu.vector_store %arg6[%c0_12, %c0_13], %14 {strides = array<i32>} : memref<64x32xf32, #tpu.memory_space<vmem>>, vector<64x32xf32>,
    return
  }
  func.func @transform_0(%arg0: i32) -> (i32, i32) {
    %c0_i32 = arith.constant 0 : i32
    %c0_i32_0 = arith.constant 0 : i32
    %c0_i32_1 = arith.constant 0 : i32
    return %c0_i32, %c0_i32_0 : i32, i32
  }
  func.func @transform_1(%arg0: i32) -> (i32, i32) {
    %c0_i32 = arith.constant 0 : i32
    %c0_i32_0 = arith.constant 0 : i32
    %c0_i32_1 = arith.constant 0 : i32
    return %c0_i32, %c0_i32_0 : i32, i32
  }
  func.func @transform_2(%arg0: i32) -> (i32, i32) {
    %c0_i32 = arith.constant 0 : i32
    %c0_i32_0 = arith.constant 0 : i32
    %c0_i32_1 = arith.constant 0 : i32
    return %c0_i32, %c0_i32_0 : i32, i32
  }
  func.func @transform_3(%arg0: i32) -> (i32, i32) {
    %c0_i32 = arith.constant 0 : i32
    %c0_i32_0 = arith.constant 0 : i32
    %c0_i32_1 = arith.constant 0 : i32
    return %c0_i32, %c0_i32_0 : i32, i32
  }
  func.func @transform_4(%arg0: i32) -> (i32, i32) {
    %c0_i32 = arith.constant 0 : i32
    %c0_i32_0 = arith.constant 0 : i32
    %c0_i32_1 = arith.constant 0 : i32
    return %c0_i32, %c0_i32_0 : i32, i32
  }
  func.func @transform_5(%arg0: i32) -> (i32, i32) {
    %c0_i32 = arith.constant 0 : i32
    %c0_i32_0 = arith.constant 0 : i32
    %c0_i32_1 = arith.constant 0 : i32
    return %c0_i32, %c0_i32_0 : i32, i32
  }
}

module attributes {stable_mosaic.version = 11 : i64} {
  func.func @_sqdist_kernel(%arg0: i32, %arg1: memref<2x64x3xf32, #tpu.memory_space<vmem>>, %arg2: memref<2x32x3xf32, #tpu.memory_space<vmem>>, %arg3: memref<2x64x32xf32, #tpu.memory_space<vmem>>) attributes {dimension_semantics = [#tpu.dimension_semantics<arbitrary>], iteration_bounds = array<i64: 1>, scalar_prefetch = 0 : i64, scratch_operands = 0 : i64, tpu.core_type = #tpu.core_type<tc>, window_params = [{pipeline_mode = #tpu.pipeline_mode<synchronous>, transform_indices = @transform_0, window_bounds = array<i64: 2, 64, 3>}, {pipeline_mode = #tpu.pipeline_mode<synchronous>, transform_indices = @transform_1, window_bounds = array<i64: 2, 32, 3>}, {pipeline_mode = #tpu.pipeline_mode<synchronous>, transform_indices = @transform_2, window_bounds = array<i64: 2, 64, 32>}]} {
    %c0 = arith.constant 0 : index
    %c0_0 = arith.constant 0 : index
    %c0_1 = arith.constant 0 : index
    %0 = vector.load %arg1[%c0, %c0_0, %c0_1] : memref<2x64x3xf32, #tpu.memory_space<vmem>>, vector<1x64x3xf32>
    %1 = vector.shape_cast %0 : vector<1x64x3xf32> to vector<64x3xf32>
    %c0_2 = arith.constant 0 : index
    %c0_3 = arith.constant 0 : index
    %c0_4 = arith.constant 0 : index
    %2 = vector.load %arg2[%c0_2, %c0_3, %c0_4] : memref<2x32x3xf32, #tpu.memory_space<vmem>>, vector<1x32x3xf32>
    %3 = vector.shape_cast %2 : vector<1x32x3xf32> to vector<32x3xf32>
    %4 = tpu.transpose %3, [1, 0] : vector<32x3xf32> -> vector<3x32xf32>
    %cst = arith.constant dense<0.000000e+00> : vector<64x32xf32>
    %5 = tpu.matmul %1, %4, %cst {dimension_numbers = #tpu.dot_dimension_numbers<[1], [0], [0], [1], [0, 0, 1, 1], [], []>} : vector<64x3xf32>, vector<3x32xf32>, vector<64x32xf32> -> vector<64x32xf32>
    %6 = arith.mulf %1, %1 : vector<64x3xf32>
    %cst_5 = arith.constant dense<0.000000e+00> : vector<64xf32>
    %7 = vector.multi_reduction <add>, %6, %cst_5 [1] : vector<64x3xf32> to vector<64xf32>
    %8 = vector.shape_cast %7 : vector<64xf32> to vector<64x1xf32>
    %9 = arith.mulf %3, %3 : vector<32x3xf32>
    %cst_6 = arith.constant dense<0.000000e+00> : vector<32xf32>
    %10 = vector.multi_reduction <add>, %9, %cst_6 [1] : vector<32x3xf32> to vector<32xf32>
    %11 = vector.shape_cast %10 : vector<32xf32> to vector<32x1xf32>
    %cst_7 = arith.constant 2.000000e+00 : f32
    %12 = vector.broadcast %cst_7 : f32 to vector<64x32xf32>
    %13 = arith.mulf %12, %5 : vector<64x32xf32>
    %14 = vector.broadcast %8 : vector<64x1xf32> to vector<64x32xf32>
    %15 = arith.subf %14, %13 : vector<64x32xf32>
    %16 = tpu.transpose %11, [1, 0] : vector<32x1xf32> -> vector<1x32xf32>
    %17 = vector.broadcast %16 : vector<1x32xf32> to vector<64x32xf32>
    %18 = arith.addf %15, %17 : vector<64x32xf32>
    %c0_8 = arith.constant 0 : index
    %c0_9 = arith.constant 0 : index
    %c0_10 = arith.constant 0 : index
    %19 = vector.load %arg3[%c0_8, %c0_9, %c0_10] : memref<2x64x32xf32, #tpu.memory_space<vmem>>, vector<1x64x32xf32>
    %20 = vector.shape_cast %19 : vector<1x64x32xf32> to vector<64x32xf32>
    %21 = vector.shape_cast %18 : vector<64x32xf32> to vector<1x64x32xf32>
    tpu.vector_store %arg3[%c0_8, %c0_9, %c0_10], %21 {strides = array<i32>} : memref<2x64x32xf32, #tpu.memory_space<vmem>>, vector<1x64x32xf32>,
    %c1 = arith.constant 1 : index
    %c0_11 = arith.constant 0 : index
    %c0_12 = arith.constant 0 : index
    %22 = vector.load %arg1[%c1, %c0_11, %c0_12] : memref<2x64x3xf32, #tpu.memory_space<vmem>>, vector<1x64x3xf32>
    %23 = vector.shape_cast %22 : vector<1x64x3xf32> to vector<64x3xf32>
    %c1_13 = arith.constant 1 : index
    %c0_14 = arith.constant 0 : index
    %c0_15 = arith.constant 0 : index
    %24 = vector.load %arg2[%c1_13, %c0_14, %c0_15] : memref<2x32x3xf32, #tpu.memory_space<vmem>>, vector<1x32x3xf32>
    %25 = vector.shape_cast %24 : vector<1x32x3xf32> to vector<32x3xf32>
    %26 = tpu.transpose %25, [1, 0] : vector<32x3xf32> -> vector<3x32xf32>
    %cst_16 = arith.constant dense<0.000000e+00> : vector<64x32xf32>
    %27 = tpu.matmul %23, %26, %cst_16 {dimension_numbers = #tpu.dot_dimension_numbers<[1], [0], [0], [1], [0, 0, 1, 1], [], []>} : vector<64x3xf32>, vector<3x32xf32>, vector<64x32xf32> -> vector<64x32xf32>
    %28 = arith.mulf %23, %23 : vector<64x3xf32>
    %cst_17 = arith.constant dense<0.000000e+00> : vector<64xf32>
    %29 = vector.multi_reduction <add>, %28, %cst_17 [1] : vector<64x3xf32> to vector<64xf32>
    %30 = vector.shape_cast %29 : vector<64xf32> to vector<64x1xf32>
    %31 = arith.mulf %25, %25 : vector<32x3xf32>
    %cst_18 = arith.constant dense<0.000000e+00> : vector<32xf32>
    %32 = vector.multi_reduction <add>, %31, %cst_18 [1] : vector<32x3xf32> to vector<32xf32>
    %33 = vector.shape_cast %32 : vector<32xf32> to vector<32x1xf32>
    %cst_19 = arith.constant 2.000000e+00 : f32
    %34 = vector.broadcast %cst_19 : f32 to vector<64x32xf32>
    %35 = arith.mulf %34, %27 : vector<64x32xf32>
    %36 = vector.broadcast %30 : vector<64x1xf32> to vector<64x32xf32>
    %37 = arith.subf %36, %35 : vector<64x32xf32>
    %38 = tpu.transpose %33, [1, 0] : vector<32x1xf32> -> vector<1x32xf32>
    %39 = vector.broadcast %38 : vector<1x32xf32> to vector<64x32xf32>
    %40 = arith.addf %37, %39 : vector<64x32xf32>
    %c1_20 = arith.constant 1 : index
    %c0_21 = arith.constant 0 : index
    %c0_22 = arith.constant 0 : index
    %41 = vector.load %arg3[%c1_20, %c0_21, %c0_22] : memref<2x64x32xf32, #tpu.memory_space<vmem>>, vector<1x64x32xf32>
    %42 = vector.shape_cast %41 : vector<1x64x32xf32> to vector<64x32xf32>
    %43 = vector.shape_cast %40 : vector<64x32xf32> to vector<1x64x32xf32>
    tpu.vector_store %arg3[%c1_20, %c0_21, %c0_22], %43 {strides = array<i32>} : memref<2x64x32xf32, #tpu.memory_space<vmem>>, vector<1x64x32xf32>,
    return
  }
  func.func @transform_0(%arg0: i32) -> (i32, i32, i32) {
    %c0_i32 = arith.constant 0 : i32
    %c0_i32_0 = arith.constant 0 : i32
    %c0_i32_1 = arith.constant 0 : i32
    %c0_i32_2 = arith.constant 0 : i32
    return %c0_i32, %c0_i32_0, %c0_i32_1 : i32, i32, i32
  }
  func.func @transform_1(%arg0: i32) -> (i32, i32, i32) {
    %c0_i32 = arith.constant 0 : i32
    %c0_i32_0 = arith.constant 0 : i32
    %c0_i32_1 = arith.constant 0 : i32
    %c0_i32_2 = arith.constant 0 : i32
    return %c0_i32, %c0_i32_0, %c0_i32_1 : i32, i32, i32
  }
  func.func @transform_2(%arg0: i32) -> (i32, i32, i32) {
    %c0_i32 = arith.constant 0 : i32
    %c0_i32_0 = arith.constant 0 : i32
    %c0_i32_1 = arith.constant 0 : i32
    %c0_i32_2 = arith.constant 0 : i32
    return %c0_i32, %c0_i32_0, %c0_i32_1 : i32, i32, i32
  }
}

module attributes {stable_mosaic.version = 11 : i64} {
  func.func @_mlp_chain_kernel(%arg0: i32, %arg1: memref<128x34xf32, #tpu.memory_space<vmem>>, %arg2: memref<34x32xf32, #tpu.memory_space<vmem>>, %arg3: memref<1x32xf32, #tpu.memory_space<vmem>>, %arg4: memref<32x32xf32, #tpu.memory_space<vmem>>, %arg5: memref<1x32xf32, #tpu.memory_space<vmem>>, %arg6: memref<32x16xf32, #tpu.memory_space<vmem>>, %arg7: memref<1x16xf32, #tpu.memory_space<vmem>>, %arg8: memref<128x16xf32, #tpu.memory_space<vmem>>) attributes {dimension_semantics = [#tpu.dimension_semantics<arbitrary>], iteration_bounds = array<i64: 1>, scalar_prefetch = 0 : i64, scratch_operands = 0 : i64, tpu.core_type = #tpu.core_type<tc>, window_params = [{pipeline_mode = #tpu.pipeline_mode<synchronous>, transform_indices = @transform_0, window_bounds = array<i64: 128, 34>}, {pipeline_mode = #tpu.pipeline_mode<synchronous>, transform_indices = @transform_1, window_bounds = array<i64: 34, 32>}, {pipeline_mode = #tpu.pipeline_mode<synchronous>, transform_indices = @transform_2, window_bounds = array<i64: 1, 32>}, {pipeline_mode = #tpu.pipeline_mode<synchronous>, transform_indices = @transform_3, window_bounds = array<i64: 32, 32>}, {pipeline_mode = #tpu.pipeline_mode<synchronous>, transform_indices = @transform_4, window_bounds = array<i64: 1, 32>}, {pipeline_mode = #tpu.pipeline_mode<synchronous>, transform_indices = @transform_5, window_bounds = array<i64: 32, 16>}, {pipeline_mode = #tpu.pipeline_mode<synchronous>, transform_indices = @transform_6, window_bounds = array<i64: 1, 16>}, {pipeline_mode = #tpu.pipeline_mode<synchronous>, transform_indices = @transform_7, window_bounds = array<i64: 128, 16>}]} {
    %c0 = arith.constant 0 : index
    %c0_0 = arith.constant 0 : index
    %0 = vector.load %arg1[%c0, %c0_0] : memref<128x34xf32, #tpu.memory_space<vmem>>, vector<128x34xf32>
    %c0_1 = arith.constant 0 : index
    %c0_2 = arith.constant 0 : index
    %1 = vector.load %arg2[%c0_1, %c0_2] : memref<34x32xf32, #tpu.memory_space<vmem>>, vector<34x32xf32>
    %c0_3 = arith.constant 0 : index
    %c0_4 = arith.constant 0 : index
    %2 = vector.load %arg3[%c0_3, %c0_4] : memref<1x32xf32, #tpu.memory_space<vmem>>, vector<1x32xf32>
    %cst = arith.constant dense<0.000000e+00> : vector<128x32xf32>
    %3 = tpu.matmul %0, %1, %cst {dimension_numbers = #tpu.dot_dimension_numbers<[1], [0], [0], [1], [0, 0, 1, 1], [], []>} : vector<128x34xf32>, vector<34x32xf32>, vector<128x32xf32> -> vector<128x32xf32>
    %4 = vector.broadcast %2 : vector<1x32xf32> to vector<128x32xf32>
    %5 = arith.addf %3, %4 : vector<128x32xf32>
    %cst_5 = arith.constant 0.000000e+00 : f32
    %6 = vector.broadcast %cst_5 : f32 to vector<128x32xf32>
    %7 = arith.maximumf %5, %6 : vector<128x32xf32>
    %c0_6 = arith.constant 0 : index
    %c0_7 = arith.constant 0 : index
    %8 = vector.load %arg4[%c0_6, %c0_7] : memref<32x32xf32, #tpu.memory_space<vmem>>, vector<32x32xf32>
    %c0_8 = arith.constant 0 : index
    %c0_9 = arith.constant 0 : index
    %9 = vector.load %arg5[%c0_8, %c0_9] : memref<1x32xf32, #tpu.memory_space<vmem>>, vector<1x32xf32>
    %cst_10 = arith.constant dense<0.000000e+00> : vector<128x32xf32>
    %10 = tpu.matmul %7, %8, %cst_10 {dimension_numbers = #tpu.dot_dimension_numbers<[1], [0], [0], [1], [0, 0, 1, 1], [], []>} : vector<128x32xf32>, vector<32x32xf32>, vector<128x32xf32> -> vector<128x32xf32>
    %11 = vector.broadcast %9 : vector<1x32xf32> to vector<128x32xf32>
    %12 = arith.addf %10, %11 : vector<128x32xf32>
    %cst_11 = arith.constant 0.000000e+00 : f32
    %13 = vector.broadcast %cst_11 : f32 to vector<128x32xf32>
    %14 = arith.maximumf %12, %13 : vector<128x32xf32>
    %c0_12 = arith.constant 0 : index
    %c0_13 = arith.constant 0 : index
    %15 = vector.load %arg6[%c0_12, %c0_13] : memref<32x16xf32, #tpu.memory_space<vmem>>, vector<32x16xf32>
    %c0_14 = arith.constant 0 : index
    %c0_15 = arith.constant 0 : index
    %16 = vector.load %arg7[%c0_14, %c0_15] : memref<1x16xf32, #tpu.memory_space<vmem>>, vector<1x16xf32>
    %cst_16 = arith.constant dense<0.000000e+00> : vector<128x16xf32>
    %17 = tpu.matmul %14, %15, %cst_16 {dimension_numbers = #tpu.dot_dimension_numbers<[1], [0], [0], [1], [0, 0, 1, 1], [], []>} : vector<128x32xf32>, vector<32x16xf32>, vector<128x16xf32> -> vector<128x16xf32>
    %18 = vector.broadcast %16 : vector<1x16xf32> to vector<128x16xf32>
    %19 = arith.addf %17, %18 : vector<128x16xf32>
    %cst_17 = arith.constant 0.000000e+00 : f32
    %20 = vector.broadcast %cst_17 : f32 to vector<128x16xf32>
    %21 = arith.maximumf %19, %20 : vector<128x16xf32>
    %c0_18 = arith.constant 0 : index
    %c0_19 = arith.constant 0 : index
    %22 = vector.load %arg8[%c0_18, %c0_19] : memref<128x16xf32, #tpu.memory_space<vmem>>, vector<128x16xf32>
    tpu.vector_store %arg8[%c0_18, %c0_19], %21 {strides = array<i32>} : memref<128x16xf32, #tpu.memory_space<vmem>>, vector<128x16xf32>,
    return
  }
  func.func @transform_0(%arg0: i32) -> (i32, i32) {
    %c0_i32 = arith.constant 0 : i32
    %c0_i32_0 = arith.constant 0 : i32
    %c0_i32_1 = arith.constant 0 : i32
    return %c0_i32, %c0_i32_0 : i32, i32
  }
  func.func @transform_1(%arg0: i32) -> (i32, i32) {
    %c0_i32 = arith.constant 0 : i32
    %c0_i32_0 = arith.constant 0 : i32
    %c0_i32_1 = arith.constant 0 : i32
    return %c0_i32, %c0_i32_0 : i32, i32
  }
  func.func @transform_2(%arg0: i32) -> (i32, i32) {
    %c0_i32 = arith.constant 0 : i32
    %c0_i32_0 = arith.constant 0 : i32
    %c0_i32_1 = arith.constant 0 : i32
    return %c0_i32, %c0_i32_0 : i32, i32
  }
  func.func @transform_3(%arg0: i32) -> (i32, i32) {
    %c0_i32 = arith.constant 0 : i32
    %c0_i32_0 = arith.constant 0 : i32
    %c0_i32_1 = arith.constant 0 : i32
    return %c0_i32, %c0_i32_0 : i32, i32
  }
  func.func @transform_4(%arg0: i32) -> (i32, i32) {
    %c0_i32 = arith.constant 0 : i32
    %c0_i32_0 = arith.constant 0 : i32
    %c0_i32_1 = arith.constant 0 : i32
    return %c0_i32, %c0_i32_0 : i32, i32
  }
  func.func @transform_5(%arg0: i32) -> (i32, i32) {
    %c0_i32 = arith.constant 0 : i32
    %c0_i32_0 = arith.constant 0 : i32
    %c0_i32_1 = arith.constant 0 : i32
    return %c0_i32, %c0_i32_0 : i32, i32
  }
  func.func @transform_6(%arg0: i32) -> (i32, i32) {
    %c0_i32 = arith.constant 0 : i32
    %c0_i32_0 = arith.constant 0 : i32
    %c0_i32_1 = arith.constant 0 : i32
    return %c0_i32, %c0_i32_0 : i32, i32
  }
  func.func @transform_7(%arg0: i32) -> (i32, i32) {
    %c0_i32 = arith.constant 0 : i32
    %c0_i32_0 = arith.constant 0 : i32
    %c0_i32_1 = arith.constant 0 : i32
    return %c0_i32, %c0_i32_0 : i32, i32
  }
}

module attributes {stable_mosaic.version = 11 : i64} {
  func.func @_head_kernel(%arg0: i32, %arg1: memref<2x64x16xf32, #tpu.memory_space<vmem>>, %arg2: memref<16x16xf32, #tpu.memory_space<vmem>>, %arg3: memref<1x16xf32, #tpu.memory_space<vmem>>, %arg4: memref<16x16xf32, #tpu.memory_space<vmem>>, %arg5: memref<1x16xf32, #tpu.memory_space<vmem>>, %arg6: memref<16x1xf32, #tpu.memory_space<vmem>>, %arg7: memref<1x1xf32, #tpu.memory_space<vmem>>, %arg8: memref<16x16xf32, #tpu.memory_space<vmem>>, %arg9: memref<1x16xf32, #tpu.memory_space<vmem>>, %arg10: memref<16x4xf32, #tpu.memory_space<vmem>>, %arg11: memref<1x4xf32, #tpu.memory_space<vmem>>, %arg12: memref<2x64x64xf32, #tpu.memory_space<vmem>>, %arg13: memref<2x64x1xf32, #tpu.memory_space<vmem>>, %arg14: memref<2x64x4xf32, #tpu.memory_space<vmem>>) attributes {dimension_semantics = [#tpu.dimension_semantics<arbitrary>], iteration_bounds = array<i64: 1>, scalar_prefetch = 0 : i64, scratch_operands = 0 : i64, tpu.core_type = #tpu.core_type<tc>, window_params = [{pipeline_mode = #tpu.pipeline_mode<synchronous>, transform_indices = @transform_0, window_bounds = array<i64: 2, 64, 16>}, {pipeline_mode = #tpu.pipeline_mode<synchronous>, transform_indices = @transform_1, window_bounds = array<i64: 16, 16>}, {pipeline_mode = #tpu.pipeline_mode<synchronous>, transform_indices = @transform_2, window_bounds = array<i64: 1, 16>}, {pipeline_mode = #tpu.pipeline_mode<synchronous>, transform_indices = @transform_3, window_bounds = array<i64: 16, 16>}, {pipeline_mode = #tpu.pipeline_mode<synchronous>, transform_indices = @transform_4, window_bounds = array<i64: 1, 16>}, {pipeline_mode = #tpu.pipeline_mode<synchronous>, transform_indices = @transform_5, window_bounds = array<i64: 16, 1>}, {pipeline_mode = #tpu.pipeline_mode<synchronous>, transform_indices = @transform_6, window_bounds = array<i64: 1, 1>}, {pipeline_mode = #tpu.pipeline_mode<synchronous>, transform_indices = @transform_7, window_bounds = array<i64: 16, 16>}, {pipeline_mode = #tpu.pipeline_mode<synchronous>, transform_indices = @transform_8, window_bounds = array<i64: 1, 16>}, {pipeline_mode = #tpu.pipeline_mode<synchronous>, transform_indices = @transform_9, window_bounds = array<i64: 16, 4>}, {pipeline_mode = #tpu.pipeline_mode<synchronous>, transform_indices = @transform_10, window_bounds = array<i64: 1, 4>}, {pipeline_mode = #tpu.pipeline_mode<synchronous>, transform_indices = @transform_11, window_bounds = array<i64: 2, 64, 64>}, {pipeline_mode = #tpu.pipeline_mode<synchronous>, transform_indices = @transform_12, window_bounds = array<i64: 2, 64, 1>}, {pipeline_mode = #tpu.pipeline_mode<synchronous>, transform_indices = @transform_13, window_bounds = array<i64: 2, 64, 4>}]} {
    %c0 = arith.constant 0 : index
    %c0_0 = arith.constant 0 : index
    %0 = vector.load %arg2[%c0, %c0_0] : memref<16x16xf32, #tpu.memory_space<vmem>>, vector<16x16xf32>
    %c0_1 = arith.constant 0 : index
    %c0_2 = arith.constant 0 : index
    %1 = vector.load %arg3[%c0_1, %c0_2] : memref<1x16xf32, #tpu.memory_space<vmem>>, vector<1x16xf32>
    %c0_3 = arith.constant 0 : index
    %c0_4 = arith.constant 0 : index
    %2 = vector.load %arg4[%c0_3, %c0_4] : memref<16x16xf32, #tpu.memory_space<vmem>>, vector<16x16xf32>
    %c0_5 = arith.constant 0 : index
    %c0_6 = arith.constant 0 : index
    %3 = vector.load %arg5[%c0_5, %c0_6] : memref<1x16xf32, #tpu.memory_space<vmem>>, vector<1x16xf32>
    %c0_7 = arith.constant 0 : index
    %c0_8 = arith.constant 0 : index
    %4 = vector.load %arg6[%c0_7, %c0_8] : memref<16x1xf32, #tpu.memory_space<vmem>>, vector<16x1xf32>
    %c0_9 = arith.constant 0 : index
    %c0_10 = arith.constant 0 : index
    %5 = vector.load %arg7[%c0_9, %c0_10] : memref<1x1xf32, #tpu.memory_space<vmem>>, vector<1x1xf32>
    %c0_11 = arith.constant 0 : index
    %c0_12 = arith.constant 0 : index
    %6 = vector.load %arg8[%c0_11, %c0_12] : memref<16x16xf32, #tpu.memory_space<vmem>>, vector<16x16xf32>
    %c0_13 = arith.constant 0 : index
    %c0_14 = arith.constant 0 : index
    %7 = vector.load %arg9[%c0_13, %c0_14] : memref<1x16xf32, #tpu.memory_space<vmem>>, vector<1x16xf32>
    %c0_15 = arith.constant 0 : index
    %c0_16 = arith.constant 0 : index
    %8 = vector.load %arg10[%c0_15, %c0_16] : memref<16x4xf32, #tpu.memory_space<vmem>>, vector<16x4xf32>
    %c0_17 = arith.constant 0 : index
    %c0_18 = arith.constant 0 : index
    %9 = vector.load %arg11[%c0_17, %c0_18] : memref<1x4xf32, #tpu.memory_space<vmem>>, vector<1x4xf32>
    %c0_19 = arith.constant 0 : index
    %c0_20 = arith.constant 0 : index
    %c0_21 = arith.constant 0 : index
    %10 = vector.load %arg1[%c0_19, %c0_20, %c0_21] : memref<2x64x16xf32, #tpu.memory_space<vmem>>, vector<1x64x16xf32>
    %11 = vector.shape_cast %10 : vector<1x64x16xf32> to vector<64x16xf32>
    %cst = arith.constant dense<0.000000e+00> : vector<64x16xf32>
    %12 = tpu.matmul %11, %0, %cst {dimension_numbers = #tpu.dot_dimension_numbers<[1], [0], [0], [1], [0, 0, 1, 1], [], []>} : vector<64x16xf32>, vector<16x16xf32>, vector<64x16xf32> -> vector<64x16xf32>
    %13 = vector.broadcast %1 : vector<1x16xf32> to vector<64x16xf32>
    %14 = arith.addf %12, %13 : vector<64x16xf32>
    %15 = tpu.transpose %14, [1, 0] : vector<64x16xf32> -> vector<16x64xf32>
    %cst_22 = arith.constant dense<0.000000e+00> : vector<64x64xf32>
    %16 = tpu.matmul %14, %15, %cst_22 {dimension_numbers = #tpu.dot_dimension_numbers<[1], [0], [0], [1], [0, 0, 1, 1], [], []>} : vector<64x16xf32>, vector<16x64xf32>, vector<64x64xf32> -> vector<64x64xf32>
    %17 = arith.mulf %14, %14 : vector<64x16xf32>
    %cst_23 = arith.constant dense<0.000000e+00> : vector<64xf32>
    %18 = vector.multi_reduction <add>, %17, %cst_23 [1] : vector<64x16xf32> to vector<64xf32>
    %19 = vector.shape_cast %18 : vector<64xf32> to vector<64x1xf32>
    %cst_24 = arith.constant 2.000000e+00 : f32
    %20 = vector.broadcast %cst_24 : f32 to vector<64x64xf32>
    %21 = arith.mulf %20, %16 : vector<64x64xf32>
    %22 = vector.broadcast %19 : vector<64x1xf32> to vector<64x64xf32>
    %23 = arith.subf %22, %21 : vector<64x64xf32>
    %24 = tpu.transpose %19, [1, 0] : vector<64x1xf32> -> vector<1x64xf32>
    %25 = vector.broadcast %24 : vector<1x64xf32> to vector<64x64xf32>
    %26 = arith.addf %23, %25 : vector<64x64xf32>
    %cst_25 = arith.constant 0.000000e+00 : f32
    %27 = vector.broadcast %cst_25 : f32 to vector<64x64xf32>
    %28 = arith.maximumf %26, %27 : vector<64x64xf32>
    %c0_26 = arith.constant 0 : index
    %c0_27 = arith.constant 0 : index
    %c0_28 = arith.constant 0 : index
    %29 = vector.load %arg12[%c0_26, %c0_27, %c0_28] : memref<2x64x64xf32, #tpu.memory_space<vmem>>, vector<1x64x64xf32>
    %30 = vector.shape_cast %29 : vector<1x64x64xf32> to vector<64x64xf32>
    %31 = vector.shape_cast %28 : vector<64x64xf32> to vector<1x64x64xf32>
    tpu.vector_store %arg12[%c0_26, %c0_27, %c0_28], %31 {strides = array<i32>} : memref<2x64x64xf32, #tpu.memory_space<vmem>>, vector<1x64x64xf32>,
    %cst_29 = arith.constant dense<0.000000e+00> : vector<64x16xf32>
    %32 = tpu.matmul %11, %2, %cst_29 {dimension_numbers = #tpu.dot_dimension_numbers<[1], [0], [0], [1], [0, 0, 1, 1], [], []>} : vector<64x16xf32>, vector<16x16xf32>, vector<64x16xf32> -> vector<64x16xf32>
    %33 = vector.broadcast %3 : vector<1x16xf32> to vector<64x16xf32>
    %34 = arith.addf %32, %33 : vector<64x16xf32>
    %cst_30 = arith.constant 0.000000e+00 : f32
    %35 = vector.broadcast %cst_30 : f32 to vector<64x16xf32>
    %36 = arith.maximumf %34, %35 : vector<64x16xf32>
    %cst_31 = arith.constant dense<0.000000e+00> : vector<64x1xf32>
    %37 = tpu.matmul %36, %4, %cst_31 {dimension_numbers = #tpu.dot_dimension_numbers<[1], [0], [0], [1], [0, 0, 1, 1], [], []>} : vector<64x16xf32>, vector<16x1xf32>, vector<64x1xf32> -> vector<64x1xf32>
    %38 = vector.broadcast %5 : vector<1x1xf32> to vector<64x1xf32>
    %39 = arith.addf %37, %38 : vector<64x1xf32>
    %40 = arith.negf %39 : vector<64x1xf32>
    %41 = math.exp %40 : vector<64x1xf32>
    %cst_32 = arith.constant 1.000000e+00 : f32
    %42 = vector.broadcast %cst_32 : f32 to vector<64x1xf32>
    %43 = arith.addf %42, %41 : vector<64x1xf32>
    %44 = arith.divf %42, %43 : vector<64x1xf32>
    %c0_33 = arith.constant 0 : index
    %c0_34 = arith.constant 0 : index
    %c0_35 = arith.constant 0 : index
    %45 = vector.load %arg13[%c0_33, %c0_34, %c0_35] : memref<2x64x1xf32, #tpu.memory_space<vmem>>, vector<1x64x1xf32>
    %46 = vector.shape_cast %45 : vector<1x64x1xf32> to vector<64x1xf32>
    %47 = vector.shape_cast %44 : vector<64x1xf32> to vector<1x64x1xf32>
    tpu.vector_store %arg13[%c0_33, %c0_34, %c0_35], %47 {strides = array<i32>} : memref<2x64x1xf32, #tpu.memory_space<vmem>>, vector<1x64x1xf32>,
    %cst_36 = arith.constant dense<0.000000e+00> : vector<64x16xf32>
    %48 = tpu.matmul %11, %6, %cst_36 {dimension_numbers = #tpu.dot_dimension_numbers<[1], [0], [0], [1], [0, 0, 1, 1], [], []>} : vector<64x16xf32>, vector<16x16xf32>, vector<64x16xf32> -> vector<64x16xf32>
    %49 = vector.broadcast %7 : vector<1x16xf32> to vector<64x16xf32>
    %50 = arith.addf %48, %49 : vector<64x16xf32>
    %cst_37 = arith.constant 0.000000e+00 : f32
    %51 = vector.broadcast %cst_37 : f32 to vector<64x16xf32>
    %52 = arith.maximumf %50, %51 : vector<64x16xf32>
    %cst_38 = arith.constant dense<0.000000e+00> : vector<64x4xf32>
    %53 = tpu.matmul %52, %8, %cst_38 {dimension_numbers = #tpu.dot_dimension_numbers<[1], [0], [0], [1], [0, 0, 1, 1], [], []>} : vector<64x16xf32>, vector<16x4xf32>, vector<64x4xf32> -> vector<64x4xf32>
    %54 = vector.broadcast %9 : vector<1x4xf32> to vector<64x4xf32>
    %55 = arith.addf %53, %54 : vector<64x4xf32>
    %cst_39 = arith.constant dense<0xFF800000> : vector<64xf32>
    %56 = vector.multi_reduction <maximumf>, %55, %cst_39 [1] : vector<64x4xf32> to vector<64xf32>
    %57 = vector.shape_cast %56 : vector<64xf32> to vector<64x1xf32>
    %58 = vector.broadcast %57 : vector<64x1xf32> to vector<64x4xf32>
    %59 = arith.subf %55, %58 : vector<64x4xf32>
    %60 = math.exp %59 : vector<64x4xf32>
    %cst_40 = arith.constant dense<0.000000e+00> : vector<64xf32>
    %61 = vector.multi_reduction <add>, %60, %cst_40 [1] : vector<64x4xf32> to vector<64xf32>
    %62 = vector.shape_cast %61 : vector<64xf32> to vector<64x1xf32>
    %63 = math.log %62 : vector<64x1xf32>
    %64 = arith.addf %57, %63 : vector<64x1xf32>
    %65 = vector.broadcast %64 : vector<64x1xf32> to vector<64x4xf32>
    %66 = arith.subf %55, %65 : vector<64x4xf32>
    %c0_41 = arith.constant 0 : index
    %c0_42 = arith.constant 0 : index
    %c0_43 = arith.constant 0 : index
    %67 = vector.load %arg14[%c0_41, %c0_42, %c0_43] : memref<2x64x4xf32, #tpu.memory_space<vmem>>, vector<1x64x4xf32>
    %68 = vector.shape_cast %67 : vector<1x64x4xf32> to vector<64x4xf32>
    %69 = vector.shape_cast %66 : vector<64x4xf32> to vector<1x64x4xf32>
    tpu.vector_store %arg14[%c0_41, %c0_42, %c0_43], %69 {strides = array<i32>} : memref<2x64x4xf32, #tpu.memory_space<vmem>>, vector<1x64x4xf32>,
    %c1 = arith.constant 1 : index
    %c0_44 = arith.constant 0 : index
    %c0_45 = arith.constant 0 : index
    %70 = vector.load %arg1[%c1, %c0_44, %c0_45] : memref<2x64x16xf32, #tpu.memory_space<vmem>>, vector<1x64x16xf32>
    %71 = vector.shape_cast %70 : vector<1x64x16xf32> to vector<64x16xf32>
    %cst_46 = arith.constant dense<0.000000e+00> : vector<64x16xf32>
    %72 = tpu.matmul %71, %0, %cst_46 {dimension_numbers = #tpu.dot_dimension_numbers<[1], [0], [0], [1], [0, 0, 1, 1], [], []>} : vector<64x16xf32>, vector<16x16xf32>, vector<64x16xf32> -> vector<64x16xf32>
    %73 = vector.broadcast %1 : vector<1x16xf32> to vector<64x16xf32>
    %74 = arith.addf %72, %73 : vector<64x16xf32>
    %75 = tpu.transpose %74, [1, 0] : vector<64x16xf32> -> vector<16x64xf32>
    %cst_47 = arith.constant dense<0.000000e+00> : vector<64x64xf32>
    %76 = tpu.matmul %74, %75, %cst_47 {dimension_numbers = #tpu.dot_dimension_numbers<[1], [0], [0], [1], [0, 0, 1, 1], [], []>} : vector<64x16xf32>, vector<16x64xf32>, vector<64x64xf32> -> vector<64x64xf32>
    %77 = arith.mulf %74, %74 : vector<64x16xf32>
    %cst_48 = arith.constant dense<0.000000e+00> : vector<64xf32>
    %78 = vector.multi_reduction <add>, %77, %cst_48 [1] : vector<64x16xf32> to vector<64xf32>
    %79 = vector.shape_cast %78 : vector<64xf32> to vector<64x1xf32>
    %cst_49 = arith.constant 2.000000e+00 : f32
    %80 = vector.broadcast %cst_49 : f32 to vector<64x64xf32>
    %81 = arith.mulf %80, %76 : vector<64x64xf32>
    %82 = vector.broadcast %79 : vector<64x1xf32> to vector<64x64xf32>
    %83 = arith.subf %82, %81 : vector<64x64xf32>
    %84 = tpu.transpose %79, [1, 0] : vector<64x1xf32> -> vector<1x64xf32>
    %85 = vector.broadcast %84 : vector<1x64xf32> to vector<64x64xf32>
    %86 = arith.addf %83, %85 : vector<64x64xf32>
    %cst_50 = arith.constant 0.000000e+00 : f32
    %87 = vector.broadcast %cst_50 : f32 to vector<64x64xf32>
    %88 = arith.maximumf %86, %87 : vector<64x64xf32>
    %c1_51 = arith.constant 1 : index
    %c0_52 = arith.constant 0 : index
    %c0_53 = arith.constant 0 : index
    %89 = vector.load %arg12[%c1_51, %c0_52, %c0_53] : memref<2x64x64xf32, #tpu.memory_space<vmem>>, vector<1x64x64xf32>
    %90 = vector.shape_cast %89 : vector<1x64x64xf32> to vector<64x64xf32>
    %91 = vector.shape_cast %88 : vector<64x64xf32> to vector<1x64x64xf32>
    tpu.vector_store %arg12[%c1_51, %c0_52, %c0_53], %91 {strides = array<i32>} : memref<2x64x64xf32, #tpu.memory_space<vmem>>, vector<1x64x64xf32>,
    %cst_54 = arith.constant dense<0.000000e+00> : vector<64x16xf32>
    %92 = tpu.matmul %71, %2, %cst_54 {dimension_numbers = #tpu.dot_dimension_numbers<[1], [0], [0], [1], [0, 0, 1, 1], [], []>} : vector<64x16xf32>, vector<16x16xf32>, vector<64x16xf32> -> vector<64x16xf32>
    %93 = vector.broadcast %3 : vector<1x16xf32> to vector<64x16xf32>
    %94 = arith.addf %92, %93 : vector<64x16xf32>
    %cst_55 = arith.constant 0.000000e+00 : f32
    %95 = vector.broadcast %cst_55 : f32 to vector<64x16xf32>
    %96 = arith.maximumf %94, %95 : vector<64x16xf32>
    %cst_56 = arith.constant dense<0.000000e+00> : vector<64x1xf32>
    %97 = tpu.matmul %96, %4, %cst_56 {dimension_numbers = #tpu.dot_dimension_numbers<[1], [0], [0], [1], [0, 0, 1, 1], [], []>} : vector<64x16xf32>, vector<16x1xf32>, vector<64x1xf32> -> vector<64x1xf32>
    %98 = vector.broadcast %5 : vector<1x1xf32> to vector<64x1xf32>
    %99 = arith.addf %97, %98 : vector<64x1xf32>
    %100 = arith.negf %99 : vector<64x1xf32>
    %101 = math.exp %100 : vector<64x1xf32>
    %cst_57 = arith.constant 1.000000e+00 : f32
    %102 = vector.broadcast %cst_57 : f32 to vector<64x1xf32>
    %103 = arith.addf %102, %101 : vector<64x1xf32>
    %104 = arith.divf %102, %103 : vector<64x1xf32>
    %c1_58 = arith.constant 1 : index
    %c0_59 = arith.constant 0 : index
    %c0_60 = arith.constant 0 : index
    %105 = vector.load %arg13[%c1_58, %c0_59, %c0_60] : memref<2x64x1xf32, #tpu.memory_space<vmem>>, vector<1x64x1xf32>
    %106 = vector.shape_cast %105 : vector<1x64x1xf32> to vector<64x1xf32>
    %107 = vector.shape_cast %104 : vector<64x1xf32> to vector<1x64x1xf32>
    tpu.vector_store %arg13[%c1_58, %c0_59, %c0_60], %107 {strides = array<i32>} : memref<2x64x1xf32, #tpu.memory_space<vmem>>, vector<1x64x1xf32>,
    %cst_61 = arith.constant dense<0.000000e+00> : vector<64x16xf32>
    %108 = tpu.matmul %71, %6, %cst_61 {dimension_numbers = #tpu.dot_dimension_numbers<[1], [0], [0], [1], [0, 0, 1, 1], [], []>} : vector<64x16xf32>, vector<16x16xf32>, vector<64x16xf32> -> vector<64x16xf32>
    %109 = vector.broadcast %7 : vector<1x16xf32> to vector<64x16xf32>
    %110 = arith.addf %108, %109 : vector<64x16xf32>
    %cst_62 = arith.constant 0.000000e+00 : f32
    %111 = vector.broadcast %cst_62 : f32 to vector<64x16xf32>
    %112 = arith.maximumf %110, %111 : vector<64x16xf32>
    %cst_63 = arith.constant dense<0.000000e+00> : vector<64x4xf32>
    %113 = tpu.matmul %112, %8, %cst_63 {dimension_numbers = #tpu.dot_dimension_numbers<[1], [0], [0], [1], [0, 0, 1, 1], [], []>} : vector<64x16xf32>, vector<16x4xf32>, vector<64x4xf32> -> vector<64x4xf32>
    %114 = vector.broadcast %9 : vector<1x4xf32> to vector<64x4xf32>
    %115 = arith.addf %113, %114 : vector<64x4xf32>
    %cst_64 = arith.constant dense<0xFF800000> : vector<64xf32>
    %116 = vector.multi_reduction <maximumf>, %115, %cst_64 [1] : vector<64x4xf32> to vector<64xf32>
    %117 = vector.shape_cast %116 : vector<64xf32> to vector<64x1xf32>
    %118 = vector.broadcast %117 : vector<64x1xf32> to vector<64x4xf32>
    %119 = arith.subf %115, %118 : vector<64x4xf32>
    %120 = math.exp %119 : vector<64x4xf32>
    %cst_65 = arith.constant dense<0.000000e+00> : vector<64xf32>
    %121 = vector.multi_reduction <add>, %120, %cst_65 [1] : vector<64x4xf32> to vector<64xf32>
    %122 = vector.shape_cast %121 : vector<64xf32> to vector<64x1xf32>
    %123 = math.log %122 : vector<64x1xf32>
    %124 = arith.addf %117, %123 : vector<64x1xf32>
    %125 = vector.broadcast %124 : vector<64x1xf32> to vector<64x4xf32>
    %126 = arith.subf %115, %125 : vector<64x4xf32>
    %c1_66 = arith.constant 1 : index
    %c0_67 = arith.constant 0 : index
    %c0_68 = arith.constant 0 : index
    %127 = vector.load %arg14[%c1_66, %c0_67, %c0_68] : memref<2x64x4xf32, #tpu.memory_space<vmem>>, vector<1x64x4xf32>
    %128 = vector.shape_cast %127 : vector<1x64x4xf32> to vector<64x4xf32>
    %129 = vector.shape_cast %126 : vector<64x4xf32> to vector<1x64x4xf32>
    tpu.vector_store %arg14[%c1_66, %c0_67, %c0_68], %129 {strides = array<i32>} : memref<2x64x4xf32, #tpu.memory_space<vmem>>, vector<1x64x4xf32>,
    return
  }
  func.func @transform_0(%arg0: i32) -> (i32, i32, i32) {
    %c0_i32 = arith.constant 0 : i32
    %c0_i32_0 = arith.constant 0 : i32
    %c0_i32_1 = arith.constant 0 : i32
    %c0_i32_2 = arith.constant 0 : i32
    return %c0_i32, %c0_i32_0, %c0_i32_1 : i32, i32, i32
  }
  func.func @transform_1(%arg0: i32) -> (i32, i32) {
    %c0_i32 = arith.constant 0 : i32
    %c0_i32_0 = arith.constant 0 : i32
    %c0_i32_1 = arith.constant 0 : i32
    return %c0_i32, %c0_i32_0 : i32, i32
  }
  func.func @transform_2(%arg0: i32) -> (i32, i32) {
    %c0_i32 = arith.constant 0 : i32
    %c0_i32_0 = arith.constant 0 : i32
    %c0_i32_1 = arith.constant 0 : i32
    return %c0_i32, %c0_i32_0 : i32, i32
  }
  func.func @transform_3(%arg0: i32) -> (i32, i32) {
    %c0_i32 = arith.constant 0 : i32
    %c0_i32_0 = arith.constant 0 : i32
    %c0_i32_1 = arith.constant 0 : i32
    return %c0_i32, %c0_i32_0 : i32, i32
  }
  func.func @transform_4(%arg0: i32) -> (i32, i32) {
    %c0_i32 = arith.constant 0 : i32
    %c0_i32_0 = arith.constant 0 : i32
    %c0_i32_1 = arith.constant 0 : i32
    return %c0_i32, %c0_i32_0 : i32, i32
  }
  func.func @transform_5(%arg0: i32) -> (i32, i32) {
    %c0_i32 = arith.constant 0 : i32
    %c0_i32_0 = arith.constant 0 : i32
    %c0_i32_1 = arith.constant 0 : i32
    return %c0_i32, %c0_i32_0 : i32, i32
  }
  func.func @transform_6(%arg0: i32) -> (i32, i32) {
    %c0_i32 = arith.constant 0 : i32
    %c0_i32_0 = arith.constant 0 : i32
    %c0_i32_1 = arith.constant 0 : i32
    return %c0_i32, %c0_i32_0 : i32, i32
  }
  func.func @transform_7(%arg0: i32) -> (i32, i32) {
    %c0_i32 = arith.constant 0 : i32
    %c0_i32_0 = arith.constant 0 : i32
    %c0_i32_1 = arith.constant 0 : i32
    return %c0_i32, %c0_i32_0 : i32, i32
  }
  func.func @transform_8(%arg0: i32) -> (i32, i32) {
    %c0_i32 = arith.constant 0 : i32
    %c0_i32_0 = arith.constant 0 : i32
    %c0_i32_1 = arith.constant 0 : i32
    return %c0_i32, %c0_i32_0 : i32, i32
  }
  func.func @transform_9(%arg0: i32) -> (i32, i32) {
    %c0_i32 = arith.constant 0 : i32
    %c0_i32_0 = arith.constant 0 : i32
    %c0_i32_1 = arith.constant 0 : i32
    return %c0_i32, %c0_i32_0 : i32, i32
  }
  func.func @transform_10(%arg0: i32) -> (i32, i32) {
    %c0_i32 = arith.constant 0 : i32
    %c0_i32_0 = arith.constant 0 : i32
    %c0_i32_1 = arith.constant 0 : i32
    return %c0_i32, %c0_i32_0 : i32, i32
  }
  func.func @transform_11(%arg0: i32) -> (i32, i32, i32) {
    %c0_i32 = arith.constant 0 : i32
    %c0_i32_0 = arith.constant 0 : i32
    %c0_i32_1 = arith.constant 0 : i32
    %c0_i32_2 = arith.constant 0 : i32
    return %c0_i32, %c0_i32_0, %c0_i32_1 : i32, i32, i32
  }
  func.func @transform_12(%arg0: i32) -> (i32, i32, i32) {
    %c0_i32 = arith.constant 0 : i32
    %c0_i32_0 = arith.constant 0 : i32
    %c0_i32_1 = arith.constant 0 : i32
    %c0_i32_2 = arith.constant 0 : i32
    return %c0_i32, %c0_i32_0, %c0_i32_1 : i32, i32, i32
  }
  func.func @transform_13(%arg0: i32) -> (i32, i32, i32) {
    %c0_i32 = arith.constant 0 : i32
    %c0_i32_0 = arith.constant 0 : i32
    %c0_i32_1 = arith.constant 0 : i32
    %c0_i32_2 = arith.constant 0 : i32
    return %c0_i32, %c0_i32_0, %c0_i32_1 : i32, i32, i32
  }
}

</mosaic_0001>

<bundles_post_ra>
// kernel: custom-call.24
= control target key start
LH: loop header
LB: loop body
LE: loop exit
PB: predicated region body
PF: predicated region fallthrough
CT: control target
= control target key end

     0   :  { %s6_s0 = inlined_call_operand.vmem [shape: f32[2,64], index: 0, kind: output, shape index: {}]  }

// kernel: forward.9
= control target key start
LH: loop header
LB: loop body
LE: loop exit
PB: predicated region body
PF: predicated region fallthrough
CT: control target
= control target key end

     0   :  { %vm23_vm0 = vcmask 23552   ;;  %vm241_vm2 = vcmask 523264   ;;  %s863_s1 = inlined_call_operand.vmem [shape: f32[2,64,3], index: 1, kind: input, shape index: {}]   ;;  %s864_s0 = inlined_call_operand.vmem [shape: f32[2,32,3], index: 0, kind: input, shape index: {}]   ;;  %s865_s2 = inlined_call_operand.vmem [shape: f32[2,32,64], index: 2, kind: output, shape index: {}]  }
   0x1   :  { %v15_v0 = vld [vmem:[%s863_s1] sm:$0xff]  ;;  %v16_v1 = vld [vmem:[%s863_s1 + $0x8] sm:$0xff]  ;;  %vm666_vm1 = vmpackc.low %vm23_vm0, %vm23_vm0 }
   0x2   :  { %v594_v3 = vpack.c.bf16 %v16_v1, %v15_v0  ;;  %v502_v4 = vld [vmem:[%s863_s1 + $0x40] sm:$0xff]  ;;  %v676_v5 = vld [vmem:[%s863_s1 + $0x48] sm:$0xff]  ;;  %v681_v6 = vld [vmem:[%s864_s0 + $0x10] sm:$0xff]  ;;  %v162_v24 = vmul.f32 %v16_v1, %v16_v1  ;;  %v161_v26 = vmul.f32 %v15_v0, %v15_v0 }
   0x3   :  { %v618_v7 = vpack.c.bf16 %v676_v5, %v502_v4  ;;  %v147_v8 = vmul.f32 %v681_v6, %v681_v6  ;;  %v11_v9 = vld [vmem:[%s864_s0] sm:$0xff]  ;;  %v692_v10 = vld [vmem:[%s864_s0 + $0x18] sm:$0xff]  ;;  %v697_v11 = vld [vmem:[%s864_s0 + $0x8] sm:$0xff]  ;;  %v397_v39 = vmul.f32 %v502_v4, %v502_v4  ;;  %v398_v50 = vmul.f32 %v676_v5, %v676_v5 }
   0x4   :  { %596 = vmatprep.subr.msk.bf16.mxu0 %vm666_vm1, %v594_v3  ;;  %v145_v12 = vmul.f32 %v11_v9, %v11_v9  ;;  %v148_v13 = vmul.f32 %v692_v10, %v692_v10  ;;  %v146_v14 = vmul.f32 %v697_v11, %v697_v11  ;;  %v17_v15 = vld [vmem:[%s863_s1 + $0x10] sm:$0xff]  ;;  %v18_v16 = vld [vmem:[%s863_s1 + $0x18] sm:$0xff]  ;;  %566 = vmatprep.mubr.msk.f32.mxu0 %vm23_vm0, %v11_v9  ;;  %v19_v27 = vld [vmem:[%s863_s1 + $0x20] sm:$0xff]  ;;  %v172_v32 = vsel %vm23_vm0, %v162_v24, 0.0 }
   0x5   :  { %v504_v17 = vld [vmem:[%s863_s1 + $0x50] sm:$0xff]  ;;  %620 = vmatprep.subr.msk.bf16.mxu1 %vm666_vm1, %v618_v7  ;;  %599 = vmatpush3.bf16.xpose.msk.msra.mxu0 %vm666_vm1, %v594_v3  ;;  %v155_v18 = vsel %vm23_vm0, %v147_v8, 0.0  ;;  %v600_v19 = vpack.c.bf16 %v18_v16, %v17_v15  ;;  %v505_v20 = vld [vmem:[%s863_s1 + $0x58] sm:$0xff]  ;;  %v20_v28 = vld [vmem:[%s863_s1 + $0x28] sm:$0xff]  ;;  %v164_v33 = vmul.f32 %v18_v16, %v18_v16  ;;  %v169_v35 = vsel %vm23_vm0, %v161_v26, 0.0 }
   0x6   :  { %623 = vmatpush3.bf16.xpose.msk.msra.mxu1 %vm666_vm1, %v618_v7  ;;  %156 = vadd.xlane.f32.xlu1 %v155_v18  ;;  %v149_v21 = vsel %vm23_vm0, %v145_v12, 0.0  ;;  %v624_v22 = vpack.c.bf16 %v505_v20, %v504_v17  ;;  %v158_v23 = vsel %vm23_vm0, %v148_v13, 0.0  ;;  %v152_v25 = vsel %vm23_vm0, %v146_v14, 0.0  ;;  %v741_v29 = vld [vmem:[%s864_s0 + $0x20] sm:$0xff]  ;;  %v507_v31 = vld [vmem:[%s863_s1 + $0x68] sm:$0xff]  ;;  %v21_v42 = vld [vmem:[%s863_s1 + $0x30] sm:$0xff] }
   0x7   :  { %150 = vadd.xlane.f32.xlu0 %v149_v21  ;;  %602 = vmatprep.subr.msk.bf16.mxu0 %vm666_vm1, %v600_v19  ;;  %v506_v30 = vld [vmem:[%s863_s1 + $0x60] sm:$0xff]  ;;  %v606_v34 = vpack.c.bf16 %v20_v28, %v19_v27  ;;  %v163_v36 = vmul.f32 %v17_v15, %v17_v15  ;;  %v178_v38 = vsel %vm23_vm0, %v164_v33, 0.0  ;;  %v165_v41 = vmul.f32 %v19_v27, %v19_v27  ;;  %v22_v43 = vld [vmem:[%s863_s1 + $0x38] sm:$0xff]  ;;  %v508_v44 = vld [vmem:[%s863_s1 + $0x70] sm:$0xff] }
   0x8   :  { %626 = vmatprep.subr.msk.bf16.mxu1 %vm666_vm1, %v624_v22  ;;  %588 = vmatprep.mubr.msk.f32.mxu1 %vm23_vm0, %v741_v29  ;;  %v630_v37 = vpack.c.bf16 %v507_v31, %v506_v30  ;;  %v509_v45 = vld [vmem:[%s863_s1 + $0x78] sm:$0xff]  ;;  %v405_v46 = vsel %vm23_vm0, %v397_v39, 0.0  ;;  %v612_v47 = vpack.c.bf16 %v22_v43, %v21_v42  ;;  %v399_v48 = vmul.f32 %v504_v17, %v504_v17  ;;  %v499_v0 = vld [vmem:[%s864_s0 + $0x28] sm:$0xff]  ;;  %v500_v1 = vld [vmem:[%s864_s0 + $0x30] sm:$0xff] }
   0x9   :  { %v175_v40 = vsel %vm23_vm0, %v163_v36, 0.0  ;;  %v181_v49 = vsel %vm23_vm0, %v165_v41, 0.0  ;;  %v636_v51 = vpack.c.bf16 %v509_v45, %v508_v44  ;;  %v401_v53 = vmul.f32 %v506_v30, %v506_v30  ;;  %v501_v7 = vld [vmem:[%s864_s0 + $0x38] sm:$0xff] }
   0xa   :  { %159 = vadd.xlane.f32.xlu1 %v158_v23  ;;  %v411_v52 = vsel %vm23_vm0, %v399_v48, 0.0  ;;  %v408_v54 = vsel %vm23_vm0, %v398_v50, 0.0  ;;  %v400_v55 = vmul.f32 %v505_v20, %v505_v20  ;;  %v402_v57 = vmul.f32 %v507_v31, %v507_v31 }
   0xb   :  { %153 = vadd.xlane.f32.xlu0 %v152_v25  ;;  %v417_v56 = vsel %vm23_vm0, %v401_v53, 0.0  ;;  %v166_v59 = vmul.f32 %v20_v28, %v20_v28  ;;  %v403_v61 = vmul.f32 %v508_v44, %v508_v44  ;;  %v167_v63 = vmul.f32 %v21_v42, %v21_v42 }
   0xc   :  { %v414_v58 = vsel %vm23_vm0, %v400_v55, 0.0  ;;  %v420_v60 = vsel %vm23_vm0, %v402_v57, 0.0  ;;  %v404_v3 = vmul.f32 %v509_v45, %v509_v45  ;;  %v168_v5 = vmul.f32 %v22_v43, %v22_v43 }
   0xd   :  { %605 = vmatpush3.bf16.xpose.msk.msra.mxu0 %vm666_vm1, %v600_v19  ;;  %v184_v62 = vsel %vm23_vm0, %v166_v59, 0.0  ;;  %v423_v2 = vsel %vm23_vm0, %v403_v61, 0.0  ;;  %v187_v4 = vsel %vm23_vm0, %v167_v63, 0.0  ;;  %v381_v8 = vmul.f32 %v741_v29, %v741_v29 }
   0xe   :  { %629 = vmatpush3.bf16.xpose.msk.msra.mxu1 %vm666_vm1, %v624_v22  ;;  %173 = vadd.xlane.f32.xlu1 %v172_v32  ;;  %v426_v9 = vsel %vm23_vm0, %v404_v3, 0.0  ;;  %v382_v12 = vmul.f32 %v499_v0, %v499_v0  ;;  %v383_v14 = vmul.f32 %v500_v1, %v500_v1  ;;  %v384_v16 = vmul.f32 %v501_v7, %v501_v7 }
   0xf   :  { %170 = vadd.xlane.f32.xlu0 %v169_v35  ;;  %608 = vmatprep.subr.msk.bf16.mxu0 %vm666_vm1, %v606_v34 }
  0x10   :  { %632 = vmatprep.subr.msk.bf16.mxu1 %vm666_vm1, %v630_v37  ;;  %v388_v13 = vsel %vm23_vm0, %v382_v12, 0.0  ;;  %v391_v15 = vsel %vm23_vm0, %v383_v14, 0.0 }
  0x12   :  { %179 = vadd.xlane.f32.xlu1 %v178_v38 }
  0x13   :  { %176 = vadd.xlane.f32.xlu0 %v175_v40 }
  0x15   :  { %611 = vmatpush3.bf16.xpose.msk.msra.mxu0 %vm666_vm1, %v606_v34 }
  0x16   :  { %635 = vmatpush3.bf16.xpose.msk.msra.mxu1 %vm666_vm1, %v630_v37  ;;  %406 = vadd.xlane.f32.xlu1 %v405_v46  ;;  %v233_v46 = vlaneseq }
  0x17   :  { %182 = vadd.xlane.f32.xlu0 %v181_v49  ;;  %614 = vmatprep.subr.msk.bf16.mxu0 %vm666_vm1, %v612_v47 }
  0x18   :  { %638 = vmatprep.subr.msk.bf16.mxu1 %vm666_vm1, %v636_v51  ;;  %v234_v48 = vshrl.u32 %v233_v46, 7 }
  0x1a   :  { %412 = vadd.xlane.f32.xlu1 %v411_v52  ;;  %v235_v53 = vsub.s32 0, %v234_v48 }
  0x1b   :  { %409 = vadd.xlane.f32.xlu0 %v408_v54 }
  0x1d   :  { %617 = vmatpush3.bf16.xpose.msk.msra.mxu0 %vm666_vm1, %v612_v47 }
  0x1e   :  { %641 = vmatpush3.bf16.xpose.msk.msra.mxu1 %vm666_vm1, %v636_v51  ;;  %418 = vadd.xlane.f32.xlu1 %v417_v56 }
  0x1f   :  { %415 = vadd.xlane.f32.xlu0 %v414_v58 }
  0x22   :  { %421 = vadd.xlane.f32.xlu1 %v420_v60 }
  0x23   :  { %185 = vadd.xlane.f32.xlu0 %v184_v62 }
  0x24   :  { %567 = vmatmul.mubr.msk.f32.vlgmr.msra.gmra.mrb[0].mxu0 %vm23_vm0, %v697_v11  ;;  %v190_v11 = vsel %vm23_vm0, %v168_v5, 0.0 }
  0x25   :  { %589 = vmatmul.mubr.msk.f32.vlgmr.msra.gmra.mrb[0].mxu1 %vm23_vm0, %v499_v0  ;;  %569 = vmatprep.mubr.msk.f32.mxu0 %vm23_vm0, %v681_v6  ;;  %v385_v6 = vsel %vm23_vm0, %v381_v8, 0.0 }
  0x26   :  { %591 = vmatprep.mubr.msk.f32.mxu1 %vm23_vm0, %v500_v1  ;;  %424 = vadd.xlane.f32.xlu1 %v423_v2 }
  0x27   :  { %188 = vadd.xlane.f32.xlu0 %v187_v4 }
  0x28   :  { %570 = vmatmul.mubr.msk.f32.gmra.mrb[2].mxu0 %vm23_vm0, %v692_v10  ;;  %v394_v10 = vsel %vm23_vm0, %v384_v16, 0.0 }
  0x29   :  { %592 = vmatmul.mubr.msk.f32.gmra.mrb[2].mxu1 %vm23_vm0, %v501_v7 }
  0x2a   :  { %427 = vadd.xlane.f32.xlu1 %v426_v9 }
  0x2b   :  { %191 = vadd.xlane.f32.xlu0 %v190_v11 }
  0x2e   :  { %386 = vadd.xlane.f32.xlu1 %v385_v6 }
  0x32   :  { %389 = vadd.xlane.f32.xlu1 %v388_v13 }
  0x36   :  { %392 = vadd.xlane.f32.xlu1 %v391_v15 }
  0x3a   :  { %395 = vadd.xlane.f32.xlu1 %v394_v10 }
  0x93   :  { %v825_v17 = vpop.xlane.xlu1 %156 }
  0x94   :  { %v151_v18 = vpop.xlane.xlu0 %150 }
  0x97   :  { %v827_v19 = vpop.xlane.xlu1 %159 }
  0x98   :  { %v154_v20 = vpop.xlane.xlu0 %153 }
  0x9b   :  { %v174_v21 = vpop.xlane.xlu1 %173 }
  0x9c   :  { %v171_v22 = vpop.xlane.xlu0 %170 }
  0x9d   :  { %201 = vxpose.xlu0.b32.start [1/8] (short) (narrow) %v171_v22, 8 }
  0x9f   :  { %v180_v23 = vpop.xlane.xlu1 %179 }
  0xa0   :  { %v177_v24 = vpop.xlane.xlu0 %176 }
  0xa1   :  { %202 = vxpose.xlu0.b32.cont [2/8] (short) (narrow) %v174_v21, 8 }
  0xa3   :  { %v407_v25 = vpop.xlane.xlu1 %406 }
  0xa4   :  { %v183_v26 = vpop.xlane.xlu0 %182  ;;  %437 = vxpose.xlu1.b32.start [1/8] (short) (narrow) %v407_v25, 8 }
  0xa5   :  { %203 = vxpose.xlu0.b32.cont [3/8] (short) (narrow) %v177_v24, 8 }
  0xa7   :  { %v413_v28 = vpop.xlane.xlu1 %412 }
  0xa8   :  { %v410_v27 = vpop.xlane.xlu0 %409 }
  0xa9   :  { %204 = vxpose.xlu0.b32.cont [4/8] (short) (narrow) %v180_v23, 8  ;;  %438 = vxpose.xlu1.b32.cont [2/8] (short) (narrow) %v410_v27, 8 }
  0xab   :  { %v419_v30 = vpop.xlane.xlu1 %418 }
  0xac   :  { %v416_v29 = vpop.xlane.xlu0 %415 }
  0xad   :  { %205 = vxpose.xlu0.b32.cont [5/8] (short) (narrow) %v183_v26, 8  ;;  %439 = vxpose.xlu1.b32.cont [3/8] (short) (narrow) %v413_v28, 8 }
  0xaf   :  { %v422_v32 = vpop.xlane.xlu1 %421 }
  0xb0   :  { %v186_v31 = vpop.xlane.xlu0 %185 }
  0xb1   :  { %440 = vxpose.xlu1.b32.cont [4/8] (short) (narrow) %v416_v29, 8  ;;  %206 = vxpose.xlu0.b32.cont [6/8] (short) (narrow) %v186_v31, 8 }
  0xb3   :  { %v425_v35 = vpop.xlane.xlu1 %424 }
  0xb4   :  { %v189_v33 = vpop.xlane.xlu0 %188 }
  0xb5   :  { %441 = vxpose.xlu1.b32.cont [5/8] (short) (narrow) %v419_v30, 8  ;;  %207 = vxpose.xlu0.b32.cont [7/8] (short) (narrow) %v189_v33, 8 }
  0xb7   :  { %v428_v36 = vpop.xlane.xlu1 %427 }
  0xb8   :  { %v192_v34 = vpop.xlane.xlu0 %191 }
  0xb9   :  { %442 = vxpose.xlu1.b32.cont [6/8] (short) (narrow) %v422_v32, 8  ;;  %208 = vxpose.xlu0.b32.end [8/8] (short) (narrow) %v192_v34, 8 }
  0xbb   :  { %v387_v45 = vpop.xlane.xlu1 %386 }
  0xbd   :  { %443 = vxpose.xlu1.b32.cont [7/8] (short) (narrow) %v425_v35, 8 }
  0xbf   :  { %v390_v47 = vpop.xlane.xlu1 %389 }
  0xc1   :  { %444 = vxpose.xlu1.b32.end [8/8] (short) (narrow) %v428_v36, 8 }
  0xc3   :  { %v393_v54 = vpop.xlane.xlu1 %392 }
  0xc7   :  { %v396_v2 = vpop.xlane.xlu1 %395 }
  0xf7   :  { %v568_v37 = vpop.f32.mrb[0].mxu0 }
  0xf8   :  { %v590_v38 = vpop.f32.mrb[0].mxu1  ;;  %v126_v39 = vpop.f32.mrb[1].mxu0  ;;  %v194_v49 = vmul.f32 2.0, %v568_v37 }
  0xf9   :  { %v362_v40 = vpop.f32.mrb[1].mxu1  ;;  %v193_v50 = vmul.f32 2.0, %v126_v39  ;;  %v430_v1 = vmul.f32 2.0, %v590_v38 }
  0xfa   :  { %v198_v55 = vsub.f32 %v154_v20, %v194_v49  ;;  %v429_v3 = vmul.f32 2.0, %v362_v40 }
  0xfb   :  { %v571_v41 = vpop.f32.mrb[2].mxu0  ;;  %v197_v57 = vsub.f32 %v151_v18, %v193_v50  ;;  %v434_v7 = vsub.f32 %v390_v47, %v430_v1 }
  0xfc   :  { %v593_v42 = vpop.f32.mrb[2].mxu1  ;;  %v136_v43 = vpop.f32.mrb[3].mxu0  ;;  %v196_v51 = vmul.f32 2.0, %v571_v41  ;;  %v433_v9 = vsub.f32 %v387_v45, %v429_v3 }
  0xfd   :  { %v372_v44 = vpop.f32.mrb[3].mxu1  ;;  %v195_v52 = vmul.f32 2.0, %v136_v43  ;;  %v432_v4 = vmul.f32 2.0, %v593_v42 }
  0xfe   :  { %v200_v58 = vsub.f32 %v827_v19, %v196_v51  ;;  %v431_v5 = vmul.f32 2.0, %v372_v44 }
  0xff   :  { %v199_v59 = vsub.f32 %v825_v17, %v195_v52  ;;  %v436_v6 = vsub.f32 %v396_v2, %v432_v4 }
 0x100   :  { %v435_v11 = vsub.f32 %v393_v54, %v431_v5 }
 0x11d   :  { %v217_v56 = vpop.trf.xlu0 }
 0x11e   :  { %v236_v60 = vrot.slane %v217_v56, %v235_v53 }
 0x120   :  { %v237_v61 = vadd.f32 %v236_v60, %v197_v57  ;;  %v238_v62 = vadd.f32 %v236_v60, %v198_v55  ;;  %v239_v63 = vadd.f32 %v236_v60, %v199_v59  ;;  %v240_v0 = vadd.f32 %v236_v60, %v200_v58 }
 0x122   :  { %242 = vst.msk [vmem:[%s865_s2] sm:$0xff] %vm241_vm2, %v237_v61  ;;  %243 = vst.msk [vmem:[%s865_s2 + $0x8] sm:$0xff] %vm241_vm2, %v238_v62 }
 0x123   :  { %244 = vst.msk [vmem:[%s865_s2 + $0x10] sm:$0xff] %vm241_vm2, %v239_v63  ;;  %245 = vst.msk [vmem:[%s865_s2 + $0x18] sm:$0xff] %vm241_vm2, %v240_v0 }
 0x125   :  { %v453_v8 = vpop.trf.xlu1 }
 0x126   :  { %v472_v12 = vrot.slane %v453_v8, %v235_v53 }
 0x128   :  { %v473_v13 = vadd.f32 %v472_v12, %v433_v9  ;;  %v474_v14 = vadd.f32 %v472_v12, %v434_v7  ;;  %v475_v15 = vadd.f32 %v472_v12, %v435_v11  ;;  %v476_v16 = vadd.f32 %v472_v12, %v436_v6 }
 0x12a   :  { %522 = vst.msk [vmem:[%s865_s2 + $0x20] sm:$0xff] %vm241_vm2, %v473_v13  ;;  %523 = vst.msk [vmem:[%s865_s2 + $0x28] sm:$0xff] %vm241_vm2, %v474_v14 }
 0x12b   :  { %524 = vst.msk [vmem:[%s865_s2 + $0x30] sm:$0xff] %vm241_vm2, %v475_v15  ;;  %525 = vst.msk [vmem:[%s865_s2 + $0x38] sm:$0xff] %vm241_vm2, %v476_v16 }

// kernel: custom-call.25
= control target key start
LH: loop header
LB: loop body
LE: loop exit
PB: predicated region body
PF: predicated region fallthrough
CT: control target
= control target key end

     0   :  { %s6_s0 = inlined_call_operand.vmem [shape: f32[2,32], index: 0, kind: output, shape index: {}]  }

// kernel: forward.11
= control target key start
LH: loop header
LB: loop body
LE: loop exit
PB: predicated region body
PF: predicated region fallthrough
CT: control target
= control target key end

     0   :  { %vm16_vm0 = vcmask 23552   ;;  %v387_v3 = vmov 0.0|0.0   ;;  %vm388_vm2 = vmmov 0   ;;  %v389_v11 = vmov 0.0   ;;  %s467_s1 = inlined_call_operand.vmem [shape: f32[2,32,3], index: 1, kind: input, shape index: {}]   ;;  %s468_s0 = inlined_call_operand.vmem [shape: f32[2,8,3], index: 0, kind: input, shape index: {}]   ;;  %s469_s2 = inlined_call_operand.vmem [shape: f32[2,8,32], index: 2, kind: output, shape index: {}]  }
   0x1   :  { %v12_v0 = vld [vmem:[%s467_s1] sm:$0xff]  ;;  %v13_v1 = vld [vmem:[%s467_s1 + $0x8] sm:$0xff]  ;;  %368 = vmatprep.subr.bf16.mxu0 %v387_v3  ;;  %376 = vmatprep.subr.bf16.mxu1 %v387_v3  ;;  %v14_v9 = vld [vmem:[%s467_s1 + $0x10] sm:$0xff]  ;;  %v156_v49 = vlaneseq  ;;  %vm161_vm3 = vcmask 261120  }
   0x2   :  { %v326_v2 = vld [vmem:[%s467_s1 + $0x20] sm:$0xff]  ;;  %v106_v4 = vmul.f32 %v12_v0, %v12_v0  ;;  %v107_v5 = vmul.f32 %v13_v1, %v13_v1  ;;  %v369_v6 = vpack.c.bf16 %v13_v1, %v12_v0  ;;  %v327_v8 = vld [vmem:[%s467_s1 + $0x28] sm:$0xff]  ;;  %vm422_vm1 = vmpackc.low %vm16_vm0, %vm16_vm0  ;;  %354 = vmatprep.mubr.msk.f32.mxu0 %vm388_vm2, %v389_v11  ;;  %365 = vmatprep.mubr.msk.f32.mxu1 %vm388_vm2, %v389_v11 }
   0x3   :  { %v259_v7 = vmul.f32 %v326_v2, %v326_v2  ;;  %v260_v12 = vmul.f32 %v327_v8, %v327_v8  ;;  %v328_v13 = vld [vmem:[%s467_s1 + $0x30] sm:$0xff]  ;;  %v377_v14 = vpack.c.bf16 %v327_v8, %v326_v2  ;;  %v108_v17 = vmul.f32 %v14_v9, %v14_v9  ;;  %v15_v21 = vld [vmem:[%s467_s1 + $0x18] sm:$0xff]  ;;  %v11_v29 = vld [vmem:[%s468_s0] sm:$0xff] }
   0x4   :  { %v110_v15 = vsel %vm16_vm0, %v106_v4, 0.0  ;;  %v113_v16 = vsel %vm16_vm0, %v107_v5, 0.0  ;;  %371 = vmatpush3.bf16.xpose.msk.msra.mxu0 %vm422_vm1, %v369_v6  ;;  %v261_v20 = vmul.f32 %v328_v13, %v328_v13  ;;  %v329_v22 = vld [vmem:[%s467_s1 + $0x38] sm:$0xff]  ;;  %v373_v23 = vpack.c.bf16 %v15_v21, %v14_v9  ;;  %v325_v33 = vld [vmem:[%s468_s0 + $0x8] sm:$0xff] }
   0x5   :  { %111 = vadd.xlane.f32.xlu0 %v110_v15  ;;  %114 = vadd.xlane.f32.xlu1 %v113_v16  ;;  %v263_v18 = vsel %vm16_vm0, %v259_v7, 0.0  ;;  %v266_v19 = vsel %vm16_vm0, %v260_v12, 0.0  ;;  %v116_v24 = vsel %vm16_vm0, %v108_v17, 0.0  ;;  %v109_v26 = vmul.f32 %v15_v21, %v15_v21 }
   0x6   :  { %379 = vmatpush3.bf16.xpose.msk.msra.mxu1 %vm422_vm1, %v377_v14  ;;  %372 = vmatprep.subr.bf16.mxu0 %v387_v3  ;;  %v269_v25 = vsel %vm16_vm0, %v261_v20, 0.0  ;;  %v381_v27 = vpack.c.bf16 %v329_v22, %v328_v13  ;;  %v262_v28 = vmul.f32 %v329_v22, %v329_v22  ;;  %v102_v32 = vmul.f32 %v11_v29, %v11_v29 }
   0x7   :  { %380 = vmatprep.subr.bf16.mxu1 %v387_v3  ;;  %v119_v30 = vsel %vm16_vm0, %v109_v26, 0.0  ;;  %v255_v35 = vmul.f32 %v325_v33, %v325_v33  ;;  %v157_v50 = vshrl.u32 %v156_v49, 7 }
   0x8   :  { %v272_v31 = vsel %vm16_vm0, %v262_v28, 0.0  ;;  %v103_v34 = vsel %vm16_vm0, %v102_v32, 0.0 }
   0x9   :  { %264 = vadd.xlane.f32.xlu0 %v263_v18  ;;  %267 = vadd.xlane.f32.xlu1 %v266_v19  ;;  %v256_v36 = vsel %vm16_vm0, %v255_v35, 0.0  ;;  %v158_v53 = vsub.s32 0, %v157_v50 }
   0xc   :  { %375 = vmatpush3.bf16.xpose.msk.msra.mxu0 %vm422_vm1, %v373_v23 }
   0xd   :  { %117 = vadd.xlane.f32.xlu0 %v116_v24  ;;  %270 = vadd.xlane.f32.xlu1 %v269_v25 }
   0xe   :  { %383 = vmatpush3.bf16.xpose.msk.msra.mxu1 %vm422_vm1, %v381_v27 }
  0x11   :  { %120 = vadd.xlane.f32.xlu0 %v119_v30  ;;  %273 = vadd.xlane.f32.xlu1 %v272_v31 }
  0x13   :  { %355 = vmatmul.mubr.msk.f32.vlgmr.msra.gmra.mrb[0].mxu0 %vm16_vm0, %v11_v29 }
  0x15   :  { %366 = vmatmul.mubr.msk.f32.vlgmr.msra.gmra.mrb[0].mxu1 %vm16_vm0, %v325_v33  ;;  %104 = vadd.xlane.f32.xlu0 %v103_v34 }
  0x19   :  { %257 = vadd.xlane.f32.xlu0 %v256_v36 }
  0x92   :  { %v112_v37 = vpop.xlane.xlu0 %111  ;;  %v115_v38 = vpop.xlane.xlu1 %114 }
  0x93   :  { %124 = vxpose.xlu1.b32.start [1/4] (short) (narrow) %v112_v37, 8 }
  0x96   :  { %v265_v39 = vpop.xlane.xlu0 %264  ;;  %v268_v40 = vpop.xlane.xlu1 %267 }
  0x97   :  { %125 = vxpose.xlu1.b32.cont [2/4] (short) (narrow) %v115_v38, 8  ;;  %277 = vxpose.xlu0.b32.start [1/4] (short) (narrow) %v265_v39, 8 }
  0x9a   :  { %v118_v41 = vpop.xlane.xlu0 %117  ;;  %v271_v42 = vpop.xlane.xlu1 %270 }
  0x9b   :  { %126 = vxpose.xlu1.b32.cont [3/4] (short) (narrow) %v118_v41, 8  ;;  %278 = vxpose.xlu0.b32.cont [2/4] (short) (narrow) %v268_v40, 8 }
  0x9e   :  { %v121_v43 = vpop.xlane.xlu0 %120  ;;  %v274_v44 = vpop.xlane.xlu1 %273 }
  0x9f   :  { %127 = vxpose.xlu1.b32.end [4/4] (short) (narrow) %v121_v43, 8  ;;  %279 = vxpose.xlu0.b32.cont [3/4] (short) (narrow) %v271_v42, 8 }
  0xa2   :  { %v105_v51 = vpop.xlane.xlu0 %104 }
  0xa3   :  { %280 = vxpose.xlu0.b32.end [4/4] (short) (narrow) %v274_v44, 8 }
  0xa6   :  { %v258_v54 = vpop.xlane.xlu0 %257 }
  0xe6   :  { %v98_v45 = vpop.f32.mrb[0].mxu0 }
  0xe7   :  { %v356_v46 = vpop.f32.mrb[1].mxu0  ;;  %v122_v52 = vmul.f32 2.0, %v98_v45 }
  0xe8   :  { %v251_v47 = vpop.f32.mrb[0].mxu1 }
  0xe9   :  { %v367_v48 = vpop.f32.mrb[1].mxu1  ;;  %v123_v56 = vsub.f32 %v105_v51, %v122_v52  ;;  %v275_v57 = vmul.f32 2.0, %v251_v47 }
  0xeb   :  { %v276_v61 = vsub.f32 %v258_v54, %v275_v57 }
 0x113   :  { %v140_v55 = vpop.trf.xlu1 }
 0x114   :  { %v159_v58 = vrot.slane %v140_v55, %v158_v53 }
 0x116   :  { %v160_v59 = vadd.f32 %v159_v58, %v123_v56 }
 0x117   :  { %v293_v60 = vpop.trf.xlu0 }
 0x118   :  { %162 = vst.msk [vmem:[%s469_s2] sm:$0xff] %vm161_vm3, %v160_v59  ;;  %v312_v62 = vrot.slane %v293_v60, %v158_v53 }
 0x11a   :  { %v313_v63 = vadd.f32 %v312_v62, %v276_v61 }
 0x11c   :  { %335 = vst.msk [vmem:[%s469_s2 + $0x8] sm:$0xff] %vm161_vm3, %v313_v63 }

// kernel: forward.10
= control target key start
LH: loop header
LB: loop body
LE: loop exit
PB: predicated region body
PF: predicated region fallthrough
CT: control target
= control target key end

     0   :  { %vm75_vm0 = vcmask 1044480   ;;  %vm50_vm1 = vcmask 39936   ;;  %vm198_vm2 = vcmask 130048   ;;  %vm342_vm3 = vcmask 261120   ;;  %s10748_s1 = inlined_call_operand.vmem [shape: f32[5,16], index: 1, kind: input, shape index: {}]   ;;  %s10749_s0 = inlined_call_operand.vmem [shape: f32[16,64,5], index: 0, kind: input, shape index: {}]   ;;  %s10750_s3 = inlined_call_operand.vmem [shape: f32[16,32], index: 3, kind: input, shape index: {}]   ;;  %s10751_s5 = inlined_call_operand.vmem [shape: f32[32,64], index: 5, kind: input, shape index: {}]   ;;  %s10752_s2 = inlined_call_operand.vmem [shape: f32[1,16], index: 2, kind: input, shape index: {}]   ;;  %s10753_s4 = inlined_call_operand.vmem [shape: f32[1,32], index: 4, kind: input, shape index: {}]   ;;  %s10754_s6 = inlined_call_operand.vmem [shape: f32[1,64], index: 6, kind: input, shape index: {}]   ;;  %s10755_s7 = inlined_call_operand.vmem [shape: f32[64,64], index: 7, kind: output, shape index: {}]  }
   0x1   :  { %v8978_v0 = vld [vmem:[%s10748_s1] sm:$0x1f]  ;;  %v37_v2 = vld [vmem:[%s10749_s0 + $0x8] sm:$0xff]  ;;  %v38_v3 = vld [vmem:[%s10749_s0 + $0x10] sm:$0xff]  ;;  %vm6900_vm4 = vcmask 523264  }
   0x2   :  { %v36_v1 = vld [vmem:[%s10749_s0] sm:$0xff]  ;;  %7932 = vmatprep.subr.msk.mxu0 %vm75_vm0, %v8978_v0  ;;  %v39_v4 = vld [vmem:[%s10749_s0 + $0x18] sm:$0xff]  ;;  %v41_v6 = vld [vmem:[%s10749_s0 + $0x28] sm:$0xff] }
   0x3   :  { %7934 = vmatprep.mubr.msk.f32.mxu0 %vm50_vm1, %v36_v1  ;;  %7933 = vmatpush3.msk.msra.mxu0 %vm75_vm0, %v8978_v0  ;;  %v40_v5 = vld [vmem:[%s10749_s0 + $0x20] sm:$0xff]  ;;  %v42_v7 = vld [vmem:[%s10749_s0 + $0x30] sm:$0xff]  ;;  %v43_v8 = vld [vmem:[%s10749_s0 + $0x38] sm:$0xff] }
   0x4   :  { %7935 = vmatmul.mubr.msk.f32.vlgmr.msra.gmra.mrb[0].mxu0 %vm50_vm1, %v37_v2  ;;  %v27_v9 = vld [vmem:[%s10750_s3] sm:$0xff]  ;;  %v28_v10 = vld [vmem:[%s10750_s3 + $0x8] sm:$0xff]  ;;  %v31_v14 = vld [vmem:[%s10751_s5 + $0x10] sm:$0xff] }
   0x5   :  { %7937 = vmatprep.mubr.msk.f32.mxu0 %vm50_vm1, %v38_v3  ;;  %v9022_v11 = vpack.c.bf16 %v28_v10, %v27_v9  ;;  %v29_v12 = vld [vmem:[%s10751_s5] sm:$0xff]  ;;  %v30_v13 = vld [vmem:[%s10751_s5 + $0x8] sm:$0xff]  ;;  %v32_v16 = vld [vmem:[%s10751_s5 + $0x18] sm:$0xff] }
   0x6   :  { %v9037_v15 = vpack.c.bf16 %v30_v13, %v29_v12  ;;  %v9042_v17 = vpack.c.bf16 %v32_v16, %v31_v14  ;;  %v9052_v18 = vld [vmem:[%s10752_s2] ss:$0 sm:$0xff]  ;;  %v6942_v44 = vld [vmem:[%s10749_s0 + $0x48] sm:$0xff]  ;;  %v6943_v45 = vld [vmem:[%s10749_s0 + $0x50] sm:$0xff] }
   0x7   :  { %8733 = vmatprep.subr.bf16.mxu1 %v9022_v11  ;;  %v6941_v43 = vld [vmem:[%s10749_s0 + $0x40] sm:$0xff]  ;;  %v6944_v46 = vld [vmem:[%s10749_s0 + $0x58] sm:$0xff]  ;;  %v6946_v48 = vld [vmem:[%s10749_s0 + $0x68] sm:$0xff] }
   0x8   :  { %7938 = vmatmul.mubr.msk.f32.gmra.mrb[2].mxu0 %vm50_vm1, %v39_v4  ;;  %8735 = vmatpush3.bf16.msra.mxu1 %v9022_v11  ;;  %v6945_v47 = vld [vmem:[%s10749_s0 + $0x60] sm:$0xff]  ;;  %v6947_v49 = vld [vmem:[%s10749_s0 + $0x70] sm:$0xff]  ;;  %v6948_v50 = vld [vmem:[%s10749_s0 + $0x78] sm:$0xff] }
   0x9   :  { %7940 = vmatprep.mubr.msk.f32.mxu0 %vm50_vm1, %v40_v5  ;;  %7982 = vmatprep.subr.msk.mxu1 %vm75_vm0, %v8978_v0  ;;  %v9112_v51 = vld [vmem:[%s10753_s4] ss:$0 sm:$0xff] }
   0xa   :  { %8737 = vmatprep.subr.bf16.mxu0 %v9037_v15 }
   0xb   :  { %8739 = vmatpush3.bf16.msra.mxu0 %v9037_v15 }
   0xc   :  { %7941 = vmatmul.mubr.msk.f32.gmra.mrb[4].mxu0 %vm50_vm1, %v41_v6  ;;  %8741 = vmatprep.subr.bf16.mxu0 %v9042_v17 }
   0xd   :  { %7943 = vmatprep.mubr.msk.f32.mxu0 %vm50_vm1, %v42_v7 }
   0xf   :  { %8743 = vmatpush3.bf16.msra.mxu0 %v9042_v17 }
  0x10   :  { %7944 = vmatmul.mubr.msk.f32.gmra.mrb[6].mxu0 %vm50_vm1, %v43_v8  ;;  %8745 = vmatprep.subr.bf16.mxu0 %v9022_v11 }
  0xd7   :  { %v7936_v19 = vpop.f32.mrb[0].mxu0 }
  0xd8   :  { %v151_v20 = vadd.f32 %v7936_v19, %v9052_v18  ;;  %v145_v21 = vpop.f32.mrb[1].mxu0 }
  0xd9   :  { %v146_v22 = vadd.f32 %v9052_v18, %v145_v21 }
  0xda   :  { %v185_v25 = vmax.f32 %v151_v20, 0.0 }
  0xdb   :  { %v184_v23 = vmax.f32 %v146_v22, 0.0  ;;  %v7939_v24 = vpop.f32.mrb[2].mxu0 }
  0xdc   :  { %v161_v26 = vadd.f32 %v7939_v24, %v9052_v18  ;;  %v155_v27 = vpop.f32.mrb[3].mxu0 }
  0xdd   :  { %v156_v28 = vadd.f32 %v9052_v18, %v155_v27  ;;  %7950 = vmatprep.mubr.msk.f32.mxu1 %vm198_vm2, %v184_v23 }
  0xde   :  { %7951 = vmatmul.mubr.msk.f32.vlgmr.msra.gmra.mrb[0].mxu1 %vm198_vm2, %v185_v25  ;;  %v187_v31 = vmax.f32 %v161_v26, 0.0 }
  0xdf   :  { %v186_v29 = vmax.f32 %v156_v28, 0.0  ;;  %7983 = vmatpush3.msk.msra.mxu1 %vm75_vm0, %v8978_v0  ;;  %v7942_v30 = vpop.f32.mrb[4].mxu0 }
  0xe0   :  { %v171_v32 = vadd.f32 %v7942_v30, %v9052_v18  ;;  %v165_v33 = vpop.f32.mrb[5].mxu0  ;;  %8749 = vmatprep.subr.bf16.mxu1 %v9037_v15 }
  0xe1   :  { %v166_v34 = vadd.f32 %v9052_v18, %v165_v33  ;;  %7953 = vmatprep.mubr.msk.f32.mxu1 %vm198_vm2, %v186_v29 }
  0xe2   :  { %7954 = vmatmul.mubr.msk.f32.gmra.mrb[2].mxu1 %vm198_vm2, %v187_v31  ;;  %v189_v37 = vmax.f32 %v171_v32, 0.0 }
  0xe3   :  { %v188_v35 = vmax.f32 %v166_v34, 0.0  ;;  %v7945_v36 = vpop.f32.mrb[6].mxu0 }
  0xe4   :  { %v181_v38 = vadd.f32 %v7945_v36, %v9052_v18  ;;  %v175_v39 = vpop.f32.mrb[7].mxu0 }
  0xe5   :  { %v176_v40 = vadd.f32 %v9052_v18, %v175_v39  ;;  %7956 = vmatprep.mubr.msk.f32.mxu1 %vm198_vm2, %v188_v35 }
  0xe6   :  { %7957 = vmatmul.mubr.msk.f32.gmra.mrb[4].mxu1 %vm198_vm2, %v189_v37  ;;  %v191_v42 = vmax.f32 %v181_v38, 0.0 }
  0xe7   :  { %v190_v41 = vmax.f32 %v176_v40, 0.0 }
  0xe9   :  { %7959 = vmatprep.mubr.msk.f32.mxu1 %vm198_vm2, %v190_v41  ;;  %v6974_v41 = vld [vmem:[%s10749_s0 + $0x80] sm:$0xff] }
  0xea   :  { %7960 = vmatmul.mubr.msk.f32.gmra.mrb[6].mxu1 %vm198_vm2, %v191_v42  ;;  %v6975_v42 = vld [vmem:[%s10749_s0 + $0x88] sm:$0xff] }
  0xeb   :  { %7984 = vmatprep.mubr.msk.f32.mxu1 %vm50_vm1, %v6941_v43  ;;  %v6976_v43 = vld [vmem:[%s10749_s0 + $0x90] sm:$0xff] }
  0xee   :  { %7985 = vmatmul.mubr.msk.f32.vlgmr.msra.gmra.mrb[8].mxu1 %vm50_vm1, %v6942_v44  ;;  %v6977_v44 = vld [vmem:[%s10749_s0 + $0x98] sm:$0xff] }
  0xef   :  { %7987 = vmatprep.mubr.msk.f32.mxu1 %vm50_vm1, %v6943_v45  ;;  %8751 = vmatpush3.bf16.msra.mxu1 %v9037_v15  ;;  %v6978_v45 = vld [vmem:[%s10749_s0 + $0xa0] sm:$0xff] }
  0xf0   :  { %8753 = vmatprep.subr.bf16.mxu1 %v9042_v17 }
  0xf2   :  { %7988 = vmatmul.mubr.msk.f32.gmra.mrb[10].mxu1 %vm50_vm1, %v6944_v46  ;;  %v6979_v46 = vld [vmem:[%s10749_s0 + $0xa8] sm:$0xff] }
  0xf3   :  { %7990 = vmatprep.mubr.msk.f32.mxu1 %vm50_vm1, %v6945_v47  ;;  %8755 = vmatpush3.bf16.msra.mxu1 %v9042_v17  ;;  %v6980_v47 = vld [vmem:[%s10749_s0 + $0xb0] sm:$0xff] }
  0xf4   :  { %8757 = vmatprep.subr.bf16.mxu1 %v9022_v11 }
  0xf6   :  { %7991 = vmatmul.mubr.msk.f32.gmra.mrb[12].mxu1 %vm50_vm1, %v6946_v48  ;;  %v6981_v48 = vld [vmem:[%s10749_s0 + $0xb8] sm:$0xff] }
  0xf7   :  { %7993 = vmatprep.mubr.msk.f32.mxu1 %vm50_vm1, %v6947_v49 }
  0xfa   :  { %7994 = vmatmul.mubr.msk.f32.gmra.mrb[14].mxu1 %vm50_vm1, %v6948_v50 }
 0x1b1   :  { %v7952_v52 = vpop.f32.mrb[0].mxu1 }
 0x1b2   :  { %v295_v53 = vadd.f32 %v7952_v52, %v9112_v51  ;;  %v289_v54 = vpop.f32.mrb[1].mxu1 }
 0x1b3   :  { %v290_v55 = vadd.f32 %v9112_v51, %v289_v54 }
 0x1b4   :  { %v329_v58 = vmax.f32 %v295_v53, 0.0 }
 0x1b5   :  { %v328_v56 = vmax.f32 %v290_v55, 0.0  ;;  %v7955_v57 = vpop.f32.mrb[2].mxu1 }
 0x1b6   :  { %v305_v59 = vadd.f32 %v7955_v57, %v9112_v51  ;;  %v299_v60 = vpop.f32.mrb[3].mxu1 }
 0x1b7   :  { %v300_v61 = vadd.f32 %v9112_v51, %v299_v60  ;;  %7970 = vmatprep.mubr.msk.f32.mxu0 %vm342_vm3, %v328_v56 }
 0x1b8   :  { %7971 = vmatmul.mubr.msk.f32.vlgmr.msra.gmra.mrb[8].mxu0 %vm342_vm3, %v329_v58  ;;  %v331_v1 = vmax.f32 %v305_v59, 0.0 }
 0x1b9   :  { %v330_v62 = vmax.f32 %v300_v61, 0.0  ;;  %8747 = vmatpush3.bf16.msra.mxu0 %v9022_v11  ;;  %v7958_v63 = vpop.f32.mrb[4].mxu1 }
 0x1ba   :  { %v315_v2 = vadd.f32 %v7958_v63, %v9112_v51  ;;  %v309_v3 = vpop.f32.mrb[5].mxu1  ;;  %8032 = vmatprep.subr.msk.mxu0 %vm75_vm0, %v8978_v0 }
 0x1bb   :  { %v310_v4 = vadd.f32 %v9112_v51, %v309_v3  ;;  %7973 = vmatprep.mubr.msk.f32.mxu0 %vm342_vm3, %v330_v62 }
 0x1bc   :  { %7974 = vmatmul.mubr.msk.f32.gmra.mrb[10].mxu0 %vm342_vm3, %v331_v1  ;;  %v333_v7 = vmax.f32 %v315_v2, 0.0 }
 0x1bd   :  { %v332_v5 = vmax.f32 %v310_v4, 0.0  ;;  %v7961_v6 = vpop.f32.mrb[6].mxu1 }
 0x1be   :  { %v325_v8 = vadd.f32 %v7961_v6, %v9112_v51  ;;  %v319_v9 = vpop.f32.mrb[7].mxu1 }
 0x1bf   :  { %v320_v10 = vadd.f32 %v9112_v51, %v319_v9  ;;  %7976 = vmatprep.mubr.msk.f32.mxu0 %vm342_vm3, %v332_v5 }
 0x1c0   :  { %7977 = vmatmul.mubr.msk.f32.gmra.mrb[12].mxu0 %vm342_vm3, %v333_v7  ;;  %v335_v14 = vmax.f32 %v325_v8, 0.0 }
 0x1c1   :  { %v334_v12 = vmax.f32 %v320_v10, 0.0  ;;  %v7986_v13 = vpop.f32.mrb[8].mxu1 }
 0x1c2   :  { %v585_v16 = vadd.f32 %v7986_v13, %v9052_v18  ;;  %v579_v19 = vpop.f32.mrb[9].mxu1 }
 0x1c3   :  { %v580_v20 = vadd.f32 %v9052_v18, %v579_v19  ;;  %7979 = vmatprep.mubr.msk.f32.mxu0 %vm342_vm3, %v334_v12 }
 0x1c4   :  { %7980 = vmatmul.mubr.msk.f32.gmra.mrb[14].mxu0 %vm342_vm3, %v335_v14  ;;  %v619_v23 = vmax.f32 %v585_v16, 0.0 }
 0x1c5   :  { %v618_v21 = vmax.f32 %v580_v20, 0.0  ;;  %v7989_v22 = vpop.f32.mrb[10].mxu1 }
 0x1c6   :  { %v595_v24 = vadd.f32 %v7989_v22, %v9052_v18  ;;  %v589_v25 = vpop.f32.mrb[11].mxu1 }
 0x1c7   :  { %v590_v26 = vadd.f32 %v9052_v18, %v589_v25  ;;  %8000 = vmatprep.mubr.msk.f32.mxu0 %vm198_vm2, %v618_v21 }
 0x1c8   :  { %8001 = vmatmul.mubr.msk.f32.vlgmr.msra.gmra.mrb[16].mxu0 %vm198_vm2, %v619_v23  ;;  %v621_v29 = vmax.f32 %v595_v24, 0.0 }
 0x1c9   :  { %v620_v27 = vmax.f32 %v590_v26, 0.0  ;;  %8033 = vmatpush3.msk.msra.mxu0 %vm75_vm0, %v8978_v0  ;;  %v7992_v28 = vpop.f32.mrb[12].mxu1 }
 0x1ca   :  { %v605_v30 = vadd.f32 %v7992_v28, %v9052_v18  ;;  %v599_v31 = vpop.f32.mrb[13].mxu1  ;;  %8761 = vmatprep.subr.bf16.mxu0 %v9037_v15 }
 0x1cb   :  { %v600_v32 = vadd.f32 %v9052_v18, %v599_v31  ;;  %8003 = vmatprep.mubr.msk.f32.mxu0 %vm198_vm2, %v620_v27 }
 0x1cc   :  { %8004 = vmatmul.mubr.msk.f32.gmra.mrb[18].mxu0 %vm198_vm2, %v621_v29  ;;  %v623_v35 = vmax.f32 %v605_v30, 0.0 }
 0x1cd   :  { %v622_v33 = vmax.f32 %v600_v32, 0.0  ;;  %v7995_v34 = vpop.f32.mrb[14].mxu1 }
 0x1ce   :  { %v615_v36 = vadd.f32 %v7995_v34, %v9052_v18  ;;  %v609_v37 = vpop.f32.mrb[15].mxu1 }
 0x1cf   :  { %v610_v38 = vadd.f32 %v9052_v18, %v609_v37  ;;  %8006 = vmatprep.mubr.msk.f32.mxu0 %vm198_vm2, %v622_v33 }
 0x1d0   :  { %8007 = vmatmul.mubr.msk.f32.gmra.mrb[20].mxu0 %vm198_vm2, %v623_v35  ;;  %v625_v40 = vmax.f32 %v615_v36, 0.0 }
 0x1d1   :  { %v624_v39 = vmax.f32 %v610_v38, 0.0 }
 0x1d3   :  { %8009 = vmatprep.mubr.msk.f32.mxu0 %vm198_vm2, %v624_v39 }
 0x1d4   :  { %8010 = vmatmul.mubr.msk.f32.gmra.mrb[22].mxu0 %vm198_vm2, %v625_v40 }
 0x1d5   :  { %8034 = vmatprep.mubr.msk.f32.mxu0 %vm50_vm1, %v6974_v41 }
 0x1d8   :  { %8035 = vmatmul.mubr.msk.f32.vlgmr.msra.gmra.mrb[24].mxu0 %vm50_vm1, %v6975_v42 }
 0x1d9   :  { %8037 = vmatprep.mubr.msk.f32.mxu0 %vm50_vm1, %v6976_v43  ;;  %8763 = vmatpush3.bf16.msra.mxu0 %v9037_v15 }
 0x1da   :  { %8765 = vmatprep.subr.bf16.mxu0 %v9042_v17 }
 0x1dc   :  { %8038 = vmatmul.mubr.msk.f32.gmra.mrb[26].mxu0 %vm50_vm1, %v6977_v44 }
 0x1dd   :  { %8040 = vmatprep.mubr.msk.f32.mxu0 %vm50_vm1, %v6978_v45  ;;  %8767 = vmatpush3.bf16.msra.mxu0 %v9042_v17 }
 0x1de   :  { %8769 = vmatprep.subr.bf16.mxu0 %v9022_v11 }
 0x1e0   :  { %8041 = vmatmul.mubr.msk.f32.gmra.mrb[28].mxu0 %vm50_vm1, %v6979_v46 }
 0x1e1   :  { %8043 = vmatprep.mubr.msk.f32.mxu0 %vm50_vm1, %v6980_v47  ;;  %v7007_v47 = vld [vmem:[%s10749_s0 + $0xc0] sm:$0xff] }
 0x1e4   :  { %8044 = vmatmul.mubr.msk.f32.gmra.mrb[30].mxu0 %vm50_vm1, %v6981_v48  ;;  %v7008_v48 = vld [vmem:[%s10749_s0 + $0xc8] sm:$0xff] }
 0x28b   :  { %v9188_v49 = vpop.f32.mrb[8].mxu0 }
 0x28c   :  { %v9190_v50 = vpop.f32.mrb[9].mxu0 }
 0x28f   :  { %v9192_v52 = vpop.f32.mrb[10].mxu0 }
 0x290   :  { %v9194_v53 = vpop.f32.mrb[11].mxu0 }
 0x293   :  { %v9196_v54 = vpop.f32.mrb[12].mxu0 }
 0x294   :  { %v9198_v55 = vpop.f32.mrb[13].mxu0 }
 0x297   :  { %v9200_v56 = vpop.f32.mrb[14].mxu0 }
 0x298   :  { %v9202_v57 = vpop.f32.mrb[15].mxu0 }
 0x29b   :  { %v8002_v58 = vpop.f32.mrb[16].mxu0 }
 0x29c   :  { %v722_v59 = vadd.f32 %v8002_v58, %v9112_v51  ;;  %v716_v60 = vpop.f32.mrb[17].mxu0  ;;  %v7009_v58 = vld [vmem:[%s10749_s0 + $0xd0] sm:$0xff] }
 0x29d   :  { %v717_v61 = vadd.f32 %v9112_v51, %v716_v60  ;;  %v7011_v60 = vld [vmem:[%s10749_s0 + $0xe0] sm:$0xff] }
 0x29e   :  { %v756_v1 = vmax.f32 %v722_v59, 0.0  ;;  %v7010_v59 = vld [vmem:[%s10749_s0 + $0xd8] sm:$0xff] }
 0x29f   :  { %v755_v62 = vmax.f32 %v717_v61, 0.0  ;;  %v8005_v63 = vpop.f32.mrb[18].mxu0  ;;  %v7012_v61 = vld [vmem:[%s10749_s0 + $0xe8] sm:$0xff] }
 0x2a0   :  { %v732_v2 = vadd.f32 %v8005_v63, %v9112_v51  ;;  %v726_v3 = vpop.f32.mrb[19].mxu0  ;;  %v7014_v63 = vld [vmem:[%s10749_s0 + $0xf8] sm:$0xff] }
 0x2a1   :  { %v727_v4 = vadd.f32 %v9112_v51, %v726_v3  ;;  %8020 = vmatprep.mubr.msk.f32.mxu1 %vm342_vm3, %v755_v62  ;;  %v7013_v62 = vld [vmem:[%s10749_s0 + $0xf0] sm:$0xff] }
 0x2a2   :  { %8021 = vmatmul.mubr.msk.f32.vlgmr.msra.gmra.mrb[16].mxu1 %vm342_vm3, %v756_v1  ;;  %v758_v7 = vmax.f32 %v732_v2, 0.0  ;;  %v9281_v1 = vld [vmem:[%s10754_s6] ss:$0 sm:$0xff] }
 0x2a3   :  { %v757_v5 = vmax.f32 %v727_v4, 0.0  ;;  %8759 = vmatpush3.bf16.msra.mxu1 %v9022_v11  ;;  %v8008_v6 = vpop.f32.mrb[20].mxu0  ;;  %v439_v2 = vadd.f32 %v9188_v49, %v9281_v1  ;;  %v434_v3 = vadd.f32 %v9281_v1, %v9190_v50 }
 0x2a4   :  { %v742_v8 = vadd.f32 %v8008_v6, %v9112_v51  ;;  %v736_v9 = vpop.f32.mrb[21].mxu0  ;;  %8082 = vmatprep.subr.msk.mxu1 %vm75_vm0, %v8978_v0 }
 0x2a5   :  { %v737_v10 = vadd.f32 %v9112_v51, %v736_v9  ;;  %8023 = vmatprep.mubr.msk.f32.mxu1 %vm342_vm3, %v757_v5  ;;  %v449_v9 = vadd.f32 %v9192_v52, %v9281_v1  ;;  %v459_v52 = vadd.f32 %v9196_v54, %v9281_v1  ;;  %v469_v54 = vadd.f32 %v9200_v56, %v9281_v1 }
 0x2a6   :  { %8024 = vmatmul.mubr.msk.f32.gmra.mrb[18].mxu1 %vm342_vm3, %v758_v7  ;;  %v760_v14 = vmax.f32 %v742_v8, 0.0  ;;  %v473_v8 = vmax.f32 %v439_v2, 0.0 }
 0x2a7   :  { %v759_v12 = vmax.f32 %v737_v10, 0.0  ;;  %v8011_v13 = vpop.f32.mrb[22].mxu0 }
 0x2a8   :  { %v752_v16 = vadd.f32 %v8011_v13, %v9112_v51  ;;  %v746_v19 = vpop.f32.mrb[23].mxu0  ;;  %v444_v13 = vadd.f32 %v9281_v1, %v9194_v53  ;;  %v454_v53 = vadd.f32 %v9281_v1, %v9198_v55  ;;  %v464_v55 = vadd.f32 %v9281_v1, %v9202_v57 }
 0x2a9   :  { %v747_v20 = vadd.f32 %v9112_v51, %v746_v19  ;;  %8026 = vmatprep.mubr.msk.f32.mxu1 %vm342_vm3, %v759_v12  ;;  %v472_v12 = vmax.f32 %v434_v3, 0.0 }
 0x2aa   :  { %8027 = vmatmul.mubr.msk.f32.gmra.mrb[20].mxu1 %vm342_vm3, %v760_v14  ;;  %v762_v23 = vmax.f32 %v752_v16, 0.0 }
 0x2ab   :  { %v761_v21 = vmax.f32 %v747_v20, 0.0  ;;  %v8036_v22 = vpop.f32.mrb[24].mxu0 }
 0x2ac   :  { %v1013_v24 = vadd.f32 %v8036_v22, %v9052_v18  ;;  %v1007_v25 = vpop.f32.mrb[25].mxu0  ;;  %v475_v22 = vmax.f32 %v449_v9, 0.0 }
 0x2ad   :  { %v1008_v26 = vadd.f32 %v9052_v18, %v1007_v25  ;;  %8029 = vmatprep.mubr.msk.f32.mxu1 %vm342_vm3, %v761_v21 }
 0x2ae   :  { %8030 = vmatmul.mubr.msk.f32.gmra.mrb[22].mxu1 %vm342_vm3, %v762_v23  ;;  %v1047_v29 = vmax.f32 %v1013_v24, 0.0  ;;  %v474_v24 = vmax.f32 %v444_v13, 0.0 }
 0x2af   :  { %v1046_v27 = vmax.f32 %v1008_v26, 0.0  ;;  %v8039_v28 = vpop.f32.mrb[26].mxu0 }
 0x2b0   :  { %v1023_v30 = vadd.f32 %v8039_v28, %v9052_v18  ;;  %v1017_v31 = vpop.f32.mrb[27].mxu0 }
 0x2b1   :  { %v1018_v32 = vadd.f32 %v9052_v18, %v1017_v31  ;;  %8050 = vmatprep.mubr.msk.f32.mxu1 %vm198_vm2, %v1046_v27 }
 0x2b2   :  { %8051 = vmatmul.mubr.msk.f32.vlgmr.msra.gmra.mrb[24].mxu1 %vm198_vm2, %v1047_v29  ;;  %v1049_v35 = vmax.f32 %v1023_v30, 0.0 }
 0x2b3   :  { %v1048_v33 = vmax.f32 %v1018_v32, 0.0  ;;  %8083 = vmatpush3.msk.msra.mxu1 %vm75_vm0, %v8978_v0  ;;  %v8042_v34 = vpop.f32.mrb[28].mxu0  ;;  %v477_v32 = vmax.f32 %v459_v52, 0.0 }
 0x2b4   :  { %v1033_v36 = vadd.f32 %v8042_v34, %v9052_v18  ;;  %v1027_v37 = vpop.f32.mrb[29].mxu0  ;;  %8773 = vmatprep.subr.bf16.mxu1 %v9037_v15  ;;  %v476_v34 = vmax.f32 %v454_v53, 0.0 }
 0x2b5   :  { %v1028_v38 = vadd.f32 %v9052_v18, %v1027_v37  ;;  %8053 = vmatprep.mubr.msk.f32.mxu1 %vm198_vm2, %v1048_v33 }
 0x2b6   :  { %8054 = vmatmul.mubr.msk.f32.gmra.mrb[26].mxu1 %vm198_vm2, %v1049_v35  ;;  %v1051_v41 = vmax.f32 %v1033_v36, 0.0 }
 0x2b7   :  { %v1050_v39 = vmax.f32 %v1028_v38, 0.0  ;;  %v8045_v40 = vpop.f32.mrb[30].mxu0 }
 0x2b8   :  { %v1043_v42 = vadd.f32 %v8045_v40, %v9052_v18  ;;  %v1037_v43 = vpop.f32.mrb[31].mxu0 }
 0x2b9   :  { %v1038_v44 = vadd.f32 %v9052_v18, %v1037_v43  ;;  %8056 = vmatprep.mubr.msk.f32.mxu1 %vm198_vm2, %v1050_v39 }
 0x2ba   :  { %8057 = vmatmul.mubr.msk.f32.gmra.mrb[28].mxu1 %vm198_vm2, %v1051_v41  ;;  %v1053_v46 = vmax.f32 %v1043_v42, 0.0  ;;  %v479_v42 = vmax.f32 %v469_v54, 0.0 }
 0x2bb   :  { %v1052_v45 = vmax.f32 %v1038_v44, 0.0  ;;  %v478_v44 = vmax.f32 %v464_v55, 0.0 }
 0x2bd   :  { %8059 = vmatprep.mubr.msk.f32.mxu1 %vm198_vm2, %v1052_v45 }
 0x2be   :  { %8060 = vmatmul.mubr.msk.f32.gmra.mrb[30].mxu1 %vm198_vm2, %v1053_v46 }
 0x2bf   :  { %8084 = vmatprep.mubr.msk.f32.mxu1 %vm50_vm1, %v7007_v47 }
 0x2c2   :  { %8085 = vmatmul.mubr.msk.f32.vlgmr.msra.gmra.mrb[32].mxu1 %vm50_vm1, %v7008_v48 }
 0x2c3   :  { %8087 = vmatprep.mubr.msk.f32.mxu1 %vm50_vm1, %v7009_v58  ;;  %8775 = vmatpush3.bf16.msra.mxu1 %v9037_v15 }
 0x2c4   :  { %8777 = vmatprep.subr.bf16.mxu1 %v9042_v17 }
 0x2c6   :  { %8088 = vmatmul.mubr.msk.f32.gmra.mrb[34].mxu1 %vm50_vm1, %v7010_v59 }
 0x2c7   :  { %8090 = vmatprep.mubr.msk.f32.mxu1 %vm50_vm1, %v7011_v60  ;;  %8779 = vmatpush3.bf16.msra.mxu1 %v9042_v17 }
 0x2c8   :  { %8781 = vmatprep.subr.bf16.mxu1 %v9022_v11 }
 0x2ca   :  { %8091 = vmatmul.mubr.msk.f32.gmra.mrb[36].mxu1 %vm50_vm1, %v7012_v61 }
 0x2cb   :  { %8093 = vmatprep.mubr.msk.f32.mxu1 %vm50_vm1, %v7013_v62 }
 0x2ce   :  { %8094 = vmatmul.mubr.msk.f32.gmra.mrb[38].mxu1 %vm50_vm1, %v7014_v63 }
 0x375   :  { %v8022_v4 = vpop.f32.mrb[16].mxu1 }
 0x376   :  { %v859_v5 = vadd.f32 %v8022_v4, %v9281_v1  ;;  %v853_v6 = vpop.f32.mrb[17].mxu1 }
 0x377   :  { %v854_v7 = vadd.f32 %v9281_v1, %v853_v6 }
 0x378   :  { %v893_v10 = vmax.f32 %v859_v5, 0.0 }
 0x379   :  { %v892_v14 = vmax.f32 %v854_v7, 0.0  ;;  %v8025_v49 = vpop.f32.mrb[18].mxu1 }
 0x37a   :  { %v9293_v16 = vmax.f32 %v473_v8, %v893_v10  ;;  %v869_v50 = vadd.f32 %v8025_v49, %v9281_v1  ;;  %v863_v19 = vpop.f32.mrb[19].mxu1 }
 0x37b   :  { %v9296_v20 = vmax.f32 %v472_v12, %v892_v14  ;;  %v864_v21 = vadd.f32 %v9281_v1, %v863_v19 }
 0x37c   :  { %v895_v23 = vmax.f32 %v869_v50, 0.0 }
 0x37d   :  { %v894_v25 = vmax.f32 %v864_v21, 0.0  ;;  %v8028_v26 = vpop.f32.mrb[20].mxu1 }
 0x37e   :  { %v9303_v27 = vmax.f32 %v475_v22, %v895_v23  ;;  %v879_v28 = vadd.f32 %v8028_v26, %v9281_v1  ;;  %v873_v29 = vpop.f32.mrb[21].mxu1 }
 0x37f   :  { %v9306_v30 = vmax.f32 %v474_v24, %v894_v25  ;;  %v874_v31 = vadd.f32 %v9281_v1, %v873_v29 }
 0x380   :  { %v897_v33 = vmax.f32 %v879_v28, 0.0 }
 0x381   :  { %v896_v35 = vmax.f32 %v874_v31, 0.0  ;;  %v8031_v36 = vpop.f32.mrb[22].mxu1 }
 0x382   :  { %v9313_v37 = vmax.f32 %v477_v32, %v897_v33  ;;  %v889_v38 = vadd.f32 %v8031_v36, %v9281_v1  ;;  %v883_v39 = vpop.f32.mrb[23].mxu1 }
 0x383   :  { %v9316_v40 = vmax.f32 %v476_v34, %v896_v35  ;;  %v884_v41 = vadd.f32 %v9281_v1, %v883_v39 }
 0x384   :  { %v899_v43 = vmax.f32 %v889_v38, 0.0 }
 0x385   :  { %v898_v56 = vmax.f32 %v884_v41, 0.0  ;;  %v8052_v45 = vpop.f32.mrb[24].mxu1 }
 0x386   :  { %v9319_v46 = vmax.f32 %v479_v42, %v899_v43  ;;  %v1150_v57 = vadd.f32 %v8052_v45, %v9112_v51  ;;  %v1144_v47 = vpop.f32.mrb[25].mxu1  ;;  %v7041_v45 = vld [vmem:[%s10749_s0 + $0x108] sm:$0xff] }
 0x387   :  { %v9322_v48 = vmax.f32 %v478_v44, %v898_v56  ;;  %v1145_v58 = vadd.f32 %v9112_v51, %v1144_v47  ;;  %v7040_v56 = vld [vmem:[%s10749_s0 + $0x100] sm:$0xff]  ;;  %v7043_v47 = vld [vmem:[%s10749_s0 + $0x118] sm:$0xff] }
 0x388   :  { %v1184_v61 = vmax.f32 %v1150_v57, 0.0  ;;  %v7042_v57 = vld [vmem:[%s10749_s0 + $0x110] sm:$0xff] }
 0x389   :  { %v1183_v59 = vmax.f32 %v1145_v58, 0.0  ;;  %v8055_v60 = vpop.f32.mrb[26].mxu1  ;;  %v7044_v58 = vld [vmem:[%s10749_s0 + $0x120] sm:$0xff] }
 0x38a   :  { %v1160_v62 = vadd.f32 %v8055_v60, %v9112_v51  ;;  %v1154_v63 = vpop.f32.mrb[27].mxu1  ;;  %v7046_v60 = vld [vmem:[%s10749_s0 + $0x130] sm:$0xff] }
 0x38b   :  { %v1155_v2 = vadd.f32 %v9112_v51, %v1154_v63  ;;  %8070 = vmatprep.mubr.msk.f32.mxu0 %vm342_vm3, %v1183_v59  ;;  %v7045_v59 = vld [vmem:[%s10749_s0 + $0x128] sm:$0xff] }
 0x38c   :  { %8071 = vmatmul.mubr.msk.f32.vlgmr.msra.gmra.mrb[32].mxu0 %vm342_vm3, %v1184_v61  ;;  %v1186_v5 = vmax.f32 %v1160_v62, 0.0  ;;  %v7047_v61 = vld [vmem:[%s10749_s0 + $0x138] sm:$0xff] }
 0x38d   :  { %v1185_v3 = vmax.f32 %v1155_v2, 0.0  ;;  %8771 = vmatpush3.bf16.msra.mxu0 %v9022_v11  ;;  %v8058_v4 = vpop.f32.mrb[28].mxu1 }
 0x38e   :  { %v1170_v6 = vadd.f32 %v8058_v4, %v9112_v51  ;;  %v1164_v7 = vpop.f32.mrb[29].mxu1  ;;  %8132 = vmatprep.subr.msk.mxu0 %vm75_vm0, %v8978_v0 }
 0x38f   :  { %v1165_v8 = vadd.f32 %v9112_v51, %v1164_v7  ;;  %8073 = vmatprep.mubr.msk.f32.mxu0 %vm342_vm3, %v1185_v3 }
 0x390   :  { %8074 = vmatmul.mubr.msk.f32.gmra.mrb[34].mxu0 %vm342_vm3, %v1186_v5  ;;  %v1188_v12 = vmax.f32 %v1170_v6, 0.0 }
 0x391   :  { %v1187_v9 = vmax.f32 %v1165_v8, 0.0  ;;  %v8061_v10 = vpop.f32.mrb[30].mxu1 }
 0x392   :  { %v1180_v13 = vadd.f32 %v8061_v10, %v9112_v51  ;;  %v1174_v14 = vpop.f32.mrb[31].mxu1 }
 0x393   :  { %v1175_v49 = vadd.f32 %v9112_v51, %v1174_v14  ;;  %8076 = vmatprep.mubr.msk.f32.mxu0 %vm342_vm3, %v1187_v9 }
 0x394   :  { %8077 = vmatmul.mubr.msk.f32.gmra.mrb[36].mxu0 %vm342_vm3, %v1188_v12  ;;  %v1190_v21 = vmax.f32 %v1180_v13, 0.0 }
 0x395   :  { %v1189_v50 = vmax.f32 %v1175_v49, 0.0  ;;  %v8086_v19 = vpop.f32.mrb[32].mxu1 }
 0x396   :  { %v1441_v22 = vadd.f32 %v8086_v19, %v9052_v18  ;;  %v1435_v52 = vpop.f32.mrb[33].mxu1 }
 0x397   :  { %v1436_v23 = vadd.f32 %v9052_v18, %v1435_v52  ;;  %8079 = vmatprep.mubr.msk.f32.mxu0 %vm342_vm3, %v1189_v50 }
 0x398   :  { %8080 = vmatmul.mubr.msk.f32.gmra.mrb[38].mxu0 %vm342_vm3, %v1190_v21  ;;  %v1475_v25 = vmax.f32 %v1441_v22, 0.0 }
 0x399   :  { %v1474_v24 = vmax.f32 %v1436_v23, 0.0  ;;  %v8089_v53 = vpop.f32.mrb[34].mxu1 }
 0x39a   :  { %v1451_v26 = vadd.f32 %v8089_v53, %v9052_v18  ;;  %v1445_v28 = vpop.f32.mrb[35].mxu1 }
 0x39b   :  { %v1446_v29 = vadd.f32 %v9052_v18, %v1445_v28  ;;  %8100 = vmatprep.mubr.msk.f32.mxu0 %vm198_vm2, %v1474_v24 }
 0x39c   :  { %8101 = vmatmul.mubr.msk.f32.vlgmr.msra.gmra.mrb[40].mxu0 %vm198_vm2, %v1475_v25  ;;  %v1477_v54 = vmax.f32 %v1451_v26, 0.0 }
 0x39d   :  { %v1476_v31 = vmax.f32 %v1446_v29, 0.0  ;;  %8133 = vmatpush3.msk.msra.mxu0 %vm75_vm0, %v8978_v0  ;;  %v8092_v32 = vpop.f32.mrb[36].mxu1 }
 0x39e   :  { %v1461_v33 = vadd.f32 %v8092_v32, %v9052_v18  ;;  %v1455_v34 = vpop.f32.mrb[37].mxu1  ;;  %8785 = vmatprep.subr.bf16.mxu0 %v9037_v15 }
 0x39f   :  { %v1456_v55 = vadd.f32 %v9052_v18, %v1455_v34  ;;  %8103 = vmatprep.mubr.msk.f32.mxu0 %vm198_vm2, %v1476_v31 }
 0x3a0   :  { %8104 = vmatmul.mubr.msk.f32.gmra.mrb[42].mxu0 %vm198_vm2, %v1477_v54  ;;  %v1479_v38 = vmax.f32 %v1461_v33, 0.0 }
 0x3a1   :  { %v1478_v35 = vmax.f32 %v1456_v55, 0.0  ;;  %v8095_v36 = vpop.f32.mrb[38].mxu1 }
 0x3a2   :  { %v1471_v39 = vadd.f32 %v8095_v36, %v9052_v18  ;;  %v1465_v41 = vpop.f32.mrb[39].mxu1 }
 0x3a3   :  { %v1466_v42 = vadd.f32 %v9052_v18, %v1465_v41  ;;  %8106 = vmatprep.mubr.msk.f32.mxu0 %vm198_vm2, %v1478_v35 }
 0x3a4   :  { %8107 = vmatmul.mubr.msk.f32.gmra.mrb[44].mxu0 %vm198_vm2, %v1479_v38  ;;  %v1481_v44 = vmax.f32 %v1471_v39, 0.0 }
 0x3a5   :  { %v1480_v43 = vmax.f32 %v1466_v42, 0.0 }
 0x3a7   :  { %8109 = vmatprep.mubr.msk.f32.mxu0 %vm198_vm2, %v1480_v43 }
 0x3a8   :  { %8110 = vmatmul.mubr.msk.f32.gmra.mrb[46].mxu0 %vm198_vm2, %v1481_v44 }
 0x3a9   :  { %8134 = vmatprep.mubr.msk.f32.mxu0 %vm50_vm1, %v7040_v56 }
 0x3ac   :  { %8135 = vmatmul.mubr.msk.f32.vlgmr.msra.gmra.mrb[48].mxu0 %vm50_vm1, %v7041_v45 }
 0x3ad   :  { %8137 = vmatprep.mubr.msk.f32.mxu0 %vm50_vm1, %v7042_v57  ;;  %8787 = vmatpush3.bf16.msra.mxu0 %v9037_v15 }
 0x3ae   :  { %8789 = vmatprep.subr.bf16.mxu0 %v9042_v17 }
 0x3b0   :  { %8138 = vmatmul.mubr.msk.f32.gmra.mrb[50].mxu0 %vm50_vm1, %v7043_v47 }
 0x3b1   :  { %8140 = vmatprep.mubr.msk.f32.mxu0 %vm50_vm1, %v7044_v58  ;;  %8791 = vmatpush3.bf16.msra.mxu0 %v9042_v17 }
 0x3b2   :  { %8793 = vmatprep.subr.bf16.mxu0 %v9022_v11 }
 0x3b4   :  { %8141 = vmatmul.mubr.msk.f32.gmra.mrb[52].mxu0 %vm50_vm1, %v7045_v59 }
 0x3b5   :  { %8143 = vmatprep.mubr.msk.f32.mxu0 %vm50_vm1, %v7046_v60 }
 0x3b8   :  { %8144 = vmatmul.mubr.msk.f32.gmra.mrb[54].mxu0 %vm50_vm1, %v7047_v61 }
 0x45f   :  { %v8072_v62 = vpop.f32.mrb[32].mxu0 }
 0x460   :  { %v1287_v63 = vadd.f32 %v8072_v62, %v9281_v1  ;;  %v1281_v2 = vpop.f32.mrb[33].mxu0 }
 0x461   :  { %v1282_v3 = vadd.f32 %v9281_v1, %v1281_v2 }
 0x462   :  { %v1321_v4 = vmax.f32 %v1287_v63, 0.0 }
 0x463   :  { %v1320_v5 = vmax.f32 %v1282_v3, 0.0  ;;  %v8075_v6 = vpop.f32.mrb[34].mxu0 }
 0x464   :  { %v9400_v7 = vmax.f32 %v9293_v16, %v1321_v4  ;;  %v1297_v8 = vadd.f32 %v8075_v6, %v9281_v1  ;;  %v1291_v9 = vpop.f32.mrb[35].mxu0 }
 0x465   :  { %v9404_v10 = vmax.f32 %v9296_v20, %v1320_v5  ;;  %v1292_v12 = vadd.f32 %v9281_v1, %v1291_v9 }
 0x466   :  { %v1323_v13 = vmax.f32 %v1297_v8, 0.0 }
 0x467   :  { %v1322_v14 = vmax.f32 %v1292_v12, 0.0  ;;  %v8078_v49 = vpop.f32.mrb[36].mxu0 }
 0x468   :  { %v9408_v50 = vmax.f32 %v9303_v27, %v1323_v13  ;;  %v1307_v19 = vadd.f32 %v8078_v49, %v9281_v1  ;;  %v1301_v21 = vpop.f32.mrb[37].mxu0 }
 0x469   :  { %v9412_v16 = vmax.f32 %v9306_v30, %v1322_v14  ;;  %v1302_v22 = vadd.f32 %v9281_v1, %v1301_v21 }
 0x46a   :  { %v1325_v52 = vmax.f32 %v1307_v19, 0.0 }
 0x46b   :  { %v1324_v23 = vmax.f32 %v1302_v22, 0.0  ;;  %v8081_v20 = vpop.f32.mrb[38].mxu0 }
 0x46c   :  { %v9416_v24 = vmax.f32 %v9313_v37, %v1325_v52  ;;  %v1317_v53 = vadd.f32 %v8081_v20, %v9281_v1  ;;  %v1311_v25 = vpop.f32.mrb[39].mxu0 }
 0x46d   :  { %v9420_v27 = vmax.f32 %v9316_v40, %v1324_v23  ;;  %v1312_v26 = vadd.f32 %v9281_v1, %v1311_v25 }
 0x46e   :  { %v1327_v28 = vmax.f32 %v1317_v53, 0.0 }
 0x46f   :  { %v1326_v29 = vmax.f32 %v1312_v26, 0.0  ;;  %v8102_v30 = vpop.f32.mrb[40].mxu0 }
 0x470   :  { %v9424_v31 = vmax.f32 %v9319_v46, %v1327_v28  ;;  %v1578_v32 = vadd.f32 %v8102_v30, %v9112_v51  ;;  %v1572_v54 = vpop.f32.mrb[41].mxu0  ;;  %v7073_v28 = vld [vmem:[%s10749_s0 + $0x140] sm:$0xff]  ;;  %v7076_v30 = vld [vmem:[%s10749_s0 + $0x158] sm:$0xff] }
 0x471   :  { %v9428_v37 = vmax.f32 %v9322_v48, %v1326_v29  ;;  %v1573_v33 = vadd.f32 %v9112_v51, %v1572_v54  ;;  %v7075_v29 = vld [vmem:[%s10749_s0 + $0x150] sm:$0xff]  ;;  %v7078_v54 = vld [vmem:[%s10749_s0 + $0x168] sm:$0xff] }
 0x472   :  { %v1612_v40 = vmax.f32 %v1578_v32, 0.0  ;;  %v7077_v32 = vld [vmem:[%s10749_s0 + $0x160] sm:$0xff] }
 0x473   :  { %v1611_v34 = vmax.f32 %v1573_v33, 0.0  ;;  %v8105_v55 = vpop.f32.mrb[42].mxu0  ;;  %v7079_v33 = vld [vmem:[%s10749_s0 + $0x170] sm:$0xff] }
 0x474   :  { %v1588_v35 = vadd.f32 %v8105_v55, %v9112_v51  ;;  %v1582_v36 = vpop.f32.mrb[43].mxu0 }
 0x475   :  { %v1583_v38 = vadd.f32 %v9112_v51, %v1582_v36  ;;  %8120 = vmatprep.mubr.msk.f32.mxu1 %vm342_vm3, %v1611_v34  ;;  %v7080_v34 = vld [vmem:[%s10749_s0 + $0x178] sm:$0xff] }
 0x476   :  { %8121 = vmatmul.mubr.msk.f32.vlgmr.msra.gmra.mrb[40].mxu1 %vm342_vm3, %v1612_v40  ;;  %v1614_v48 = vmax.f32 %v1588_v35, 0.0 }
 0x477   :  { %v1613_v46 = vmax.f32 %v1583_v38, 0.0  ;;  %8783 = vmatpush3.bf16.msra.mxu1 %v9022_v11  ;;  %v8108_v39 = vpop.f32.mrb[44].mxu0 }
 0x478   :  { %v1598_v41 = vadd.f32 %v8108_v39, %v9112_v51  ;;  %v1592_v42 = vpop.f32.mrb[45].mxu0  ;;  %8182 = vmatprep.subr.msk.mxu1 %vm75_vm0, %v8978_v0 }
 0x479   :  { %v1593_v43 = vadd.f32 %v9112_v51, %v1592_v42  ;;  %8123 = vmatprep.mubr.msk.f32.mxu1 %vm342_vm3, %v1613_v46 }
 0x47a   :  { %8124 = vmatmul.mubr.msk.f32.gmra.mrb[42].mxu1 %vm342_vm3, %v1614_v48  ;;  %v1616_v45 = vmax.f32 %v1598_v41, 0.0 }
 0x47b   :  { %v1615_v44 = vmax.f32 %v1593_v43, 0.0  ;;  %v8111_v56 = vpop.f32.mrb[46].mxu0 }
 0x47c   :  { %v1608_v57 = vadd.f32 %v8111_v56, %v9112_v51  ;;  %v1602_v47 = vpop.f32.mrb[47].mxu0 }
 0x47d   :  { %v1603_v58 = vadd.f32 %v9112_v51, %v1602_v47  ;;  %8126 = vmatprep.mubr.msk.f32.mxu1 %vm342_vm3, %v1615_v44 }
 0x47e   :  { %8127 = vmatmul.mubr.msk.f32.gmra.mrb[44].mxu1 %vm342_vm3, %v1616_v45  ;;  %v1618_v61 = vmax.f32 %v1608_v57, 0.0 }
 0x47f   :  { %v1617_v59 = vmax.f32 %v1603_v58, 0.0  ;;  %v8136_v60 = vpop.f32.mrb[48].mxu0 }
 0x480   :  { %v1869_v62 = vadd.f32 %v8136_v60, %v9052_v18  ;;  %v1863_v63 = vpop.f32.mrb[49].mxu0 }
 0x481   :  { %v1864_v2 = vadd.f32 %v9052_v18, %v1863_v63  ;;  %8129 = vmatprep.mubr.msk.f32.mxu1 %vm342_vm3, %v1617_v59 }
 0x482   :  { %8130 = vmatmul.mubr.msk.f32.gmra.mrb[46].mxu1 %vm342_vm3, %v1618_v61  ;;  %v1903_v5 = vmax.f32 %v1869_v62, 0.0 }
 0x483   :  { %v1902_v3 = vmax.f32 %v1864_v2, 0.0  ;;  %v8139_v4 = vpop.f32.mrb[50].mxu0 }
 0x484   :  { %v1879_v6 = vadd.f32 %v8139_v4, %v9052_v18  ;;  %v1873_v8 = vpop.f32.mrb[51].mxu0 }
 0x485   :  { %v1874_v9 = vadd.f32 %v9052_v18, %v1873_v8  ;;  %8150 = vmatprep.mubr.msk.f32.mxu1 %vm198_vm2, %v1902_v3 }
 0x486   :  { %8151 = vmatmul.mubr.msk.f32.vlgmr.msra.gmra.mrb[48].mxu1 %vm198_vm2, %v1903_v5  ;;  %v1905_v14 = vmax.f32 %v1879_v6, 0.0 }
 0x487   :  { %v1904_v12 = vmax.f32 %v1874_v9, 0.0  ;;  %8183 = vmatpush3.msk.msra.mxu1 %vm75_vm0, %v8978_v0  ;;  %v8142_v13 = vpop.f32.mrb[52].mxu0 }
 0x488   :  { %v1889_v49 = vadd.f32 %v8142_v13, %v9052_v18  ;;  %v1883_v19 = vpop.f32.mrb[53].mxu0  ;;  %8797 = vmatprep.subr.bf16.mxu1 %v9037_v15 }
 0x489   :  { %v1884_v21 = vadd.f32 %v9052_v18, %v1883_v19  ;;  %8153 = vmatprep.mubr.msk.f32.mxu1 %vm198_vm2, %v1904_v12 }
 0x48a   :  { %8154 = vmatmul.mubr.msk.f32.gmra.mrb[50].mxu1 %vm198_vm2, %v1905_v14  ;;  %v1907_v23 = vmax.f32 %v1889_v49, 0.0 }
 0x48b   :  { %v1906_v22 = vmax.f32 %v1884_v21, 0.0  ;;  %v8145_v52 = vpop.f32.mrb[54].mxu0 }
 0x48c   :  { %v1899_v20 = vadd.f32 %v8145_v52, %v9052_v18  ;;  %v1893_v53 = vpop.f32.mrb[55].mxu0 }
 0x48d   :  { %v1894_v0 = vadd.f32 %v9052_v18, %v1893_v53  ;;  %8156 = vmatprep.mubr.msk.f32.mxu1 %vm198_vm2, %v1906_v22  ;;  %v7074_v18 = vld [vmem:[%s10749_s0 + $0x148] sm:$0xff]  ;;  %v9546_v53 = vld [vmem:[%s10748_s1] sm:$0x1f] }
 0x48e   :  { %8157 = vmatmul.mubr.msk.f32.gmra.mrb[52].mxu1 %vm198_vm2, %v1907_v23  ;;  %v1909_v26 = vmax.f32 %v1899_v20, 0.0 }
 0x48f   :  { %v1908_v25 = vmax.f32 %v1894_v0, 0.0 }
 0x491   :  { %8159 = vmatprep.mubr.msk.f32.mxu1 %vm198_vm2, %v1908_v25 }
 0x492   :  { %8160 = vmatmul.mubr.msk.f32.gmra.mrb[54].mxu1 %vm198_vm2, %v1909_v26 }
 0x493   :  { %8184 = vmatprep.mubr.msk.f32.mxu1 %vm50_vm1, %v7073_v28 }
 0x496   :  { %8185 = vmatmul.mubr.msk.f32.vlgmr.msra.gmra.mrb[56].mxu1 %vm50_vm1, %v7074_v18 }
 0x497   :  { %8187 = vmatprep.mubr.msk.f32.mxu1 %vm50_vm1, %v7075_v29  ;;  %8799 = vmatpush3.bf16.msra.mxu1 %v9037_v15 }
 0x498   :  { %8801 = vmatprep.subr.bf16.mxu1 %v9042_v17 }
 0x49a   :  { %8188 = vmatmul.mubr.msk.f32.gmra.mrb[58].mxu1 %vm50_vm1, %v7076_v30 }
 0x49b   :  { %8190 = vmatprep.mubr.msk.f32.mxu1 %vm50_vm1, %v7077_v32  ;;  %8803 = vmatpush3.bf16.msra.mxu1 %v9042_v17 }
 0x49c   :  { %8805 = vmatprep.subr.bf16.mxu1 %v9022_v11 }
 0x49e   :  { %8191 = vmatmul.mubr.msk.f32.gmra.mrb[60].mxu1 %vm50_vm1, %v7078_v54 }
 0x49f   :  { %8193 = vmatprep.mubr.msk.f32.mxu1 %vm50_vm1, %v7079_v33 }
 0x4a2   :  { %8194 = vmatmul.mubr.msk.f32.gmra.mrb[62].mxu1 %vm50_vm1, %v7080_v34  ;;  %v9560_v34 = vld [vmem:[%s10752_s2] ss:$0 sm:$0xff] }
 0x549   :  { %v8122_v55 = vpop.f32.mrb[40].mxu1 }
 0x54a   :  { %v1715_v40 = vadd.f32 %v8122_v55, %v9281_v1  ;;  %v1709_v35 = vpop.f32.mrb[41].mxu1 }
 0x54b   :  { %v1710_v36 = vadd.f32 %v9281_v1, %v1709_v35 }
 0x54c   :  { %v1749_v38 = vmax.f32 %v1715_v40, 0.0 }
 0x54d   :  { %v1748_v46 = vmax.f32 %v1710_v36, 0.0  ;;  %v8125_v39 = vpop.f32.mrb[42].mxu1 }
 0x54e   :  { %v9506_v48 = vmax.f32 %v9400_v7, %v1749_v38  ;;  %v1725_v41 = vadd.f32 %v8125_v39, %v9281_v1  ;;  %v1719_v42 = vpop.f32.mrb[43].mxu1 }
 0x54f   :  { %v9510_v43 = vmax.f32 %v9404_v10, %v1748_v46  ;;  %v1720_v44 = vadd.f32 %v9281_v1, %v1719_v42 }
 0x550   :  { %v1751_v56 = vmax.f32 %v1725_v41, 0.0 }
 0x551   :  { %v1750_v45 = vmax.f32 %v1720_v44, 0.0  ;;  %v8128_v57 = vpop.f32.mrb[44].mxu1 }
 0x552   :  { %v9514_v47 = vmax.f32 %v9408_v50, %v1751_v56  ;;  %v1735_v58 = vadd.f32 %v8128_v57, %v9281_v1  ;;  %v1729_v59 = vpop.f32.mrb[45].mxu1 }
 0x553   :  { %v9518_v7 = vmax.f32 %v9412_v16, %v1750_v45  ;;  %v1730_v60 = vadd.f32 %v9281_v1, %v1729_v59 }
 0x554   :  { %v1753_v61 = vmax.f32 %v1735_v58, 0.0 }
 0x555   :  { %v1752_v62 = vmax.f32 %v1730_v60, 0.0  ;;  %v8131_v10 = vpop.f32.mrb[46].mxu1 }
 0x556   :  { %v9522_v63 = vmax.f32 %v9416_v24, %v1753_v61  ;;  %v1745_v2 = vadd.f32 %v8131_v10, %v9281_v1  ;;  %v1739_v3 = vpop.f32.mrb[47].mxu1 }
 0x557   :  { %v9526_v50 = vmax.f32 %v9420_v27, %v1752_v62  ;;  %v1740_v4 = vadd.f32 %v9281_v1, %v1739_v3 }
 0x558   :  { %v1755_v5 = vmax.f32 %v1745_v2, 0.0 }
 0x559   :  { %v1754_v6 = vmax.f32 %v1740_v4, 0.0  ;;  %v8152_v16 = vpop.f32.mrb[48].mxu1 }
 0x55a   :  { %v9530_v8 = vmax.f32 %v9424_v31, %v1755_v5  ;;  %v2006_v9 = vadd.f32 %v8152_v16, %v9112_v51  ;;  %v2000_v12 = vpop.f32.mrb[49].mxu1  ;;  %v7106_v5 = vld [vmem:[%s10749_s0 + $0x180] sm:$0xff]  ;;  %v7108_v16 = vld [vmem:[%s10749_s0 + $0x190] sm:$0xff] }
 0x55b   :  { %v9534_v24 = vmax.f32 %v9428_v37, %v1754_v6  ;;  %v2001_v13 = vadd.f32 %v9112_v51, %v2000_v12  ;;  %v7107_v6 = vld [vmem:[%s10749_s0 + $0x188] sm:$0xff]  ;;  %v7110_v12 = vld [vmem:[%s10749_s0 + $0x1a0] sm:$0xff] }
 0x55c   :  { %v2040_v27 = vmax.f32 %v2006_v9, 0.0  ;;  %v7109_v9 = vld [vmem:[%s10749_s0 + $0x198] sm:$0xff] }
 0x55d   :  { %v2039_v14 = vmax.f32 %v2001_v13, 0.0  ;;  %v8155_v49 = vpop.f32.mrb[50].mxu1  ;;  %v7111_v13 = vld [vmem:[%s10749_s0 + $0x1a8] sm:$0xff] }
 0x55e   :  { %v2016_v19 = vadd.f32 %v8155_v49, %v9112_v51  ;;  %v2010_v21 = vpop.f32.mrb[51].mxu1  ;;  %v7113_v49 = vld [vmem:[%s10749_s0 + $0x1b8] sm:$0xff] }
 0x55f   :  { %v2011_v22 = vadd.f32 %v9112_v51, %v2010_v21  ;;  %8170 = vmatprep.mubr.msk.f32.mxu0 %vm342_vm3, %v2039_v14  ;;  %v7112_v14 = vld [vmem:[%s10749_s0 + $0x1b0] sm:$0xff] }
 0x560   :  { %8171 = vmatmul.mubr.msk.f32.vlgmr.msra.gmra.mrb[56].mxu0 %vm342_vm3, %v2040_v27  ;;  %v2042_v37 = vmax.f32 %v2016_v19, 0.0 }
 0x561   :  { %v2041_v31 = vmax.f32 %v2011_v22, 0.0  ;;  %8795 = vmatpush3.bf16.msra.mxu0 %v9022_v11  ;;  %v8158_v52 = vpop.f32.mrb[52].mxu1 }
 0x562   :  { %v2026_v23 = vadd.f32 %v8158_v52, %v9112_v51  ;;  %v2020_v20 = vpop.f32.mrb[53].mxu1  ;;  %8232 = vmatprep.subr.msk.mxu0 %vm75_vm0, %v9546_v53 }
 0x563   :  { %v2021_v0 = vadd.f32 %v9112_v51, %v2020_v20  ;;  %8173 = vmatprep.mubr.msk.f32.mxu0 %vm342_vm3, %v2041_v31 }
 0x564   :  { %8174 = vmatmul.mubr.msk.f32.gmra.mrb[58].mxu0 %vm342_vm3, %v2042_v37  ;;  %v2044_v28 = vmax.f32 %v2026_v23, 0.0 }
 0x565   :  { %v2043_v25 = vmax.f32 %v2021_v0, 0.0  ;;  %v8161_v26 = vpop.f32.mrb[54].mxu1 }
 0x566   :  { %v2036_v18 = vadd.f32 %v8161_v26, %v9112_v51  ;;  %v2030_v29 = vpop.f32.mrb[55].mxu1 }
 0x567   :  { %v2031_v30 = vadd.f32 %v9112_v51, %v2030_v29  ;;  %8176 = vmatprep.mubr.msk.f32.mxu0 %vm342_vm3, %v2043_v25 }
 0x568   :  { %8177 = vmatmul.mubr.msk.f32.gmra.mrb[60].mxu0 %vm342_vm3, %v2044_v28  ;;  %v2046_v33 = vmax.f32 %v2036_v18, 0.0 }
 0x569   :  { %v2045_v32 = vmax.f32 %v2031_v30, 0.0  ;;  %v8186_v54 = vpop.f32.mrb[56].mxu1 }
 0x56a   :  { %v2297_v55 = vadd.f32 %v9560_v34, %v8186_v54  ;;  %v2291_v40 = vpop.f32.mrb[57].mxu1 }
 0x56b   :  { %v2292_v35 = vadd.f32 %v9560_v34, %v2291_v40  ;;  %8179 = vmatprep.mubr.msk.f32.mxu0 %vm342_vm3, %v2045_v32 }
 0x56c   :  { %8180 = vmatmul.mubr.msk.f32.gmra.mrb[62].mxu0 %vm342_vm3, %v2046_v33  ;;  %v2331_v38 = vmax.f32 %v2297_v55, 0.0 }
 0x56d   :  { %v2330_v51 = vmax.f32 %v2292_v35, 0.0  ;;  %v8189_v36 = vpop.f32.mrb[58].mxu1 }
 0x56e   :  { %v2307_v46 = vadd.f32 %v9560_v34, %v8189_v36  ;;  %v2301_v39 = vpop.f32.mrb[59].mxu1 }
 0x56f   :  { %v2302_v41 = vadd.f32 %v9560_v34, %v2301_v39  ;;  %8200 = vmatprep.mubr.msk.f32.mxu0 %vm198_vm2, %v2330_v51 }
 0x570   :  { %8201 = vmatmul.mubr.msk.f32.vlgmr.msra.gmra.mrb[64].mxu0 %vm198_vm2, %v2331_v38  ;;  %v2333_v56 = vmax.f32 %v2307_v46, 0.0 }
 0x571   :  { %v2332_v42 = vmax.f32 %v2302_v41, 0.0  ;;  %8233 = vmatpush3.msk.msra.mxu0 %vm75_vm0, %v9546_v53  ;;  %v8192_v44 = vpop.f32.mrb[60].mxu1 }
 0x572   :  { %v2317_v45 = vadd.f32 %v9560_v34, %v8192_v44  ;;  %v2311_v57 = vpop.f32.mrb[61].mxu1  ;;  %8809 = vmatprep.subr.bf16.mxu0 %v9037_v15 }
 0x573   :  { %v2312_v58 = vadd.f32 %v9560_v34, %v2311_v57  ;;  %8203 = vmatprep.mubr.msk.f32.mxu0 %vm198_vm2, %v2332_v42  ;;  %v9651_v42 = vld [vmem:[%s10753_s4] ss:$0 sm:$0xff] }
 0x574   :  { %8204 = vmatmul.mubr.msk.f32.gmra.mrb[66].mxu0 %vm198_vm2, %v2333_v56  ;;  %v2335_v61 = vmax.f32 %v2317_v45, 0.0 }
 0x575   :  { %v2334_v59 = vmax.f32 %v2312_v58, 0.0  ;;  %v8195_v60 = vpop.f32.mrb[62].mxu1 }
 0x576   :  { %v2327_v62 = vadd.f32 %v9560_v34, %v8195_v60  ;;  %v2321_v10 = vpop.f32.mrb[63].mxu1 }
 0x577   :  { %v2322_v2 = vadd.f32 %v9560_v34, %v2321_v10  ;;  %8206 = vmatprep.mubr.msk.f32.mxu0 %vm198_vm2, %v2334_v59 }
 0x578   :  { %8207 = vmatmul.mubr.msk.f32.gmra.mrb[68].mxu0 %vm198_vm2, %v2335_v61  ;;  %v2337_v4 = vmax.f32 %v2327_v62, 0.0 }
 0x579   :  { %v2336_v3 = vmax.f32 %v2322_v2, 0.0 }
 0x57b   :  { %8209 = vmatprep.mubr.msk.f32.mxu0 %vm198_vm2, %v2336_v3 }
 0x57c   :  { %8210 = vmatmul.mubr.msk.f32.gmra.mrb[70].mxu0 %vm198_vm2, %v2337_v4 }
 0x57d   :  { %8234 = vmatprep.mubr.msk.f32.mxu0 %vm50_vm1, %v7106_v5 }
 0x580   :  { %8235 = vmatmul.mubr.msk.f32.vlgmr.msra.gmra.mrb[72].mxu0 %vm50_vm1, %v7107_v6 }
 0x581   :  { %8237 = vmatprep.mubr.msk.f32.mxu0 %vm50_vm1, %v7108_v16  ;;  %8811 = vmatpush3.bf16.msra.mxu0 %v9037_v15 }
 0x582   :  { %8813 = vmatprep.subr.bf16.mxu0 %v9042_v17 }
 0x584   :  { %8238 = vmatmul.mubr.msk.f32.gmra.mrb[74].mxu0 %vm50_vm1, %v7109_v9 }
 0x585   :  { %8240 = vmatprep.mubr.msk.f32.mxu0 %vm50_vm1, %v7110_v12  ;;  %8815 = vmatpush3.bf16.msra.mxu0 %v9042_v17 }
 0x586   :  { %8817 = vmatprep.subr.bf16.mxu0 %v9022_v11 }
 0x588   :  { %8241 = vmatmul.mubr.msk.f32.gmra.mrb[76].mxu0 %vm50_vm1, %v7111_v13 }
 0x589   :  { %8243 = vmatprep.mubr.msk.f32.mxu0 %vm50_vm1, %v7112_v14 }
 0x58c   :  { %8244 = vmatmul.mubr.msk.f32.gmra.mrb[78].mxu0 %vm50_vm1, %v7113_v49 }
 0x633   :  { %v8172_v27 = vpop.f32.mrb[56].mxu0 }
 0x634   :  { %v2143_v19 = vadd.f32 %v8172_v27, %v9281_v1  ;;  %v2137_v21 = vpop.f32.mrb[57].mxu0 }
 0x635   :  { %v2138_v22 = vadd.f32 %v9281_v1, %v2137_v21 }
 0x636   :  { %v2177_v31 = vmax.f32 %v2143_v19, 0.0 }
 0x637   :  { %v2176_v52 = vmax.f32 %v2138_v22, 0.0  ;;  %v8175_v37 = vpop.f32.mrb[58].mxu0 }
 0x638   :  { %v9622_v23 = vmax.f32 %v9506_v48, %v2177_v31  ;;  %v2153_v20 = vadd.f32 %v8175_v37, %v9281_v1  ;;  %v2147_v0 = vpop.f32.mrb[59].mxu0 }
 0x639   :  { %v9626_v25 = vmax.f32 %v9510_v43, %v2176_v52  ;;  %v2148_v26 = vadd.f32 %v9281_v1, %v2147_v0 }
 0x63a   :  { %v2179_v28 = vmax.f32 %v2153_v20, 0.0 }
 0x63b   :  { %v2178_v18 = vmax.f32 %v2148_v26, 0.0  ;;  %v8178_v29 = vpop.f32.mrb[60].mxu0 }
 0x63c   :  { %v9630_v30 = vmax.f32 %v9514_v47, %v2179_v28  ;;  %v2163_v32 = vadd.f32 %v8178_v29, %v9281_v1  ;;  %v2157_v54 = vpop.f32.mrb[61].mxu0 }
 0x63d   :  { %v9634_v48 = vmax.f32 %v9518_v7, %v2178_v18  ;;  %v2158_v33 = vadd.f32 %v9281_v1, %v2157_v54 }
 0x63e   :  { %v2181_v55 = vmax.f32 %v2163_v32, 0.0 }
 0x63f   :  { %v2180_v40 = vmax.f32 %v2158_v33, 0.0  ;;  %v8181_v43 = vpop.f32.mrb[62].mxu0 }
 0x640   :  { %v9638_v35 = vmax.f32 %v9522_v63, %v2181_v55  ;;  %v2173_v51 = vadd.f32 %v8181_v43, %v9281_v1  ;;  %v2167_v36 = vpop.f32.mrb[63].mxu0 }
 0x641   :  { %v9642_v47 = vmax.f32 %v9526_v50, %v2180_v40  ;;  %v2168_v38 = vadd.f32 %v9281_v1, %v2167_v36 }
 0x642   :  { %v2183_v46 = vmax.f32 %v2173_v51, 0.0 }
 0x643   :  { %v2182_v39 = vmax.f32 %v2168_v38, 0.0  ;;  %v8202_v7 = vpop.f32.mrb[64].mxu0 }
 0x644   :  { %v9646_v41 = vmax.f32 %v9530_v8, %v2183_v46  ;;  %v2434_v63 = vadd.f32 %v9651_v42, %v8202_v7  ;;  %v2428_v44 = vpop.f32.mrb[65].mxu0  ;;  %v7140_v7 = vld [vmem:[%s10749_s0 + $0x1c8] sm:$0xff] }
 0x645   :  { %v9655_v56 = vmax.f32 %v9534_v24, %v2182_v39  ;;  %v2429_v50 = vadd.f32 %v9651_v42, %v2428_v44  ;;  %v7139_v39 = vld [vmem:[%s10749_s0 + $0x1c0] sm:$0xff]  ;;  %v7142_v44 = vld [vmem:[%s10749_s0 + $0x1d8] sm:$0xff] }
 0x646   :  { %v2468_v58 = vmax.f32 %v2434_v63, 0.0  ;;  %v7141_v63 = vld [vmem:[%s10749_s0 + $0x1d0] sm:$0xff] }
 0x647   :  { %v2467_v45 = vmax.f32 %v2429_v50, 0.0  ;;  %v8205_v57 = vpop.f32.mrb[66].mxu0  ;;  %v7143_v50 = vld [vmem:[%s10749_s0 + $0x1e0] sm:$0xff] }
 0x648   :  { %v2444_v59 = vadd.f32 %v9651_v42, %v8205_v57  ;;  %v2438_v8 = vpop.f32.mrb[67].mxu0  ;;  %v7145_v57 = vld [vmem:[%s10749_s0 + $0x1f0] sm:$0xff] }
 0x649   :  { %v2439_v60 = vadd.f32 %v9651_v42, %v2438_v8  ;;  %8220 = vmatprep.mubr.msk.f32.mxu1 %vm342_vm3, %v2467_v45  ;;  %v7144_v45 = vld [vmem:[%s10749_s0 + $0x1e8] sm:$0xff] }
 0x64a   :  { %8221 = vmatmul.mubr.msk.f32.vlgmr.msra.gmra.mrb[64].mxu1 %vm342_vm3, %v2468_v58  ;;  %v2470_v24 = vmax.f32 %v2444_v59, 0.0  ;;  %v7146_v58 = vld [vmem:[%s10749_s0 + $0x1f8] sm:$0xff] }
 0x64b   :  { %v2469_v61 = vmax.f32 %v2439_v60, 0.0  ;;  %8807 = vmatpush3.bf16.msra.mxu1 %v9022_v11  ;;  %v8208_v62 = vpop.f32.mrb[68].mxu0 }
 0x64c   :  { %v2454_v10 = vadd.f32 %v9651_v42, %v8208_v62  ;;  %v2448_v2 = vpop.f32.mrb[69].mxu0  ;;  %8282 = vmatprep.subr.msk.mxu1 %vm75_vm0, %v9546_v53 }
 0x64d   :  { %v2449_v3 = vadd.f32 %v9651_v42, %v2448_v2  ;;  %8223 = vmatprep.mubr.msk.f32.mxu1 %vm342_vm3, %v2469_v61 }
 0x64e   :  { %8224 = vmatmul.mubr.msk.f32.gmra.mrb[66].mxu1 %vm342_vm3, %v2470_v24  ;;  %v2472_v6 = vmax.f32 %v2454_v10, 0.0 }
 0x64f   :  { %v2471_v4 = vmax.f32 %v2449_v3, 0.0  ;;  %v8211_v5 = vpop.f32.mrb[70].mxu0 }
 0x650   :  { %v2464_v16 = vadd.f32 %v9651_v42, %v8211_v5  ;;  %v2458_v9 = vpop.f32.mrb[71].mxu0 }
 0x651   :  { %v2459_v12 = vadd.f32 %v9651_v42, %v2458_v9  ;;  %8226 = vmatprep.mubr.msk.f32.mxu1 %vm342_vm3, %v2471_v4 }
 0x652   :  { %8227 = vmatmul.mubr.msk.f32.gmra.mrb[68].mxu1 %vm342_vm3, %v2472_v6  ;;  %v2474_v49 = vmax.f32 %v2464_v16, 0.0 }
 0x653   :  { %v2473_v13 = vmax.f32 %v2459_v12, 0.0  ;;  %v8236_v14 = vpop.f32.mrb[72].mxu0 }
 0x654   :  { %v2725_v27 = vadd.f32 %v9560_v34, %v8236_v14  ;;  %v2719_v19 = vpop.f32.mrb[73].mxu0  ;;  %v9746_v14 = vld [vmem:[%s10754_s6] ss:$0 sm:$0xff] }
 0x655   :  { %v2720_v21 = vadd.f32 %v9560_v34, %v2719_v19  ;;  %8229 = vmatprep.mubr.msk.f32.mxu1 %vm342_vm3, %v2473_v13 }
 0x656   :  { %8230 = vmatmul.mubr.msk.f32.gmra.mrb[70].mxu1 %vm342_vm3, %v2474_v49  ;;  %v2759_v52 = vmax.f32 %v2725_v27, 0.0 }
 0x657   :  { %v2758_v22 = vmax.f32 %v2720_v21, 0.0  ;;  %v8239_v31 = vpop.f32.mrb[74].mxu0 }
 0x658   :  { %v2735_v37 = vadd.f32 %v9560_v34, %v8239_v31  ;;  %v2729_v20 = vpop.f32.mrb[75].mxu0 }
 0x659   :  { %v2730_v0 = vadd.f32 %v9560_v34, %v2729_v20  ;;  %8250 = vmatprep.mubr.msk.f32.mxu1 %vm198_vm2, %v2758_v22 }
 0x65a   :  { %8251 = vmatmul.mubr.msk.f32.vlgmr.msra.gmra.mrb[72].mxu1 %vm198_vm2, %v2759_v52  ;;  %v2761_v18 = vmax.f32 %v2735_v37, 0.0 }
 0x65b   :  { %v2760_v26 = vmax.f32 %v2730_v0, 0.0  ;;  %8283 = vmatpush3.msk.msra.mxu1 %vm75_vm0, %v9546_v53  ;;  %v8242_v28 = vpop.f32.mrb[76].mxu0 }
 0x65c   :  { %v2745_v29 = vadd.f32 %v9560_v34, %v8242_v28  ;;  %v2739_v32 = vpop.f32.mrb[77].mxu0  ;;  %8821 = vmatprep.subr.bf16.mxu1 %v9037_v15 }
 0x65d   :  { %v2740_v54 = vadd.f32 %v9560_v34, %v2739_v32  ;;  %8253 = vmatprep.mubr.msk.f32.mxu1 %vm198_vm2, %v2760_v26 }
 0x65e   :  { %8254 = vmatmul.mubr.msk.f32.gmra.mrb[74].mxu1 %vm198_vm2, %v2761_v18  ;;  %v2763_v40 = vmax.f32 %v2745_v29, 0.0 }
 0x65f   :  { %v2762_v33 = vmax.f32 %v2740_v54, 0.0  ;;  %v8245_v55 = vpop.f32.mrb[78].mxu0 }
 0x660   :  { %v2755_v43 = vadd.f32 %v9560_v34, %v8245_v55  ;;  %v2749_v51 = vpop.f32.mrb[79].mxu0 }
 0x661   :  { %v2750_v36 = vadd.f32 %v9560_v34, %v2749_v51  ;;  %8256 = vmatprep.mubr.msk.f32.mxu1 %vm198_vm2, %v2762_v33 }
 0x662   :  { %8257 = vmatmul.mubr.msk.f32.gmra.mrb[76].mxu1 %vm198_vm2, %v2763_v40  ;;  %v2765_v46 = vmax.f32 %v2755_v43, 0.0 }
 0x663   :  { %v2764_v38 = vmax.f32 %v2750_v36, 0.0 }
 0x665   :  { %8259 = vmatprep.mubr.msk.f32.mxu1 %vm198_vm2, %v2764_v38 }
 0x666   :  { %8260 = vmatmul.mubr.msk.f32.gmra.mrb[78].mxu1 %vm198_vm2, %v2765_v46 }
 0x667   :  { %8284 = vmatprep.mubr.msk.f32.mxu1 %vm50_vm1, %v7139_v39 }
 0x66a   :  { %8285 = vmatmul.mubr.msk.f32.vlgmr.msra.gmra.mrb[80].mxu1 %vm50_vm1, %v7140_v7 }
 0x66b   :  { %8287 = vmatprep.mubr.msk.f32.mxu1 %vm50_vm1, %v7141_v63  ;;  %8823 = vmatpush3.bf16.msra.mxu1 %v9037_v15 }
 0x66c   :  { %8825 = vmatprep.subr.bf16.mxu1 %v9042_v17 }
 0x66e   :  { %8288 = vmatmul.mubr.msk.f32.gmra.mrb[82].mxu1 %vm50_vm1, %v7142_v44 }
 0x66f   :  { %8290 = vmatprep.mubr.msk.f32.mxu1 %vm50_vm1, %v7143_v50  ;;  %8827 = vmatpush3.bf16.msra.mxu1 %v9042_v17 }
 0x670   :  { %8829 = vmatprep.subr.bf16.mxu1 %v9022_v11 }
 0x672   :  { %8291 = vmatmul.mubr.msk.f32.gmra.mrb[84].mxu1 %vm50_vm1, %v7144_v45 }
 0x673   :  { %8293 = vmatprep.mubr.msk.f32.mxu1 %vm50_vm1, %v7145_v57 }
 0x676   :  { %8294 = vmatmul.mubr.msk.f32.gmra.mrb[86].mxu1 %vm50_vm1, %v7146_v58 }
 0x71d   :  { %v8222_v59 = vpop.f32.mrb[64].mxu1 }
 0x71e   :  { %v2571_v8 = vadd.f32 %v8222_v59, %v9281_v1  ;;  %v2565_v60 = vpop.f32.mrb[65].mxu1 }
 0x71f   :  { %v2566_v61 = vadd.f32 %v9281_v1, %v2565_v60 }
 0x720   :  { %v2605_v62 = vmax.f32 %v2571_v8, 0.0 }
 0x721   :  { %v2604_v24 = vmax.f32 %v2566_v61, 0.0  ;;  %v8225_v10 = vpop.f32.mrb[66].mxu1 }
 0x722   :  { %v9733_v2 = vmax.f32 %v9622_v23, %v2605_v62  ;;  %v2581_v3 = vadd.f32 %v8225_v10, %v9281_v1  ;;  %v2575_v4 = vpop.f32.mrb[67].mxu1 }
 0x723   :  { %v9737_v5 = vmax.f32 %v9626_v25, %v2604_v24  ;;  %v2576_v6 = vadd.f32 %v9281_v1, %v2575_v4 }
 0x724   :  { %v2607_v16 = vmax.f32 %v2581_v3, 0.0 }
 0x725   :  { %v2606_v9 = vmax.f32 %v2576_v6, 0.0  ;;  %v8228_v12 = vpop.f32.mrb[68].mxu1 }
 0x726   :  { %v9741_v13 = vmax.f32 %v9630_v30, %v2607_v16  ;;  %v2591_v23 = vadd.f32 %v9746_v14, %v8228_v12  ;;  %v2585_v49 = vpop.f32.mrb[69].mxu1 }
 0x727   :  { %v9750_v27 = vmax.f32 %v9634_v48, %v2606_v9  ;;  %v2586_v25 = vadd.f32 %v9746_v14, %v2585_v49 }
 0x728   :  { %v2609_v1 = vmax.f32 %v2591_v23, 0.0 }
 0x729   :  { %v2608_v19 = vmax.f32 %v2586_v25, 0.0  ;;  %v8231_v21 = vpop.f32.mrb[70].mxu1 }
 0x72a   :  { %v9754_v22 = vmax.f32 %v9638_v35, %v2609_v1  ;;  %v2601_v30 = vadd.f32 %v9746_v14, %v8231_v21  ;;  %v2595_v31 = vpop.f32.mrb[71].mxu1 }
 0x72b   :  { %v9758_v52 = vmax.f32 %v9642_v47, %v2608_v19  ;;  %v2596_v37 = vadd.f32 %v9746_v14, %v2595_v31 }
 0x72c   :  { %v2611_v20 = vmax.f32 %v2601_v30, 0.0 }
 0x72d   :  { %v2610_v0 = vmax.f32 %v2596_v37, 0.0  ;;  %v8252_v48 = vpop.f32.mrb[72].mxu1 }
 0x72e   :  { %v9762_v26 = vmax.f32 %v9646_v41, %v2611_v20  ;;  %v2862_v28 = vadd.f32 %v9651_v42, %v8252_v48  ;;  %v2856_v18 = vpop.f32.mrb[73].mxu1  ;;  %v7173_v48 = vld [vmem:[%s10749_s0 + $0x208] sm:$0xff] }
 0x72f   :  { %v9766_v35 = vmax.f32 %v9655_v56, %v2610_v0  ;;  %v2857_v29 = vadd.f32 %v9651_v42, %v2856_v18  ;;  %v7172_v0 = vld [vmem:[%s10749_s0 + $0x200] sm:$0xff]  ;;  %v7175_v18 = vld [vmem:[%s10749_s0 + $0x218] sm:$0xff] }
 0x730   :  { %v2896_v47 = vmax.f32 %v2862_v28, 0.0  ;;  %v7174_v28 = vld [vmem:[%s10749_s0 + $0x210] sm:$0xff] }
 0x731   :  { %v2895_v32 = vmax.f32 %v2857_v29, 0.0  ;;  %v8255_v54 = vpop.f32.mrb[74].mxu1  ;;  %v7176_v29 = vld [vmem:[%s10749_s0 + $0x220] sm:$0xff] }
 0x732   :  { %v2872_v33 = vadd.f32 %v9651_v42, %v8255_v54  ;;  %v2866_v55 = vpop.f32.mrb[75].mxu1  ;;  %v7178_v54 = vld [vmem:[%s10749_s0 + $0x230] sm:$0xff] }
 0x733   :  { %v2867_v40 = vadd.f32 %v9651_v42, %v2866_v55  ;;  %8270 = vmatprep.mubr.msk.f32.mxu0 %vm342_vm3, %v2895_v32  ;;  %v7177_v32 = vld [vmem:[%s10749_s0 + $0x228] sm:$0xff] }
 0x734   :  { %8271 = vmatmul.mubr.msk.f32.vlgmr.msra.gmra.mrb[80].mxu0 %vm342_vm3, %v2896_v47  ;;  %v2898_v56 = vmax.f32 %v2872_v33, 0.0  ;;  %v7179_v47 = vld [vmem:[%s10749_s0 + $0x238] sm:$0xff] }
 0x735   :  { %v2897_v41 = vmax.f32 %v2867_v40, 0.0  ;;  %8819 = vmatpush3.bf16.msra.mxu0 %v9022_v11  ;;  %v8258_v43 = vpop.f32.mrb[76].mxu1 }
 0x736   :  { %v2882_v51 = vadd.f32 %v9651_v42, %v8258_v43  ;;  %v2876_v36 = vpop.f32.mrb[77].mxu1  ;;  %8332 = vmatprep.subr.msk.mxu0 %vm75_vm0, %v9546_v53 }
 0x737   :  { %v2877_v38 = vadd.f32 %v9651_v42, %v2876_v36  ;;  %8273 = vmatprep.mubr.msk.f32.mxu0 %vm342_vm3, %v2897_v41 }
 0x738   :  { %8274 = vmatmul.mubr.msk.f32.gmra.mrb[82].mxu0 %vm342_vm3, %v2898_v56  ;;  %v2900_v7 = vmax.f32 %v2882_v51, 0.0 }
 0x739   :  { %v2899_v46 = vmax.f32 %v2877_v38, 0.0  ;;  %v8261_v39 = vpop.f32.mrb[78].mxu1 }
 0x73a   :  { %v2892_v63 = vadd.f32 %v9651_v42, %v8261_v39  ;;  %v2886_v44 = vpop.f32.mrb[79].mxu1 }
 0x73b   :  { %v2887_v50 = vadd.f32 %v9651_v42, %v2886_v44  ;;  %8276 = vmatprep.mubr.msk.f32.mxu0 %vm342_vm3, %v2899_v46 }
 0x73c   :  { %8277 = vmatmul.mubr.msk.f32.gmra.mrb[84].mxu0 %vm342_vm3, %v2900_v7  ;;  %v2902_v58 = vmax.f32 %v2892_v63, 0.0 }
 0x73d   :  { %v2901_v45 = vmax.f32 %v2887_v50, 0.0  ;;  %v8286_v57 = vpop.f32.mrb[80].mxu1 }
 0x73e   :  { %v3153_v59 = vadd.f32 %v9560_v34, %v8286_v57  ;;  %v3147_v8 = vpop.f32.mrb[81].mxu1 }
 0x73f   :  { %v3148_v60 = vadd.f32 %v9560_v34, %v3147_v8  ;;  %8279 = vmatprep.mubr.msk.f32.mxu0 %vm342_vm3, %v2901_v45 }
 0x740   :  { %8280 = vmatmul.mubr.msk.f32.gmra.mrb[86].mxu0 %vm342_vm3, %v2902_v58  ;;  %v3187_v24 = vmax.f32 %v3153_v59, 0.0 }
 0x741   :  { %v3186_v61 = vmax.f32 %v3148_v60, 0.0  ;;  %v8289_v62 = vpop.f32.mrb[82].mxu1 }
 0x742   :  { %v3163_v10 = vadd.f32 %v9560_v34, %v8289_v62  ;;  %v3157_v3 = vpop.f32.mrb[83].mxu1 }
 0x743   :  { %v3158_v4 = vadd.f32 %v9560_v34, %v3157_v3  ;;  %8300 = vmatprep.mubr.msk.f32.mxu0 %vm198_vm2, %v3186_v61 }
 0x744   :  { %8301 = vmatmul.mubr.msk.f32.vlgmr.msra.gmra.mrb[88].mxu0 %vm198_vm2, %v3187_v24  ;;  %v3189_v9 = vmax.f32 %v3163_v10, 0.0 }
 0x745   :  { %v3188_v6 = vmax.f32 %v3158_v4, 0.0  ;;  %8333 = vmatpush3.msk.msra.mxu0 %vm75_vm0, %v9546_v53  ;;  %v8292_v16 = vpop.f32.mrb[84].mxu1 }
 0x746   :  { %v3173_v12 = vadd.f32 %v9560_v34, %v8292_v16  ;;  %v3167_v23 = vpop.f32.mrb[85].mxu1  ;;  %8833 = vmatprep.subr.bf16.mxu0 %v9037_v15 }
 0x747   :  { %v3168_v49 = vadd.f32 %v9560_v34, %v3167_v23  ;;  %8303 = vmatprep.mubr.msk.f32.mxu0 %vm198_vm2, %v3188_v6 }
 0x748   :  { %8304 = vmatmul.mubr.msk.f32.gmra.mrb[90].mxu0 %vm198_vm2, %v3189_v9  ;;  %v3191_v19 = vmax.f32 %v3173_v12, 0.0 }
 0x749   :  { %v3190_v25 = vmax.f32 %v3168_v49, 0.0  ;;  %v8295_v1 = vpop.f32.mrb[86].mxu1 }
 0x74a   :  { %v3183_v21 = vadd.f32 %v9560_v34, %v8295_v1  ;;  %v3177_v30 = vpop.f32.mrb[87].mxu1 }
 0x74b   :  { %v3178_v31 = vadd.f32 %v9560_v34, %v3177_v30  ;;  %8306 = vmatprep.mubr.msk.f32.mxu0 %vm198_vm2, %v3190_v25 }
 0x74c   :  { %8307 = vmatmul.mubr.msk.f32.gmra.mrb[92].mxu0 %vm198_vm2, %v3191_v19  ;;  %v3193_v20 = vmax.f32 %v3183_v21, 0.0 }
 0x74d   :  { %v3192_v37 = vmax.f32 %v3178_v31, 0.0 }
 0x74f   :  { %8309 = vmatprep.mubr.msk.f32.mxu0 %vm198_vm2, %v3192_v37 }
 0x750   :  { %8310 = vmatmul.mubr.msk.f32.gmra.mrb[94].mxu0 %vm198_vm2, %v3193_v20 }
 0x751   :  { %8334 = vmatprep.mubr.msk.f32.mxu0 %vm50_vm1, %v7172_v0 }
 0x754   :  { %8335 = vmatmul.mubr.msk.f32.vlgmr.msra.gmra.mrb[96].mxu0 %vm50_vm1, %v7173_v48 }
 0x755   :  { %8337 = vmatprep.mubr.msk.f32.mxu0 %vm50_vm1, %v7174_v28  ;;  %8835 = vmatpush3.bf16.msra.mxu0 %v9037_v15 }
 0x756   :  { %8837 = vmatprep.subr.bf16.mxu0 %v9042_v17 }
 0x758   :  { %8338 = vmatmul.mubr.msk.f32.gmra.mrb[98].mxu0 %vm50_vm1, %v7175_v18 }
 0x759   :  { %8340 = vmatprep.mubr.msk.f32.mxu0 %vm50_vm1, %v7176_v29  ;;  %8839 = vmatpush3.bf16.msra.mxu0 %v9042_v17 }
 0x75a   :  { %8841 = vmatprep.subr.bf16.mxu0 %v9022_v11 }
 0x75c   :  { %8341 = vmatmul.mubr.msk.f32.gmra.mrb[100].mxu0 %vm50_vm1, %v7177_v32 }
 0x75d   :  { %8343 = vmatprep.mubr.msk.f32.mxu0 %vm50_vm1, %v7178_v54 }
 0x760   :  { %8344 = vmatmul.mubr.msk.f32.gmra.mrb[102].mxu0 %vm50_vm1, %v7179_v47 }
 0x807   :  { %v8272_v33 = vpop.f32.mrb[80].mxu0 }
 0x808   :  { %v2999_v55 = vadd.f32 %v9746_v14, %v8272_v33  ;;  %v2993_v40 = vpop.f32.mrb[81].mxu0 }
 0x809   :  { %v2994_v41 = vadd.f32 %v9746_v14, %v2993_v40 }
 0x80a   :  { %v3033_v43 = vmax.f32 %v2999_v55, 0.0 }
 0x80b   :  { %v3032_v56 = vmax.f32 %v2994_v41, 0.0  ;;  %v8275_v51 = vpop.f32.mrb[82].mxu0 }
 0x80c   :  { %v9844_v36 = vmax.f32 %v9733_v2, %v3033_v43  ;;  %v3009_v38 = vadd.f32 %v9746_v14, %v8275_v51  ;;  %v3003_v46 = vpop.f32.mrb[83].mxu0 }
 0x80d   :  { %v9848_v39 = vmax.f32 %v9737_v5, %v3032_v56  ;;  %v3004_v7 = vadd.f32 %v9746_v14, %v3003_v46 }
 0x80e   :  { %v3035_v63 = vmax.f32 %v3009_v38, 0.0 }
 0x80f   :  { %v3034_v44 = vmax.f32 %v3004_v7, 0.0  ;;  %v8278_v50 = vpop.f32.mrb[84].mxu0 }
 0x810   :  { %v9852_v45 = vmax.f32 %v9741_v13, %v3035_v63  ;;  %v3019_v57 = vadd.f32 %v9746_v14, %v8278_v50  ;;  %v3013_v58 = vpop.f32.mrb[85].mxu0 }
 0x811   :  { %v9856_v2 = vmax.f32 %v9750_v27, %v3034_v44  ;;  %v3014_v59 = vadd.f32 %v9746_v14, %v3013_v58 }
 0x812   :  { %v3037_v8 = vmax.f32 %v3019_v57, 0.0 }
 0x813   :  { %v3036_v60 = vmax.f32 %v3014_v59, 0.0  ;;  %v8281_v5 = vpop.f32.mrb[86].mxu0 }
 0x814   :  { %v9860_v61 = vmax.f32 %v9754_v22, %v3037_v8  ;;  %v3029_v62 = vadd.f32 %v9746_v14, %v8281_v5  ;;  %v3023_v24 = vpop.f32.mrb[87].mxu0 }
 0x815   :  { %v9864_v13 = vmax.f32 %v9758_v52, %v3036_v60  ;;  %v3024_v10 = vadd.f32 %v9746_v14, %v3023_v24 }
 0x816   :  { %v3039_v3 = vmax.f32 %v3029_v62, 0.0 }
 0x817   :  { %v3038_v4 = vmax.f32 %v3024_v10, 0.0  ;;  %v8302_v27 = vpop.f32.mrb[88].mxu0 }
 0x818   :  { %v9868_v6 = vmax.f32 %v9762_v26, %v3039_v3  ;;  %v3290_v16 = vadd.f32 %v9651_v42, %v8302_v27  ;;  %v3284_v9 = vpop.f32.mrb[89].mxu0  ;;  %v7206_v27 = vld [vmem:[%s10749_s0 + $0x248] sm:$0xff] }
 0x819   :  { %v9872_v22 = vmax.f32 %v9766_v35, %v3038_v4  ;;  %v3285_v12 = vadd.f32 %v9651_v42, %v3284_v9  ;;  %v7205_v4 = vld [vmem:[%s10749_s0 + $0x240] sm:$0xff]  ;;  %v7208_v9 = vld [vmem:[%s10749_s0 + $0x258] sm:$0xff] }
 0x81a   :  { %v3324_v52 = vmax.f32 %v3290_v16, 0.0  ;;  %v7207_v16 = vld [vmem:[%s10749_s0 + $0x250] sm:$0xff] }
 0x81b   :  { %v3323_v23 = vmax.f32 %v3285_v12, 0.0  ;;  %v8305_v49 = vpop.f32.mrb[90].mxu0  ;;  %v7209_v12 = vld [vmem:[%s10749_s0 + $0x260] sm:$0xff] }
 0x81c   :  { %v3300_v25 = vadd.f32 %v9651_v42, %v8305_v49  ;;  %v3294_v1 = vpop.f32.mrb[91].mxu0  ;;  %v7211_v49 = vld [vmem:[%s10749_s0 + $0x270] sm:$0xff] }
 0x81d   :  { %v3295_v19 = vadd.f32 %v9651_v42, %v3294_v1  ;;  %8320 = vmatprep.mubr.msk.f32.mxu1 %vm342_vm3, %v3323_v23  ;;  %v7210_v23 = vld [vmem:[%s10749_s0 + $0x268] sm:$0xff] }
 0x81e   :  { %8321 = vmatmul.mubr.msk.f32.vlgmr.msra.gmra.mrb[88].mxu1 %vm342_vm3, %v3324_v52  ;;  %v3326_v35 = vmax.f32 %v3300_v25, 0.0  ;;  %v7212_v52 = vld [vmem:[%s10749_s0 + $0x278] sm:$0xff] }
 0x81f   :  { %v3325_v26 = vmax.f32 %v3295_v19, 0.0  ;;  %8831 = vmatpush3.bf16.msra.mxu1 %v9022_v11  ;;  %v8308_v21 = vpop.f32.mrb[92].mxu0 }
 0x820   :  { %v3310_v30 = vadd.f32 %v9651_v42, %v8308_v21  ;;  %v3304_v31 = vpop.f32.mrb[93].mxu0  ;;  %8382 = vmatprep.subr.msk.mxu1 %vm75_vm0, %v9546_v53 }
 0x821   :  { %v3305_v37 = vadd.f32 %v9651_v42, %v3304_v31  ;;  %8323 = vmatprep.mubr.msk.f32.mxu1 %vm342_vm3, %v3325_v26 }
 0x822   :  { %8324 = vmatmul.mubr.msk.f32.gmra.mrb[90].mxu1 %vm342_vm3, %v3326_v35  ;;  %v3328_v48 = vmax.f32 %v3310_v30, 0.0 }
 0x823   :  { %v3327_v20 = vmax.f32 %v3305_v37, 0.0  ;;  %v8311_v0 = vpop.f32.mrb[94].mxu0 }
 0x824   :  { %v3320_v28 = vadd.f32 %v9651_v42, %v8311_v0  ;;  %v3314_v18 = vpop.f32.mrb[95].mxu0 }
 0x825   :  { %v3315_v29 = vadd.f32 %v9651_v42, %v3314_v18  ;;  %8326 = vmatprep.mubr.msk.f32.mxu1 %vm342_vm3, %v3327_v20 }
 0x826   :  { %8327 = vmatmul.mubr.msk.f32.gmra.mrb[92].mxu1 %vm342_vm3, %v3328_v48  ;;  %v3330_v47 = vmax.f32 %v3320_v28, 0.0 }
 0x827   :  { %v3329_v32 = vmax.f32 %v3315_v29, 0.0  ;;  %v8336_v54 = vpop.f32.mrb[96].mxu0 }
 0x828   :  { %v3581_v33 = vadd.f32 %v9560_v34, %v8336_v54  ;;  %v3575_v55 = vpop.f32.mrb[97].mxu0 }
 0x829   :  { %v3576_v40 = vadd.f32 %v9560_v34, %v3575_v55  ;;  %8329 = vmatprep.mubr.msk.f32.mxu1 %vm342_vm3, %v3329_v32 }
 0x82a   :  { %8330 = vmatmul.mubr.msk.f32.gmra.mrb[94].mxu1 %vm342_vm3, %v3330_v47  ;;  %v3615_v56 = vmax.f32 %v3581_v33, 0.0 }
 0x82b   :  { %v3614_v41 = vmax.f32 %v3576_v40, 0.0  ;;  %v8339_v43 = vpop.f32.mrb[98].mxu0 }
 0x82c   :  { %v3591_v51 = vadd.f32 %v9560_v34, %v8339_v43  ;;  %v3585_v38 = vpop.f32.mrb[99].mxu0 }
 0x82d   :  { %v3586_v46 = vadd.f32 %v9560_v34, %v3585_v38  ;;  %8350 = vmatprep.mubr.msk.f32.mxu1 %vm198_vm2, %v3614_v41 }
 0x82e   :  { %8351 = vmatmul.mubr.msk.f32.vlgmr.msra.gmra.mrb[96].mxu1 %vm198_vm2, %v3615_v56  ;;  %v3617_v44 = vmax.f32 %v3591_v51, 0.0 }
 0x82f   :  { %v3616_v7 = vmax.f32 %v3586_v46, 0.0  ;;  %8383 = vmatpush3.msk.msra.mxu1 %vm75_vm0, %v9546_v53  ;;  %v8342_v63 = vpop.f32.mrb[100].mxu0 }
 0x830   :  { %v3601_v50 = vadd.f32 %v9560_v34, %v8342_v63  ;;  %v3595_v57 = vpop.f32.mrb[101].mxu0  ;;  %8845 = vmatprep.subr.bf16.mxu1 %v9037_v15 }
 0x831   :  { %v3596_v58 = vadd.f32 %v9560_v34, %v3595_v57  ;;  %8353 = vmatprep.mubr.msk.f32.mxu1 %vm198_vm2, %v3616_v7 }
 0x832   :  { %8354 = vmatmul.mubr.msk.f32.gmra.mrb[98].mxu1 %vm198_vm2, %v3617_v44  ;;  %v3619_v60 = vmax.f32 %v3601_v50, 0.0 }
 0x833   :  { %v3618_v59 = vmax.f32 %v3596_v58, 0.0  ;;  %v8345_v8 = vpop.f32.mrb[102].mxu0 }
 0x834   :  { %v3611_v5 = vadd.f32 %v9560_v34, %v8345_v8  ;;  %v3605_v62 = vpop.f32.mrb[103].mxu0 }
 0x835   :  { %v3606_v24 = vadd.f32 %v9560_v34, %v3605_v62  ;;  %8356 = vmatprep.mubr.msk.f32.mxu1 %vm198_vm2, %v3618_v59 }
 0x836   :  { %8357 = vmatmul.mubr.msk.f32.gmra.mrb[100].mxu1 %vm198_vm2, %v3619_v60  ;;  %v3621_v3 = vmax.f32 %v3611_v5, 0.0 }
 0x837   :  { %v3620_v10 = vmax.f32 %v3606_v24, 0.0 }
 0x839   :  { %8359 = vmatprep.mubr.msk.f32.mxu1 %vm198_vm2, %v3620_v10 }
 0x83a   :  { %8360 = vmatmul.mubr.msk.f32.gmra.mrb[102].mxu1 %vm198_vm2, %v3621_v3 }
 0x83b   :  { %8384 = vmatprep.mubr.msk.f32.mxu1 %vm50_vm1, %v7205_v4 }
 0x83e   :  { %8385 = vmatmul.mubr.msk.f32.vlgmr.msra.gmra.mrb[104].mxu1 %vm50_vm1, %v7206_v27 }
 0x83f   :  { %8387 = vmatprep.mubr.msk.f32.mxu1 %vm50_vm1, %v7207_v16  ;;  %8847 = vmatpush3.bf16.msra.mxu1 %v9037_v15 }
 0x840   :  { %8849 = vmatprep.subr.bf16.mxu1 %v9042_v17 }
 0x842   :  { %8388 = vmatmul.mubr.msk.f32.gmra.mrb[106].mxu1 %vm50_vm1, %v7208_v9 }
 0x843   :  { %8390 = vmatprep.mubr.msk.f32.mxu1 %vm50_vm1, %v7209_v12  ;;  %8851 = vmatpush3.bf16.msra.mxu1 %v9042_v17 }
 0x844   :  { %8853 = vmatprep.subr.bf16.mxu1 %v9022_v11 }
 0x846   :  { %8391 = vmatmul.mubr.msk.f32.gmra.mrb[108].mxu1 %vm50_vm1, %v7210_v23 }
 0x847   :  { %8393 = vmatprep.mubr.msk.f32.mxu1 %vm50_vm1, %v7211_v49 }
 0x84a   :  { %8394 = vmatmul.mubr.msk.f32.gmra.mrb[110].mxu1 %vm50_vm1, %v7212_v52 }
 0x8f1   :  { %v8322_v25 = vpop.f32.mrb[88].mxu1 }
 0x8f2   :  { %v3427_v1 = vadd.f32 %v9746_v14, %v8322_v25  ;;  %v3421_v19 = vpop.f32.mrb[89].mxu1 }
 0x8f3   :  { %v3422_v26 = vadd.f32 %v9746_v14, %v3421_v19 }
 0x8f4   :  { %v3461_v21 = vmax.f32 %v3427_v1, 0.0 }
 0x8f5   :  { %v3460_v35 = vmax.f32 %v3422_v26, 0.0  ;;  %v8325_v30 = vpop.f32.mrb[90].mxu1 }
 0x8f6   :  { %v9950_v31 = vmax.f32 %v9844_v36, %v3461_v21  ;;  %v3437_v37 = vadd.f32 %v9746_v14, %v8325_v30  ;;  %v3431_v20 = vpop.f32.mrb[91].mxu1 }
 0x8f7   :  { %v9954_v0 = vmax.f32 %v9848_v39, %v3460_v35  ;;  %v3432_v48 = vadd.f32 %v9746_v14, %v3431_v20 }
 0x8f8   :  { %v3463_v28 = vmax.f32 %v3437_v37, 0.0 }
 0x8f9   :  { %v3462_v18 = vmax.f32 %v3432_v48, 0.0  ;;  %v8328_v29 = vpop.f32.mrb[92].mxu1 }
 0x8fa   :  { %v9958_v32 = vmax.f32 %v9852_v45, %v3463_v28  ;;  %v3447_v54 = vadd.f32 %v9746_v14, %v8328_v29  ;;  %v3441_v47 = vpop.f32.mrb[93].mxu1 }
 0x8fb   :  { %v9962_v36 = vmax.f32 %v9856_v2, %v3462_v18  ;;  %v3442_v33 = vadd.f32 %v9746_v14, %v3441_v47 }
 0x8fc   :  { %v3465_v55 = vmax.f32 %v3447_v54, 0.0 }
 0x8fd   :  { %v3464_v40 = vmax.f32 %v3442_v33, 0.0  ;;  %v8331_v39 = vpop.f32.mrb[94].mxu1 }
 0x8fe   :  { %v9966_v41 = vmax.f32 %v9860_v61, %v3465_v55  ;;  %v3457_v43 = vadd.f32 %v9746_v14, %v8331_v39  ;;  %v3451_v56 = vpop.f32.mrb[95].mxu1 }
 0x8ff   :  { %v9970_v45 = vmax.f32 %v9864_v13, %v3464_v40  ;;  %v3452_v51 = vadd.f32 %v9746_v14, %v3451_v56 }
 0x900   :  { %v3467_v38 = vmax.f32 %v3457_v43, 0.0 }
 0x901   :  { %v3466_v46 = vmax.f32 %v3452_v51, 0.0  ;;  %v8352_v2 = vpop.f32.mrb[96].mxu1 }
 0x902   :  { %v9974_v7 = vmax.f32 %v9868_v6, %v3467_v38  ;;  %v3718_v63 = vadd.f32 %v9651_v42, %v8352_v2  ;;  %v3712_v44 = vpop.f32.mrb[97].mxu1  ;;  %v7238_v38 = vld [vmem:[%s10749_s0 + $0x280] sm:$0xff]  ;;  %v7241_v2 = vld [vmem:[%s10749_s0 + $0x298] sm:$0xff] }
 0x903   :  { %v9978_v61 = vmax.f32 %v9872_v22, %v3466_v46  ;;  %v3713_v50 = vadd.f32 %v9651_v42, %v3712_v44  ;;  %v7240_v46 = vld [vmem:[%s10749_s0 + $0x290] sm:$0xff]  ;;  %v7243_v44 = vld [vmem:[%s10749_s0 + $0x2a8] sm:$0xff] }
 0x904   :  { %v3752_v13 = vmax.f32 %v3718_v63, 0.0  ;;  %v7242_v63 = vld [vmem:[%s10749_s0 + $0x2a0] sm:$0xff] }
 0x905   :  { %v3751_v57 = vmax.f32 %v3713_v50, 0.0  ;;  %v8355_v58 = vpop.f32.mrb[98].mxu1  ;;  %v7244_v50 = vld [vmem:[%s10749_s0 + $0x2b0] sm:$0xff] }
 0x906   :  { %v3728_v59 = vadd.f32 %v9651_v42, %v8355_v58  ;;  %v3722_v8 = vpop.f32.mrb[99].mxu1 }
 0x907   :  { %v3723_v60 = vadd.f32 %v9651_v42, %v3722_v8  ;;  %8370 = vmatprep.mubr.msk.f32.mxu0 %vm342_vm3, %v3751_v57  ;;  %v7245_v57 = vld [vmem:[%s10749_s0 + $0x2b8] sm:$0xff] }
 0x908   :  { %8371 = vmatmul.mubr.msk.f32.vlgmr.msra.gmra.mrb[104].mxu0 %vm342_vm3, %v3752_v13  ;;  %v3754_v22 = vmax.f32 %v3728_v59, 0.0 }
 0x909   :  { %v3753_v6 = vmax.f32 %v3723_v60, 0.0  ;;  %8843 = vmatpush3.bf16.msra.mxu0 %v9022_v11  ;;  %v8358_v5 = vpop.f32.mrb[100].mxu1 }
 0x90a   :  { %v3738_v62 = vadd.f32 %v9651_v42, %v8358_v5  ;;  %v3732_v24 = vpop.f32.mrb[101].mxu1  ;;  %8432 = vmatprep.subr.msk.mxu0 %vm75_vm0, %v9546_v53 }
 0x90b   :  { %v3733_v10 = vadd.f32 %v9651_v42, %v3732_v24  ;;  %8373 = vmatprep.mubr.msk.f32.mxu0 %vm342_vm3, %v3753_v6 }
 0x90c   :  { %8374 = vmatmul.mubr.msk.f32.gmra.mrb[106].mxu0 %vm342_vm3, %v3754_v22  ;;  %v3756_v27 = vmax.f32 %v3738_v62, 0.0 }
 0x90d   :  { %v3755_v3 = vmax.f32 %v3733_v10, 0.0  ;;  %v8361_v4 = vpop.f32.mrb[102].mxu1 }
 0x90e   :  { %v3748_v16 = vadd.f32 %v9651_v42, %v8361_v4  ;;  %v3742_v9 = vpop.f32.mrb[103].mxu1 }
 0x90f   :  { %v3743_v12 = vadd.f32 %v9651_v42, %v3742_v9  ;;  %8376 = vmatprep.mubr.msk.f32.mxu0 %vm342_vm3, %v3755_v3 }
 0x910   :  { %8377 = vmatmul.mubr.msk.f32.gmra.mrb[108].mxu0 %vm342_vm3, %v3756_v27  ;;  %v3758_v52 = vmax.f32 %v3748_v16, 0.0 }
 0x911   :  { %v3757_v23 = vmax.f32 %v3743_v12, 0.0  ;;  %v8386_v49 = vpop.f32.mrb[104].mxu1 }
 0x912   :  { %v4009_v25 = vadd.f32 %v9560_v34, %v8386_v49  ;;  %v4003_v1 = vpop.f32.mrb[105].mxu1 }
 0x913   :  { %v4004_v19 = vadd.f32 %v9560_v34, %v4003_v1  ;;  %8379 = vmatprep.mubr.msk.f32.mxu0 %vm342_vm3, %v3757_v23 }
 0x914   :  { %8380 = vmatmul.mubr.msk.f32.gmra.mrb[110].mxu0 %vm342_vm3, %v3758_v52  ;;  %v4043_v35 = vmax.f32 %v4009_v25, 0.0 }
 0x915   :  { %v4042_v26 = vmax.f32 %v4004_v19, 0.0  ;;  %v8389_v21 = vpop.f32.mrb[106].mxu1 }
 0x916   :  { %v4019_v30 = vadd.f32 %v9560_v34, %v8389_v21  ;;  %v4013_v37 = vpop.f32.mrb[107].mxu1 }
 0x917   :  { %v4014_v20 = vadd.f32 %v9560_v34, %v4013_v37  ;;  %8400 = vmatprep.mubr.msk.f32.mxu0 %vm198_vm2, %v4042_v26 }
 0x918   :  { %8401 = vmatmul.mubr.msk.f32.vlgmr.msra.gmra.mrb[112].mxu0 %vm198_vm2, %v4043_v35  ;;  %v4045_v18 = vmax.f32 %v4019_v30, 0.0 }
 0x919   :  { %v4044_v48 = vmax.f32 %v4014_v20, 0.0  ;;  %8433 = vmatpush3.msk.msra.mxu0 %vm75_vm0, %v9546_v53  ;;  %v8392_v28 = vpop.f32.mrb[108].mxu1 }
 0x91a   :  { %v4029_v29 = vadd.f32 %v9560_v34, %v8392_v28  ;;  %v4023_v54 = vpop.f32.mrb[109].mxu1  ;;  %8857 = vmatprep.subr.bf16.mxu0 %v9037_v15 }
 0x91b   :  { %v4024_v47 = vadd.f32 %v9560_v34, %v4023_v54  ;;  %8403 = vmatprep.mubr.msk.f32.mxu0 %vm198_vm2, %v4044_v48 }
 0x91c   :  { %8404 = vmatmul.mubr.msk.f32.gmra.mrb[114].mxu0 %vm198_vm2, %v4045_v18  ;;  %v4047_v40 = vmax.f32 %v4029_v29, 0.0 }
 0x91d   :  { %v4046_v33 = vmax.f32 %v4024_v47, 0.0  ;;  %v8395_v55 = vpop.f32.mrb[110].mxu1 }
 0x91e   :  { %v4039_v39 = vadd.f32 %v9560_v34, %v8395_v55  ;;  %v4033_v43 = vpop.f32.mrb[111].mxu1 }
 0x91f   :  { %v4034_v53 = vadd.f32 %v9560_v34, %v4033_v43  ;;  %8406 = vmatprep.mubr.msk.f32.mxu0 %vm198_vm2, %v4046_v33  ;;  %v7239_v34 = vld [vmem:[%s10749_s0 + $0x288] sm:$0xff]  ;;  %v10096_v43 = vld [vmem:[%s10748_s1] sm:$0x1f] }
 0x920   :  { %8407 = vmatmul.mubr.msk.f32.gmra.mrb[116].mxu0 %vm198_vm2, %v4047_v40  ;;  %v4049_v51 = vmax.f32 %v4039_v39, 0.0 }
 0x921   :  { %v4048_v56 = vmax.f32 %v4034_v53, 0.0 }
 0x923   :  { %8409 = vmatprep.mubr.msk.f32.mxu0 %vm198_vm2, %v4048_v56 }
 0x924   :  { %8410 = vmatmul.mubr.msk.f32.gmra.mrb[118].mxu0 %vm198_vm2, %v4049_v51 }
 0x925   :  { %8434 = vmatprep.mubr.msk.f32.mxu0 %vm50_vm1, %v7238_v38 }
 0x928   :  { %8435 = vmatmul.mubr.msk.f32.vlgmr.msra.gmra.mrb[120].mxu0 %vm50_vm1, %v7239_v34 }
 0x929   :  { %8437 = vmatprep.mubr.msk.f32.mxu0 %vm50_vm1, %v7240_v46  ;;  %8859 = vmatpush3.bf16.msra.mxu0 %v9037_v15 }
 0x92a   :  { %8861 = vmatprep.subr.bf16.mxu0 %v9042_v17 }
 0x92c   :  { %8438 = vmatmul.mubr.msk.f32.gmra.mrb[122].mxu0 %vm50_vm1, %v7241_v2 }
 0x92d   :  { %8440 = vmatprep.mubr.msk.f32.mxu0 %vm50_vm1, %v7242_v63  ;;  %8863 = vmatpush3.bf16.msra.mxu0 %v9042_v17 }
 0x92e   :  { %8865 = vmatprep.subr.bf16.mxu0 %v9022_v11 }
 0x930   :  { %8441 = vmatmul.mubr.msk.f32.gmra.mrb[124].mxu0 %vm50_vm1, %v7243_v44 }
 0x931   :  { %8443 = vmatprep.mubr.msk.f32.mxu0 %vm50_vm1, %v7244_v50 }
 0x934   :  { %8444 = vmatmul.mubr.msk.f32.gmra.mrb[126].mxu0 %vm50_vm1, %v7245_v57  ;;  %v10110_v57 = vld [vmem:[%s10752_s2] ss:$0 sm:$0xff] }
 0x9db   :  { %v8372_v58 = vpop.f32.mrb[104].mxu0 }
 0x9dc   :  { %v3855_v13 = vadd.f32 %v9746_v14, %v8372_v58  ;;  %v3849_v59 = vpop.f32.mrb[105].mxu0 }
 0x9dd   :  { %v3850_v8 = vadd.f32 %v9746_v14, %v3849_v59 }
 0x9de   :  { %v3889_v60 = vmax.f32 %v3855_v13, 0.0 }
 0x9df   :  { %v3888_v6 = vmax.f32 %v3850_v8, 0.0  ;;  %v8375_v5 = vpop.f32.mrb[106].mxu0 }
 0x9e0   :  { %v10056_v22 = vmax.f32 %v9950_v31, %v3889_v60  ;;  %v3865_v62 = vadd.f32 %v9746_v14, %v8375_v5  ;;  %v3859_v24 = vpop.f32.mrb[107].mxu0 }
 0x9e1   :  { %v10060_v10 = vmax.f32 %v9954_v0, %v3888_v6  ;;  %v3860_v3 = vadd.f32 %v9746_v14, %v3859_v24 }
 0x9e2   :  { %v3891_v4 = vmax.f32 %v3865_v62, 0.0 }
 0x9e3   :  { %v3890_v27 = vmax.f32 %v3860_v3, 0.0  ;;  %v8378_v16 = vpop.f32.mrb[108].mxu0 }
 0x9e4   :  { %v10064_v9 = vmax.f32 %v9958_v32, %v3891_v4  ;;  %v3875_v12 = vadd.f32 %v9746_v14, %v8378_v16  ;;  %v3869_v23 = vpop.f32.mrb[109].mxu0 }
 0x9e5   :  { %v10068_v31 = vmax.f32 %v9962_v36, %v3890_v27  ;;  %v3870_v49 = vadd.f32 %v9746_v14, %v3869_v23 }
 0x9e6   :  { %v3893_v52 = vmax.f32 %v3875_v12, 0.0 }
 0x9e7   :  { %v3892_v25 = vmax.f32 %v3870_v49, 0.0  ;;  %v8381_v0 = vpop.f32.mrb[110].mxu0 }
 0x9e8   :  { %v10072_v1 = vmax.f32 %v9966_v41, %v3893_v52  ;;  %v3885_v19 = vadd.f32 %v9746_v14, %v8381_v0  ;;  %v3879_v26 = vpop.f32.mrb[111].mxu0 }
 0x9e9   :  { %v10076_v32 = vmax.f32 %v9970_v45, %v3892_v25  ;;  %v3880_v21 = vadd.f32 %v9746_v14, %v3879_v26 }
 0x9ea   :  { %v3895_v35 = vmax.f32 %v3885_v19, 0.0 }
 0x9eb   :  { %v3894_v30 = vmax.f32 %v3880_v21, 0.0  ;;  %v8402_v36 = vpop.f32.mrb[112].mxu0 }
 0x9ec   :  { %v10080_v37 = vmax.f32 %v9974_v7, %v3895_v35  ;;  %v4146_v20 = vadd.f32 %v9651_v42, %v8402_v36  ;;  %v4140_v48 = vpop.f32.mrb[113].mxu0  ;;  %v7271_v35 = vld [vmem:[%s10749_s0 + $0x2c0] sm:$0xff]  ;;  %v7273_v36 = vld [vmem:[%s10749_s0 + $0x2d0] sm:$0xff] }
 0x9ed   :  { %v10084_v41 = vmax.f32 %v9978_v61, %v3894_v30  ;;  %v4141_v28 = vadd.f32 %v9651_v42, %v4140_v48  ;;  %v7272_v30 = vld [vmem:[%s10749_s0 + $0x2c8] sm:$0xff]  ;;  %v7275_v48 = vld [vmem:[%s10749_s0 + $0x2e0] sm:$0xff] }
 0x9ee   :  { %v4180_v45 = vmax.f32 %v4146_v20, 0.0  ;;  %v7274_v20 = vld [vmem:[%s10749_s0 + $0x2d8] sm:$0xff] }
 0x9ef   :  { %v4179_v18 = vmax.f32 %v4141_v28, 0.0  ;;  %v8405_v29 = vpop.f32.mrb[114].mxu0  ;;  %v7276_v28 = vld [vmem:[%s10749_s0 + $0x2e8] sm:$0xff] }
 0x9f0   :  { %v4156_v54 = vadd.f32 %v9651_v42, %v8405_v29  ;;  %v4150_v47 = vpop.f32.mrb[115].mxu0  ;;  %v7278_v29 = vld [vmem:[%s10749_s0 + $0x2f8] sm:$0xff] }
 0x9f1   :  { %v4151_v33 = vadd.f32 %v9651_v42, %v4150_v47  ;;  %8420 = vmatprep.mubr.msk.f32.mxu1 %vm342_vm3, %v4179_v18  ;;  %v7277_v18 = vld [vmem:[%s10749_s0 + $0x2f0] sm:$0xff] }
 0x9f2   :  { %8421 = vmatmul.mubr.msk.f32.vlgmr.msra.gmra.mrb[112].mxu1 %vm342_vm3, %v4180_v45  ;;  %v4182_v61 = vmax.f32 %v4156_v54, 0.0 }
 0x9f3   :  { %v4181_v7 = vmax.f32 %v4151_v33, 0.0  ;;  %8855 = vmatpush3.bf16.msra.mxu1 %v9022_v11  ;;  %v8408_v55 = vpop.f32.mrb[116].mxu0 }
 0x9f4   :  { %v4166_v40 = vadd.f32 %v9651_v42, %v8408_v55  ;;  %v4160_v39 = vpop.f32.mrb[117].mxu0  ;;  %8482 = vmatprep.subr.msk.mxu1 %vm75_vm0, %v10096_v43 }
 0x9f5   :  { %v4161_v53 = vadd.f32 %v9651_v42, %v4160_v39  ;;  %8423 = vmatprep.mubr.msk.f32.mxu1 %vm342_vm3, %v4181_v7 }
 0x9f6   :  { %8424 = vmatmul.mubr.msk.f32.gmra.mrb[114].mxu1 %vm342_vm3, %v4182_v61  ;;  %v4184_v38 = vmax.f32 %v4166_v40, 0.0 }
 0x9f7   :  { %v4183_v56 = vmax.f32 %v4161_v53, 0.0  ;;  %v8411_v51 = vpop.f32.mrb[118].mxu0 }
 0x9f8   :  { %v4176_v34 = vadd.f32 %v9651_v42, %v8411_v51  ;;  %v4170_v46 = vpop.f32.mrb[119].mxu0 }
 0x9f9   :  { %v4171_v2 = vadd.f32 %v9651_v42, %v4170_v46  ;;  %8426 = vmatprep.mubr.msk.f32.mxu1 %vm342_vm3, %v4183_v56 }
 0x9fa   :  { %8427 = vmatmul.mubr.msk.f32.gmra.mrb[116].mxu1 %vm342_vm3, %v4184_v38  ;;  %v4186_v50 = vmax.f32 %v4176_v34, 0.0 }
 0x9fb   :  { %v4185_v63 = vmax.f32 %v4171_v2, 0.0  ;;  %v8436_v44 = vpop.f32.mrb[120].mxu0 }
 0x9fc   :  { %v4437_v58 = vadd.f32 %v10110_v57, %v8436_v44  ;;  %v4431_v13 = vpop.f32.mrb[121].mxu0 }
 0x9fd   :  { %v4432_v59 = vadd.f32 %v10110_v57, %v4431_v13  ;;  %8429 = vmatprep.mubr.msk.f32.mxu1 %vm342_vm3, %v4185_v63 }
 0x9fe   :  { %8430 = vmatmul.mubr.msk.f32.gmra.mrb[118].mxu1 %vm342_vm3, %v4186_v50  ;;  %v4471_v60 = vmax.f32 %v4437_v58, 0.0 }
 0x9ff   :  { %v4470_v42 = vmax.f32 %v4432_v59, 0.0  ;;  %v8439_v8 = vpop.f32.mrb[122].mxu0 }
 0xa00   :  { %v4447_v6 = vadd.f32 %v10110_v57, %v8439_v8  ;;  %v4441_v5 = vpop.f32.mrb[123].mxu0 }
 0xa01   :  { %v4442_v62 = vadd.f32 %v10110_v57, %v4441_v5  ;;  %8450 = vmatprep.mubr.msk.f32.mxu1 %vm198_vm2, %v4470_v42 }
 0xa02   :  { %8451 = vmatmul.mubr.msk.f32.vlgmr.msra.gmra.mrb[120].mxu1 %vm198_vm2, %v4471_v60  ;;  %v4473_v4 = vmax.f32 %v4447_v6, 0.0 }
 0xa03   :  { %v4472_v24 = vmax.f32 %v4442_v62, 0.0  ;;  %8483 = vmatpush3.msk.msra.mxu1 %vm75_vm0, %v10096_v43  ;;  %v8442_v3 = vpop.f32.mrb[124].mxu0 }
 0xa04   :  { %v4457_v27 = vadd.f32 %v10110_v57, %v8442_v3  ;;  %v4451_v16 = vpop.f32.mrb[125].mxu0  ;;  %8869 = vmatprep.subr.bf16.mxu1 %v9037_v15 }
 0xa05   :  { %v4452_v12 = vadd.f32 %v10110_v57, %v4451_v16  ;;  %8453 = vmatprep.mubr.msk.f32.mxu1 %vm198_vm2, %v4472_v24  ;;  %v10201_v24 = vld [vmem:[%s10753_s4] ss:$0 sm:$0xff] }
 0xa06   :  { %8454 = vmatmul.mubr.msk.f32.gmra.mrb[122].mxu1 %vm198_vm2, %v4473_v4  ;;  %v4475_v52 = vmax.f32 %v4457_v27, 0.0 }
 0xa07   :  { %v4474_v23 = vmax.f32 %v4452_v12, 0.0  ;;  %v8445_v49 = vpop.f32.mrb[126].mxu0 }
 0xa08   :  { %v4467_v25 = vadd.f32 %v10110_v57, %v8445_v49  ;;  %v4461_v0 = vpop.f32.mrb[127].mxu0 }
 0xa09   :  { %v4462_v19 = vadd.f32 %v10110_v57, %v4461_v0  ;;  %8456 = vmatprep.mubr.msk.f32.mxu1 %vm198_vm2, %v4474_v23 }
 0xa0a   :  { %8457 = vmatmul.mubr.msk.f32.gmra.mrb[124].mxu1 %vm198_vm2, %v4475_v52  ;;  %v4477_v21 = vmax.f32 %v4467_v25, 0.0 }
 0xa0b   :  { %v4476_v26 = vmax.f32 %v4462_v19, 0.0 }
 0xa0d   :  { %8459 = vmatprep.mubr.msk.f32.mxu1 %vm198_vm2, %v4476_v26 }
 0xa0e   :  { %8460 = vmatmul.mubr.msk.f32.gmra.mrb[126].mxu1 %vm198_vm2, %v4477_v21 }
 0xa0f   :  { %8484 = vmatprep.mubr.msk.f32.mxu1 %vm50_vm1, %v7271_v35 }
 0xa12   :  { %8485 = vmatmul.mubr.msk.f32.vlgmr.msra.gmra.mrb[128].mxu1 %vm50_vm1, %v7272_v30 }
 0xa13   :  { %8487 = vmatprep.mubr.msk.f32.mxu1 %vm50_vm1, %v7273_v36  ;;  %8871 = vmatpush3.bf16.msra.mxu1 %v9037_v15 }
 0xa14   :  { %8873 = vmatprep.subr.bf16.mxu1 %v9042_v17 }
 0xa16   :  { %8488 = vmatmul.mubr.msk.f32.gmra.mrb[130].mxu1 %vm50_vm1, %v7274_v20 }
 0xa17   :  { %8490 = vmatprep.mubr.msk.f32.mxu1 %vm50_vm1, %v7275_v48  ;;  %8875 = vmatpush3.bf16.msra.mxu1 %v9042_v17 }
 0xa18   :  { %8877 = vmatprep.subr.bf16.mxu1 %v9022_v11 }
 0xa1a   :  { %8491 = vmatmul.mubr.msk.f32.gmra.mrb[132].mxu1 %vm50_vm1, %v7276_v28 }
 0xa1b   :  { %8493 = vmatprep.mubr.msk.f32.mxu1 %vm50_vm1, %v7277_v18 }
 0xa1e   :  { %8494 = vmatmul.mubr.msk.f32.gmra.mrb[134].mxu1 %vm50_vm1, %v7278_v29 }
 0xac5   :  { %v8422_v45 = vpop.f32.mrb[112].mxu1 }
 0xac6   :  { %v4283_v54 = vadd.f32 %v9746_v14, %v8422_v45  ;;  %v4277_v47 = vpop.f32.mrb[113].mxu1 }
 0xac7   :  { %v4278_v33 = vadd.f32 %v9746_v14, %v4277_v47 }
 0xac8   :  { %v4317_v7 = vmax.f32 %v4283_v54, 0.0 }
 0xac9   :  { %v4316_v55 = vmax.f32 %v4278_v33, 0.0  ;;  %v8425_v61 = vpop.f32.mrb[114].mxu1 }
 0xaca   :  { %v10172_v40 = vmax.f32 %v10056_v22, %v4317_v7  ;;  %v4293_v39 = vadd.f32 %v9746_v14, %v8425_v61  ;;  %v4287_v53 = vpop.f32.mrb[115].mxu1 }
 0xacb   :  { %v10176_v56 = vmax.f32 %v10060_v10, %v4316_v55  ;;  %v4288_v51 = vadd.f32 %v9746_v14, %v4287_v53 }
 0xacc   :  { %v4319_v38 = vmax.f32 %v4293_v39, 0.0 }
 0xacd   :  { %v4318_v34 = vmax.f32 %v4288_v51, 0.0  ;;  %v8428_v46 = vpop.f32.mrb[116].mxu1 }
 0xace   :  { %v10180_v2 = vmax.f32 %v10064_v9, %v4319_v38  ;;  %v4303_v63 = vadd.f32 %v9746_v14, %v8428_v46  ;;  %v4297_v44 = vpop.f32.mrb[117].mxu1 }
 0xacf   :  { %v10184_v22 = vmax.f32 %v10068_v31, %v4318_v34  ;;  %v4298_v50 = vadd.f32 %v9746_v14, %v4297_v44 }
 0xad0   :  { %v4321_v58 = vmax.f32 %v4303_v63, 0.0 }
 0xad1   :  { %v4320_v13 = vmax.f32 %v4298_v50, 0.0  ;;  %v8431_v10 = vpop.f32.mrb[118].mxu1 }
 0xad2   :  { %v10188_v59 = vmax.f32 %v10072_v1, %v4321_v58  ;;  %v4313_v42 = vadd.f32 %v9746_v14, %v8431_v10  ;;  %v4307_v8 = vpop.f32.mrb[119].mxu1 }
 0xad3   :  { %v10192_v9 = vmax.f32 %v10076_v32, %v4320_v13  ;;  %v4308_v60 = vadd.f32 %v9746_v14, %v4307_v8 }
 0xad4   :  { %v4323_v6 = vmax.f32 %v4313_v42, 0.0 }
 0xad5   :  { %v4322_v5 = vmax.f32 %v4308_v60, 0.0  ;;  %v8452_v31 = vpop.f32.mrb[120].mxu1 }
 0xad6   :  { %v10196_v62 = vmax.f32 %v10080_v37, %v4323_v6  ;;  %v4574_v1 = vadd.f32 %v10201_v24, %v8452_v31  ;;  %v4568_v3 = vpop.f32.mrb[121].mxu1  ;;  %v7304_v6 = vld [vmem:[%s10749_s0 + $0x300] sm:$0xff]  ;;  %v7306_v31 = vld [vmem:[%s10749_s0 + $0x310] sm:$0xff] }
 0xad7   :  { %v10205_v4 = vmax.f32 %v10084_v41, %v4322_v5  ;;  %v4569_v32 = vadd.f32 %v10201_v24, %v4568_v3  ;;  %v7305_v5 = vld [vmem:[%s10749_s0 + $0x308] sm:$0xff]  ;;  %v7308_v3 = vld [vmem:[%s10749_s0 + $0x320] sm:$0xff] }
 0xad8   :  { %v4608_v16 = vmax.f32 %v4574_v1, 0.0  ;;  %v7307_v1 = vld [vmem:[%s10749_s0 + $0x318] sm:$0xff] }
 0xad9   :  { %v4607_v14 = vmax.f32 %v4569_v32, 0.0  ;;  %v8455_v27 = vpop.f32.mrb[122].mxu1  ;;  %v7309_v32 = vld [vmem:[%s10749_s0 + $0x328] sm:$0xff] }
 0xada   :  { %v4584_v12 = vadd.f32 %v10201_v24, %v8455_v27  ;;  %v4578_v37 = vpop.f32.mrb[123].mxu1  ;;  %v7311_v27 = vld [vmem:[%s10749_s0 + $0x338] sm:$0xff] }
 0xadb   :  { %v4579_v23 = vadd.f32 %v10201_v24, %v4578_v37  ;;  %8470 = vmatprep.mubr.msk.f32.mxu0 %vm342_vm3, %v4607_v14  ;;  %v7310_v14 = vld [vmem:[%s10749_s0 + $0x330] sm:$0xff] }
 0xadc   :  { %8471 = vmatmul.mubr.msk.f32.vlgmr.msra.gmra.mrb[128].mxu0 %vm342_vm3, %v4608_v16  ;;  %v4610_v41 = vmax.f32 %v4584_v12, 0.0  ;;  %v10283_v12 = vld [vmem:[%s10754_s6] ss:$0 sm:$0xff] }
 0xadd   :  { %v4609_v49 = vmax.f32 %v4579_v23, 0.0  ;;  %8867 = vmatpush3.bf16.msra.mxu0 %v9022_v11  ;;  %v8458_v52 = vpop.f32.mrb[124].mxu1 }
 0xade   :  { %v4594_v25 = vadd.f32 %v10201_v24, %v8458_v52  ;;  %v4588_v0 = vpop.f32.mrb[125].mxu1  ;;  %8532 = vmatprep.subr.msk.mxu0 %vm75_vm0, %v10096_v43 }
 0xadf   :  { %v4589_v19 = vadd.f32 %v10201_v24, %v4588_v0  ;;  %8473 = vmatprep.mubr.msk.f32.mxu0 %vm342_vm3, %v4609_v49 }
 0xae0   :  { %8474 = vmatmul.mubr.msk.f32.gmra.mrb[130].mxu0 %vm342_vm3, %v4610_v41  ;;  %v4612_v35 = vmax.f32 %v4594_v25, 0.0 }
 0xae1   :  { %v4611_v26 = vmax.f32 %v4589_v19, 0.0  ;;  %v8461_v21 = vpop.f32.mrb[126].mxu1 }
 0xae2   :  { %v4604_v30 = vadd.f32 %v10201_v24, %v8461_v21  ;;  %v4598_v36 = vpop.f32.mrb[127].mxu1 }
 0xae3   :  { %v4599_v20 = vadd.f32 %v10201_v24, %v4598_v36  ;;  %8476 = vmatprep.mubr.msk.f32.mxu0 %vm342_vm3, %v4611_v26 }
 0xae4   :  { %8477 = vmatmul.mubr.msk.f32.gmra.mrb[132].mxu0 %vm342_vm3, %v4612_v35  ;;  %v4614_v18 = vmax.f32 %v4604_v30, 0.0 }
 0xae5   :  { %v4613_v48 = vmax.f32 %v4599_v20, 0.0  ;;  %v8486_v28 = vpop.f32.mrb[128].mxu1 }
 0xae6   :  { %v4865_v29 = vadd.f32 %v10110_v57, %v8486_v28  ;;  %v4859_v45 = vpop.f32.mrb[129].mxu1 }
 0xae7   :  { %v4860_v54 = vadd.f32 %v10110_v57, %v4859_v45  ;;  %8479 = vmatprep.mubr.msk.f32.mxu0 %vm342_vm3, %v4613_v48 }
 0xae8   :  { %8480 = vmatmul.mubr.msk.f32.gmra.mrb[134].mxu0 %vm342_vm3, %v4614_v18  ;;  %v4899_v7 = vmax.f32 %v4865_v29, 0.0 }
 0xae9   :  { %v4898_v47 = vmax.f32 %v4860_v54, 0.0  ;;  %v8489_v33 = vpop.f32.mrb[130].mxu1 }
 0xaea   :  { %v4875_v55 = vadd.f32 %v10110_v57, %v8489_v33  ;;  %v4869_v61 = vpop.f32.mrb[131].mxu1 }
 0xaeb   :  { %v4870_v39 = vadd.f32 %v10110_v57, %v4869_v61  ;;  %8500 = vmatprep.mubr.msk.f32.mxu0 %vm198_vm2, %v4898_v47 }
 0xaec   :  { %8501 = vmatmul.mubr.msk.f32.vlgmr.msra.gmra.mrb[136].mxu0 %vm198_vm2, %v4899_v7  ;;  %v4901_v38 = vmax.f32 %v4875_v55, 0.0 }
 0xaed   :  { %v4900_v53 = vmax.f32 %v4870_v39, 0.0  ;;  %8533 = vmatpush3.msk.msra.mxu0 %vm75_vm0, %v10096_v43  ;;  %v8492_v51 = vpop.f32.mrb[132].mxu1 }
 0xaee   :  { %v4885_v34 = vadd.f32 %v10110_v57, %v8492_v51  ;;  %v4879_v46 = vpop.f32.mrb[133].mxu1  ;;  %8881 = vmatprep.subr.bf16.mxu0 %v9037_v15 }
 0xaef   :  { %v4880_v63 = vadd.f32 %v10110_v57, %v4879_v46  ;;  %8503 = vmatprep.mubr.msk.f32.mxu0 %vm198_vm2, %v4900_v53 }
 0xaf0   :  { %8504 = vmatmul.mubr.msk.f32.gmra.mrb[138].mxu0 %vm198_vm2, %v4901_v38  ;;  %v4903_v58 = vmax.f32 %v4885_v34, 0.0 }
 0xaf1   :  { %v4902_v44 = vmax.f32 %v4880_v63, 0.0  ;;  %v8495_v50 = vpop.f32.mrb[134].mxu1 }
 0xaf2   :  { %v4895_v13 = vadd.f32 %v10110_v57, %v8495_v50  ;;  %v4889_v10 = vpop.f32.mrb[135].mxu1 }
 0xaf3   :  { %v4890_v42 = vadd.f32 %v10110_v57, %v4889_v10  ;;  %8506 = vmatprep.mubr.msk.f32.mxu0 %vm198_vm2, %v4902_v44 }
 0xaf4   :  { %8507 = vmatmul.mubr.msk.f32.gmra.mrb[140].mxu0 %vm198_vm2, %v4903_v58  ;;  %v4905_v60 = vmax.f32 %v4895_v13, 0.0 }
 0xaf5   :  { %v4904_v8 = vmax.f32 %v4890_v42, 0.0 }
 0xaf7   :  { %8509 = vmatprep.mubr.msk.f32.mxu0 %vm198_vm2, %v4904_v8 }
 0xaf8   :  { %8510 = vmatmul.mubr.msk.f32.gmra.mrb[142].mxu0 %vm198_vm2, %v4905_v60 }
 0xaf9   :  { %8534 = vmatprep.mubr.msk.f32.mxu0 %vm50_vm1, %v7304_v6 }
 0xafc   :  { %8535 = vmatmul.mubr.msk.f32.vlgmr.msra.gmra.mrb[144].mxu0 %vm50_vm1, %v7305_v5 }
 0xafd   :  { %8537 = vmatprep.mubr.msk.f32.mxu0 %vm50_vm1, %v7306_v31  ;;  %8883 = vmatpush3.bf16.msra.mxu0 %v9037_v15 }
 0xafe   :  { %8885 = vmatprep.subr.bf16.mxu0 %v9042_v17 }
 0xb00   :  { %8538 = vmatmul.mubr.msk.f32.gmra.mrb[146].mxu0 %vm50_vm1, %v7307_v1 }
 0xb01   :  { %8540 = vmatprep.mubr.msk.f32.mxu0 %vm50_vm1, %v7308_v3  ;;  %8887 = vmatpush3.bf16.msra.mxu0 %v9042_v17 }
 0xb02   :  { %8889 = vmatprep.subr.bf16.mxu0 %v9022_v11 }
 0xb04   :  { %8541 = vmatmul.mubr.msk.f32.gmra.mrb[148].mxu0 %vm50_vm1, %v7309_v32 }
 0xb05   :  { %8543 = vmatprep.mubr.msk.f32.mxu0 %vm50_vm1, %v7310_v14 }
 0xb08   :  { %8544 = vmatmul.mubr.msk.f32.gmra.mrb[150].mxu0 %vm50_vm1, %v7311_v27 }
 0xbaf   :  { %v8472_v16 = vpop.f32.mrb[128].mxu0 }
 0xbb0   :  { %v4711_v37 = vadd.f32 %v10283_v12, %v8472_v16  ;;  %v4705_v23 = vpop.f32.mrb[129].mxu0 }
 0xbb1   :  { %v4706_v49 = vadd.f32 %v10283_v12, %v4705_v23 }
 0xbb2   :  { %v4745_v52 = vmax.f32 %v4711_v37, 0.0 }
 0xbb3   :  { %v4744_v41 = vmax.f32 %v4706_v49, 0.0  ;;  %v8475_v25 = vpop.f32.mrb[130].mxu0 }
 0xbb4   :  { %v10288_v0 = vmax.f32 %v10172_v40, %v4745_v52  ;;  %v4721_v19 = vadd.f32 %v10283_v12, %v8475_v25  ;;  %v4715_v26 = vpop.f32.mrb[131].mxu0 }
 0xbb5   :  { %v10292_v21 = vmax.f32 %v10176_v56, %v4744_v41  ;;  %v4716_v35 = vadd.f32 %v10283_v12, %v4715_v26 }
 0xbb6   :  { %v4747_v30 = vmax.f32 %v4721_v19, 0.0 }
 0xbb7   :  { %v4746_v36 = vmax.f32 %v4716_v35, 0.0  ;;  %v8478_v20 = vpop.f32.mrb[132].mxu0 }
 0xbb8   :  { %v10296_v48 = vmax.f32 %v10180_v2, %v4747_v30  ;;  %v4731_v28 = vadd.f32 %v10283_v12, %v8478_v20  ;;  %v4725_v18 = vpop.f32.mrb[133].mxu0 }
 0xbb9   :  { %v10300_v40 = vmax.f32 %v10184_v22, %v4746_v36  ;;  %v4726_v29 = vadd.f32 %v10283_v12, %v4725_v18 }
 0xbba   :  { %v4749_v45 = vmax.f32 %v4731_v28, 0.0 }
 0xbbb   :  { %v4748_v54 = vmax.f32 %v4726_v29, 0.0  ;;  %v8481_v56 = vpop.f32.mrb[134].mxu0 }
 0xbbc   :  { %v10304_v47 = vmax.f32 %v10188_v59, %v4749_v45  ;;  %v4741_v33 = vadd.f32 %v10283_v12, %v8481_v56  ;;  %v4735_v7 = vpop.f32.mrb[135].mxu0 }
 0xbbd   :  { %v10308_v2 = vmax.f32 %v10192_v9, %v4748_v54  ;;  %v4736_v55 = vadd.f32 %v10283_v12, %v4735_v7 }
 0xbbe   :  { %v4751_v61 = vmax.f32 %v4741_v33, 0.0 }
 0xbbf   :  { %v4750_v39 = vmax.f32 %v4736_v55, 0.0  ;;  %v8502_v22 = vpop.f32.mrb[136].mxu0 }
 0xbc0   :  { %v10312_v53 = vmax.f32 %v10196_v62, %v4751_v61  ;;  %v5002_v51 = vadd.f32 %v10201_v24, %v8502_v22  ;;  %v4996_v38 = vpop.f32.mrb[137].mxu0  ;;  %v7338_v22 = vld [vmem:[%s10749_s0 + $0x348] sm:$0xff] }
 0xbc1   :  { %v10316_v59 = vmax.f32 %v10205_v4, %v4750_v39  ;;  %v4997_v34 = vadd.f32 %v10201_v24, %v4996_v38  ;;  %v7337_v39 = vld [vmem:[%s10749_s0 + $0x340] sm:$0xff]  ;;  %v7340_v38 = vld [vmem:[%s10749_s0 + $0x358] sm:$0xff] }
 0xbc2   :  { %v5036_v9 = vmax.f32 %v5002_v51, 0.0  ;;  %v7339_v51 = vld [vmem:[%s10749_s0 + $0x350] sm:$0xff] }
 0xbc3   :  { %v5035_v46 = vmax.f32 %v4997_v34, 0.0  ;;  %v8505_v63 = vpop.f32.mrb[138].mxu0  ;;  %v7341_v34 = vld [vmem:[%s10749_s0 + $0x360] sm:$0xff] }
 0xbc4   :  { %v5012_v44 = vadd.f32 %v10201_v24, %v8505_v63  ;;  %v5006_v50 = vpop.f32.mrb[139].mxu0  ;;  %v7343_v63 = vld [vmem:[%s10749_s0 + $0x370] sm:$0xff] }
 0xbc5   :  { %v5007_v58 = vadd.f32 %v10201_v24, %v5006_v50  ;;  %8520 = vmatprep.mubr.msk.f32.mxu1 %vm342_vm3, %v5035_v46  ;;  %v7342_v46 = vld [vmem:[%s10749_s0 + $0x368] sm:$0xff] }
 0xbc6   :  { %8521 = vmatmul.mubr.msk.f32.vlgmr.msra.gmra.mrb[136].mxu1 %vm342_vm3, %v5036_v9  ;;  %v5038_v4 = vmax.f32 %v5012_v44, 0.0  ;;  %v7344_v9 = vld [vmem:[%s10749_s0 + $0x378] sm:$0xff] }
 0xbc7   :  { %v5037_v62 = vmax.f32 %v5007_v58, 0.0  ;;  %8879 = vmatpush3.bf16.msra.mxu1 %v9022_v11  ;;  %v8508_v13 = vpop.f32.mrb[140].mxu0 }
 0xbc8   :  { %v5022_v10 = vadd.f32 %v10201_v24, %v8508_v13  ;;  %v5016_v42 = vpop.f32.mrb[141].mxu0  ;;  %8582 = vmatprep.subr.msk.mxu1 %vm75_vm0, %v10096_v43 }
 0xbc9   :  { %v5017_v8 = vadd.f32 %v10201_v24, %v5016_v42  ;;  %8523 = vmatprep.mubr.msk.f32.mxu1 %vm342_vm3, %v5037_v62 }
 0xbca   :  { %8524 = vmatmul.mubr.msk.f32.gmra.mrb[138].mxu1 %vm342_vm3, %v5038_v4  ;;  %v5040_v5 = vmax.f32 %v5022_v10, 0.0 }
 0xbcb   :  { %v5039_v60 = vmax.f32 %v5017_v8, 0.0  ;;  %v8511_v6 = vpop.f32.mrb[142].mxu0 }
 0xbcc   :  { %v5032_v31 = vadd.f32 %v10201_v24, %v8511_v6  ;;  %v5026_v1 = vpop.f32.mrb[143].mxu0 }
 0xbcd   :  { %v5027_v3 = vadd.f32 %v10201_v24, %v5026_v1  ;;  %8526 = vmatprep.mubr.msk.f32.mxu1 %vm342_vm3, %v5039_v60 }
 0xbce   :  { %8527 = vmatmul.mubr.msk.f32.gmra.mrb[140].mxu1 %vm342_vm3, %v5040_v5  ;;  %v5042_v27 = vmax.f32 %v5032_v31, 0.0 }
 0xbcf   :  { %v5041_v32 = vmax.f32 %v5027_v3, 0.0  ;;  %v8536_v14 = vpop.f32.mrb[144].mxu0 }
 0xbd0   :  { %v5293_v16 = vadd.f32 %v10110_v57, %v8536_v14  ;;  %v5287_v37 = vpop.f32.mrb[145].mxu0 }
 0xbd1   :  { %v5288_v23 = vadd.f32 %v10110_v57, %v5287_v37  ;;  %8529 = vmatprep.mubr.msk.f32.mxu1 %vm342_vm3, %v5041_v32 }
 0xbd2   :  { %8530 = vmatmul.mubr.msk.f32.gmra.mrb[142].mxu1 %vm342_vm3, %v5042_v27  ;;  %v5327_v41 = vmax.f32 %v5293_v16, 0.0 }
 0xbd3   :  { %v5326_v49 = vmax.f32 %v5288_v23, 0.0  ;;  %v8539_v52 = vpop.f32.mrb[146].mxu0 }
 0xbd4   :  { %v5303_v25 = vadd.f32 %v10110_v57, %v8539_v52  ;;  %v5297_v19 = vpop.f32.mrb[147].mxu0 }
 0xbd5   :  { %v5298_v26 = vadd.f32 %v10110_v57, %v5297_v19  ;;  %8550 = vmatprep.mubr.msk.f32.mxu1 %vm198_vm2, %v5326_v49 }
 0xbd6   :  { %8551 = vmatmul.mubr.msk.f32.vlgmr.msra.gmra.mrb[144].mxu1 %vm198_vm2, %v5327_v41  ;;  %v5329_v36 = vmax.f32 %v5303_v25, 0.0 }
 0xbd7   :  { %v5328_v35 = vmax.f32 %v5298_v26, 0.0  ;;  %8583 = vmatpush3.msk.msra.mxu1 %vm75_vm0, %v10096_v43  ;;  %v8542_v30 = vpop.f32.mrb[148].mxu0 }
 0xbd8   :  { %v5313_v20 = vadd.f32 %v10110_v57, %v8542_v30  ;;  %v5307_v28 = vpop.f32.mrb[149].mxu0  ;;  %8893 = vmatprep.subr.bf16.mxu1 %v9037_v15 }
 0xbd9   :  { %v5308_v18 = vadd.f32 %v10110_v57, %v5307_v28  ;;  %8553 = vmatprep.mubr.msk.f32.mxu1 %vm198_vm2, %v5328_v35 }
 0xbda   :  { %8554 = vmatmul.mubr.msk.f32.gmra.mrb[146].mxu1 %vm198_vm2, %v5329_v36  ;;  %v5331_v54 = vmax.f32 %v5313_v20, 0.0 }
 0xbdb   :  { %v5330_v29 = vmax.f32 %v5308_v18, 0.0  ;;  %v8545_v45 = vpop.f32.mrb[150].mxu0 }
 0xbdc   :  { %v5323_v56 = vadd.f32 %v10110_v57, %v8545_v45  ;;  %v5317_v33 = vpop.f32.mrb[151].mxu0 }
 0xbdd   :  { %v5318_v7 = vadd.f32 %v10110_v57, %v5317_v33  ;;  %8556 = vmatprep.mubr.msk.f32.mxu1 %vm198_vm2, %v5330_v29 }
 0xbde   :  { %8557 = vmatmul.mubr.msk.f32.gmra.mrb[148].mxu1 %vm198_vm2, %v5331_v54  ;;  %v5333_v61 = vmax.f32 %v5323_v56, 0.0 }
 0xbdf   :  { %v5332_v55 = vmax.f32 %v5318_v7, 0.0 }
 0xbe1   :  { %8559 = vmatprep.mubr.msk.f32.mxu1 %vm198_vm2, %v5332_v55 }
 0xbe2   :  { %8560 = vmatmul.mubr.msk.f32.gmra.mrb[150].mxu1 %vm198_vm2, %v5333_v61 }
 0xbe3   :  { %8584 = vmatprep.mubr.msk.f32.mxu1 %vm50_vm1, %v7337_v39 }
 0xbe6   :  { %8585 = vmatmul.mubr.msk.f32.vlgmr.msra.gmra.mrb[152].mxu1 %vm50_vm1, %v7338_v22 }
 0xbe7   :  { %8587 = vmatprep.mubr.msk.f32.mxu1 %vm50_vm1, %v7339_v51  ;;  %8895 = vmatpush3.bf16.msra.mxu1 %v9037_v15 }
 0xbe8   :  { %8897 = vmatprep.subr.bf16.mxu1 %v9042_v17 }
 0xbea   :  { %8588 = vmatmul.mubr.msk.f32.gmra.mrb[154].mxu1 %vm50_vm1, %v7340_v38 }
 0xbeb   :  { %8590 = vmatprep.mubr.msk.f32.mxu1 %vm50_vm1, %v7341_v34  ;;  %8899 = vmatpush3.bf16.msra.mxu1 %v9042_v17 }
 0xbec   :  { %8901 = vmatprep.subr.bf16.mxu1 %v9022_v11 }
 0xbee   :  { %8591 = vmatmul.mubr.msk.f32.gmra.mrb[156].mxu1 %vm50_vm1, %v7342_v46 }
 0xbef   :  { %8593 = vmatprep.mubr.msk.f32.mxu1 %vm50_vm1, %v7343_v63 }
 0xbf2   :  { %8594 = vmatmul.mubr.msk.f32.gmra.mrb[158].mxu1 %vm50_vm1, %v7344_v9 }
 0xc99   :  { %v8522_v44 = vpop.f32.mrb[136].mxu1 }
 0xc9a   :  { %v5139_v50 = vadd.f32 %v10283_v12, %v8522_v44  ;;  %v5133_v58 = vpop.f32.mrb[137].mxu1 }
 0xc9b   :  { %v5134_v62 = vadd.f32 %v10283_v12, %v5133_v58 }
 0xc9c   :  { %v5173_v13 = vmax.f32 %v5139_v50, 0.0 }
 0xc9d   :  { %v5172_v4 = vmax.f32 %v5134_v62, 0.0  ;;  %v8525_v10 = vpop.f32.mrb[138].mxu1 }
 0xc9e   :  { %v10394_v42 = vmax.f32 %v10288_v0, %v5173_v13  ;;  %v5149_v8 = vadd.f32 %v10283_v12, %v8525_v10  ;;  %v5143_v60 = vpop.f32.mrb[139].mxu1 }
 0xc9f   :  { %v10398_v6 = vmax.f32 %v10292_v21, %v5172_v4  ;;  %v5144_v5 = vadd.f32 %v10283_v12, %v5143_v60 }
 0xca0   :  { %v5175_v31 = vmax.f32 %v5149_v8, 0.0 }
 0xca1   :  { %v5174_v1 = vmax.f32 %v5144_v5, 0.0  ;;  %v8528_v3 = vpop.f32.mrb[140].mxu1 }
 0xca2   :  { %v10402_v32 = vmax.f32 %v10296_v48, %v5175_v31  ;;  %v5159_v14 = vadd.f32 %v10283_v12, %v8528_v3  ;;  %v5153_v27 = vpop.f32.mrb[141].mxu1 }
 0xca3   :  { %v10406_v0 = vmax.f32 %v10300_v40, %v5174_v1  ;;  %v5154_v16 = vadd.f32 %v10283_v12, %v5153_v27 }
 0xca4   :  { %v5177_v37 = vmax.f32 %v5159_v14, 0.0 }
 0xca5   :  { %v5176_v23 = vmax.f32 %v5154_v16, 0.0  ;;  %v8531_v21 = vpop.f32.mrb[142].mxu1 }
 0xca6   :  { %v10410_v49 = vmax.f32 %v10304_v47, %v5177_v37  ;;  %v5169_v52 = vadd.f32 %v10283_v12, %v8531_v21  ;;  %v5163_v41 = vpop.f32.mrb[143].mxu1 }
 0xca7   :  { %v10414_v48 = vmax.f32 %v10308_v2, %v5176_v23  ;;  %v5164_v25 = vadd.f32 %v10283_v12, %v5163_v41 }
 0xca8   :  { %v5179_v19 = vmax.f32 %v5169_v52, 0.0 }
 0xca9   :  { %v5178_v26 = vmax.f32 %v5164_v25, 0.0  ;;  %v8552_v40 = vpop.f32.mrb[144].mxu1 }
 0xcaa   :  { %v10418_v35 = vmax.f32 %v10312_v53, %v5179_v19  ;;  %v5430_v30 = vadd.f32 %v10201_v24, %v8552_v40  ;;  %v5424_v36 = vpop.f32.mrb[145].mxu1  ;;  %v7371_v40 = vld [vmem:[%s10749_s0 + $0x388] sm:$0xff] }
 0xcab   :  { %v10422_v47 = vmax.f32 %v10316_v59, %v5178_v26  ;;  %v5425_v20 = vadd.f32 %v10201_v24, %v5424_v36  ;;  %v7370_v26 = vld [vmem:[%s10749_s0 + $0x380] sm:$0xff]  ;;  %v7373_v36 = vld [vmem:[%s10749_s0 + $0x398] sm:$0xff] }
 0xcac   :  { %v5464_v2 = vmax.f32 %v5430_v30, 0.0  ;;  %v7372_v30 = vld [vmem:[%s10749_s0 + $0x390] sm:$0xff] }
 0xcad   :  { %v5463_v28 = vmax.f32 %v5425_v20, 0.0  ;;  %v8555_v18 = vpop.f32.mrb[146].mxu1  ;;  %v7374_v20 = vld [vmem:[%s10749_s0 + $0x3a0] sm:$0xff] }
 0xcae   :  { %v5440_v29 = vadd.f32 %v10201_v24, %v8555_v18  ;;  %v5434_v45 = vpop.f32.mrb[147].mxu1  ;;  %v7376_v18 = vld [vmem:[%s10749_s0 + $0x3b0] sm:$0xff] }
 0xcaf   :  { %v5435_v54 = vadd.f32 %v10201_v24, %v5434_v45  ;;  %8570 = vmatprep.mubr.msk.f32.mxu0 %vm342_vm3, %v5463_v28  ;;  %v7375_v28 = vld [vmem:[%s10749_s0 + $0x3a8] sm:$0xff] }
 0xcb0   :  { %8571 = vmatmul.mubr.msk.f32.vlgmr.msra.gmra.mrb[152].mxu0 %vm342_vm3, %v5464_v2  ;;  %v5466_v59 = vmax.f32 %v5440_v29, 0.0  ;;  %v7377_v2 = vld [vmem:[%s10749_s0 + $0x3b8] sm:$0xff] }
 0xcb1   :  { %v5465_v53 = vmax.f32 %v5435_v54, 0.0  ;;  %8891 = vmatpush3.bf16.msra.mxu0 %v9022_v11  ;;  %v8558_v56 = vpop.f32.mrb[148].mxu1 }
 0xcb2   :  { %v5450_v33 = vadd.f32 %v10201_v24, %v8558_v56  ;;  %v5444_v7 = vpop.f32.mrb[149].mxu1  ;;  %8632 = vmatprep.subr.msk.mxu0 %vm75_vm0, %v10096_v43 }
 0xcb3   :  { %v5445_v55 = vadd.f32 %v10201_v24, %v5444_v7  ;;  %8573 = vmatprep.mubr.msk.f32.mxu0 %vm342_vm3, %v5465_v53 }
 0xcb4   :  { %8574 = vmatmul.mubr.msk.f32.gmra.mrb[154].mxu0 %vm342_vm3, %v5466_v59  ;;  %v5468_v22 = vmax.f32 %v5450_v33, 0.0 }
 0xcb5   :  { %v5467_v61 = vmax.f32 %v5445_v55, 0.0  ;;  %v8561_v39 = vpop.f32.mrb[150].mxu1 }
 0xcb6   :  { %v5460_v51 = vadd.f32 %v10201_v24, %v8561_v39  ;;  %v5454_v38 = vpop.f32.mrb[151].mxu1 }
 0xcb7   :  { %v5455_v34 = vadd.f32 %v10201_v24, %v5454_v38  ;;  %8576 = vmatprep.mubr.msk.f32.mxu0 %vm342_vm3, %v5467_v61 }
 0xcb8   :  { %8577 = vmatmul.mubr.msk.f32.gmra.mrb[156].mxu0 %vm342_vm3, %v5468_v22  ;;  %v5470_v9 = vmax.f32 %v5460_v51, 0.0 }
 0xcb9   :  { %v5469_v46 = vmax.f32 %v5455_v34, 0.0  ;;  %v8586_v63 = vpop.f32.mrb[152].mxu1 }
 0xcba   :  { %v5721_v44 = vadd.f32 %v10110_v57, %v8586_v63  ;;  %v5715_v50 = vpop.f32.mrb[153].mxu1 }
 0xcbb   :  { %v5716_v58 = vadd.f32 %v10110_v57, %v5715_v50  ;;  %8579 = vmatprep.mubr.msk.f32.mxu0 %vm342_vm3, %v5469_v46 }
 0xcbc   :  { %8580 = vmatmul.mubr.msk.f32.gmra.mrb[158].mxu0 %vm342_vm3, %v5470_v9  ;;  %v5755_v4 = vmax.f32 %v5721_v44, 0.0 }
 0xcbd   :  { %v5754_v62 = vmax.f32 %v5716_v58, 0.0  ;;  %v8589_v13 = vpop.f32.mrb[154].mxu1 }
 0xcbe   :  { %v5731_v10 = vadd.f32 %v10110_v57, %v8589_v13  ;;  %v5725_v8 = vpop.f32.mrb[155].mxu1 }
 0xcbf   :  { %v5726_v60 = vadd.f32 %v10110_v57, %v5725_v8  ;;  %8600 = vmatprep.mubr.msk.f32.mxu0 %vm198_vm2, %v5754_v62 }
 0xcc0   :  { %8601 = vmatmul.mubr.msk.f32.vlgmr.msra.gmra.mrb[160].mxu0 %vm198_vm2, %v5755_v4  ;;  %v5757_v1 = vmax.f32 %v5731_v10, 0.0 }
 0xcc1   :  { %v5756_v5 = vmax.f32 %v5726_v60, 0.0  ;;  %8633 = vmatpush3.msk.msra.mxu0 %vm75_vm0, %v10096_v43  ;;  %v8592_v31 = vpop.f32.mrb[156].mxu1 }
 0xcc2   :  { %v5741_v3 = vadd.f32 %v10110_v57, %v8592_v31  ;;  %v5735_v14 = vpop.f32.mrb[157].mxu1  ;;  %8905 = vmatprep.subr.bf16.mxu0 %v9037_v15 }
 0xcc3   :  { %v5736_v27 = vadd.f32 %v10110_v57, %v5735_v14  ;;  %8603 = vmatprep.mubr.msk.f32.mxu0 %vm198_vm2, %v5756_v5 }
 0xcc4   :  { %8604 = vmatmul.mubr.msk.f32.gmra.mrb[162].mxu0 %vm198_vm2, %v5757_v1  ;;  %v5759_v23 = vmax.f32 %v5741_v3, 0.0 }
 0xcc5   :  { %v5758_v16 = vmax.f32 %v5736_v27, 0.0  ;;  %v8595_v37 = vpop.f32.mrb[158].mxu1 }
 0xcc6   :  { %v5751_v21 = vadd.f32 %v10110_v57, %v8595_v37  ;;  %v5745_v52 = vpop.f32.mrb[159].mxu1 }
 0xcc7   :  { %v5746_v41 = vadd.f32 %v10110_v57, %v5745_v52  ;;  %8606 = vmatprep.mubr.msk.f32.mxu0 %vm198_vm2, %v5758_v16 }
 0xcc8   :  { %8607 = vmatmul.mubr.msk.f32.gmra.mrb[164].mxu0 %vm198_vm2, %v5759_v23  ;;  %v5761_v19 = vmax.f32 %v5751_v21, 0.0 }
 0xcc9   :  { %v5760_v25 = vmax.f32 %v5746_v41, 0.0 }
 0xccb   :  { %8609 = vmatprep.mubr.msk.f32.mxu0 %vm198_vm2, %v5760_v25 }
 0xccc   :  { %8610 = vmatmul.mubr.msk.f32.gmra.mrb[166].mxu0 %vm198_vm2, %v5761_v19 }
 0xccd   :  { %8634 = vmatprep.mubr.msk.f32.mxu0 %vm50_vm1, %v7370_v26 }
 0xcd0   :  { %8635 = vmatmul.mubr.msk.f32.vlgmr.msra.gmra.mrb[168].mxu0 %vm50_vm1, %v7371_v40 }
 0xcd1   :  { %8637 = vmatprep.mubr.msk.f32.mxu0 %vm50_vm1, %v7372_v30  ;;  %8907 = vmatpush3.bf16.msra.mxu0 %v9037_v15 }
 0xcd2   :  { %8909 = vmatprep.subr.bf16.mxu0 %v9042_v17 }
 0xcd4   :  { %8638 = vmatmul.mubr.msk.f32.gmra.mrb[170].mxu0 %vm50_vm1, %v7373_v36 }
 0xcd5   :  { %8640 = vmatprep.mubr.msk.f32.mxu0 %vm50_vm1, %v7374_v20  ;;  %8911 = vmatpush3.bf16.msra.mxu0 %v9042_v17 }
 0xcd6   :  { %8913 = vmatprep.subr.bf16.mxu0 %v9022_v11 }
 0xcd8   :  { %8641 = vmatmul.mubr.msk.f32.gmra.mrb[172].mxu0 %vm50_vm1, %v7375_v28 }
 0xcd9   :  { %8643 = vmatprep.mubr.msk.f32.mxu0 %vm50_vm1, %v7376_v18 }
 0xcdc   :  { %8644 = vmatmul.mubr.msk.f32.gmra.mrb[174].mxu0 %vm50_vm1, %v7377_v2 }
 0xd83   :  { %v8572_v29 = vpop.f32.mrb[152].mxu0 }
 0xd84   :  { %v5567_v45 = vadd.f32 %v10283_v12, %v8572_v29  ;;  %v5561_v54 = vpop.f32.mrb[153].mxu0 }
 0xd85   :  { %v5562_v53 = vadd.f32 %v10283_v12, %v5561_v54 }
 0xd86   :  { %v5601_v56 = vmax.f32 %v5567_v45, 0.0 }
 0xd87   :  { %v5600_v59 = vmax.f32 %v5562_v53, 0.0  ;;  %v8575_v33 = vpop.f32.mrb[154].mxu0 }
 0xd88   :  { %v10500_v7 = vmax.f32 %v10394_v42, %v5601_v56  ;;  %v5577_v55 = vadd.f32 %v10283_v12, %v8575_v33  ;;  %v5571_v61 = vpop.f32.mrb[155].mxu0 }
 0xd89   :  { %v10504_v39 = vmax.f32 %v10398_v6, %v5600_v59  ;;  %v5572_v22 = vadd.f32 %v10283_v12, %v5571_v61 }
 0xd8a   :  { %v5603_v51 = vmax.f32 %v5577_v55, 0.0 }
 0xd8b   :  { %v5602_v38 = vmax.f32 %v5572_v22, 0.0  ;;  %v8578_v34 = vpop.f32.mrb[156].mxu0 }
 0xd8c   :  { %v10508_v46 = vmax.f32 %v10402_v32, %v5603_v51  ;;  %v5587_v63 = vadd.f32 %v10283_v12, %v8578_v34  ;;  %v5581_v9 = vpop.f32.mrb[157].mxu0 }
 0xd8d   :  { %v10512_v42 = vmax.f32 %v10406_v0, %v5602_v38  ;;  %v5582_v44 = vadd.f32 %v10283_v12, %v5581_v9 }
 0xd8e   :  { %v5605_v50 = vmax.f32 %v5587_v63, 0.0 }
 0xd8f   :  { %v5604_v58 = vmax.f32 %v5582_v44, 0.0  ;;  %v8581_v6 = vpop.f32.mrb[158].mxu0 }
 0xd90   :  { %v10516_v62 = vmax.f32 %v10410_v49, %v5605_v50  ;;  %v5597_v13 = vadd.f32 %v10283_v12, %v8581_v6  ;;  %v5591_v4 = vpop.f32.mrb[159].mxu0 }
 0xd91   :  { %v10520_v32 = vmax.f32 %v10414_v48, %v5604_v58  ;;  %v5592_v10 = vadd.f32 %v10283_v12, %v5591_v4 }
 0xd92   :  { %v5607_v8 = vmax.f32 %v5597_v13, 0.0 }
 0xd93   :  { %v5606_v60 = vmax.f32 %v5592_v10, 0.0  ;;  %v8602_v0 = vpop.f32.mrb[160].mxu0 }
 0xd94   :  { %v10524_v5 = vmax.f32 %v10418_v35, %v5607_v8  ;;  %v5858_v31 = vadd.f32 %v10201_v24, %v8602_v0  ;;  %v5852_v1 = vpop.f32.mrb[161].mxu0  ;;  %v7403_v8 = vld [vmem:[%s10749_s0 + $0x3c0] sm:$0xff]  ;;  %v7406_v0 = vld [vmem:[%s10749_s0 + $0x3d8] sm:$0xff] }
 0xd95   :  { %v10528_v49 = vmax.f32 %v10422_v47, %v5606_v60  ;;  %v5853_v3 = vadd.f32 %v10201_v24, %v5852_v1  ;;  %v7405_v60 = vld [vmem:[%s10749_s0 + $0x3d0] sm:$0xff]  ;;  %v7408_v1 = vld [vmem:[%s10749_s0 + $0x3e8] sm:$0xff] }
 0xd96   :  { %v5892_v48 = vmax.f32 %v5858_v31, 0.0  ;;  %v7407_v31 = vld [vmem:[%s10749_s0 + $0x3e0] sm:$0xff] }
 0xd97   :  { %v5891_v14 = vmax.f32 %v5853_v3, 0.0  ;;  %v8605_v27 = vpop.f32.mrb[162].mxu0  ;;  %v7410_v3 = vld [vmem:[%s10749_s0 + $0x3f8] sm:$0xff] }
 0xd98   :  { %v5868_v16 = vadd.f32 %v10201_v24, %v8605_v27  ;;  %v5862_v37 = vpop.f32.mrb[163].mxu0 }
 0xd99   :  { %v5863_v23 = vadd.f32 %v10201_v24, %v5862_v37  ;;  %8620 = vmatprep.mubr.msk.f32.mxu1 %vm342_vm3, %v5891_v14 }
 0xd9a   :  { %8621 = vmatmul.mubr.msk.f32.vlgmr.msra.gmra.mrb[160].mxu1 %vm342_vm3, %v5892_v48  ;;  %v5894_v47 = vmax.f32 %v5868_v16, 0.0 }
 0xd9b   :  { %v5893_v35 = vmax.f32 %v5863_v23, 0.0  ;;  %8903 = vmatpush3.bf16.msra.mxu1 %v9022_v11  ;;  %v8608_v21 = vpop.f32.mrb[164].mxu0 }
 0xd9c   :  { %v5878_v52 = vadd.f32 %v10201_v24, %v8608_v21  ;;  %v5872_v41 = vpop.f32.mrb[165].mxu0  ;;  %8682 = vmatprep.subr.msk.mxu1 %vm75_vm0, %v10096_v43 }
 0xd9d   :  { %v5873_v25 = vadd.f32 %v10201_v24, %v5872_v41  ;;  %8623 = vmatprep.mubr.msk.f32.mxu1 %vm342_vm3, %v5893_v35 }
 0xd9e   :  { %8624 = vmatmul.mubr.msk.f32.gmra.mrb[162].mxu1 %vm342_vm3, %v5894_v47  ;;  %v5896_v40 = vmax.f32 %v5878_v52, 0.0 }
 0xd9f   :  { %v5895_v19 = vmax.f32 %v5873_v25, 0.0  ;;  %v8611_v26 = vpop.f32.mrb[166].mxu0 }
 0xda0   :  { %v5888_v30 = vadd.f32 %v10201_v24, %v8611_v26  ;;  %v5882_v36 = vpop.f32.mrb[167].mxu0 }
 0xda1   :  { %v5883_v20 = vadd.f32 %v10201_v24, %v5882_v36  ;;  %8626 = vmatprep.mubr.msk.f32.mxu1 %vm342_vm3, %v5895_v19 }
 0xda2   :  { %8627 = vmatmul.mubr.msk.f32.gmra.mrb[164].mxu1 %vm342_vm3, %v5896_v40  ;;  %v5898_v2 = vmax.f32 %v5888_v30, 0.0 }
 0xda3   :  { %v5897_v28 = vmax.f32 %v5883_v20, 0.0  ;;  %v8636_v18 = vpop.f32.mrb[168].mxu0 }
 0xda4   :  { %v6149_v29 = vadd.f32 %v10110_v57, %v8636_v18  ;;  %v6143_v45 = vpop.f32.mrb[169].mxu0 }
 0xda5   :  { %v6144_v54 = vadd.f32 %v10110_v57, %v6143_v45  ;;  %8629 = vmatprep.mubr.msk.f32.mxu1 %vm342_vm3, %v5897_v28 }
 0xda6   :  { %8630 = vmatmul.mubr.msk.f32.gmra.mrb[166].mxu1 %vm342_vm3, %v5898_v2  ;;  %v6183_v59 = vmax.f32 %v6149_v29, 0.0 }
 0xda7   :  { %v6182_v53 = vmax.f32 %v6144_v54, 0.0  ;;  %v8639_v56 = vpop.f32.mrb[170].mxu0 }
 0xda8   :  { %v6159_v33 = vadd.f32 %v10110_v57, %v8639_v56  ;;  %v6153_v55 = vpop.f32.mrb[171].mxu0 }
 0xda9   :  { %v6154_v61 = vadd.f32 %v10110_v57, %v6153_v55  ;;  %8650 = vmatprep.mubr.msk.f32.mxu1 %vm198_vm2, %v6182_v53 }
 0xdaa   :  { %8651 = vmatmul.mubr.msk.f32.vlgmr.msra.gmra.mrb[168].mxu1 %vm198_vm2, %v6183_v59  ;;  %v6185_v38 = vmax.f32 %v6159_v33, 0.0 }
 0xdab   :  { %v6184_v22 = vmax.f32 %v6154_v61, 0.0  ;;  %8683 = vmatpush3.msk.msra.mxu1 %vm75_vm0, %v10096_v43  ;;  %v8642_v51 = vpop.f32.mrb[172].mxu0 }
 0xdac   :  { %v6169_v34 = vadd.f32 %v10110_v57, %v8642_v51  ;;  %v6163_v63 = vpop.f32.mrb[173].mxu0  ;;  %8917 = vmatprep.subr.bf16.mxu1 %v9037_v15 }
 0xdad   :  { %v6164_v9 = vadd.f32 %v10110_v57, %v6163_v63  ;;  %8653 = vmatprep.mubr.msk.f32.mxu1 %vm198_vm2, %v6184_v22 }
 0xdae   :  { %8654 = vmatmul.mubr.msk.f32.gmra.mrb[170].mxu1 %vm198_vm2, %v6185_v38  ;;  %v6187_v58 = vmax.f32 %v6169_v34, 0.0 }
 0xdaf   :  { %v6186_v44 = vmax.f32 %v6164_v9, 0.0  ;;  %v8645_v50 = vpop.f32.mrb[174].mxu0 }
 0xdb0   :  { %v6179_v6 = vadd.f32 %v10110_v57, %v8645_v50  ;;  %v6173_v13 = vpop.f32.mrb[175].mxu0 }
 0xdb1   :  { %v6174_v43 = vadd.f32 %v10110_v57, %v6173_v13  ;;  %8656 = vmatprep.mubr.msk.f32.mxu1 %vm198_vm2, %v6186_v44  ;;  %v7404_v57 = vld [vmem:[%s10749_s0 + $0x3c8] sm:$0xff] }
 0xdb2   :  { %8657 = vmatmul.mubr.msk.f32.gmra.mrb[172].mxu1 %vm198_vm2, %v6187_v58  ;;  %v6189_v10 = vmax.f32 %v6179_v6, 0.0 }
 0xdb3   :  { %v6188_v4 = vmax.f32 %v6174_v43, 0.0 }
 0xdb5   :  { %8659 = vmatprep.mubr.msk.f32.mxu1 %vm198_vm2, %v6188_v4 }
 0xdb6   :  { %8660 = vmatmul.mubr.msk.f32.gmra.mrb[174].mxu1 %vm198_vm2, %v6189_v10 }
 0xdb7   :  { %8684 = vmatprep.mubr.msk.f32.mxu1 %vm50_vm1, %v7403_v8 }
 0xdba   :  { %8685 = vmatmul.mubr.msk.f32.vlgmr.msra.gmra.mrb[176].mxu1 %vm50_vm1, %v7404_v57 }
 0xdbb   :  { %8687 = vmatprep.mubr.msk.f32.mxu1 %vm50_vm1, %v7405_v60  ;;  %8919 = vmatpush3.bf16.msra.mxu1 %v9037_v15  ;;  %v7409_v15 = vld [vmem:[%s10749_s0 + $0x3f0] sm:$0xff] }
 0xdbc   :  { %8921 = vmatprep.subr.bf16.mxu1 %v9042_v17 }
 0xdbe   :  { %8688 = vmatmul.mubr.msk.f32.gmra.mrb[178].mxu1 %vm50_vm1, %v7406_v0  ;;  %v8932_v0 = vld [vmem:[%s10752_s2] ss:$0 sm:$0xff] }
 0xdbf   :  { %8690 = vmatprep.mubr.msk.f32.mxu1 %vm50_vm1, %v7407_v31  ;;  %8923 = vmatpush3.bf16.msra.mxu1 %v9042_v17 }
 0xdc2   :  { %8691 = vmatmul.mubr.msk.f32.gmra.mrb[180].mxu1 %vm50_vm1, %v7408_v1 }
 0xdc3   :  { %8693 = vmatprep.mubr.msk.f32.mxu1 %vm50_vm1, %v7409_v15 }
 0xdc6   :  { %8694 = vmatmul.mubr.msk.f32.gmra.mrb[182].mxu1 %vm50_vm1, %v7410_v3 }
 0xe6d   :  { %v8622_v14 = vpop.f32.mrb[160].mxu1 }
 0xe6e   :  { %v5995_v27 = vadd.f32 %v10283_v12, %v8622_v14  ;;  %v5989_v48 = vpop.f32.mrb[161].mxu1 }
 0xe6f   :  { %v5990_v17 = vadd.f32 %v10283_v12, %v5989_v48 }
 0xe70   :  { %v6029_v16 = vmax.f32 %v5995_v27, 0.0 }
 0xe71   :  { %v6028_v37 = vmax.f32 %v5990_v17, 0.0  ;;  %v8625_v23 = vpop.f32.mrb[162].mxu1 }
 0xe72   :  { %v10605_v35 = vmax.f32 %v10500_v7, %v6029_v16  ;;  %v6005_v21 = vadd.f32 %v10283_v12, %v8625_v23  ;;  %v5999_v47 = vpop.f32.mrb[163].mxu1 }
 0xe73   :  { %v10609_v52 = vmax.f32 %v10504_v39, %v6028_v37  ;;  %v6000_v41 = vadd.f32 %v10283_v12, %v5999_v47 }
 0xe74   :  { %v6031_v25 = vmax.f32 %v6005_v21, 0.0 }
 0xe75   :  { %v6030_v19 = vmax.f32 %v6000_v41, 0.0  ;;  %v8628_v26 = vpop.f32.mrb[164].mxu1 }
 0xe76   :  { %v10613_v40 = vmax.f32 %v10508_v46, %v6031_v25  ;;  %v6015_v30 = vadd.f32 %v10283_v12, %v8628_v26  ;;  %v6009_v36 = vpop.f32.mrb[165].mxu1 }
 0xe77   :  { %v10617_v7 = vmax.f32 %v10512_v42, %v6030_v19  ;;  %v6010_v20 = vadd.f32 %v10283_v12, %v6009_v36 }
 0xe78   :  { %v6033_v28 = vmax.f32 %v6015_v30, 0.0 }
 0xe79   :  { %v6032_v18 = vmax.f32 %v6010_v20, 0.0  ;;  %v8631_v39 = vpop.f32.mrb[166].mxu1 }
 0xe7a   :  { %v10621_v2 = vmax.f32 %v10516_v62, %v6033_v28  ;;  %v6025_v29 = vadd.f32 %v10283_v12, %v8631_v39  ;;  %v6019_v45 = vpop.f32.mrb[167].mxu1 }
 0xe7b   :  { %v10625_v46 = vmax.f32 %v10520_v32, %v6032_v18  ;;  %v6020_v54 = vadd.f32 %v10283_v12, %v6019_v45 }
 0xe7c   :  { %v6035_v53 = vmax.f32 %v6025_v29, 0.0 }
 0xe7d   :  { %v6034_v56 = vmax.f32 %v6020_v54, 0.0  ;;  %v8652_v42 = vpop.f32.mrb[168].mxu1 }
 0xe7e   :  { %v10629_v59 = vmax.f32 %v10524_v5, %v6035_v53  ;;  %v6286_v33 = vadd.f32 %v10201_v24, %v8652_v42  ;;  %v6280_v55 = vpop.f32.mrb[169].mxu1 }
 0xe7f   :  { %v10633_v62 = vmax.f32 %v10528_v49, %v6034_v56  ;;  %v6281_v61 = vadd.f32 %v10201_v24, %v6280_v55 }
 0xe80   :  { %v6320_v32 = vmax.f32 %v6286_v33, 0.0 }
 0xe81   :  { %v6319_v22 = vmax.f32 %v6281_v61, 0.0  ;;  %v8655_v51 = vpop.f32.mrb[170].mxu1 }
 0xe82   :  { %v6296_v38 = vadd.f32 %v10201_v24, %v8655_v51  ;;  %v6290_v34 = vpop.f32.mrb[171].mxu1 }
 0xe83   :  { %v6291_v63 = vadd.f32 %v10201_v24, %v6290_v34  ;;  %8670 = vmatprep.mubr.msk.f32.mxu0 %vm342_vm3, %v6319_v22 }
 0xe84   :  { %8671 = vmatmul.mubr.msk.f32.vlgmr.msra.gmra.mrb[176].mxu0 %vm342_vm3, %v6320_v32  ;;  %v6322_v49 = vmax.f32 %v6296_v38, 0.0 }
 0xe85   :  { %v6321_v5 = vmax.f32 %v6291_v63, 0.0  ;;  %8915 = vmatpush3.bf16.msra.mxu0 %v9022_v11  ;;  %v8658_v9 = vpop.f32.mrb[172].mxu1 }
 0xe86   :  { %v6306_v44 = vadd.f32 %v10201_v24, %v8658_v9  ;;  %v6300_v50 = vpop.f32.mrb[173].mxu1 }
 0xe87   :  { %v6301_v58 = vadd.f32 %v10201_v24, %v6300_v50  ;;  %8673 = vmatprep.mubr.msk.f32.mxu0 %vm342_vm3, %v6321_v5 }
 0xe88   :  { %8674 = vmatmul.mubr.msk.f32.gmra.mrb[178].mxu0 %vm342_vm3, %v6322_v49  ;;  %v6324_v43 = vmax.f32 %v6306_v44, 0.0 }
 0xe89   :  { %v6323_v6 = vmax.f32 %v6301_v58, 0.0  ;;  %v8661_v13 = vpop.f32.mrb[174].mxu1 }
 0xe8a   :  { %v6316_v4 = vadd.f32 %v10201_v24, %v8661_v13  ;;  %v6310_v10 = vpop.f32.mrb[175].mxu1 }
 0xe8b   :  { %v6311_v8 = vadd.f32 %v10201_v24, %v6310_v10  ;;  %8676 = vmatprep.mubr.msk.f32.mxu0 %vm342_vm3, %v6323_v6 }
 0xe8c   :  { %8677 = vmatmul.mubr.msk.f32.gmra.mrb[180].mxu0 %vm342_vm3, %v6324_v43  ;;  %v6326_v60 = vmax.f32 %v6316_v4, 0.0 }
 0xe8d   :  { %v6325_v11 = vmax.f32 %v6311_v8, 0.0  ;;  %v8686_v57 = vpop.f32.mrb[176].mxu1 }
 0xe8e   :  { %v6577_v31 = vadd.f32 %v8932_v0, %v8686_v57  ;;  %v6571_v1 = vpop.f32.mrb[177].mxu1 }
 0xe8f   :  { %v6572_v15 = vadd.f32 %v8932_v0, %v6571_v1  ;;  %8679 = vmatprep.mubr.msk.f32.mxu0 %vm342_vm3, %v6325_v11  ;;  %v8933_v11 = vld [vmem:[%s10753_s4] ss:$0 sm:$0xff] }
 0xe90   :  { %8680 = vmatmul.mubr.msk.f32.gmra.mrb[182].mxu0 %vm342_vm3, %v6326_v60  ;;  %v6611_v14 = vmax.f32 %v6577_v31, 0.0 }
 0xe91   :  { %v6610_v3 = vmax.f32 %v6572_v15, 0.0  ;;  %v8689_v24 = vpop.f32.mrb[178].mxu1 }
 0xe92   :  { %v6587_v27 = vadd.f32 %v8932_v0, %v8689_v24  ;;  %v6581_v48 = vpop.f32.mrb[179].mxu1 }
 0xe93   :  { %v6582_v17 = vadd.f32 %v8932_v0, %v6581_v48  ;;  %8700 = vmatprep.mubr.msk.f32.mxu0 %vm198_vm2, %v6610_v3 }
 0xe94   :  { %8701 = vmatmul.mubr.msk.f32.vlgmr.msra.gmra.mrb[184].mxu0 %vm198_vm2, %v6611_v14  ;;  %v6613_v23 = vmax.f32 %v6587_v27, 0.0 }
 0xe95   :  { %v6612_v16 = vmax.f32 %v6582_v17, 0.0  ;;  %v8692_v37 = vpop.f32.mrb[180].mxu1 }
 0xe96   :  { %v6597_v21 = vadd.f32 %v8932_v0, %v8692_v37  ;;  %v6591_v47 = vpop.f32.mrb[181].mxu1 }
 0xe97   :  { %v6592_v41 = vadd.f32 %v8932_v0, %v6591_v47  ;;  %8703 = vmatprep.mubr.msk.f32.mxu0 %vm198_vm2, %v6612_v16 }
 0xe98   :  { %8704 = vmatmul.mubr.msk.f32.gmra.mrb[186].mxu0 %vm198_vm2, %v6613_v23  ;;  %v6615_v26 = vmax.f32 %v6597_v21, 0.0 }
 0xe99   :  { %v6614_v25 = vmax.f32 %v6592_v41, 0.0  ;;  %v8695_v19 = vpop.f32.mrb[182].mxu1 }
 0xe9a   :  { %v6607_v30 = vadd.f32 %v8932_v0, %v8695_v19  ;;  %v6601_v36 = vpop.f32.mrb[183].mxu1 }
 0xe9b   :  { %v6602_v20 = vadd.f32 %v8932_v0, %v6601_v36  ;;  %8706 = vmatprep.mubr.msk.f32.mxu0 %vm198_vm2, %v6614_v25 }
 0xe9c   :  { %8707 = vmatmul.mubr.msk.f32.gmra.mrb[188].mxu0 %vm198_vm2, %v6615_v26  ;;  %v6617_v18 = vmax.f32 %v6607_v30, 0.0  ;;  %v8934_v26 = vld [vmem:[%s10754_s6] ss:$0 sm:$0xff] }
 0xe9d   :  { %v6616_v28 = vmax.f32 %v6602_v20, 0.0 }
 0xe9f   :  { %8709 = vmatprep.mubr.msk.f32.mxu0 %vm198_vm2, %v6616_v28 }
 0xea0   :  { %8710 = vmatmul.mubr.msk.f32.gmra.mrb[190].mxu0 %vm198_vm2, %v6617_v18 }
 0xf57   :  { %v8672_v39 = vpop.f32.mrb[176].mxu0 }
 0xf58   :  { %v6423_v29 = vadd.f32 %v10283_v12, %v8672_v39  ;;  %v6417_v45 = vpop.f32.mrb[177].mxu0 }
 0xf59   :  { %v6418_v54 = vadd.f32 %v10283_v12, %v6417_v45 }
 0xf5a   :  { %v6457_v53 = vmax.f32 %v6423_v29, 0.0 }
 0xf5b   :  { %v6456_v56 = vmax.f32 %v6418_v54, 0.0  ;;  %v8675_v42 = vpop.f32.mrb[178].mxu0 }
 0xf5c   :  { %v10665_v33 = vmax.f32 %v10605_v35, %v6457_v53  ;;  %v6433_v55 = vadd.f32 %v10283_v12, %v8675_v42  ;;  %v6427_v61 = vpop.f32.mrb[179].mxu0 }
 0xf5d   :  { %v10669_v22 = vmax.f32 %v10609_v52, %v6456_v56  ;;  %v6428_v51 = vadd.f32 %v10283_v12, %v6427_v61 }
 0xf5e   :  { %v6459_v32 = vmax.f32 %v6433_v55, 0.0 }
 0xf5f   :  { %v6458_v38 = vmax.f32 %v6428_v51, 0.0  ;;  %v8678_v34 = vpop.f32.mrb[180].mxu0 }
 0xf60   :  { %v10673_v63 = vmax.f32 %v10613_v40, %v6459_v32  ;;  %v6443_v5 = vadd.f32 %v10283_v12, %v8678_v34  ;;  %v6437_v9 = vpop.f32.mrb[181].mxu0 }
 0xf61   :  { %v10677_v35 = vmax.f32 %v10617_v7, %v6458_v38  ;;  %v6438_v49 = vadd.f32 %v10283_v12, %v6437_v9 }
 0xf62   :  { %v6461_v44 = vmax.f32 %v6443_v5, 0.0 }
 0xf63   :  { %v6460_v50 = vmax.f32 %v6438_v49, 0.0  ;;  %v8681_v52 = vpop.f32.mrb[182].mxu0 }
 0xf64   :  { %v10681_v58 = vmax.f32 %v10621_v2, %v6461_v44  ;;  %v6453_v6 = vadd.f32 %v10283_v12, %v8681_v52  ;;  %v6447_v13 = vpop.f32.mrb[183].mxu0 }
 0xf65   :  { %v10685_v40 = vmax.f32 %v10625_v46, %v6460_v50  ;;  %v6448_v43 = vadd.f32 %v10283_v12, %v6447_v13 }
 0xf66   :  { %v6463_v4 = vmax.f32 %v6453_v6, 0.0 }
 0xf67   :  { %v6462_v10 = vmax.f32 %v6448_v43, 0.0  ;;  %v8702_v7 = vpop.f32.mrb[184].mxu0 }
 0xf68   :  { %v10689_v8 = vmax.f32 %v10629_v59, %v6463_v4  ;;  %v6714_v2 = vadd.f32 %v8933_v11, %v8702_v7  ;;  %v6708_v57 = vpop.f32.mrb[185].mxu0 }
 0xf69   :  { %v10695_v60 = vmax.f32 %v10633_v62, %v6462_v10  ;;  %v6709_v0 = vadd.f32 %v8933_v11, %v6708_v57 }
 0xf6a   :  { %v6748_v1 = vmax.f32 %v6714_v2, 0.0 }
 0xf6b   :  { %v6747_v46 = vmax.f32 %v6709_v0, 0.0  ;;  %v8705_v31 = vpop.f32.mrb[186].mxu0 }
 0xf6c   :  { %v6724_v12 = vadd.f32 %v8933_v11, %v8705_v31  ;;  %v6718_v15 = vpop.f32.mrb[187].mxu0 }
 0xf6d   :  { %v6719_v3 = vadd.f32 %v8933_v11, %v6718_v15  ;;  %8720 = vmatprep.mubr.msk.f32.mxu1 %vm342_vm3, %v6747_v46 }
 0xf6e   :  { %8721 = vmatmul.mubr.msk.f32.vlgmr.msra.gmra.mrb[184].mxu1 %vm342_vm3, %v6748_v1  ;;  %v6750_v14 = vmax.f32 %v6724_v12, 0.0 }
 0xf6f   :  { %v6749_v59 = vmax.f32 %v6719_v3, 0.0  ;;  %v8708_v24 = vpop.f32.mrb[188].mxu0 }
 0xf70   :  { %v6734_v27 = vadd.f32 %v8933_v11, %v8708_v24  ;;  %v6728_v48 = vpop.f32.mrb[189].mxu0 }
 0xf71   :  { %v6729_v17 = vadd.f32 %v8933_v11, %v6728_v48  ;;  %8723 = vmatprep.mubr.msk.f32.mxu1 %vm342_vm3, %v6749_v59 }
 0xf72   :  { %8724 = vmatmul.mubr.msk.f32.gmra.mrb[186].mxu1 %vm342_vm3, %v6750_v14  ;;  %v6752_v37 = vmax.f32 %v6734_v27, 0.0 }
 0xf73   :  { %v6751_v62 = vmax.f32 %v6729_v17, 0.0  ;;  %v8711_v16 = vpop.f32.mrb[190].mxu0 }
 0xf74   :  { %v6744_v23 = vadd.f32 %v8933_v11, %v8711_v16  ;;  %v6738_v21 = vpop.f32.mrb[191].mxu0 }
 0xf75   :  { %v6739_v47 = vadd.f32 %v8933_v11, %v6738_v21  ;;  %8726 = vmatprep.mubr.msk.f32.mxu1 %vm342_vm3, %v6751_v62 }
 0xf76   :  { %8727 = vmatmul.mubr.msk.f32.gmra.mrb[188].mxu1 %vm342_vm3, %v6752_v37  ;;  %v6754_v25 = vmax.f32 %v6744_v23, 0.0 }
 0xf77   :  { %v6753_v41 = vmax.f32 %v6739_v47, 0.0 }
 0xf79   :  { %8729 = vmatprep.mubr.msk.f32.mxu1 %vm342_vm3, %v6753_v41 }
 0xf7a   :  { %8730 = vmatmul.mubr.msk.f32.gmra.mrb[190].mxu1 %vm342_vm3, %v6754_v25 }
0x1041   :  { %v8722_v19 = vpop.f32.mrb[184].mxu1 }
0x1042   :  { %v6851_v30 = vadd.f32 %v8934_v26, %v8722_v19  ;;  %v6845_v36 = vpop.f32.mrb[185].mxu1 }
0x1043   :  { %v6846_v20 = vadd.f32 %v8934_v26, %v6845_v36 }
0x1044   :  { %v6885_v28 = vmax.f32 %v6851_v30, 0.0 }
0x1045   :  { %v6884_v18 = vmax.f32 %v6846_v20, 0.0  ;;  %v8725_v39 = vpop.f32.mrb[186].mxu1 }
0x1046   :  { %v6893_v29 = vmax.f32 %v10665_v33, %v6885_v28  ;;  %v6861_v45 = vadd.f32 %v8934_v26, %v8725_v39  ;;  %v6855_v54 = vpop.f32.mrb[187].mxu1 }
0x1047   :  { %v6892_v53 = vmax.f32 %v10669_v22, %v6884_v18  ;;  %v6856_v56 = vadd.f32 %v8934_v26, %v6855_v54 }
0x1048   :  { %6902 = vst.msk [vmem:[%s10755_s7 + $0x8] sm:$0xff] %vm6900_vm4, %v6893_v29  ;;  %v6887_v42 = vmax.f32 %v6861_v45, 0.0 }
0x1049   :  { %6901 = vst.msk [vmem:[%s10755_s7] sm:$0xff] %vm6900_vm4, %v6892_v53  ;;  %v6886_v55 = vmax.f32 %v6856_v56, 0.0  ;;  %v8728_v61 = vpop.f32.mrb[188].mxu1 }
0x104a   :  { %v6895_v33 = vmax.f32 %v10673_v63, %v6887_v42  ;;  %v6871_v51 = vadd.f32 %v8934_v26, %v8728_v61  ;;  %v6865_v32 = vpop.f32.mrb[189].mxu1 }
0x104b   :  { %v6894_v22 = vmax.f32 %v10677_v35, %v6886_v55  ;;  %v6866_v38 = vadd.f32 %v8934_v26, %v6865_v32 }
0x104c   :  { %6904 = vst.msk [vmem:[%s10755_s7 + $0x18] sm:$0xff] %vm6900_vm4, %v6895_v33  ;;  %v6889_v34 = vmax.f32 %v6871_v51, 0.0 }
0x104d   :  { %6903 = vst.msk [vmem:[%s10755_s7 + $0x10] sm:$0xff] %vm6900_vm4, %v6894_v22  ;;  %v6888_v5 = vmax.f32 %v6866_v38, 0.0  ;;  %v8731_v9 = vpop.f32.mrb[190].mxu1 }
0x104e   :  { %v6897_v63 = vmax.f32 %v10681_v58, %v6889_v34  ;;  %v6881_v49 = vadd.f32 %v8934_v26, %v8731_v9  ;;  %v6875_v44 = vpop.f32.mrb[191].mxu1 }
0x104f   :  { %v6896_v35 = vmax.f32 %v10685_v40, %v6888_v5  ;;  %v6876_v50 = vadd.f32 %v8934_v26, %v6875_v44 }
0x1050   :  { %6906 = vst.msk [vmem:[%s10755_s7 + $0x28] sm:$0xff] %vm6900_vm4, %v6897_v63  ;;  %v6891_v52 = vmax.f32 %v6881_v49, 0.0 }
0x1051   :  { %6905 = vst.msk [vmem:[%s10755_s7 + $0x20] sm:$0xff] %vm6900_vm4, %v6896_v35  ;;  %v6890_v6 = vmax.f32 %v6876_v50, 0.0 }
0x1052   :  { %v6899_v13 = vmax.f32 %v10689_v8, %v6891_v52 }
0x1053   :  { %v6898_v58 = vmax.f32 %v10695_v60, %v6890_v6 }
0x1054   :  { %6908 = vst.msk [vmem:[%s10755_s7 + $0x38] sm:$0xff] %vm6900_vm4, %v6899_v13 }
0x1055   :  { %6907 = vst.msk [vmem:[%s10755_s7 + $0x30] sm:$0xff] %vm6900_vm4, %v6898_v58 }

// kernel: forward.13
= control target key start
LH: loop header
LB: loop body
LE: loop exit
PB: predicated region body
PF: predicated region fallthrough
CT: control target
= control target key end

     0   :  { %vm16_vm0 = vcmask 23552   ;;  %v177_v44 = vlaneseq  ;;  %vm185_vm1 = vcmask 64512   ;;  %s519_s1 = inlined_call_operand.vmem [shape: f32[2,8,3], index: 1, kind: input, shape index: {}]   ;;  %s520_s0 = inlined_call_operand.vmem [shape: f32[2,32,3], index: 0, kind: input, shape index: {}]   ;;  %s521_s2 = inlined_call_operand.vmem [shape: f32[2,32,8], index: 2, kind: output, shape index: {}]  }
   0x1   :  { %v15_v0 = vld [vmem:[%s519_s1] sm:$0xff]  ;;  %v383_v1 = vld [vmem:[%s519_s1 + $0x8] sm:$0xff]  ;;  %v13_v10 = vld [vmem:[%s520_s0 + $0x10] sm:$0xff] }
   0x2   :  { %v11_v2 = vld [vmem:[%s520_s0] sm:$0xff]  ;;  %v133_v3 = vmul.f32 %v15_v0, %v15_v0  ;;  %403 = vmatprep.subr.msk.mxu0 %vm16_vm0, %v15_v0  ;;  %v313_v4 = vmul.f32 %v383_v1, %v383_v1  ;;  %v12_v6 = vld [vmem:[%s520_s0 + $0x8] sm:$0xff]  ;;  %411 = vmatprep.subr.msk.mxu1 %vm16_vm0, %v383_v1  ;;  %v14_v13 = vld [vmem:[%s520_s0 + $0x18] sm:$0xff]  ;;  %v119_v18 = vmul.f32 %v13_v10, %v13_v10  ;;  %v178_v46 = vshrl.u32 %v177_v44, 7 }
   0x3   :  { %405 = vmatprep.mubr.msk.f32.mxu0 %vm16_vm0, %v11_v2  ;;  %v117_v5 = vmul.f32 %v11_v2, %v11_v2  ;;  %404 = vmatpush3.xpose.msk.msra.mxu0 %vm16_vm0, %v15_v0  ;;  %v379_v7 = vld [vmem:[%s520_s0 + $0x20] sm:$0xff]  ;;  %v118_v8 = vmul.f32 %v12_v6, %v12_v6  ;;  %v380_v11 = vld [vmem:[%s520_s0 + $0x28] sm:$0xff]  ;;  %v381_v14 = vld [vmem:[%s520_s0 + $0x30] sm:$0xff]  ;;  %v120_v17 = vmul.f32 %v14_v13, %v14_v13 }
   0x4   :  { %v134_v9 = vsel %vm16_vm0, %v133_v3, 0.0  ;;  %412 = vmatpush3.xpose.msk.msra.mxu1 %vm16_vm0, %v383_v1  ;;  %413 = vmatprep.mubr.msk.f32.mxu1 %vm16_vm0, %v379_v7  ;;  %v314_v15 = vsel %vm16_vm0, %v313_v4, 0.0  ;;  %v382_v19 = vld [vmem:[%s520_s0 + $0x38] sm:$0xff]  ;;  %v297_v20 = vmul.f32 %v379_v7, %v379_v7  ;;  %v127_v22 = vsel %vm16_vm0, %v119_v18, 0.0 }
   0x5   :  { %v121_v12 = vsel %vm16_vm0, %v117_v5, 0.0  ;;  %135 = vadd.xlane.f32.xlu0 %v134_v9  ;;  %v124_v16 = vsel %vm16_vm0, %v118_v8, 0.0  ;;  %v130_v21 = vsel %vm16_vm0, %v120_v17, 0.0  ;;  %v298_v23 = vmul.f32 %v380_v11, %v380_v11 }
   0x6   :  { %122 = vadd.xlane.f32.xlu1 %v121_v12  ;;  %406 = vmatmul.mubr.msk.f32.vlgmr.msra.gmra.mrb[0].mxu0 %vm16_vm0, %v12_v6  ;;  %v301_v25 = vsel %vm16_vm0, %v297_v20, 0.0  ;;  %v300_v26 = vmul.f32 %v382_v19, %v382_v19  ;;  %v299_v27 = vmul.f32 %v381_v14, %v381_v14  ;;  %v179_v53 = vsub.s32 0, %v178_v46 }
   0x7   :  { %408 = vmatprep.mubr.msk.f32.mxu0 %vm16_vm0, %v13_v10  ;;  %414 = vmatmul.mubr.msk.f32.vlgmr.msra.gmra.mrb[0].mxu1 %vm16_vm0, %v380_v11  ;;  %v304_v24 = vsel %vm16_vm0, %v298_v23, 0.0 }
   0x8   :  { %416 = vmatprep.mubr.msk.f32.mxu1 %vm16_vm0, %v381_v14  ;;  %v310_v28 = vsel %vm16_vm0, %v300_v26, 0.0  ;;  %v307_v29 = vsel %vm16_vm0, %v299_v27, 0.0 }
   0x9   :  { %315 = vadd.xlane.f32.xlu0 %v314_v15 }
   0xa   :  { %125 = vadd.xlane.f32.xlu1 %v124_v16  ;;  %409 = vmatmul.mubr.msk.f32.gmra.mrb[2].mxu0 %vm16_vm0, %v14_v13 }
   0xb   :  { %417 = vmatmul.mubr.msk.f32.gmra.mrb[2].mxu1 %vm16_vm0, %v382_v19 }
   0xd   :  { %128 = vadd.xlane.f32.xlu0 %v127_v22 }
   0xe   :  { %131 = vadd.xlane.f32.xlu1 %v130_v21 }
  0x11   :  { %302 = vadd.xlane.f32.xlu0 %v301_v25 }
  0x12   :  { %305 = vadd.xlane.f32.xlu1 %v304_v24 }
  0x15   :  { %308 = vadd.xlane.f32.xlu0 %v307_v29 }
  0x16   :  { %311 = vadd.xlane.f32.xlu1 %v310_v28 }
  0x92   :  { %v136_v30 = vpop.xlane.xlu0 %135 }
  0x93   :  { %145 = vxpose.xlu0.b32.start.end [1/1] (short) (narrow) %v136_v30, 8  ;;  %v123_v40 = vpop.xlane.xlu1 %122 }
  0x96   :  { %v316_v31 = vpop.xlane.xlu0 %315 }
  0x97   :  { %325 = vxpose.xlu1.b32.start.end [1/1] (short) (narrow) %v316_v31, 8  ;;  %v126_v41 = vpop.xlane.xlu1 %125 }
  0x9a   :  { %v129_v42 = vpop.xlane.xlu0 %128 }
  0x9b   :  { %v132_v43 = vpop.xlane.xlu1 %131 }
  0x9e   :  { %v303_v45 = vpop.xlane.xlu0 %302 }
  0x9f   :  { %v306_v47 = vpop.xlane.xlu1 %305 }
  0xa2   :  { %v309_v50 = vpop.xlane.xlu0 %308 }
  0xa3   :  { %v312_v59 = vpop.xlane.xlu1 %311 }
  0xd9   :  { %v407_v32 = vpop.f32.mrb[0].mxu0 }
  0xda   :  { %v98_v33 = vpop.f32.mrb[1].mxu0  ;;  %v415_v34 = vpop.f32.mrb[0].mxu1  ;;  %v138_v48 = vmul.f32 2.0, %v407_v32 }
  0xdb   :  { %v278_v35 = vpop.f32.mrb[1].mxu1  ;;  %v137_v49 = vmul.f32 2.0, %v98_v33  ;;  %v318_v54 = vmul.f32 2.0, %v415_v34 }
  0xdc   :  { %v142_v56 = vsub.f32 %v126_v41, %v138_v48  ;;  %v317_v57 = vmul.f32 2.0, %v278_v35 }
  0xdd   :  { %v410_v36 = vpop.f32.mrb[2].mxu0  ;;  %v141_v55 = vsub.f32 %v123_v40, %v137_v49  ;;  %v322_v5 = vsub.f32 %v306_v47, %v318_v54 }
  0xde   :  { %v108_v37 = vpop.f32.mrb[3].mxu0  ;;  %v418_v38 = vpop.f32.mrb[2].mxu1  ;;  %v140_v51 = vmul.f32 2.0, %v410_v36  ;;  %v321_v8 = vsub.f32 %v303_v45, %v317_v57 }
  0xdf   :  { %v288_v39 = vpop.f32.mrb[3].mxu1  ;;  %v139_v52 = vmul.f32 2.0, %v108_v37  ;;  %v320_v58 = vmul.f32 2.0, %v418_v38 }
  0xe0   :  { %v144_v61 = vsub.f32 %v132_v43, %v140_v51  ;;  %v319_v63 = vmul.f32 2.0, %v288_v39 }
  0xe1   :  { %v143_v62 = vsub.f32 %v129_v42, %v139_v52  ;;  %v324_v7 = vsub.f32 %v312_v59, %v320_v58 }
  0xe2   :  { %v323_v9 = vsub.f32 %v309_v50, %v319_v63 }
 0x113   :  { %v161_v60 = vpop.trf.xlu0 }
 0x114   :  { %v180_v0 = vrot.slane %v161_v60, %v179_v53 }
 0x116   :  { %v181_v1 = vadd.f32 %v180_v0, %v141_v55  ;;  %v182_v2 = vadd.f32 %v180_v0, %v142_v56  ;;  %v183_v3 = vadd.f32 %v180_v0, %v143_v62  ;;  %v184_v4 = vadd.f32 %v180_v0, %v144_v61 }
 0x117   :  { %v341_v6 = vpop.trf.xlu1 }
 0x118   :  { %186 = vst.msk [vmem:[%s521_s2] sm:$0xff] %vm185_vm1, %v181_v1  ;;  %187 = vst.msk [vmem:[%s521_s2 + $0x8] sm:$0xff] %vm185_vm1, %v182_v2  ;;  %v360_v10 = vrot.slane %v341_v6, %v179_v53 }
 0x119   :  { %188 = vst.msk [vmem:[%s521_s2 + $0x10] sm:$0xff] %vm185_vm1, %v183_v3  ;;  %189 = vst.msk [vmem:[%s521_s2 + $0x18] sm:$0xff] %vm185_vm1, %v184_v4 }
 0x11a   :  { %v361_v11 = vadd.f32 %v360_v10, %v321_v8  ;;  %v362_v12 = vadd.f32 %v360_v10, %v322_v5  ;;  %v363_v13 = vadd.f32 %v360_v10, %v323_v9  ;;  %v364_v14 = vadd.f32 %v360_v10, %v324_v7 }
 0x11c   :  { %389 = vst.msk [vmem:[%s521_s2 + $0x20] sm:$0xff] %vm185_vm1, %v361_v11  ;;  %390 = vst.msk [vmem:[%s521_s2 + $0x28] sm:$0xff] %vm185_vm1, %v362_v12 }
 0x11d   :  { %391 = vst.msk [vmem:[%s521_s2 + $0x30] sm:$0xff] %vm185_vm1, %v363_v13  ;;  %392 = vst.msk [vmem:[%s521_s2 + $0x38] sm:$0xff] %vm185_vm1, %v364_v14 }

// kernel: forward.12
= control target key start
LH: loop header
LB: loop body
LE: loop exit
PB: predicated region body
PF: predicated region fallthrough
CT: control target
= control target key end

     0   :  { %vm86_vm0 = vcmask 547840   ;;  %vm93_vm1 = vcmask 1042432   ;;  %vm180_vm2 = vcmask 523264   ;;  %s3976_s1 = inlined_call_operand.vmem [shape: f32[67,64], index: 1, kind: input, shape index: {}]   ;;  %s3977_s0 = inlined_call_operand.vmem [shape: f32[8,16,67], index: 0, kind: input, shape index: {}]   ;;  %s3978_s3 = inlined_call_operand.vmem [shape: f32[64,128], index: 3, kind: input, shape index: {}]   ;;  %s3979_s5 = inlined_call_operand.vmem [shape: f32[128,256], index: 5, kind: input, shape index: {}]   ;;  %s3980_s2 = inlined_call_operand.vmem [shape: f32[1,64], index: 2, kind: input, shape index: {}]   ;;  %s3981_s4 = inlined_call_operand.vmem [shape: f32[1,128], index: 4, kind: input, shape index: {}]   ;;  %s3982_s6 = inlined_call_operand.vmem [shape: f32[1,256], index: 6, kind: input, shape index: {}]   ;;  %s3983_s7 = inlined_call_operand.vmem [shape: f32[16,256], index: 7, kind: output, shape index: {}]  }
   0x1   :  { %v26_v0 = vld [vmem:[%s3976_s1] sm:$0xff]  ;;  %v27_v1 = vld [vmem:[%s3976_s1 + $0x8] sm:$0xff]  ;;  %v28_v2 = vld [vmem:[%s3976_s1 + $0x10] sm:$0xff] }
   0x2   :  { %v3250_v3 = vpack.c.bf16 %v27_v1, %v26_v0  ;;  %v29_v4 = vld [vmem:[%s3976_s1 + $0x18] sm:$0xff]  ;;  %v30_v6 = vld [vmem:[%s3976_s1 + $0x20] sm:$0xff]  ;;  %v31_v7 = vld [vmem:[%s3976_s1 + $0x28] sm:$0xff] }
   0x3   :  { %v3255_v5 = vpack.c.bf16 %v29_v4, %v28_v2  ;;  %v78_v8 = vld [vmem:[%s3977_s0] sm:$0xff]  ;;  %v3270_v9 = vpack.c.bf16 %v31_v7, %v30_v6  ;;  %v32_v10 = vld [vmem:[%s3976_s1 + $0x30] sm:$0xff]  ;;  %v33_v11 = vld [vmem:[%s3976_s1 + $0x38] sm:$0xff] }
   0x4   :  { %2687 = vmatprep.subr.bf16.mxu0 %v3250_v3  ;;  %2384 = vmatprep.mubr.msk.f32.mxu0 %vm86_vm0, %v78_v8  ;;  %v3280_v12 = vpack.c.bf16 %v33_v11, %v32_v10  ;;  %v3287_v13 = vld [vmem:[%s3976_s1 + $0x40] sm:$0x7]  ;;  %v36_v15 = vld [vmem:[%s3978_s3 + $0x8] sm:$0xff]  ;;  %v37_v16 = vld [vmem:[%s3978_s3 + $0x10] sm:$0xff] }
   0x5   :  { %2689 = vmatpush3.bf16.msra.mxu0 %v3250_v3  ;;  %v35_v14 = vld [vmem:[%s3978_s3] sm:$0xff]  ;;  %v38_v17 = vld [vmem:[%s3978_s3 + $0x18] sm:$0xff]  ;;  %v79_v19 = vld [vmem:[%s3977_s0 + $0x8] sm:$0xff] }
   0x6   :  { %2691 = vmatprep.subr.bf16.mxu0 %v3255_v5  ;;  %v3304_v18 = vpack.c.bf16 %v36_v15, %v35_v14  ;;  %v3309_v20 = vpack.c.bf16 %v38_v17, %v37_v16  ;;  %v39_v21 = vld [vmem:[%s3978_s3 + $0x20] sm:$0xff]  ;;  %v40_v22 = vld [vmem:[%s3978_s3 + $0x28] sm:$0xff]  ;;  %v41_v24 = vld [vmem:[%s3978_s3 + $0x30] sm:$0xff] }
   0x7   :  { %v3323_v23 = vpack.c.bf16 %v40_v22, %v39_v21  ;;  %v42_v25 = vld [vmem:[%s3978_s3 + $0x38] sm:$0xff]  ;;  %v44_v27 = vld [vmem:[%s3979_s5 + $0x8] sm:$0xff]  ;;  %v43_v29 = vld [vmem:[%s3979_s5] sm:$0xff] }
   0x8   :  { %v3334_v26 = vpack.c.bf16 %v42_v25, %v41_v24  ;;  %v46_v28 = vld [vmem:[%s3979_s5 + $0x18] sm:$0xff]  ;;  %v45_v31 = vld [vmem:[%s3979_s5 + $0x10] sm:$0xff]  ;;  %v48_v32 = vld [vmem:[%s3979_s5 + $0x28] sm:$0xff] }
   0x9   :  { %2693 = vmatpush3.bf16.msra.mxu0 %v3255_v5  ;;  %v3348_v30 = vpack.c.bf16 %v46_v28, %v44_v27  ;;  %v50_v33 = vld [vmem:[%s3979_s5 + $0x38] sm:$0xff]  ;;  %v3359_v34 = vpack.c.bf16 %v45_v31, %v43_v29  ;;  %v47_v36 = vld [vmem:[%s3979_s5 + $0x20] sm:$0xff]  ;;  %v49_v37 = vld [vmem:[%s3979_s5 + $0x30] sm:$0xff]  ;;  %v3200_v29 = vmov 0.0  }
   0xa   :  { %2695 = vmatprep.subr.bf16.mxu0 %v3270_v9  ;;  %v3361_v35 = vpack.c.bf16 %v50_v33, %v48_v32  ;;  %v52_v38 = vld [vmem:[%s3979_s5 + $0x48] sm:$0xff]  ;;  %v54_v39 = vld [vmem:[%s3979_s5 + $0x58] sm:$0xff]  ;;  %v3377_v40 = vpack.c.bf16 %v49_v37, %v47_v36  ;;  %v51_v42 = vld [vmem:[%s3979_s5 + $0x40] sm:$0xff]  ;;  %339 = vmatprep.mubr.f32.mxu1 %v3200_v29 }
   0xb   :  { %2719 = vmatprep.subr.bf16.mxu1 %v3348_v30  ;;  %v3380_v41 = vpack.c.bf16 %v54_v39, %v52_v38  ;;  %v53_v43 = vld [vmem:[%s3979_s5 + $0x50] sm:$0xff]  ;;  %v56_v44 = vld [vmem:[%s3979_s5 + $0x68] sm:$0xff]  ;;  %v58_v45 = vld [vmem:[%s3979_s5 + $0x78] sm:$0xff] }
   0xc   :  { %2721 = vmatpush1.bf16.msra.mxu1 %v3359_v34  ;;  %v3395_v46 = vpack.c.bf16 %v53_v43, %v51_v42  ;;  %v3398_v47 = vpack.c.bf16 %v58_v45, %v56_v44  ;;  %v55_v48 = vld [vmem:[%s3979_s5 + $0x60] sm:$0xff]  ;;  %v57_v49 = vld [vmem:[%s3979_s5 + $0x70] sm:$0xff]  ;;  %v60_v50 = vld [vmem:[%s3979_s5 + $0x88] sm:$0xff] }
   0xd   :  { %2697 = vmatpush3.bf16.msra.mxu0 %v3270_v9  ;;  %2723 = vmatprep.subr.bf16.mxu1 %v3361_v35  ;;  %v62_v51 = vld [vmem:[%s3979_s5 + $0x98] sm:$0xff]  ;;  %v3413_v52 = vpack.c.bf16 %v57_v49, %v55_v48  ;;  %v59_v54 = vld [vmem:[%s3979_s5 + $0x80] sm:$0xff]  ;;  %v61_v55 = vld [vmem:[%s3979_s5 + $0x90] sm:$0xff] }
   0xe   :  { %2699 = vmatprep.subr.bf16.mxu0 %v3280_v12  ;;  %v3416_v53 = vpack.c.bf16 %v62_v51, %v60_v50  ;;  %v64_v56 = vld [vmem:[%s3979_s5 + $0xa8] sm:$0xff]  ;;  %v66_v57 = vld [vmem:[%s3979_s5 + $0xb8] sm:$0xff]  ;;  %v3431_v58 = vpack.c.bf16 %v61_v55, %v59_v54  ;;  %v63_v60 = vld [vmem:[%s3979_s5 + $0xa0] sm:$0xff] }
   0xf   :  { %v3434_v59 = vpack.c.bf16 %v66_v57, %v64_v56  ;;  %v65_v61 = vld [vmem:[%s3979_s5 + $0xb0] sm:$0xff]  ;;  %v68_v62 = vld [vmem:[%s3979_s5 + $0xc8] sm:$0xff]  ;;  %v70_v63 = vld [vmem:[%s3979_s5 + $0xd8] sm:$0xff] }
  0x10   :  { %2725 = vmatpush1.bf16.msra.mxu1 %v3377_v40  ;;  %v3449_v0 = vpack.c.bf16 %v65_v61, %v63_v60  ;;  %v3452_v1 = vpack.c.bf16 %v70_v63, %v68_v62  ;;  %v67_v2 = vld [vmem:[%s3979_s5 + $0xc0] sm:$0xff]  ;;  %v69_v4 = vld [vmem:[%s3979_s5 + $0xd0] sm:$0xff]  ;;  %v72_v21 = vld [vmem:[%s3979_s5 + $0xe8] sm:$0xff] }
  0x11   :  { %2701 = vmatpush3.bf16.msra.mxu0 %v3280_v12  ;;  %2727 = vmatprep.subr.bf16.mxu1 %v3380_v41  ;;  %v3461_v6 = vpack.c.bf16 %v69_v4, %v67_v2  ;;  %v3468_v7 = vld [vmem:[%s3980_s2] ss:$0 sm:$0xff]  ;;  %v2149_v17 = vld [vmem:[%s3977_s0 + $0x10] sm:$0xff]  ;;  %v74_v22 = vld [vmem:[%s3979_s5 + $0xf8] sm:$0xff] }
  0x12   :  { %2382 = vmatprep.subr.msk.mxu0 %vm93_vm1, %v3287_v13  ;;  %v3508_v24 = vpack.c.bf16 %v74_v22, %v72_v21  ;;  %v71_v25 = vld [vmem:[%s3979_s5 + $0xe0] sm:$0xff]  ;;  %v73_v27 = vld [vmem:[%s3979_s5 + $0xf0] sm:$0xff]  ;;  %v2157_v51 = vld [vmem:[%s3977_s0 + $0x28] sm:$0xff]  ;;  %v265_v21 = vlaneseq }
  0x13   :  { %v3516_v28 = vpack.c.bf16 %v73_v27, %v71_v25  ;;  %v3525_v31 = vld [vmem:[%s3981_s4] ss:$0 sm:$0xff] }
  0x14   :  { %2729 = vmatpush1.bf16.msra.mxu1 %v3395_v46  ;;  %v2156_v50 = vld [vmem:[%s3977_s0 + $0x20] sm:$0xff]  ;;  %v266_v22 = vshrl.u32 %v265_v21, 7 }
  0x15   :  { %2383 = vmatpush3.msk.msra.mxu0 %vm93_vm1, %v3287_v13  ;;  %2731 = vmatprep.subr.bf16.mxu1 %v3398_v47  ;;  %v77_v27 = vld [vmem:[%s3982_s6] sm:$0x3] }
  0x16   :  { %2385 = vmatmul.mubr.msk.f32.vlgmr.msra.gmra.mrb[0].mxu0 %vm86_vm0, %v79_v19  ;;  %2703 = vmatprep.subr.bf16.mxu0 %v3304_v18  ;;  %v2150_v19 = vld [vmem:[%s3977_s0 + $0x18] sm:$0xff]  ;;  %v267_v25 = vsub.s32 0, %v266_v22 }
  0x17   :  { %2705 = vmatpush3.bf16.msra.mxu0 %v3304_v18 }
  0x18   :  { %2707 = vmatprep.subr.bf16.mxu0 %v3309_v20  ;;  %2733 = vmatpush1.bf16.msra.mxu1 %v3413_v52 }
  0x19   :  { %2735 = vmatprep.subr.bf16.mxu1 %v3416_v53 }
  0x1b   :  { %2709 = vmatpush3.bf16.msra.mxu0 %v3309_v20 }
  0x1c   :  { %2711 = vmatprep.subr.bf16.mxu0 %v3323_v23  ;;  %2737 = vmatpush1.bf16.msra.mxu1 %v3431_v58 }
  0x1d   :  { %2739 = vmatprep.subr.bf16.mxu1 %v3434_v59 }
  0x1f   :  { %2713 = vmatpush3.bf16.msra.mxu0 %v3323_v23 }
  0x20   :  { %2715 = vmatprep.subr.bf16.mxu0 %v3334_v26  ;;  %2741 = vmatpush1.bf16.msra.mxu1 %v3449_v0 }
  0x21   :  { %2743 = vmatprep.subr.bf16.mxu1 %v3452_v1 }
  0x23   :  { %2717 = vmatpush3.bf16.msra.mxu0 %v3334_v26 }
  0x24   :  { %2751 = vmatprep.subr.bf16.mxu0 %v3250_v3  ;;  %2745 = vmatpush1.bf16.msra.mxu1 %v3461_v6 }
  0x25   :  { %2747 = vmatprep.subr.bf16.mxu1 %v3508_v24 }
  0x28   :  { %2749 = vmatpush1.bf16.msra.mxu1 %v3516_v28 }
  0x29   :  { %2783 = vmatprep.subr.bf16.mxu1 %v3348_v30 }
  0xe9   :  { %v2386_v8 = vpop.f32.mrb[0].mxu0 }
  0xea   :  { %v169_v10 = vadd.f32 %v2386_v8, %v3468_v7  ;;  %v163_v11 = vpop.f32.mrb[1].mxu0 }
  0xeb   :  { %v164_v14 = vadd.f32 %v3468_v7, %v163_v11 }
  0xec   :  { %v173_v16 = vmax.f32 %v169_v10, 0.0 }
  0xed   :  { %v172_v15 = vmax.f32 %v164_v14, 0.0 }
  0xef   :  { %2403 = vmatprep.mubr.msk.f32.mxu0 %vm180_vm2, %v172_v15 }
  0xf0   :  { %2404 = vmatmul.mubr.msk.f32.vlgmr.msra.gmra.mrb[2].mxu0 %vm180_vm2, %v173_v16 }
  0xf1   :  { %2753 = vmatpush3.bf16.msra.mxu0 %v3250_v3  ;;  %2424 = vmatprep.mubr.msk.f32.mxu0 %vm86_vm0, %v2149_v17  ;;  %v2163_v17 = vld [vmem:[%s3977_s0 + $0x30] sm:$0xff] }
  0xf2   :  { %2755 = vmatprep.subr.bf16.mxu0 %v3255_v5 }
  0xf5   :  { %2757 = vmatpush3.bf16.msra.mxu0 %v3255_v5 }
  0xf6   :  { %2759 = vmatprep.subr.bf16.mxu0 %v3270_v9 }
  0xf9   :  { %2761 = vmatpush3.bf16.msra.mxu0 %v3270_v9 }
  0xfa   :  { %2763 = vmatprep.subr.bf16.mxu0 %v3280_v12 }
  0xfd   :  { %2765 = vmatpush3.bf16.msra.mxu0 %v3280_v12 }
  0xfe   :  { %2422 = vmatprep.subr.msk.mxu0 %vm93_vm1, %v3287_v13 }
 0x101   :  { %2423 = vmatpush3.msk.msra.mxu0 %vm93_vm1, %v3287_v13 }
 0x102   :  { %2425 = vmatmul.mubr.msk.f32.vlgmr.msra.gmra.mrb[4].mxu0 %vm86_vm0, %v2150_v19  ;;  %2767 = vmatprep.subr.bf16.mxu0 %v3304_v18  ;;  %v2164_v19 = vld [vmem:[%s3977_s0 + $0x38] sm:$0xff] }
 0x103   :  { %2769 = vmatpush3.bf16.msra.mxu0 %v3304_v18 }
 0x104   :  { %2771 = vmatprep.subr.bf16.mxu0 %v3309_v20 }
 0x107   :  { %2773 = vmatpush3.bf16.msra.mxu0 %v3309_v20 }
 0x108   :  { %2775 = vmatprep.subr.bf16.mxu0 %v3323_v23 }
 0x10b   :  { %2777 = vmatpush3.bf16.msra.mxu0 %v3323_v23 }
 0x10c   :  { %2779 = vmatprep.subr.bf16.mxu0 %v3334_v26 }
 0x10f   :  { %2781 = vmatpush3.bf16.msra.mxu0 %v3334_v26 }
 0x110   :  { %2815 = vmatprep.subr.bf16.mxu0 %v3250_v3 }
 0x1c3   :  { %v2405_v32 = vpop.f32.mrb[2].mxu0 }
 0x1c4   :  { %v253_v33 = vpop.f32.mrb[3].mxu0  ;;  %v259_v37 = vadd.f32 %v2405_v32, %v3525_v31  ;;  %v271_v32 = vsub.s32 1, %v266_v22 }
 0x1c5   :  { %v254_v36 = vadd.f32 %v3525_v31, %v253_v33  ;;  %v3642_v33 = vrot.slane %v77_v27, %v267_v25 }
 0x1c6   :  { %v263_v39 = vmax.f32 %v259_v37, 0.0 }
 0x1c7   :  { %v262_v38 = vmax.f32 %v254_v36, 0.0  ;;  %v3644_v36 = vrot.slane %v77_v27, %v271_v32 }
 0x1c9   :  { %340 = vmatmul.mubr.f32.vlgmr.msra.gmra.mrb[0].mxu1 %v262_v38 }
 0x1ca   :  { %345 = vmatprep.mubr.f32.mxu1 %v3200_v29  ;;  %2785 = vmatpush1.bf16.msra.mxu1 %v3359_v34 }
 0x1cb   :  { %2787 = vmatprep.subr.bf16.mxu1 %v3361_v35 }
 0x1cd   :  { %346 = vmatmul.mubr.f32.gmra.mrb[2].mxu1 %v263_v39 }
 0x1ce   :  { %2789 = vmatpush1.bf16.msra.mxu1 %v3377_v40  ;;  %589 = vmatprep.mubr.f32.mxu1 %v3200_v29 }
 0x1cf   :  { %2791 = vmatprep.subr.bf16.mxu1 %v3380_v41 }
 0x1d2   :  { %2793 = vmatpush1.bf16.msra.mxu1 %v3395_v46 }
 0x1d3   :  { %2795 = vmatprep.subr.bf16.mxu1 %v3398_v47 }
 0x1d5   :  { %v2426_v42 = vpop.f32.mrb[4].mxu0 }
 0x1d6   :  { %v437_v43 = vadd.f32 %v2426_v42, %v3468_v7  ;;  %v431_v44 = vpop.f32.mrb[5].mxu0  ;;  %2797 = vmatpush1.bf16.msra.mxu1 %v3413_v52 }
 0x1d7   :  { %v432_v45 = vadd.f32 %v3468_v7, %v431_v44  ;;  %2799 = vmatprep.subr.bf16.mxu1 %v3416_v53 }
 0x1d8   :  { %v441_v49 = vmax.f32 %v437_v43, 0.0 }
 0x1d9   :  { %v440_v48 = vmax.f32 %v432_v45, 0.0 }
 0x1da   :  { %2801 = vmatpush1.bf16.msra.mxu1 %v3431_v58 }
 0x1db   :  { %2443 = vmatprep.mubr.msk.f32.mxu0 %vm180_vm2, %v440_v48  ;;  %2803 = vmatprep.subr.bf16.mxu1 %v3434_v59 }
 0x1dc   :  { %2444 = vmatmul.mubr.msk.f32.vlgmr.msra.gmra.mrb[6].mxu0 %vm180_vm2, %v441_v49 }
 0x1dd   :  { %2817 = vmatpush3.bf16.msra.mxu0 %v3250_v3  ;;  %2464 = vmatprep.mubr.msk.f32.mxu0 %vm86_vm0, %v2156_v50 }
 0x1de   :  { %2819 = vmatprep.subr.bf16.mxu0 %v3255_v5  ;;  %2805 = vmatpush1.bf16.msra.mxu1 %v3449_v0 }
 0x1df   :  { %2807 = vmatprep.subr.bf16.mxu1 %v3452_v1 }
 0x1e1   :  { %2821 = vmatpush3.bf16.msra.mxu0 %v3255_v5 }
 0x1e2   :  { %2823 = vmatprep.subr.bf16.mxu0 %v3270_v9  ;;  %2809 = vmatpush1.bf16.msra.mxu1 %v3461_v6 }
 0x1e3   :  { %2811 = vmatprep.subr.bf16.mxu1 %v3508_v24 }
 0x1e5   :  { %2825 = vmatpush3.bf16.msra.mxu0 %v3270_v9 }
 0x1e6   :  { %2827 = vmatprep.subr.bf16.mxu0 %v3280_v12  ;;  %2813 = vmatpush1.bf16.msra.mxu1 %v3516_v28 }
 0x1e7   :  { %2847 = vmatprep.subr.bf16.mxu1 %v3348_v30 }
 0x1e9   :  { %2829 = vmatpush3.bf16.msra.mxu0 %v3280_v12 }
 0x1ea   :  { %2462 = vmatprep.subr.msk.mxu0 %vm93_vm1, %v3287_v13 }
 0x1ed   :  { %2463 = vmatpush3.msk.msra.mxu0 %vm93_vm1, %v3287_v13 }
 0x1ee   :  { %2465 = vmatmul.mubr.msk.f32.vlgmr.msra.gmra.mrb[8].mxu0 %vm86_vm0, %v2157_v51  ;;  %2831 = vmatprep.subr.bf16.mxu0 %v3304_v18 }
 0x1ef   :  { %2833 = vmatpush3.bf16.msra.mxu0 %v3304_v18 }
 0x1f0   :  { %2835 = vmatprep.subr.bf16.mxu0 %v3309_v20 }
 0x1f3   :  { %2837 = vmatpush3.bf16.msra.mxu0 %v3309_v20 }
 0x1f4   :  { %2839 = vmatprep.subr.bf16.mxu0 %v3323_v23 }
 0x1f7   :  { %2841 = vmatpush3.bf16.msra.mxu0 %v3323_v23 }
 0x1f8   :  { %2843 = vmatprep.subr.bf16.mxu0 %v3334_v26 }
 0x1fb   :  { %2845 = vmatpush3.bf16.msra.mxu0 %v3334_v26 }
 0x1fc   :  { %2879 = vmatprep.subr.bf16.mxu0 %v3250_v3 }
 0x29c   :  { %v3579_v54 = vpop.f32.mrb[0].mxu1 }
 0x29d   :  { %v3581_v55 = vpop.f32.mrb[1].mxu1  ;;  %v342_v37 = vadd.f32 %v3579_v54, %v3642_v33 }
 0x29e   :  { %v344_v38 = vadd.f32 %v3581_v55, %v3644_v36 }
 0x29f   :  { %v352_v45 = vmax.f32 %v342_v37, 0.0 }
 0x2a0   :  { %v3583_v56 = vpop.f32.mrb[2].mxu1  ;;  %v353_v50 = vmax.f32 %v344_v38, 0.0 }
 0x2a1   :  { %v3585_v57 = vpop.f32.mrb[3].mxu1  ;;  %v348_v48 = vadd.f32 %v3583_v56, %v3642_v33 }
 0x2a2   :  { %v350_v51 = vadd.f32 %v3585_v57, %v3644_v36 }
 0x2af   :  { %v2445_v60 = vpop.f32.mrb[6].mxu0 }
 0x2b0   :  { %v514_v61 = vpop.f32.mrb[7].mxu0  ;;  %v520_v63 = vadd.f32 %v2445_v60, %v3525_v31 }
 0x2b1   :  { %v515_v62 = vadd.f32 %v3525_v31, %v514_v61 }
 0x2b2   :  { %v524_v4 = vmax.f32 %v520_v63, 0.0 }
 0x2b3   :  { %v523_v2 = vmax.f32 %v515_v62, 0.0 }
 0x2b5   :  { %590 = vmatmul.mubr.f32.vlgmr.msra.gmra.mrb[4].mxu1 %v523_v2 }
 0x2b6   :  { %595 = vmatprep.mubr.f32.mxu1 %v3200_v29  ;;  %2849 = vmatpush1.bf16.msra.mxu1 %v3359_v34 }
 0x2b7   :  { %2851 = vmatprep.subr.bf16.mxu1 %v3361_v35 }
 0x2b9   :  { %596 = vmatmul.mubr.f32.gmra.mrb[6].mxu1 %v524_v4  ;;  %v354_v4 = vmax.f32 %v348_v48, 0.0 }
 0x2ba   :  { %2853 = vmatpush1.bf16.msra.mxu1 %v3377_v40  ;;  %843 = vmatprep.mubr.f32.mxu1 %v3200_v29 }
 0x2bb   :  { %2855 = vmatprep.subr.bf16.mxu1 %v3380_v41 }
 0x2be   :  { %2857 = vmatpush1.bf16.msra.mxu1 %v3395_v46 }
 0x2bf   :  { %2859 = vmatprep.subr.bf16.mxu1 %v3398_v47 }
 0x2c1   :  { %v2466_v8 = vpop.f32.mrb[8].mxu0 }
 0x2c2   :  { %v691_v10 = vadd.f32 %v2466_v8, %v3468_v7  ;;  %v685_v11 = vpop.f32.mrb[9].mxu0  ;;  %2861 = vmatpush1.bf16.msra.mxu1 %v3413_v52 }
 0x2c3   :  { %v686_v14 = vadd.f32 %v3468_v7, %v685_v11  ;;  %2863 = vmatprep.subr.bf16.mxu1 %v3416_v53 }
 0x2c4   :  { %v695_v16 = vmax.f32 %v691_v10, 0.0  ;;  %v355_v10 = vmax.f32 %v350_v51, 0.0 }
 0x2c5   :  { %v694_v15 = vmax.f32 %v686_v14, 0.0 }
 0x2c6   :  { %2865 = vmatpush1.bf16.msra.mxu1 %v3431_v58 }
 0x2c7   :  { %2483 = vmatprep.mubr.msk.f32.mxu0 %vm180_vm2, %v694_v15  ;;  %2867 = vmatprep.subr.bf16.mxu1 %v3434_v59 }
 0x2c8   :  { %2484 = vmatmul.mubr.msk.f32.vlgmr.msra.gmra.mrb[10].mxu0 %vm180_vm2, %v695_v16 }
 0x2c9   :  { %2881 = vmatpush3.bf16.msra.mxu0 %v3250_v3  ;;  %2504 = vmatprep.mubr.msk.f32.mxu0 %vm86_vm0, %v2163_v17 }
 0x2ca   :  { %2883 = vmatprep.subr.bf16.mxu0 %v3255_v5  ;;  %2869 = vmatpush1.bf16.msra.mxu1 %v3449_v0 }
 0x2cb   :  { %2871 = vmatprep.subr.bf16.mxu1 %v3452_v1 }
 0x2cd   :  { %2885 = vmatpush3.bf16.msra.mxu0 %v3255_v5 }
 0x2ce   :  { %2887 = vmatprep.subr.bf16.mxu0 %v3270_v9  ;;  %2873 = vmatpush1.bf16.msra.mxu1 %v3461_v6 }
 0x2cf   :  { %2875 = vmatprep.subr.bf16.mxu1 %v3508_v24 }
 0x2d1   :  { %2889 = vmatpush3.bf16.msra.mxu0 %v3270_v9 }
 0x2d2   :  { %2891 = vmatprep.subr.bf16.mxu0 %v3280_v12  ;;  %2877 = vmatpush1.bf16.msra.mxu1 %v3516_v28 }
 0x2d3   :  { %2911 = vmatprep.subr.bf16.mxu1 %v3348_v30 }
 0x2d5   :  { %2893 = vmatpush3.bf16.msra.mxu0 %v3280_v12 }
 0x2d6   :  { %2502 = vmatprep.subr.msk.mxu0 %vm93_vm1, %v3287_v13 }
 0x2d9   :  { %2503 = vmatpush3.msk.msra.mxu0 %vm93_vm1, %v3287_v13 }
 0x2da   :  { %2505 = vmatmul.mubr.msk.f32.vlgmr.msra.gmra.mrb[12].mxu0 %vm86_vm0, %v2164_v19  ;;  %2895 = vmatprep.subr.bf16.mxu0 %v3304_v18 }
 0x2db   :  { %2897 = vmatpush3.bf16.msra.mxu0 %v3304_v18 }
 0x2dc   :  { %2899 = vmatprep.subr.bf16.mxu0 %v3309_v20 }
 0x2df   :  { %2901 = vmatpush3.bf16.msra.mxu0 %v3309_v20 }
 0x2e0   :  { %2903 = vmatprep.subr.bf16.mxu0 %v3323_v23 }
 0x2e3   :  { %2905 = vmatpush3.bf16.msra.mxu0 %v3323_v23 }
 0x2e4   :  { %2907 = vmatprep.subr.bf16.mxu0 %v3334_v26 }
 0x2e7   :  { %2909 = vmatpush3.bf16.msra.mxu0 %v3334_v26 }
 0x2e8   :  { %2943 = vmatprep.subr.bf16.mxu0 %v3250_v3 }
 0x388   :  { %v591_v39 = vpop.f32.mrb[4].mxu1 }
 0x389   :  { %v592_v42 = vadd.f32 %v591_v39, %v3642_v33  ;;  %v593_v43 = vpop.f32.mrb[5].mxu1  ;;  %v2170_v39 = vld [vmem:[%s3977_s0 + $0x40] sm:$0xff] }
 0x38a   :  { %v594_v44 = vadd.f32 %v593_v43, %v3644_v36 }
 0x38b   :  { %v602_v49 = vmax.f32 %v592_v42, 0.0  ;;  %v2171_v42 = vld [vmem:[%s3977_s0 + $0x48] sm:$0xff] }
 0x38c   :  { %v603_v60 = vmax.f32 %v594_v44, 0.0  ;;  %v597_v54 = vpop.f32.mrb[6].mxu1 }
 0x38d   :  { %v3656_v61 = vmax.f32 %v352_v45, %v602_v49  ;;  %v598_v55 = vadd.f32 %v597_v54, %v3642_v33  ;;  %v599_v62 = vpop.f32.mrb[7].mxu1 }
 0x38e   :  { %v3659_v63 = vmax.f32 %v353_v50, %v603_v60  ;;  %v600_v2 = vadd.f32 %v599_v62, %v3644_v36 }
 0x38f   :  { %v604_v8 = vmax.f32 %v598_v55, 0.0 }
 0x390   :  { %v605_v56 = vmax.f32 %v600_v2, 0.0 }
 0x391   :  { %v3662_v11 = vmax.f32 %v354_v4, %v604_v8 }
 0x392   :  { %v3664_v14 = vmax.f32 %v355_v10, %v605_v56 }
 0x39b   :  { %v2485_v57 = vpop.f32.mrb[10].mxu0 }
 0x39c   :  { %v768_v15 = vpop.f32.mrb[11].mxu0  ;;  %v774_v17 = vadd.f32 %v2485_v57, %v3525_v31 }
 0x39d   :  { %v769_v16 = vadd.f32 %v3525_v31, %v768_v15 }
 0x39e   :  { %v778_v21 = vmax.f32 %v774_v17, 0.0 }
 0x39f   :  { %v777_v19 = vmax.f32 %v769_v16, 0.0 }
 0x3a1   :  { %844 = vmatmul.mubr.f32.vlgmr.msra.gmra.mrb[8].mxu1 %v777_v19 }
 0x3a2   :  { %849 = vmatprep.mubr.f32.mxu1 %v3200_v29  ;;  %2913 = vmatpush1.bf16.msra.mxu1 %v3359_v34 }
 0x3a3   :  { %2915 = vmatprep.subr.bf16.mxu1 %v3361_v35 }
 0x3a5   :  { %850 = vmatmul.mubr.f32.gmra.mrb[10].mxu1 %v778_v21 }
 0x3a6   :  { %2917 = vmatpush1.bf16.msra.mxu1 %v3377_v40  ;;  %1097 = vmatprep.mubr.f32.mxu1 %v3200_v29 }
 0x3a7   :  { %2919 = vmatprep.subr.bf16.mxu1 %v3380_v41 }
 0x3aa   :  { %2921 = vmatpush1.bf16.msra.mxu1 %v3395_v46 }
 0x3ab   :  { %2923 = vmatprep.subr.bf16.mxu1 %v3398_v47 }
 0x3ad   :  { %v2506_v22 = vpop.f32.mrb[12].mxu0 }
 0x3ae   :  { %v945_v25 = vadd.f32 %v2506_v22, %v3468_v7  ;;  %v939_v27 = vpop.f32.mrb[13].mxu0  ;;  %2925 = vmatpush1.bf16.msra.mxu1 %v3413_v52 }
 0x3af   :  { %v940_v32 = vadd.f32 %v3468_v7, %v939_v27  ;;  %2927 = vmatprep.subr.bf16.mxu1 %v3416_v53  ;;  %v2177_v27 = vld [vmem:[%s3977_s0 + $0x50] sm:$0xff] }
 0x3b0   :  { %v949_v38 = vmax.f32 %v945_v25, 0.0 }
 0x3b1   :  { %v948_v37 = vmax.f32 %v940_v32, 0.0  ;;  %v2178_v32 = vld [vmem:[%s3977_s0 + $0x58] sm:$0xff] }
 0x3b2   :  { %2929 = vmatpush1.bf16.msra.mxu1 %v3431_v58 }
 0x3b3   :  { %2523 = vmatprep.mubr.msk.f32.mxu0 %vm180_vm2, %v948_v37  ;;  %2931 = vmatprep.subr.bf16.mxu1 %v3434_v59 }
 0x3b4   :  { %2524 = vmatmul.mubr.msk.f32.vlgmr.msra.gmra.mrb[14].mxu0 %vm180_vm2, %v949_v38 }
 0x3b5   :  { %2945 = vmatpush3.bf16.msra.mxu0 %v3250_v3  ;;  %2544 = vmatprep.mubr.msk.f32.mxu0 %vm86_vm0, %v2170_v39 }
 0x3b6   :  { %2947 = vmatprep.subr.bf16.mxu0 %v3255_v5  ;;  %2933 = vmatpush1.bf16.msra.mxu1 %v3449_v0 }
 0x3b7   :  { %2935 = vmatprep.subr.bf16.mxu1 %v3452_v1 }
 0x3b9   :  { %2949 = vmatpush3.bf16.msra.mxu0 %v3255_v5 }
 0x3ba   :  { %2951 = vmatprep.subr.bf16.mxu0 %v3270_v9  ;;  %2937 = vmatpush1.bf16.msra.mxu1 %v3461_v6 }
 0x3bb   :  { %2939 = vmatprep.subr.bf16.mxu1 %v3508_v24 }
 0x3bd   :  { %2953 = vmatpush3.bf16.msra.mxu0 %v3270_v9 }
 0x3be   :  { %2955 = vmatprep.subr.bf16.mxu0 %v3280_v12  ;;  %2941 = vmatpush1.bf16.msra.mxu1 %v3516_v28 }
 0x3bf   :  { %2975 = vmatprep.subr.bf16.mxu1 %v3348_v30 }
 0x3c1   :  { %2957 = vmatpush3.bf16.msra.mxu0 %v3280_v12 }
 0x3c2   :  { %2542 = vmatprep.subr.msk.mxu0 %vm93_vm1, %v3287_v13 }
 0x3c5   :  { %2543 = vmatpush3.msk.msra.mxu0 %vm93_vm1, %v3287_v13 }
 0x3c6   :  { %2545 = vmatmul.mubr.msk.f32.vlgmr.msra.gmra.mrb[16].mxu0 %vm86_vm0, %v2171_v42  ;;  %2959 = vmatprep.subr.bf16.mxu0 %v3304_v18 }
 0x3c7   :  { %2961 = vmatpush3.bf16.msra.mxu0 %v3304_v18 }
 0x3c8   :  { %2963 = vmatprep.subr.bf16.mxu0 %v3309_v20 }
 0x3cb   :  { %2965 = vmatpush3.bf16.msra.mxu0 %v3309_v20 }
 0x3cc   :  { %2967 = vmatprep.subr.bf16.mxu0 %v3323_v23 }
 0x3cf   :  { %2969 = vmatpush3.bf16.msra.mxu0 %v3323_v23 }
 0x3d0   :  { %2971 = vmatprep.subr.bf16.mxu0 %v3334_v26 }
 0x3d3   :  { %2973 = vmatpush3.bf16.msra.mxu0 %v3334_v26 }
 0x3d4   :  { %3007 = vmatprep.subr.bf16.mxu0 %v3250_v3 }
 0x474   :  { %v845_v43 = vpop.f32.mrb[8].mxu1 }
 0x475   :  { %v846_v44 = vadd.f32 %v845_v43, %v3642_v33  ;;  %v847_v45 = vpop.f32.mrb[9].mxu1 }
 0x476   :  { %v848_v48 = vadd.f32 %v847_v45, %v3644_v36 }
 0x477   :  { %v856_v49 = vmax.f32 %v846_v44, 0.0 }
 0x478   :  { %v857_v50 = vmax.f32 %v848_v48, 0.0  ;;  %v851_v51 = vpop.f32.mrb[10].mxu1 }
 0x479   :  { %v3721_v60 = vmax.f32 %v3656_v61, %v856_v49  ;;  %v852_v54 = vadd.f32 %v851_v51, %v3642_v33  ;;  %v853_v55 = vpop.f32.mrb[11].mxu1 }
 0x47a   :  { %v3725_v62 = vmax.f32 %v3659_v63, %v857_v50  ;;  %v854_v2 = vadd.f32 %v853_v55, %v3644_v36 }
 0x47b   :  { %v858_v4 = vmax.f32 %v852_v54, 0.0 }
 0x47c   :  { %v859_v8 = vmax.f32 %v854_v2, 0.0 }
 0x47d   :  { %v3729_v10 = vmax.f32 %v3662_v11, %v858_v4 }
 0x47e   :  { %v3732_v56 = vmax.f32 %v3664_v14, %v859_v8 }
 0x487   :  { %v2525_v57 = vpop.f32.mrb[14].mxu0 }
 0x488   :  { %v1022_v15 = vpop.f32.mrb[15].mxu0  ;;  %v1028_v16 = vadd.f32 %v2525_v57, %v3525_v31 }
 0x489   :  { %v1023_v61 = vadd.f32 %v3525_v31, %v1022_v15 }
 0x48a   :  { %v1032_v63 = vmax.f32 %v1028_v16, 0.0 }
 0x48b   :  { %v1031_v17 = vmax.f32 %v1023_v61, 0.0 }
 0x48d   :  { %1098 = vmatmul.mubr.f32.vlgmr.msra.gmra.mrb[12].mxu1 %v1031_v17 }
 0x48e   :  { %1103 = vmatprep.mubr.f32.mxu1 %v3200_v29  ;;  %2977 = vmatpush1.bf16.msra.mxu1 %v3359_v34 }
 0x48f   :  { %2979 = vmatprep.subr.bf16.mxu1 %v3361_v35 }
 0x491   :  { %1104 = vmatmul.mubr.f32.gmra.mrb[14].mxu1 %v1032_v63 }
 0x492   :  { %2981 = vmatpush1.bf16.msra.mxu1 %v3377_v40  ;;  %1351 = vmatprep.mubr.f32.mxu1 %v3200_v29 }
 0x493   :  { %2983 = vmatprep.subr.bf16.mxu1 %v3380_v41 }
 0x496   :  { %2985 = vmatpush1.bf16.msra.mxu1 %v3395_v46 }
 0x497   :  { %2987 = vmatprep.subr.bf16.mxu1 %v3398_v47 }
 0x499   :  { %v2546_v11 = vpop.f32.mrb[16].mxu0 }
 0x49a   :  { %v1199_v14 = vadd.f32 %v2546_v11, %v3468_v7  ;;  %v1193_v19 = vpop.f32.mrb[17].mxu0  ;;  %2989 = vmatpush1.bf16.msra.mxu1 %v3413_v52 }
 0x49b   :  { %v1194_v21 = vadd.f32 %v3468_v7, %v1193_v19  ;;  %2991 = vmatprep.subr.bf16.mxu1 %v3416_v53  ;;  %v2184_v19 = vld [vmem:[%s3977_s0 + $0x60] sm:$0xff] }
 0x49c   :  { %v1203_v25 = vmax.f32 %v1199_v14, 0.0 }
 0x49d   :  { %v1202_v22 = vmax.f32 %v1194_v21, 0.0  ;;  %v2185_v21 = vld [vmem:[%s3977_s0 + $0x68] sm:$0xff] }
 0x49e   :  { %2993 = vmatpush1.bf16.msra.mxu1 %v3431_v58 }
 0x49f   :  { %2563 = vmatprep.mubr.msk.f32.mxu0 %vm180_vm2, %v1202_v22  ;;  %2995 = vmatprep.subr.bf16.mxu1 %v3434_v59 }
 0x4a0   :  { %2564 = vmatmul.mubr.msk.f32.vlgmr.msra.gmra.mrb[18].mxu0 %vm180_vm2, %v1203_v25 }
 0x4a1   :  { %3009 = vmatpush3.bf16.msra.mxu0 %v3250_v3  ;;  %2584 = vmatprep.mubr.msk.f32.mxu0 %vm86_vm0, %v2177_v27 }
 0x4a2   :  { %3011 = vmatprep.subr.bf16.mxu0 %v3255_v5  ;;  %2997 = vmatpush1.bf16.msra.mxu1 %v3449_v0 }
 0x4a3   :  { %2999 = vmatprep.subr.bf16.mxu1 %v3452_v1 }
 0x4a5   :  { %3013 = vmatpush3.bf16.msra.mxu0 %v3255_v5 }
 0x4a6   :  { %3015 = vmatprep.subr.bf16.mxu0 %v3270_v9  ;;  %3001 = vmatpush1.bf16.msra.mxu1 %v3461_v6 }
 0x4a7   :  { %3003 = vmatprep.subr.bf16.mxu1 %v3508_v24 }
 0x4a9   :  { %3017 = vmatpush3.bf16.msra.mxu0 %v3270_v9 }
 0x4aa   :  { %3019 = vmatprep.subr.bf16.mxu0 %v3280_v12  ;;  %3005 = vmatpush1.bf16.msra.mxu1 %v3516_v28 }
 0x4ab   :  { %3039 = vmatprep.subr.bf16.mxu1 %v3348_v30 }
 0x4ad   :  { %3021 = vmatpush3.bf16.msra.mxu0 %v3280_v12 }
 0x4ae   :  { %2582 = vmatprep.subr.msk.mxu0 %vm93_vm1, %v3287_v13 }
 0x4b1   :  { %2583 = vmatpush3.msk.msra.mxu0 %vm93_vm1, %v3287_v13 }
 0x4b2   :  { %2585 = vmatmul.mubr.msk.f32.vlgmr.msra.gmra.mrb[20].mxu0 %vm86_vm0, %v2178_v32  ;;  %3023 = vmatprep.subr.bf16.mxu0 %v3304_v18 }
 0x4b3   :  { %3025 = vmatpush3.bf16.msra.mxu0 %v3304_v18 }
 0x4b4   :  { %3027 = vmatprep.subr.bf16.mxu0 %v3309_v20 }
 0x4b7   :  { %3029 = vmatpush3.bf16.msra.mxu0 %v3309_v20 }
 0x4b8   :  { %3031 = vmatprep.subr.bf16.mxu0 %v3323_v23 }
 0x4bb   :  { %3033 = vmatpush3.bf16.msra.mxu0 %v3323_v23 }
 0x4bc   :  { %3035 = vmatprep.subr.bf16.mxu0 %v3334_v26 }
 0x4bf   :  { %3037 = vmatpush3.bf16.msra.mxu0 %v3334_v26 }
 0x4c0   :  { %3071 = vmatprep.subr.bf16.mxu0 %v3250_v3 }
 0x560   :  { %v1099_v37 = vpop.f32.mrb[12].mxu1 }
 0x561   :  { %v1100_v38 = vadd.f32 %v1099_v37, %v3642_v33  ;;  %v1101_v39 = vpop.f32.mrb[13].mxu1 }
 0x562   :  { %v1102_v42 = vadd.f32 %v1101_v39, %v3644_v36 }
 0x563   :  { %v1110_v43 = vmax.f32 %v1100_v38, 0.0 }
 0x564   :  { %v1111_v44 = vmax.f32 %v1102_v42, 0.0  ;;  %v1105_v45 = vpop.f32.mrb[14].mxu1 }
 0x565   :  { %v3789_v48 = vmax.f32 %v3721_v60, %v1110_v43  ;;  %v1106_v49 = vadd.f32 %v1105_v45, %v3642_v33  ;;  %v1107_v50 = vpop.f32.mrb[15].mxu1 }
 0x566   :  { %v3793_v51 = vmax.f32 %v3725_v62, %v1111_v44  ;;  %v1108_v54 = vadd.f32 %v1107_v50, %v3644_v36 }
 0x567   :  { %v1112_v55 = vmax.f32 %v1106_v49, 0.0 }
 0x568   :  { %v1113_v2 = vmax.f32 %v1108_v54, 0.0 }
 0x569   :  { %v3797_v4 = vmax.f32 %v3729_v10, %v1112_v55 }
 0x56a   :  { %v3800_v8 = vmax.f32 %v3732_v56, %v1113_v2 }
 0x573   :  { %v2565_v57 = vpop.f32.mrb[18].mxu0 }
 0x574   :  { %v1276_v15 = vpop.f32.mrb[19].mxu0  ;;  %v1282_v61 = vadd.f32 %v2565_v57, %v3525_v31 }
 0x575   :  { %v1277_v60 = vadd.f32 %v3525_v31, %v1276_v15 }
 0x576   :  { %v1286_v62 = vmax.f32 %v1282_v61, 0.0 }
 0x577   :  { %v1285_v16 = vmax.f32 %v1277_v60, 0.0 }
 0x579   :  { %1352 = vmatmul.mubr.f32.vlgmr.msra.gmra.mrb[16].mxu1 %v1285_v16 }
 0x57a   :  { %1357 = vmatprep.mubr.f32.mxu1 %v3200_v29  ;;  %3041 = vmatpush1.bf16.msra.mxu1 %v3359_v34 }
 0x57b   :  { %3043 = vmatprep.subr.bf16.mxu1 %v3361_v35 }
 0x57d   :  { %1358 = vmatmul.mubr.f32.gmra.mrb[18].mxu1 %v1286_v62 }
 0x57e   :  { %3045 = vmatpush1.bf16.msra.mxu1 %v3377_v40  ;;  %1605 = vmatprep.mubr.f32.mxu1 %v3200_v29 }
 0x57f   :  { %3047 = vmatprep.subr.bf16.mxu1 %v3380_v41 }
 0x582   :  { %3049 = vmatpush1.bf16.msra.mxu1 %v3395_v46 }
 0x583   :  { %3051 = vmatprep.subr.bf16.mxu1 %v3398_v47 }
 0x585   :  { %v2586_v10 = vpop.f32.mrb[20].mxu0 }
 0x586   :  { %v1453_v56 = vadd.f32 %v2586_v10, %v3468_v7  ;;  %v1447_v17 = vpop.f32.mrb[21].mxu0  ;;  %3053 = vmatpush1.bf16.msra.mxu1 %v3413_v52 }
 0x587   :  { %v1448_v63 = vadd.f32 %v3468_v7, %v1447_v17  ;;  %3055 = vmatprep.subr.bf16.mxu1 %v3416_v53 }
 0x588   :  { %v1457_v14 = vmax.f32 %v1453_v56, 0.0  ;;  %v2191_v56 = vld [vmem:[%s3977_s0 + $0x70] sm:$0xff] }
 0x589   :  { %v1456_v11 = vmax.f32 %v1448_v63, 0.0 }
 0x58a   :  { %3057 = vmatpush1.bf16.msra.mxu1 %v3431_v58 }
 0x58b   :  { %2603 = vmatprep.mubr.msk.f32.mxu0 %vm180_vm2, %v1456_v11  ;;  %3059 = vmatprep.subr.bf16.mxu1 %v3434_v59 }
 0x58c   :  { %2604 = vmatmul.mubr.msk.f32.vlgmr.msra.gmra.mrb[22].mxu0 %vm180_vm2, %v1457_v14 }
 0x58d   :  { %3073 = vmatpush3.bf16.msra.mxu0 %v3250_v3  ;;  %2624 = vmatprep.mubr.msk.f32.mxu0 %vm86_vm0, %v2184_v19 }
 0x58e   :  { %3075 = vmatprep.subr.bf16.mxu0 %v3255_v5  ;;  %3061 = vmatpush1.bf16.msra.mxu1 %v3449_v0 }
 0x58f   :  { %3063 = vmatprep.subr.bf16.mxu1 %v3452_v1 }
 0x591   :  { %3077 = vmatpush3.bf16.msra.mxu0 %v3255_v5 }
 0x592   :  { %3079 = vmatprep.subr.bf16.mxu0 %v3270_v9  ;;  %3065 = vmatpush1.bf16.msra.mxu1 %v3461_v6 }
 0x593   :  { %3067 = vmatprep.subr.bf16.mxu1 %v3508_v24 }
 0x595   :  { %3081 = vmatpush3.bf16.msra.mxu0 %v3270_v9 }
 0x596   :  { %3083 = vmatprep.subr.bf16.mxu0 %v3280_v12  ;;  %3069 = vmatpush1.bf16.msra.mxu1 %v3516_v28 }
 0x597   :  { %3103 = vmatprep.subr.bf16.mxu1 %v3348_v30 }
 0x599   :  { %3085 = vmatpush3.bf16.msra.mxu0 %v3280_v12 }
 0x59a   :  { %2622 = vmatprep.subr.msk.mxu0 %vm93_vm1, %v3287_v13 }
 0x59d   :  { %2623 = vmatpush3.msk.msra.mxu0 %vm93_vm1, %v3287_v13 }
 0x59e   :  { %2625 = vmatmul.mubr.msk.f32.vlgmr.msra.gmra.mrb[24].mxu0 %vm86_vm0, %v2185_v21  ;;  %3087 = vmatprep.subr.bf16.mxu0 %v3304_v18 }
 0x59f   :  { %3089 = vmatpush3.bf16.msra.mxu0 %v3304_v18 }
 0x5a0   :  { %3091 = vmatprep.subr.bf16.mxu0 %v3309_v20 }
 0x5a3   :  { %3093 = vmatpush3.bf16.msra.mxu0 %v3309_v20 }
 0x5a4   :  { %3095 = vmatprep.subr.bf16.mxu0 %v3323_v23 }
 0x5a7   :  { %3097 = vmatpush3.bf16.msra.mxu0 %v3323_v23 }
 0x5a8   :  { %3099 = vmatprep.subr.bf16.mxu0 %v3334_v26 }
 0x5ab   :  { %3101 = vmatpush3.bf16.msra.mxu0 %v3334_v26 }
 0x5ac   :  { %3135 = vmatprep.subr.bf16.mxu0 %v3250_v3 }
 0x64c   :  { %v1353_v13 = vpop.f32.mrb[16].mxu1 }
 0x64d   :  { %v1354_v22 = vadd.f32 %v1353_v13, %v3642_v33  ;;  %v1355_v25 = vpop.f32.mrb[17].mxu1 }
 0x64e   :  { %v1356_v27 = vadd.f32 %v1355_v25, %v3644_v36 }
 0x64f   :  { %v1364_v32 = vmax.f32 %v1354_v22, 0.0 }
 0x650   :  { %v1365_v37 = vmax.f32 %v1356_v27, 0.0  ;;  %v1359_v38 = vpop.f32.mrb[18].mxu1 }
 0x651   :  { %v3857_v39 = vmax.f32 %v3789_v48, %v1364_v32  ;;  %v1360_v42 = vadd.f32 %v1359_v38, %v3642_v33  ;;  %v1361_v43 = vpop.f32.mrb[19].mxu1 }
 0x652   :  { %v3861_v44 = vmax.f32 %v3793_v51, %v1365_v37  ;;  %v1362_v45 = vadd.f32 %v1361_v43, %v3644_v36 }
 0x653   :  { %v1366_v49 = vmax.f32 %v1360_v42, 0.0 }
 0x654   :  { %v1367_v50 = vmax.f32 %v1362_v45, 0.0 }
 0x655   :  { %v3865_v54 = vmax.f32 %v3797_v4, %v1366_v49 }
 0x656   :  { %v3868_v55 = vmax.f32 %v3800_v8, %v1367_v50 }
 0x65f   :  { %v2605_v2 = vpop.f32.mrb[22].mxu0 }
 0x660   :  { %v1530_v57 = vpop.f32.mrb[23].mxu0  ;;  %v1536_v15 = vadd.f32 %v2605_v2, %v3525_v31 }
 0x661   :  { %v1531_v48 = vadd.f32 %v3525_v31, %v1530_v57 }
 0x662   :  { %v1540_v51 = vmax.f32 %v1536_v15, 0.0 }
 0x663   :  { %v1539_v60 = vmax.f32 %v1531_v48, 0.0 }
 0x665   :  { %1606 = vmatmul.mubr.f32.vlgmr.msra.gmra.mrb[20].mxu1 %v1539_v60 }
 0x666   :  { %1611 = vmatprep.mubr.f32.mxu1 %v3200_v29  ;;  %3105 = vmatpush1.bf16.msra.mxu1 %v3359_v34 }
 0x667   :  { %3107 = vmatprep.subr.bf16.mxu1 %v3361_v35 }
 0x669   :  { %1612 = vmatmul.mubr.f32.gmra.mrb[22].mxu1 %v1540_v51 }
 0x66a   :  { %3109 = vmatpush1.bf16.msra.mxu1 %v3377_v40  ;;  %1859 = vmatprep.mubr.f32.mxu1 %v3200_v29 }
 0x66b   :  { %3111 = vmatprep.subr.bf16.mxu1 %v3380_v41 }
 0x66e   :  { %3113 = vmatpush1.bf16.msra.mxu1 %v3395_v46 }
 0x66f   :  { %3115 = vmatprep.subr.bf16.mxu1 %v3398_v47 }
 0x671   :  { %v2626_v4 = vpop.f32.mrb[24].mxu0 }
 0x672   :  { %v1707_v8 = vadd.f32 %v2626_v4, %v3468_v7  ;;  %v1701_v61 = vpop.f32.mrb[25].mxu0  ;;  %3117 = vmatpush1.bf16.msra.mxu1 %v3413_v52 }
 0x673   :  { %v1702_v16 = vadd.f32 %v3468_v7, %v1701_v61  ;;  %3119 = vmatprep.subr.bf16.mxu1 %v3416_v53 }
 0x674   :  { %v1711_v10 = vmax.f32 %v1707_v8, 0.0 }
 0x675   :  { %v1710_v62 = vmax.f32 %v1702_v16, 0.0 }
 0x676   :  { %3121 = vmatpush1.bf16.msra.mxu1 %v3431_v58 }
 0x677   :  { %2643 = vmatprep.mubr.msk.f32.mxu0 %vm180_vm2, %v1710_v62  ;;  %3123 = vmatprep.subr.bf16.mxu1 %v3434_v59 }
 0x678   :  { %2644 = vmatmul.mubr.msk.f32.vlgmr.msra.gmra.mrb[26].mxu0 %vm180_vm2, %v1711_v10 }
 0x679   :  { %3137 = vmatpush3.bf16.msra.mxu0 %v3250_v3  ;;  %2664 = vmatprep.mubr.msk.f32.mxu0 %vm86_vm0, %v2191_v56  ;;  %v3199_v3 = vld [vmem:[%s3976_s1 + $0x40] sm:$0x7] }
 0x67a   :  { %3139 = vmatprep.subr.bf16.mxu0 %v3255_v5  ;;  %3125 = vmatpush1.bf16.msra.mxu1 %v3449_v0 }
 0x67b   :  { %3127 = vmatprep.subr.bf16.mxu1 %v3452_v1 }
 0x67d   :  { %3141 = vmatpush3.bf16.msra.mxu0 %v3255_v5  ;;  %v2192_v5 = vld [vmem:[%s3977_s0 + $0x78] sm:$0xff] }
 0x67e   :  { %3143 = vmatprep.subr.bf16.mxu0 %v3270_v9  ;;  %3129 = vmatpush1.bf16.msra.mxu1 %v3461_v6 }
 0x67f   :  { %3131 = vmatprep.subr.bf16.mxu1 %v3508_v24 }
 0x681   :  { %3145 = vmatpush3.bf16.msra.mxu0 %v3270_v9 }
 0x682   :  { %3147 = vmatprep.subr.bf16.mxu0 %v3280_v12  ;;  %3133 = vmatpush1.bf16.msra.mxu1 %v3516_v28 }
 0x683   :  { %3167 = vmatprep.subr.bf16.mxu1 %v3348_v30 }
 0x685   :  { %3149 = vmatpush3.bf16.msra.mxu0 %v3280_v12 }
 0x686   :  { %2662 = vmatprep.subr.msk.mxu0 %vm93_vm1, %v3199_v3 }
 0x689   :  { %2663 = vmatpush3.msk.msra.mxu0 %vm93_vm1, %v3199_v3 }
 0x68a   :  { %2665 = vmatmul.mubr.msk.f32.vlgmr.msra.gmra.mrb[28].mxu0 %vm86_vm0, %v2192_v5  ;;  %3151 = vmatprep.subr.bf16.mxu0 %v3304_v18 }
 0x68b   :  { %3153 = vmatpush3.bf16.msra.mxu0 %v3304_v18 }
 0x68c   :  { %3155 = vmatprep.subr.bf16.mxu0 %v3309_v20 }
 0x68f   :  { %3157 = vmatpush3.bf16.msra.mxu0 %v3309_v20 }
 0x690   :  { %3159 = vmatprep.subr.bf16.mxu0 %v3323_v23 }
 0x693   :  { %3161 = vmatpush3.bf16.msra.mxu0 %v3323_v23 }
 0x694   :  { %3163 = vmatprep.subr.bf16.mxu0 %v3334_v26 }
 0x697   :  { %3165 = vmatpush3.bf16.msra.mxu0 %v3334_v26 }
 0x738   :  { %v1607_v9 = vpop.f32.mrb[20].mxu1 }
 0x739   :  { %v1608_v12 = vadd.f32 %v1607_v9, %v3642_v33  ;;  %v1609_v30 = vpop.f32.mrb[21].mxu1 }
 0x73a   :  { %v1610_v17 = vadd.f32 %v1609_v30, %v3644_v36 }
 0x73b   :  { %v1618_v63 = vmax.f32 %v1608_v12, 0.0 }
 0x73c   :  { %v1619_v18 = vmax.f32 %v1610_v17, 0.0  ;;  %v1613_v11 = vpop.f32.mrb[22].mxu1 }
 0x73d   :  { %v1622_v14 = vmax.f32 %v3857_v39, %v1618_v63  ;;  %v1614_v20 = vadd.f32 %v1613_v11, %v3642_v33  ;;  %v1615_v19 = vpop.f32.mrb[23].mxu1 }
 0x73e   :  { %v1623_v23 = vmax.f32 %v3861_v44, %v1619_v18  ;;  %v1616_v21 = vadd.f32 %v1615_v19, %v3644_v36 }
 0x73f   :  { %v1620_v13 = vmax.f32 %v1614_v20, 0.0 }
 0x740   :  { %v1621_v26 = vmax.f32 %v1616_v21, 0.0 }
 0x741   :  { %v1624_v22 = vmax.f32 %v3865_v54, %v1620_v13 }
 0x742   :  { %v1625_v25 = vmax.f32 %v3868_v55, %v1621_v26 }
 0x74b   :  { %v2645_v27 = vpop.f32.mrb[26].mxu0 }
 0x74c   :  { %v1784_v32 = vpop.f32.mrb[27].mxu0  ;;  %v1790_v38 = vadd.f32 %v2645_v27, %v3525_v31 }
 0x74d   :  { %v1785_v37 = vadd.f32 %v3525_v31, %v1784_v32 }
 0x74e   :  { %v1794_v42 = vmax.f32 %v1790_v38, 0.0 }
 0x74f   :  { %v1793_v39 = vmax.f32 %v1785_v37, 0.0 }
 0x751   :  { %1860 = vmatmul.mubr.f32.vlgmr.msra.gmra.mrb[24].mxu1 %v1793_v39 }
 0x752   :  { %1865 = vmatprep.mubr.f32.mxu1 %v3200_v29  ;;  %3169 = vmatpush1.bf16.msra.mxu1 %v3359_v34 }
 0x753   :  { %3171 = vmatprep.subr.bf16.mxu1 %v3361_v35 }
 0x755   :  { %1866 = vmatmul.mubr.f32.gmra.mrb[26].mxu1 %v1794_v42 }
 0x756   :  { %3173 = vmatpush1.bf16.msra.mxu1 %v3377_v40  ;;  %2113 = vmatprep.mubr.f32.mxu1 %v3200_v29 }
 0x757   :  { %3175 = vmatprep.subr.bf16.mxu1 %v3380_v41 }
 0x75a   :  { %3177 = vmatpush1.bf16.msra.mxu1 %v3395_v46 }
 0x75b   :  { %3179 = vmatprep.subr.bf16.mxu1 %v3398_v47 }
 0x75d   :  { %v2666_v43 = vpop.f32.mrb[28].mxu0 }
 0x75e   :  { %v1961_v44 = vadd.f32 %v2666_v43, %v3468_v7  ;;  %v1955_v45 = vpop.f32.mrb[29].mxu0  ;;  %3181 = vmatpush1.bf16.msra.mxu1 %v3413_v52 }
 0x75f   :  { %v1956_v34 = vadd.f32 %v3468_v7, %v1955_v45  ;;  %3183 = vmatprep.subr.bf16.mxu1 %v3416_v53 }
 0x760   :  { %v1965_v40 = vmax.f32 %v1961_v44, 0.0 }
 0x761   :  { %v1964_v35 = vmax.f32 %v1956_v34, 0.0 }
 0x762   :  { %3185 = vmatpush1.bf16.msra.mxu1 %v3431_v58 }
 0x763   :  { %2683 = vmatprep.mubr.msk.f32.mxu0 %vm180_vm2, %v1964_v35  ;;  %3187 = vmatprep.subr.bf16.mxu1 %v3434_v59 }
 0x764   :  { %2684 = vmatmul.mubr.msk.f32.vlgmr.msra.gmra.mrb[30].mxu0 %vm180_vm2, %v1965_v40 }
 0x766   :  { %3189 = vmatpush1.bf16.msra.mxu1 %v3449_v0 }
 0x767   :  { %3191 = vmatprep.subr.bf16.mxu1 %v3452_v1 }
 0x76a   :  { %3193 = vmatpush1.bf16.msra.mxu1 %v3461_v6 }
 0x76b   :  { %3195 = vmatprep.subr.bf16.mxu1 %v3508_v24 }
 0x76e   :  { %3197 = vmatpush1.bf16.msra.mxu1 %v3516_v28 }
 0x824   :  { %v1861_v41 = vpop.f32.mrb[24].mxu1 }
 0x825   :  { %v1862_v46 = vadd.f32 %v1861_v41, %v3642_v33  ;;  %v1863_v47 = vpop.f32.mrb[25].mxu1 }
 0x826   :  { %v1864_v52 = vadd.f32 %v1863_v47, %v3644_v36 }
 0x827   :  { %v1872_v53 = vmax.f32 %v1862_v46, 0.0 }
 0x828   :  { %v1873_v58 = vmax.f32 %v1864_v52, 0.0  ;;  %v1867_v59 = vpop.f32.mrb[26].mxu1 }
 0x829   :  { %v1876_v7 = vmax.f32 %v1622_v14, %v1872_v53  ;;  %v1868_v0 = vadd.f32 %v1867_v59, %v3642_v33  ;;  %v1869_v49 = vpop.f32.mrb[27].mxu1 }
 0x82a   :  { %v1877_v1 = vmax.f32 %v1623_v23, %v1873_v58  ;;  %v1870_v6 = vadd.f32 %v1869_v49, %v3644_v36 }
 0x82b   :  { %v1874_v50 = vmax.f32 %v1868_v0, 0.0 }
 0x82c   :  { %v1875_v24 = vmax.f32 %v1870_v6, 0.0 }
 0x82d   :  { %v1878_v54 = vmax.f32 %v1624_v22, %v1874_v50 }
 0x82e   :  { %v1879_v28 = vmax.f32 %v1625_v25, %v1875_v24 }
 0x837   :  { %v2685_v55 = vpop.f32.mrb[30].mxu0 }
 0x838   :  { %v2038_v2 = vpop.f32.mrb[31].mxu0  ;;  %v2044_v48 = vadd.f32 %v2685_v55, %v3525_v31 }
 0x839   :  { %v2039_v57 = vadd.f32 %v3525_v31, %v2038_v2 }
 0x83a   :  { %v2048_v60 = vmax.f32 %v2044_v48, 0.0 }
 0x83b   :  { %v2047_v15 = vmax.f32 %v2039_v57, 0.0 }
 0x83d   :  { %2114 = vmatmul.mubr.f32.vlgmr.msra.gmra.mrb[28].mxu1 %v2047_v15 }
 0x83e   :  { %2119 = vmatprep.mubr.f32.mxu1 %v3200_v29 }
 0x841   :  { %2120 = vmatmul.mubr.f32.gmra.mrb[30].mxu1 %v2048_v60 }
 0x910   :  { %v2115_v51 = vpop.f32.mrb[28].mxu1 }
 0x911   :  { %v2116_v4 = vadd.f32 %v2115_v51, %v3642_v33  ;;  %v2117_v8 = vpop.f32.mrb[29].mxu1 }
 0x912   :  { %v2118_v61 = vadd.f32 %v2117_v8, %v3644_v36 }
 0x913   :  { %v2126_v16 = vmax.f32 %v2116_v4, 0.0 }
 0x914   :  { %v2127_v62 = vmax.f32 %v2118_v61, 0.0  ;;  %v2121_v10 = vpop.f32.mrb[30].mxu1 }
 0x915   :  { %v2130_v56 = vmax.f32 %v1876_v7, %v2126_v16  ;;  %v2122_v3 = vadd.f32 %v2121_v10, %v3642_v33  ;;  %v2123_v5 = vpop.f32.mrb[31].mxu1 }
 0x916   :  { %v2131_v31 = vmax.f32 %v1877_v1, %v2127_v62  ;;  %v2124_v9 = vadd.f32 %v2123_v5, %v3644_v36 }
 0x917   :  { %2134 = vst [vmem:[%s3983_s7] sm:$0xff] %v2130_v56  ;;  %v2128_v29 = vmax.f32 %v2122_v3, 0.0 }
 0x918   :  { %2135 = vst [vmem:[%s3983_s7 + $0x8] sm:$0xff] %v2131_v31  ;;  %v2129_v12 = vmax.f32 %v2124_v9, 0.0 }
 0x919   :  { %v2132_v30 = vmax.f32 %v1878_v54, %v2128_v29 }
 0x91a   :  { %v2133_v17 = vmax.f32 %v1879_v28, %v2129_v12 }
 0x91b   :  { %2136 = vst [vmem:[%s3983_s7 + $0x10] sm:$0xff] %v2132_v30 }
 0x91c   :  { %2137 = vst [vmem:[%s3983_s7 + $0x18] sm:$0xff] %v2133_v17 }

// kernel: forward.14
= control target key start
LH: loop header
LB: loop body
LE: loop exit
PB: predicated region body
PF: predicated region fallthrough
CT: control target
= control target key end

     0   :  { %vm91_vm0 = vcmask 523264   ;;  %vm486_vm1 = vcmask 261120   ;;  %s1025_s1 = inlined_call_operand.vmem [shape: f32[320,64], index: 1, kind: input, shape index: {}]   ;;  %s1026_s0 = inlined_call_operand.vmem [shape: f32[64,320], index: 0, kind: input, shape index: {}]   ;;  %s1027_s3 = inlined_call_operand.vmem [shape: f32[64,32], index: 3, kind: input, shape index: {}]   ;;  %s1028_s2 = inlined_call_operand.vmem [shape: f32[1,64], index: 2, kind: input, shape index: {}]   ;;  %s1029_s4 = inlined_call_operand.vmem [shape: f32[1,32], index: 4, kind: input, shape index: {}]   ;;  %s1030_s5 = inlined_call_operand.vmem [shape: f32[64,32], index: 5, kind: output, shape index: {}]  }
   0x1   :  { %v60_v0 = vld [vmem:[%s1025_s1 + $0x80] sm:$0xff]  ;;  %v61_v1 = vld [vmem:[%s1025_s1 + $0x88] sm:$0xff]  ;;  %v62_v5 = vld [vmem:[%s1025_s1 + $0x90] sm:$0xff] }
   0x2   :  { %v44_v2 = vld [vmem:[%s1025_s1] sm:$0xff]  ;;  %v661_v3 = vpack.c.bf16 %v61_v1, %v60_v0  ;;  %v45_v4 = vld [vmem:[%s1025_s1 + $0x8] sm:$0xff]  ;;  %v63_v6 = vld [vmem:[%s1025_s1 + $0x98] sm:$0xff] }
   0x3   :  { %v663_v7 = vpack.c.bf16 %v45_v4, %v44_v2  ;;  %v665_v8 = vpack.c.bf16 %v63_v6, %v62_v5  ;;  %v46_v9 = vld [vmem:[%s1025_s1 + $0x10] sm:$0xff]  ;;  %v47_v10 = vld [vmem:[%s1025_s1 + $0x18] sm:$0xff]  ;;  %v64_v11 = vld [vmem:[%s1025_s1 + $0xa0] sm:$0xff] }
   0x4   :  { %662 = vmatprep.subr.bf16.mxu0 %v661_v3  ;;  %v65_v12 = vld [vmem:[%s1025_s1 + $0xa8] sm:$0xff]  ;;  %v667_v13 = vpack.c.bf16 %v47_v10, %v46_v9  ;;  %v48_v15 = vld [vmem:[%s1025_s1 + $0x20] sm:$0xff]  ;;  %v66_v17 = vld [vmem:[%s1025_s1 + $0xb0] sm:$0xff] }
   0x5   :  { %664 = vmatpush3.bf16.msra.mxu0 %v663_v7  ;;  %v669_v14 = vpack.c.bf16 %v65_v12, %v64_v11  ;;  %v49_v16 = vld [vmem:[%s1025_s1 + $0x28] sm:$0xff]  ;;  %v67_v18 = vld [vmem:[%s1025_s1 + $0xb8] sm:$0xff]  ;;  %v76_v19 = vld [vmem:[%s1025_s1 + $0x100] sm:$0xff] }
   0x6   :  { %666 = vmatprep.subr.bf16.mxu0 %v665_v8  ;;  %v77_v20 = vld [vmem:[%s1025_s1 + $0x108] sm:$0xff]  ;;  %v671_v21 = vpack.c.bf16 %v49_v16, %v48_v15  ;;  %v50_v22 = vld [vmem:[%s1025_s1 + $0x30] sm:$0xff]  ;;  %v673_v24 = vpack.c.bf16 %v67_v18, %v66_v17  ;;  %v51_v25 = vld [vmem:[%s1025_s1 + $0x38] sm:$0xff] }
   0x7   :  { %v693_v23 = vpack.c.bf16 %v77_v20, %v76_v19  ;;  %v78_v26 = vld [vmem:[%s1025_s1 + $0x110] sm:$0xff]  ;;  %v79_v27 = vld [vmem:[%s1025_s1 + $0x118] sm:$0xff]  ;;  %v68_v28 = vld [vmem:[%s1025_s1 + $0xc0] sm:$0xff]  ;;  %v675_v33 = vpack.c.bf16 %v51_v25, %v50_v22 }
   0x8   :  { %v69_v29 = vld [vmem:[%s1025_s1 + $0xc8] sm:$0xff]  ;;  %v697_v30 = vpack.c.bf16 %v79_v27, %v78_v26  ;;  %v80_v31 = vld [vmem:[%s1025_s1 + $0x120] sm:$0xff]  ;;  %v82_v39 = vld [vmem:[%s1025_s1 + $0x130] sm:$0xff] }
   0x9   :  { %668 = vmatpush3.bf16.msra.mxu0 %v667_v13  ;;  %694 = vmatprep.subr.bf16.mxu1 %v693_v23  ;;  %v81_v32 = vld [vmem:[%s1025_s1 + $0x128] sm:$0xff]  ;;  %v52_v34 = vld [vmem:[%s1025_s1 + $0x40] sm:$0xff]  ;;  %v677_v37 = vpack.c.bf16 %v69_v29, %v68_v28  ;;  %v83_v40 = vld [vmem:[%s1025_s1 + $0x138] sm:$0xff] }
   0xa   :  { %670 = vmatprep.subr.bf16.mxu0 %v669_v14  ;;  %696 = vmatpush3.bf16.msra.mxu1 %v693_v23  ;;  %v701_v35 = vpack.c.bf16 %v81_v32, %v80_v31  ;;  %v21_v36 = vld [vmem:[%s1026_s0 + $0x8] sm:$0xff]  ;;  %v70_v41 = vld [vmem:[%s1025_s1 + $0xd0] sm:$0xff]  ;;  %v71_v42 = vld [vmem:[%s1025_s1 + $0xd8] sm:$0xff]  ;;  %v705_v45 = vpack.c.bf16 %v83_v40, %v82_v39 }
   0xb   :  { %698 = vmatprep.subr.bf16.mxu1 %v697_v30  ;;  %v53_v38 = vld [vmem:[%s1025_s1 + $0x48] sm:$0xff]  ;;  %180 = vmatprep.mubr.f32.mxu0 %v21_v36  ;;  %v22_v43 = vld [vmem:[%s1026_s0 + $0x10] sm:$0xff]  ;;  %v681_v46 = vpack.c.bf16 %v71_v42, %v70_v41  ;;  %v55_v48 = vld [vmem:[%s1025_s1 + $0x58] sm:$0xff] }
   0xc   :  { %621 = vmatprep.mubr.msk.f32.mxu1 %vm91_vm0, %v22_v43  ;;  %v679_v44 = vpack.c.bf16 %v53_v38, %v52_v34  ;;  %v54_v47 = vld [vmem:[%s1025_s1 + $0x50] sm:$0xff]  ;;  %v72_v49 = vld [vmem:[%s1025_s1 + $0xe0] sm:$0xff]  ;;  %v73_v50 = vld [vmem:[%s1025_s1 + $0xe8] sm:$0xff] }
   0xd   :  { %672 = vmatpush3.bf16.msra.mxu0 %v671_v21  ;;  %v683_v51 = vpack.c.bf16 %v55_v48, %v54_v47  ;;  %v56_v52 = vld [vmem:[%s1025_s1 + $0x60] sm:$0xff]  ;;  %v685_v53 = vpack.c.bf16 %v73_v50, %v72_v49  ;;  %v57_v54 = vld [vmem:[%s1025_s1 + $0x68] sm:$0xff]  ;;  %v74_v57 = vld [vmem:[%s1025_s1 + $0xf0] sm:$0xff] }
   0xe   :  { %674 = vmatprep.subr.bf16.mxu0 %v673_v24  ;;  %700 = vmatpush3.bf16.msra.mxu1 %v697_v30  ;;  %v334_v55 = vld [vmem:[%s1027_s3] sm:$0xff]  ;;  %v335_v56 = vld [vmem:[%s1027_s3 + $0x8] sm:$0xff]  ;;  %v75_v58 = vld [vmem:[%s1025_s1 + $0xf8] sm:$0xff]  ;;  %v687_v61 = vpack.c.bf16 %v57_v54, %v56_v52 }
   0xf   :  { %702 = vmatprep.subr.bf16.mxu1 %v701_v35  ;;  %v709_v59 = vpack.c.bf16 %v335_v56, %v334_v55  ;;  %v25_v60 = vld [vmem:[%s1026_s0 + $0x28] sm:$0xff]  ;;  %v28_v62 = vld [vmem:[%s1026_s0 + $0x40] sm:$0xff]  ;;  %v689_v63 = vpack.c.bf16 %v75_v58, %v74_v57  ;;  %v58_v0 = vld [vmem:[%s1025_s1 + $0x70] sm:$0xff] }
  0x10   :  { %v59_v1 = vld [vmem:[%s1025_s1 + $0x78] sm:$0xff]  ;;  %v34_v4 = vld [vmem:[%s1026_s0 + $0x70] sm:$0xff]  ;;  %v37_v5 = vld [vmem:[%s1026_s0 + $0x88] sm:$0xff] }
  0x11   :  { %676 = vmatpush3.bf16.msra.mxu0 %v675_v33  ;;  %v31_v2 = vld [vmem:[%s1026_s0 + $0x58] sm:$0xff]  ;;  %v691_v3 = vpack.c.bf16 %v59_v1, %v58_v0  ;;  %v20_v6 = vld [vmem:[%s1026_s0] sm:$0xff]  ;;  %v26_v12 = vld [vmem:[%s1026_s0 + $0x30] sm:$0xff] }
  0x12   :  { %678 = vmatprep.subr.bf16.mxu0 %v677_v37  ;;  %704 = vmatpush3.bf16.msra.mxu1 %v701_v35  ;;  %v40_v7 = vld [vmem:[%s1026_s0 + $0xa0] sm:$0xff]  ;;  %v43_v9 = vld [vmem:[%s1026_s0 + $0xb8] sm:$0xff]  ;;  %v30_v13 = vld [vmem:[%s1026_s0 + $0x50] sm:$0xff] }
  0x13   :  { %706 = vmatprep.subr.bf16.mxu1 %v705_v45  ;;  %v24_v8 = vld [vmem:[%s1026_s0 + $0x20] sm:$0xff]  ;;  %v23_v10 = vld [vmem:[%s1026_s0 + $0x18] sm:$0xff]  ;;  %v29_v14 = vld [vmem:[%s1026_s0 + $0x48] sm:$0xff] }
  0x14   :  { %v27_v11 = vld [vmem:[%s1026_s0 + $0x38] sm:$0xff]  ;;  %v33_v15 = vld [vmem:[%s1026_s0 + $0x68] sm:$0xff]  ;;  %v32_v16 = vld [vmem:[%s1026_s0 + $0x60] sm:$0xff] }
  0x15   :  { %680 = vmatpush3.bf16.msra.mxu0 %v679_v44  ;;  %v36_v17 = vld [vmem:[%s1026_s0 + $0x80] sm:$0xff]  ;;  %v35_v18 = vld [vmem:[%s1026_s0 + $0x78] sm:$0xff]  ;;  %v38_v20 = vld [vmem:[%s1026_s0 + $0x90] sm:$0xff] }
  0x16   :  { %682 = vmatprep.subr.bf16.mxu0 %v681_v46  ;;  %708 = vmatpush3.bf16.msra.mxu1 %v705_v45  ;;  %v39_v19 = vld [vmem:[%s1026_s0 + $0x98] sm:$0xff]  ;;  %v42_v21 = vld [vmem:[%s1026_s0 + $0xb0] sm:$0xff]  ;;  %v41_v22 = vld [vmem:[%s1026_s0 + $0xa8] sm:$0xff] }
  0x17   :  { %710 = vmatprep.subr.bf16.mxu1 %v709_v59  ;;  %v336_v23 = vld [vmem:[%s1027_s3 + $0x10] sm:$0xff]  ;;  %v337_v24 = vld [vmem:[%s1027_s3 + $0x18] sm:$0xff]  ;;  %v338_v26 = vld [vmem:[%s1027_s3 + $0x20] sm:$0xff] }
  0x18   :  { %v713_v25 = vpack.c.bf16 %v337_v24, %v336_v23  ;;  %v339_v27 = vld [vmem:[%s1027_s3 + $0x28] sm:$0xff]  ;;  %v340_v29 = vld [vmem:[%s1027_s3 + $0x30] sm:$0xff]  ;;  %v341_v30 = vld [vmem:[%s1027_s3 + $0x38] sm:$0xff] }
  0x19   :  { %684 = vmatpush3.bf16.msra.mxu0 %v683_v51  ;;  %622 = vmatmul.mubr.msk.f32.vlgmr.msra.gmra.mrb[0].mxu1 %vm91_vm0, %v25_v60  ;;  %v717_v28 = vpack.c.bf16 %v339_v27, %v338_v26  ;;  %v721_v31 = vpack.c.bf16 %v341_v30, %v340_v29  ;;  %v499_v40 = vld [vmem:[%s1028_s2] ss:$0 sm:$0xff] }
  0x1a   :  { %686 = vmatprep.subr.bf16.mxu0 %v685_v53  ;;  %624 = vmatprep.mubr.msk.f32.mxu1 %vm91_vm0, %v28_v62 }
  0x1b   :  { %712 = vmatpush3.bf16.msra.mxu1 %v709_v59 }
  0x1c   :  { %714 = vmatprep.subr.bf16.mxu1 %v713_v25 }
  0x1d   :  { %688 = vmatpush3.bf16.msra.mxu0 %v687_v61  ;;  %625 = vmatmul.mubr.msk.f32.gmra.mrb[2].mxu1 %vm91_vm0, %v31_v2 }
  0x1e   :  { %690 = vmatprep.subr.bf16.mxu0 %v689_v63  ;;  %627 = vmatprep.mubr.msk.f32.mxu1 %vm91_vm0, %v34_v4 }
  0x1f   :  { %716 = vmatpush3.bf16.msra.mxu1 %v713_v25  ;;  %v508_v25 = vld [vmem:[%s1029_s4] ss:$0 sm:$0xff] }
  0x20   :  { %718 = vmatprep.subr.bf16.mxu1 %v717_v28 }
  0x21   :  { %692 = vmatpush3.bf16.msra.mxu0 %v691_v3  ;;  %628 = vmatmul.mubr.msk.f32.gmra.mrb[4].mxu1 %vm91_vm0, %v37_v5 }
  0x22   :  { %630 = vmatprep.mubr.msk.f32.mxu1 %vm91_vm0, %v40_v7 }
  0x23   :  { %720 = vmatpush3.bf16.msra.mxu1 %v717_v28 }
  0x24   :  { %181 = vmatmul.mubr.f32.vlgmr.msra.gmra.mrb[0].mxu0 %v20_v6  ;;  %722 = vmatprep.subr.bf16.mxu1 %v721_v31 }
  0x25   :  { %185 = vmatprep.mubr.f32.mxu0 %v24_v8  ;;  %631 = vmatmul.mubr.msk.f32.gmra.mrb[6].mxu1 %vm91_vm0, %v43_v9 }
  0x27   :  { %724 = vmatpush3.bf16.msra.mxu1 %v721_v31 }
  0x28   :  { %186 = vmatmul.mubr.f32.gmra.mrb[2].mxu0 %v23_v10 }
  0x29   :  { %190 = vmatprep.mubr.f32.mxu0 %v27_v11 }
  0x2c   :  { %191 = vmatmul.mubr.f32.gmra.mrb[4].mxu0 %v26_v12 }
  0x2d   :  { %195 = vmatprep.mubr.f32.mxu0 %v30_v13 }
  0x30   :  { %196 = vmatmul.mubr.f32.gmra.mrb[6].mxu0 %v29_v14 }
  0x31   :  { %200 = vmatprep.mubr.f32.mxu0 %v33_v15 }
  0x34   :  { %201 = vmatmul.mubr.f32.gmra.mrb[8].mxu0 %v32_v16 }
  0x35   :  { %205 = vmatprep.mubr.f32.mxu0 %v36_v17 }
  0x38   :  { %206 = vmatmul.mubr.f32.gmra.mrb[10].mxu0 %v35_v18 }
  0x39   :  { %210 = vmatprep.mubr.f32.mxu0 %v39_v19 }
  0x3c   :  { %211 = vmatmul.mubr.f32.gmra.mrb[12].mxu0 %v38_v20 }
  0x3d   :  { %215 = vmatprep.mubr.f32.mxu0 %v42_v21 }
  0x40   :  { %216 = vmatmul.mubr.f32.gmra.mrb[14].mxu0 %v41_v22 }
  0xec   :  { %v623_v32 = vpop.f32.mrb[0].mxu1 }
  0xed   :  { %v287_v33 = vpop.f32.mrb[1].mxu1 }
  0xf0   :  { %v626_v34 = vpop.f32.mrb[2].mxu1 }
  0xf1   :  { %v297_v35 = vpop.f32.mrb[3].mxu1 }
  0xf4   :  { %v629_v36 = vpop.f32.mrb[4].mxu1 }
  0xf5   :  { %v307_v38 = vpop.f32.mrb[5].mxu1 }
  0xf7   :  { %v549_v37 = vpop.f32.mrb[0].mxu0 }
  0xf8   :  { %v550_v39 = vpop.f32.mrb[1].mxu0  ;;  %v632_v42 = vpop.f32.mrb[6].mxu1 }
  0xf9   :  { %v551_v41 = vadd.f32 %v550_v39, %v549_v37  ;;  %v317_v45 = vpop.f32.mrb[7].mxu1 }
  0xfb   :  { %v552_v43 = vpop.f32.mrb[2].mxu0  ;;  %v183_v44 = vadd.f32 %v551_v41, %v499_v40 }
  0xfc   :  { %v553_v46 = vpop.f32.mrb[3].mxu0 }
  0xfd   :  { %v554_v47 = vadd.f32 %v553_v46, %v552_v43  ;;  %v288_v48 = vadd.f32 %v287_v33, %v183_v44 }
  0xff   :  { %v188_v49 = vadd.f32 %v554_v47, %v499_v40  ;;  %v326_v50 = vmax.f32 %v288_v48, 0.0  ;;  %v555_v51 = vpop.f32.mrb[4].mxu0 }
 0x100   :  { %v556_v52 = vpop.f32.mrb[5].mxu0 }
 0x101   :  { %v293_v53 = vadd.f32 %v623_v32, %v188_v49  ;;  %v557_v54 = vadd.f32 %v556_v52, %v555_v51  ;;  %649 = vmatprep.mubr.msk.f32.mxu1 %vm91_vm0, %v326_v50 }
 0x103   :  { %v327_v55 = vmax.f32 %v293_v53, 0.0  ;;  %v558_v56 = vpop.f32.mrb[6].mxu0  ;;  %v193_v57 = vadd.f32 %v557_v54, %v499_v40 }
 0x104   :  { %v559_v58 = vpop.f32.mrb[7].mxu0 }
 0x105   :  { %v560_v59 = vadd.f32 %v559_v58, %v558_v56  ;;  %v298_v60 = vadd.f32 %v297_v35, %v193_v57  ;;  %650 = vmatmul.mubr.msk.f32.vlgmr.msra.gmra.mrb[8].mxu1 %vm91_vm0, %v327_v55 }
 0x107   :  { %v198_v61 = vadd.f32 %v560_v59, %v499_v40  ;;  %v328_v62 = vmax.f32 %v298_v60, 0.0  ;;  %v561_v63 = vpop.f32.mrb[8].mxu0 }
 0x108   :  { %v562_v0 = vpop.f32.mrb[9].mxu0 }
 0x109   :  { %v303_v1 = vadd.f32 %v626_v34, %v198_v61  ;;  %v563_v2 = vadd.f32 %v562_v0, %v561_v63  ;;  %652 = vmatprep.mubr.msk.f32.mxu1 %vm91_vm0, %v328_v62 }
 0x10b   :  { %v329_v3 = vmax.f32 %v303_v1, 0.0  ;;  %v564_v4 = vpop.f32.mrb[10].mxu0  ;;  %v203_v5 = vadd.f32 %v563_v2, %v499_v40 }
 0x10c   :  { %v565_v6 = vpop.f32.mrb[11].mxu0 }
 0x10d   :  { %v566_v7 = vadd.f32 %v565_v6, %v564_v4  ;;  %v308_v8 = vadd.f32 %v307_v38, %v203_v5  ;;  %653 = vmatmul.mubr.msk.f32.gmra.mrb[10].mxu1 %vm91_vm0, %v329_v3 }
 0x10f   :  { %v208_v9 = vadd.f32 %v566_v7, %v499_v40  ;;  %v330_v10 = vmax.f32 %v308_v8, 0.0  ;;  %v567_v11 = vpop.f32.mrb[12].mxu0 }
 0x110   :  { %v568_v12 = vpop.f32.mrb[13].mxu0 }
 0x111   :  { %v313_v13 = vadd.f32 %v629_v36, %v208_v9  ;;  %v569_v14 = vadd.f32 %v568_v12, %v567_v11  ;;  %655 = vmatprep.mubr.msk.f32.mxu1 %vm91_vm0, %v330_v10 }
 0x113   :  { %v331_v15 = vmax.f32 %v313_v13, 0.0  ;;  %v570_v16 = vpop.f32.mrb[14].mxu0  ;;  %v213_v17 = vadd.f32 %v569_v14, %v499_v40 }
 0x114   :  { %v571_v18 = vpop.f32.mrb[15].mxu0 }
 0x115   :  { %v572_v19 = vadd.f32 %v571_v18, %v570_v16  ;;  %v318_v20 = vadd.f32 %v317_v45, %v213_v17  ;;  %656 = vmatmul.mubr.msk.f32.gmra.mrb[12].mxu1 %vm91_vm0, %v331_v15 }
 0x117   :  { %v218_v21 = vadd.f32 %v572_v19, %v499_v40  ;;  %v332_v22 = vmax.f32 %v318_v20, 0.0 }
 0x119   :  { %v323_v23 = vadd.f32 %v632_v42, %v218_v21  ;;  %658 = vmatprep.mubr.msk.f32.mxu1 %vm91_vm0, %v332_v22 }
 0x11b   :  { %v333_v24 = vmax.f32 %v323_v23, 0.0 }
 0x11d   :  { %659 = vmatmul.mubr.msk.f32.gmra.mrb[14].mxu1 %vm91_vm0, %v333_v24 }
 0x1d8   :  { %v651_v26 = vpop.f32.mrb[8].mxu1 }
 0x1d9   :  { %v445_v27 = vadd.f32 %v651_v26, %v508_v25  ;;  %v439_v28 = vpop.f32.mrb[9].mxu1 }
 0x1da   :  { %v440_v29 = vadd.f32 %v508_v25, %v439_v28 }
 0x1db   :  { %v479_v30 = vmax.f32 %v445_v27, 0.0 }
 0x1dc   :  { %v478_v31 = vmax.f32 %v440_v29, 0.0 }
 0x1dd   :  { %488 = vst.msk [vmem:[%s1030_s5 + $0x8] sm:$0xff] %vm486_vm1, %v479_v30 }
 0x1de   :  { %487 = vst.msk [vmem:[%s1030_s5] sm:$0xff] %vm486_vm1, %v478_v31 }
 0x1e0   :  { %v654_v32 = vpop.f32.mrb[10].mxu1 }
 0x1e1   :  { %v455_v33 = vadd.f32 %v654_v32, %v508_v25  ;;  %v449_v34 = vpop.f32.mrb[11].mxu1 }
 0x1e2   :  { %v450_v35 = vadd.f32 %v508_v25, %v449_v34 }
 0x1e3   :  { %v481_v36 = vmax.f32 %v455_v33, 0.0 }
 0x1e4   :  { %v480_v37 = vmax.f32 %v450_v35, 0.0 }
 0x1e5   :  { %490 = vst.msk [vmem:[%s1030_s5 + $0x18] sm:$0xff] %vm486_vm1, %v481_v36 }
 0x1e6   :  { %489 = vst.msk [vmem:[%s1030_s5 + $0x10] sm:$0xff] %vm486_vm1, %v480_v37 }
 0x1e8   :  { %v657_v38 = vpop.f32.mrb[12].mxu1 }
 0x1e9   :  { %v465_v39 = vadd.f32 %v657_v38, %v508_v25  ;;  %v459_v40 = vpop.f32.mrb[13].mxu1 }
 0x1ea   :  { %v460_v41 = vadd.f32 %v508_v25, %v459_v40 }
 0x1eb   :  { %v483_v42 = vmax.f32 %v465_v39, 0.0 }
 0x1ec   :  { %v482_v43 = vmax.f32 %v460_v41, 0.0 }
 0x1ed   :  { %492 = vst.msk [vmem:[%s1030_s5 + $0x28] sm:$0xff] %vm486_vm1, %v483_v42 }
 0x1ee   :  { %491 = vst.msk [vmem:[%s1030_s5 + $0x20] sm:$0xff] %vm486_vm1, %v482_v43 }
 0x1f0   :  { %v660_v44 = vpop.f32.mrb[14].mxu1 }
 0x1f1   :  { %v475_v45 = vadd.f32 %v660_v44, %v508_v25  ;;  %v469_v46 = vpop.f32.mrb[15].mxu1 }
 0x1f2   :  { %v470_v47 = vadd.f32 %v508_v25, %v469_v46 }
 0x1f3   :  { %v485_v48 = vmax.f32 %v475_v45, 0.0 }
 0x1f4   :  { %v484_v49 = vmax.f32 %v470_v47, 0.0 }
 0x1f5   :  { %494 = vst.msk [vmem:[%s1030_s5 + $0x38] sm:$0xff] %vm486_vm1, %v485_v48 }
 0x1f6   :  { %493 = vst.msk [vmem:[%s1030_s5 + $0x30] sm:$0xff] %vm486_vm1, %v484_v49 }

// kernel: forward.15
= control target key start
LH: loop header
LB: loop body
LE: loop exit
PB: predicated region body
PF: predicated region fallthrough
CT: control target
= control target key end

     0   :  { %vm23_vm0 = vcmask 23552   ;;  %vm273_vm2 = vcmask 261120   ;;  %s948_s1 = inlined_call_operand.vmem [shape: f32[2,32,3], index: 1, kind: input, shape index: {}]   ;;  %s949_s0 = inlined_call_operand.vmem [shape: f32[2,64,3], index: 0, kind: input, shape index: {}]   ;;  %s950_s2 = inlined_call_operand.vmem [shape: f32[2,64,32], index: 2, kind: output, shape index: {}]  }
   0x1   :  { %v19_v0 = vld [vmem:[%s948_s1] sm:$0xff]  ;;  %v20_v1 = vld [vmem:[%s948_s1 + $0x8] sm:$0xff]  ;;  %vm714_vm1 = vmpackc.low %vm23_vm0, %vm23_vm0 }
   0x2   :  { %v666_v3 = vpack.c.bf16 %v20_v1, %v19_v0  ;;  %v578_v4 = vld [vmem:[%s948_s1 + $0x20] sm:$0xff]  ;;  %v579_v5 = vld [vmem:[%s948_s1 + $0x28] sm:$0xff]  ;;  %v13_v6 = vld [vmem:[%s949_s0 + $0x10] sm:$0xff]  ;;  %v197_v26 = vmul.f32 %v19_v0, %v19_v0  ;;  %v198_v30 = vmul.f32 %v20_v1, %v20_v1 }
   0x3   :  { %v678_v7 = vpack.c.bf16 %v579_v5, %v578_v4  ;;  %v167_v8 = vmul.f32 %v13_v6, %v13_v6  ;;  %v11_v9 = vld [vmem:[%s949_s0] sm:$0xff]  ;;  %v14_v10 = vld [vmem:[%s949_s0 + $0x18] sm:$0xff]  ;;  %v12_v11 = vld [vmem:[%s949_s0 + $0x8] sm:$0xff]  ;;  %v469_v32 = vmul.f32 %v578_v4, %v578_v4  ;;  %v470_v36 = vmul.f32 %v579_v5, %v579_v5 }
   0x4   :  { %668 = vmatprep.subr.msk.bf16.mxu0 %vm714_vm1, %v666_v3  ;;  %v165_v12 = vmul.f32 %v11_v9, %v11_v9  ;;  %v168_v13 = vmul.f32 %v14_v10, %v14_v10  ;;  %v166_v14 = vmul.f32 %v12_v11, %v12_v11  ;;  %v21_v15 = vld [vmem:[%s948_s1 + $0x10] sm:$0xff]  ;;  %v22_v16 = vld [vmem:[%s948_s1 + $0x18] sm:$0xff]  ;;  %634 = vmatprep.mubr.msk.f32.mxu0 %vm23_vm0, %v11_v9  ;;  %v15_v21 = vld [vmem:[%s949_s0 + $0x20] sm:$0xff]  ;;  %v201_v29 = vsel %vm23_vm0, %v197_v26, 0.0 }
   0x5   :  { %v580_v17 = vld [vmem:[%s948_s1 + $0x30] sm:$0xff]  ;;  %680 = vmatprep.subr.msk.bf16.mxu1 %vm714_vm1, %v678_v7  ;;  %671 = vmatpush3.bf16.xpose.msk.msra.mxu0 %vm714_vm1, %v666_v3  ;;  %v179_v18 = vsel %vm23_vm0, %v167_v8, 0.0  ;;  %v672_v19 = vpack.c.bf16 %v22_v16, %v21_v15  ;;  %v581_v20 = vld [vmem:[%s948_s1 + $0x38] sm:$0xff]  ;;  %v762_v22 = vld [vmem:[%s949_s0 + $0x40] sm:$0xff]  ;;  %v169_v28 = vmul.f32 %v15_v21, %v15_v21  ;;  %v204_v33 = vsel %vm23_vm0, %v198_v30, 0.0 }
   0x6   :  { %683 = vmatpush3.bf16.xpose.msk.msra.mxu1 %vm714_vm1, %v678_v7  ;;  %180 = vadd.xlane.f32.xlu1 %v179_v18  ;;  %v173_v23 = vsel %vm23_vm0, %v165_v12, 0.0  ;;  %v684_v24 = vpack.c.bf16 %v581_v20, %v580_v17  ;;  %v182_v25 = vsel %vm23_vm0, %v168_v13, 0.0  ;;  %v176_v27 = vsel %vm23_vm0, %v166_v14, 0.0  ;;  %v571_v37 = vld [vmem:[%s949_s0 + $0x48] sm:$0xff]  ;;  %v572_v39 = vld [vmem:[%s949_s0 + $0x50] sm:$0xff]  ;;  %v573_v43 = vld [vmem:[%s949_s0 + $0x58] sm:$0xff] }
   0x7   :  { %174 = vadd.xlane.f32.xlu0 %v173_v23  ;;  %674 = vmatprep.subr.msk.bf16.mxu0 %vm714_vm1, %v672_v19  ;;  %v185_v31 = vsel %vm23_vm0, %v169_v28, 0.0  ;;  %v199_v34 = vmul.f32 %v21_v15, %v21_v15  ;;  %v473_v35 = vsel %vm23_vm0, %v469_v32, 0.0  ;;  %v200_v40 = vmul.f32 %v22_v16, %v22_v16  ;;  %v16_v44 = vld [vmem:[%s949_s0 + $0x28] sm:$0xff]  ;;  %v574_v46 = vld [vmem:[%s949_s0 + $0x60] sm:$0xff]  ;;  %v17_v51 = vld [vmem:[%s949_s0 + $0x30] sm:$0xff] }
   0x8   :  { %686 = vmatprep.subr.msk.bf16.mxu1 %vm714_vm1, %v684_v24  ;;  %654 = vmatprep.mubr.msk.f32.mxu1 %vm23_vm0, %v762_v22  ;;  %v476_v41 = vsel %vm23_vm0, %v470_v36, 0.0  ;;  %v471_v42 = vmul.f32 %v580_v17, %v580_v17  ;;  %v170_v47 = vmul.f32 %v16_v44, %v16_v44  ;;  %v472_v49 = vmul.f32 %v581_v20, %v581_v20  ;;  %v575_v50 = vld [vmem:[%s949_s0 + $0x68] sm:$0xff]  ;;  %v18_v52 = vld [vmem:[%s949_s0 + $0x38] sm:$0xff]  ;;  %v576_v53 = vld [vmem:[%s949_s0 + $0x70] sm:$0xff] }
   0x9   :  { %v207_v38 = vsel %vm23_vm0, %v199_v34, 0.0  ;;  %v210_v45 = vsel %vm23_vm0, %v200_v40, 0.0  ;;  %v172_v55 = vmul.f32 %v18_v52, %v18_v52  ;;  %v171_v57 = vmul.f32 %v17_v51, %v17_v51  ;;  %v577_v58 = vld [vmem:[%s949_s0 + $0x78] sm:$0xff] }
   0xa   :  { %183 = vadd.xlane.f32.xlu1 %v182_v25  ;;  %v479_v48 = vsel %vm23_vm0, %v471_v42, 0.0  ;;  %v188_v54 = vsel %vm23_vm0, %v170_v47, 0.0  ;;  %v482_v56 = vsel %vm23_vm0, %v472_v49, 0.0  ;;  %v437_v59 = vmul.f32 %v762_v22, %v762_v22 }
   0xb   :  { %177 = vadd.xlane.f32.xlu0 %v176_v27  ;;  %v194_v60 = vsel %vm23_vm0, %v172_v55, 0.0  ;;  %v191_v61 = vsel %vm23_vm0, %v171_v57, 0.0  ;;  %v438_v63 = vmul.f32 %v571_v37, %v571_v37  ;;  %v439_v1 = vmul.f32 %v572_v39, %v572_v39 }
   0xc   :  { %v445_v62 = vsel %vm23_vm0, %v437_v59, 0.0  ;;  %v440_v3 = vmul.f32 %v573_v43, %v573_v43  ;;  %v441_v5 = vmul.f32 %v574_v46, %v574_v46  ;;  %v442_v7 = vmul.f32 %v575_v50, %v575_v50 }
   0xd   :  { %677 = vmatpush3.bf16.xpose.msk.msra.mxu0 %vm714_vm1, %v672_v19  ;;  %v448_v0 = vsel %vm23_vm0, %v438_v63, 0.0  ;;  %v451_v2 = vsel %vm23_vm0, %v439_v1, 0.0  ;;  %v443_v9 = vmul.f32 %v576_v53, %v576_v53 }
   0xe   :  { %689 = vmatpush3.bf16.xpose.msk.msra.mxu1 %vm714_vm1, %v684_v24  ;;  %202 = vadd.xlane.f32.xlu1 %v201_v29  ;;  %v454_v4 = vsel %vm23_vm0, %v440_v3, 0.0  ;;  %v460_v8 = vsel %vm23_vm0, %v442_v7, 0.0 }
   0xf   :  { %186 = vadd.xlane.f32.xlu0 %v185_v31 }
  0x12   :  { %205 = vadd.xlane.f32.xlu1 %v204_v33 }
  0x13   :  { %474 = vadd.xlane.f32.xlu0 %v473_v35 }
  0x14   :  { %635 = vmatmul.mubr.msk.f32.vlgmr.msra.gmra.mrb[0].mxu0 %vm23_vm0, %v12_v11  ;;  %v444_v11 = vmul.f32 %v577_v58, %v577_v58 }
  0x15   :  { %655 = vmatmul.mubr.msk.f32.vlgmr.msra.gmra.mrb[0].mxu1 %vm23_vm0, %v571_v37  ;;  %637 = vmatprep.mubr.msk.f32.mxu0 %vm23_vm0, %v13_v6  ;;  %v457_v6 = vsel %vm23_vm0, %v441_v5, 0.0 }
  0x16   :  { %208 = vadd.xlane.f32.xlu1 %v207_v38  ;;  %657 = vmatprep.mubr.msk.f32.mxu1 %vm23_vm0, %v572_v39  ;;  %v466_v12 = vsel %vm23_vm0, %v444_v11, 0.0 }
  0x17   :  { %477 = vadd.xlane.f32.xlu0 %v476_v41 }
  0x18   :  { %638 = vmatmul.mubr.msk.f32.gmra.mrb[2].mxu0 %vm23_vm0, %v14_v10  ;;  %v463_v10 = vsel %vm23_vm0, %v443_v9, 0.0 }
  0x19   :  { %658 = vmatmul.mubr.msk.f32.gmra.mrb[2].mxu1 %vm23_vm0, %v573_v43  ;;  %640 = vmatprep.mubr.msk.f32.mxu0 %vm23_vm0, %v15_v21 }
  0x1a   :  { %211 = vadd.xlane.f32.xlu1 %v210_v45  ;;  %660 = vmatprep.mubr.msk.f32.mxu1 %vm23_vm0, %v574_v46 }
  0x1b   :  { %480 = vadd.xlane.f32.xlu0 %v479_v48 }
  0x1c   :  { %641 = vmatmul.mubr.msk.f32.gmra.mrb[4].mxu0 %vm23_vm0, %v16_v44 }
  0x1d   :  { %661 = vmatmul.mubr.msk.f32.gmra.mrb[4].mxu1 %vm23_vm0, %v575_v50  ;;  %643 = vmatprep.mubr.msk.f32.mxu0 %vm23_vm0, %v17_v51  ;;  %v261_v50 = vlaneseq }
  0x1e   :  { %663 = vmatprep.mubr.msk.f32.mxu1 %vm23_vm0, %v576_v53  ;;  %189 = vadd.xlane.f32.xlu1 %v188_v54 }
  0x1f   :  { %483 = vadd.xlane.f32.xlu0 %v482_v56  ;;  %v262_v51 = vshrl.u32 %v261_v50, 7 }
  0x20   :  { %644 = vmatmul.mubr.msk.f32.gmra.mrb[6].mxu0 %vm23_vm0, %v18_v52 }
  0x21   :  { %664 = vmatmul.mubr.msk.f32.gmra.mrb[6].mxu1 %vm23_vm0, %v577_v58 }
  0x22   :  { %195 = vadd.xlane.f32.xlu1 %v194_v60  ;;  %v263_v60 = vsub.s32 0, %v262_v51 }
  0x23   :  { %192 = vadd.xlane.f32.xlu0 %v191_v61 }
  0x26   :  { %446 = vadd.xlane.f32.xlu1 %v445_v62 }
  0x2a   :  { %449 = vadd.xlane.f32.xlu1 %v448_v0 }
  0x2e   :  { %452 = vadd.xlane.f32.xlu1 %v451_v2 }
  0x32   :  { %455 = vadd.xlane.f32.xlu1 %v454_v4 }
  0x36   :  { %458 = vadd.xlane.f32.xlu1 %v457_v6 }
  0x3a   :  { %461 = vadd.xlane.f32.xlu1 %v460_v8 }
  0x3e   :  { %464 = vadd.xlane.f32.xlu1 %v463_v10 }
  0x42   :  { %467 = vadd.xlane.f32.xlu1 %v466_v12 }
  0x93   :  { %v845_v13 = vpop.xlane.xlu1 %180 }
  0x94   :  { %v847_v14 = vpop.xlane.xlu0 %174 }
  0x97   :  { %v849_v15 = vpop.xlane.xlu1 %183 }
  0x98   :  { %v851_v16 = vpop.xlane.xlu0 %177 }
  0x9b   :  { %v203_v17 = vpop.xlane.xlu1 %202 }
  0x9c   :  { %v853_v18 = vpop.xlane.xlu0 %186  ;;  %229 = vxpose.xlu0.b32.start [1/4] (short) (narrow) %v203_v17, 8 }
  0x9f   :  { %v206_v19 = vpop.xlane.xlu1 %205 }
  0xa0   :  { %v475_v20 = vpop.xlane.xlu0 %474  ;;  %230 = vxpose.xlu0.b32.cont [2/4] (short) (narrow) %v206_v19, 8 }
  0xa1   :  { %501 = vxpose.xlu1.b32.start [1/4] (short) (narrow) %v475_v20, 8 }
  0xa3   :  { %v209_v21 = vpop.xlane.xlu1 %208 }
  0xa4   :  { %v478_v22 = vpop.xlane.xlu0 %477  ;;  %231 = vxpose.xlu0.b32.cont [3/4] (short) (narrow) %v209_v21, 8 }
  0xa5   :  { %502 = vxpose.xlu1.b32.cont [2/4] (short) (narrow) %v478_v22, 8 }
  0xa7   :  { %v212_v23 = vpop.xlane.xlu1 %211 }
  0xa8   :  { %v481_v24 = vpop.xlane.xlu0 %480  ;;  %232 = vxpose.xlu0.b32.end [4/4] (short) (narrow) %v212_v23, 8 }
  0xa9   :  { %503 = vxpose.xlu1.b32.cont [3/4] (short) (narrow) %v481_v24, 8 }
  0xab   :  { %v855_v26 = vpop.xlane.xlu1 %189 }
  0xac   :  { %v484_v25 = vpop.xlane.xlu0 %483 }
  0xad   :  { %504 = vxpose.xlu1.b32.end [4/4] (short) (narrow) %v484_v25, 8 }
  0xaf   :  { %v196_v34 = vpop.xlane.xlu1 %195 }
  0xb0   :  { %v193_v57 = vpop.xlane.xlu0 %192 }
  0xb3   :  { %v857_v40 = vpop.xlane.xlu1 %446 }
  0xb7   :  { %v859_v45 = vpop.xlane.xlu1 %449 }
  0xbb   :  { %v861_v46 = vpop.xlane.xlu1 %452 }
  0xbf   :  { %v863_v47 = vpop.xlane.xlu1 %455 }
  0xc3   :  { %v865_v48 = vpop.xlane.xlu1 %458 }
  0xc7   :  { %v867_v49 = vpop.xlane.xlu1 %461 }
  0xcb   :  { %v869_v54 = vpop.xlane.xlu1 %464 }
  0xcf   :  { %v468_v12 = vpop.xlane.xlu1 %467 }
  0xe7   :  { %v636_v27 = vpop.f32.mrb[0].mxu0 }
  0xe8   :  { %v656_v28 = vpop.f32.mrb[0].mxu1  ;;  %v126_v29 = vpop.f32.mrb[1].mxu0  ;;  %v214_v52 = vmul.f32 2.0, %v636_v27 }
  0xe9   :  { %v398_v30 = vpop.f32.mrb[1].mxu1  ;;  %v213_v53 = vmul.f32 2.0, %v126_v29  ;;  %v486_v61 = vmul.f32 2.0, %v656_v28 }
  0xea   :  { %v222_v0 = vsub.f32 %v851_v16, %v214_v52  ;;  %v485_v2 = vmul.f32 2.0, %v398_v30 }
  0xeb   :  { %v639_v31 = vpop.f32.mrb[2].mxu0  ;;  %v221_v1 = vsub.f32 %v847_v14, %v213_v53  ;;  %v494_v28 = vsub.f32 %v859_v45, %v486_v61 }
  0xec   :  { %v659_v32 = vpop.f32.mrb[2].mxu1  ;;  %v136_v33 = vpop.f32.mrb[3].mxu0  ;;  %v216_v55 = vmul.f32 2.0, %v639_v31 }
  0xed   :  { %v408_v35 = vpop.f32.mrb[3].mxu1  ;;  %v215_v56 = vmul.f32 2.0, %v136_v33  ;;  %v488_v3 = vmul.f32 2.0, %v659_v32 }
  0xee   :  { %v224_v4 = vsub.f32 %v849_v15, %v216_v55  ;;  %v487_v6 = vmul.f32 2.0, %v408_v35 }
  0xef   :  { %v642_v36 = vpop.f32.mrb[4].mxu0  ;;  %v223_v5 = vsub.f32 %v845_v13, %v215_v56  ;;  %v496_v29 = vsub.f32 %v863_v47, %v488_v3 }
  0xf0   :  { %v662_v37 = vpop.f32.mrb[4].mxu1  ;;  %v146_v38 = vpop.f32.mrb[5].mxu0  ;;  %v218_v58 = vmul.f32 2.0, %v642_v36  ;;  %v495_v30 = vsub.f32 %v861_v46, %v487_v6 }
  0xf1   :  { %v418_v39 = vpop.f32.mrb[5].mxu1  ;;  %v217_v59 = vmul.f32 2.0, %v146_v38  ;;  %v490_v7 = vmul.f32 2.0, %v662_v37 }
  0xf2   :  { %v226_v9 = vsub.f32 %v855_v26, %v218_v58  ;;  %v489_v11 = vmul.f32 2.0, %v418_v39  ;;  %v493_v26 = vsub.f32 %v857_v40, %v485_v2 }
  0xf3   :  { %v645_v41 = vpop.f32.mrb[6].mxu0  ;;  %v225_v10 = vsub.f32 %v853_v18, %v217_v59  ;;  %v498_v33 = vsub.f32 %v867_v49, %v490_v7 }
  0xf4   :  { %v665_v42 = vpop.f32.mrb[6].mxu1  ;;  %v156_v43 = vpop.f32.mrb[7].mxu0  ;;  %v220_v62 = vmul.f32 2.0, %v645_v41  ;;  %v497_v32 = vsub.f32 %v865_v48, %v489_v11 }
  0xf5   :  { %v428_v44 = vpop.f32.mrb[7].mxu1  ;;  %v219_v63 = vmul.f32 2.0, %v156_v43  ;;  %v492_v16 = vmul.f32 2.0, %v665_v42 }
  0xf6   :  { %v228_v19 = vsub.f32 %v196_v34, %v220_v62  ;;  %v491_v20 = vmul.f32 2.0, %v428_v44 }
  0xf7   :  { %v227_v14 = vsub.f32 %v193_v57, %v219_v63  ;;  %v500_v35 = vsub.f32 %v468_v12, %v492_v16 }
  0xf8   :  { %v499_v34 = vsub.f32 %v869_v54, %v491_v20 }
 0x11c   :  { %v245_v8 = vpop.trf.xlu0 }
 0x11d   :  { %v264_v17 = vrot.slane %v245_v8, %v263_v60 }
 0x11f   :  { %v265_v21 = vadd.f32 %v264_v17, %v221_v1  ;;  %v266_v22 = vadd.f32 %v264_v17, %v222_v0  ;;  %v267_v23 = vadd.f32 %v264_v17, %v223_v5  ;;  %v268_v15 = vadd.f32 %v264_v17, %v224_v4 }
 0x120   :  { %v269_v24 = vadd.f32 %v264_v17, %v225_v10  ;;  %v270_v13 = vadd.f32 %v264_v17, %v226_v9  ;;  %v271_v25 = vadd.f32 %v264_v17, %v227_v14  ;;  %v272_v27 = vadd.f32 %v264_v17, %v228_v19 }
 0x121   :  { %274 = vst.msk [vmem:[%s950_s2] sm:$0xff] %vm273_vm2, %v265_v21  ;;  %275 = vst.msk [vmem:[%s950_s2 + $0x8] sm:$0xff] %vm273_vm2, %v266_v22  ;;  %v517_v18 = vpop.trf.xlu1 }
 0x122   :  { %276 = vst.msk [vmem:[%s950_s2 + $0x10] sm:$0xff] %vm273_vm2, %v267_v23  ;;  %277 = vst.msk [vmem:[%s950_s2 + $0x18] sm:$0xff] %vm273_vm2, %v268_v15  ;;  %v536_v31 = vrot.slane %v517_v18, %v263_v60 }
 0x123   :  { %278 = vst.msk [vmem:[%s950_s2 + $0x20] sm:$0xff] %vm273_vm2, %v269_v24  ;;  %279 = vst.msk [vmem:[%s950_s2 + $0x28] sm:$0xff] %vm273_vm2, %v270_v13 }
 0x124   :  { %280 = vst.msk [vmem:[%s950_s2 + $0x30] sm:$0xff] %vm273_vm2, %v271_v25  ;;  %281 = vst.msk [vmem:[%s950_s2 + $0x38] sm:$0xff] %vm273_vm2, %v272_v27  ;;  %v537_v36 = vadd.f32 %v536_v31, %v493_v26  ;;  %v538_v37 = vadd.f32 %v536_v31, %v494_v28  ;;  %v539_v38 = vadd.f32 %v536_v31, %v495_v30 }
 0x125   :  { %v540_v39 = vadd.f32 %v536_v31, %v496_v29  ;;  %v541_v40 = vadd.f32 %v536_v31, %v497_v32  ;;  %v542_v41 = vadd.f32 %v536_v31, %v498_v33  ;;  %v543_v42 = vadd.f32 %v536_v31, %v499_v34 }
 0x126   :  { %v544_v43 = vadd.f32 %v536_v31, %v500_v35  ;;  %594 = vst.msk [vmem:[%s950_s2 + $0x40] sm:$0xff] %vm273_vm2, %v537_v36  ;;  %595 = vst.msk [vmem:[%s950_s2 + $0x48] sm:$0xff] %vm273_vm2, %v538_v37 }
 0x127   :  { %596 = vst.msk [vmem:[%s950_s2 + $0x50] sm:$0xff] %vm273_vm2, %v539_v38  ;;  %597 = vst.msk [vmem:[%s950_s2 + $0x58] sm:$0xff] %vm273_vm2, %v540_v39 }
 0x128   :  { %598 = vst.msk [vmem:[%s950_s2 + $0x60] sm:$0xff] %vm273_vm2, %v541_v40  ;;  %599 = vst.msk [vmem:[%s950_s2 + $0x68] sm:$0xff] %vm273_vm2, %v542_v41 }
 0x129   :  { %600 = vst.msk [vmem:[%s950_s2 + $0x70] sm:$0xff] %vm273_vm2, %v543_v42  ;;  %601 = vst.msk [vmem:[%s950_s2 + $0x78] sm:$0xff] %vm273_vm2, %v544_v43 }

// kernel: forward.16
= control target key start
LH: loop header
LB: loop body
LE: loop exit
PB: predicated region body
PF: predicated region fallthrough
CT: control target
= control target key end

     0   :  { %vm54_vm0 = vcmask 277504   ;;  %vm103_vm1 = vcmask 1041408   ;;  %vm279_vm2 = vcmask 261120   ;;  %vm709_vm3 = vcmask 130048   ;;  %s1235_s1 = inlined_call_operand.vmem [shape: f32[34,32], index: 1, kind: input, shape index: {}]   ;;  %s1236_s0 = inlined_call_operand.vmem [shape: f32[128,34], index: 0, kind: input, shape index: {}]   ;;  %s1237_s3 = inlined_call_operand.vmem [shape: f32[32,32], index: 3, kind: input, shape index: {}]   ;;  %s1238_s5 = inlined_call_operand.vmem [shape: f32[32,16], index: 5, kind: input, shape index: {}]   ;;  %s1239_s2 = inlined_call_operand.vmem [shape: f32[1,32], index: 2, kind: input, shape index: {}]   ;;  %s1240_s4 = inlined_call_operand.vmem [shape: f32[1,32], index: 4, kind: input, shape index: {}]   ;;  %s1241_s6 = inlined_call_operand.vmem [shape: f32[1,16], index: 6, kind: input, shape index: {}]   ;;  %s1242_s7 = inlined_call_operand.vmem [shape: f32[128,16], index: 7, kind: output, shape index: {}]  }
   0x1   :  { %v42_v0 = vld [vmem:[%s1235_s1] sm:$0xff]  ;;  %v43_v1 = vld [vmem:[%s1235_s1 + $0x8] sm:$0xff]  ;;  %v44_v2 = vld [vmem:[%s1235_s1 + $0x10] sm:$0xff] }
   0x2   :  { %v941_v3 = vpack.c.bf16 %v43_v1, %v42_v0  ;;  %v45_v4 = vld [vmem:[%s1235_s1 + $0x18] sm:$0xff]  ;;  %v26_v5 = vld [vmem:[%s1236_s0] sm:$0xff]  ;;  %v269_v9 = vld [vmem:[%s1237_s3 + $0x8] sm:$0xff] }
   0x3   :  { %v945_v6 = vpack.c.bf16 %v45_v4, %v44_v2  ;;  %853 = vmatprep.mubr.msk.f32.mxu0 %vm54_vm0, %v26_v5  ;;  %v46_v7 = vld [vmem:[%s1235_s1 + $0x20] sm:$0x3]  ;;  %v270_v10 = vld [vmem:[%s1237_s3 + $0x10] sm:$0xff]  ;;  %v271_v12 = vld [vmem:[%s1237_s3 + $0x18] sm:$0xff] }
   0x4   :  { %942 = vmatprep.subr.bf16.mxu0 %v941_v3  ;;  %v268_v8 = vld [vmem:[%s1237_s3] sm:$0xff]  ;;  %v27_v13 = vld [vmem:[%s1236_s0 + $0x8] sm:$0xff]  ;;  %v953_v14 = vpack.c.bf16 %v271_v12, %v270_v10  ;;  %v28_v15 = vld [vmem:[%s1236_s0 + $0x10] sm:$0xff] }
   0x5   :  { %944 = vmatpush3.bf16.msra.mxu0 %v941_v3  ;;  %v949_v11 = vpack.c.bf16 %v269_v9, %v268_v8  ;;  %v29_v16 = vld [vmem:[%s1236_s0 + $0x18] sm:$0xff]  ;;  %v30_v17 = vld [vmem:[%s1236_s0 + $0x20] sm:$0xff]  ;;  %v31_v18 = vld [vmem:[%s1236_s0 + $0x28] sm:$0xff] }
   0x6   :  { %946 = vmatprep.subr.bf16.mxu0 %v945_v6  ;;  %v32_v19 = vld [vmem:[%s1236_s0 + $0x30] sm:$0xff]  ;;  %v33_v20 = vld [vmem:[%s1236_s0 + $0x38] sm:$0xff]  ;;  %v34_v21 = vld [vmem:[%s1236_s0 + $0x40] sm:$0xff] }
   0x7   :  { %965 = vmatprep.subr.bf16.mxu1 %v949_v11  ;;  %v35_v22 = vld [vmem:[%s1236_s0 + $0x48] sm:$0xff]  ;;  %v36_v23 = vld [vmem:[%s1236_s0 + $0x50] sm:$0xff]  ;;  %v37_v24 = vld [vmem:[%s1236_s0 + $0x58] sm:$0xff] }
   0x8   :  { %967 = vmatpush3.bf16.msra.mxu1 %v949_v11  ;;  %v38_v25 = vld [vmem:[%s1236_s0 + $0x60] sm:$0xff]  ;;  %v39_v26 = vld [vmem:[%s1236_s0 + $0x68] sm:$0xff]  ;;  %v40_v27 = vld [vmem:[%s1236_s0 + $0x70] sm:$0xff] }
   0x9   :  { %948 = vmatpush3.bf16.msra.mxu0 %v945_v6  ;;  %966 = vmatprep.subr.bf16.mxu1 %v953_v14  ;;  %v41_v28 = vld [vmem:[%s1236_s0 + $0x78] sm:$0xff]  ;;  %v489_v29 = vld [vmem:[%s1238_s5] sm:$0xff]  ;;  %v490_v30 = vld [vmem:[%s1238_s5 + $0x8] sm:$0xff] }
   0xa   :  { %851 = vmatprep.subr.msk.mxu0 %vm103_vm1, %v46_v7  ;;  %v957_v31 = vpack.c.bf16 %v490_v30, %v489_v29  ;;  %v1109_v32 = vld [vmem:[%s1239_s2] ss:$0 sm:$0xff]  ;;  %v491_v55 = vld [vmem:[%s1238_s5 + $0x10] sm:$0xff]  ;;  %v492_v56 = vld [vmem:[%s1238_s5 + $0x18] sm:$0xff] }
   0xb   :  { %v961_v62 = vpack.c.bf16 %v492_v56, %v491_v55 }
   0xc   :  { %968 = vmatpush3.bf16.msra.mxu1 %v953_v14 }
   0xd   :  { %852 = vmatpush3.msk.msra.mxu0 %vm103_vm1, %v46_v7  ;;  %958 = vmatprep.subr.bf16.mxu1 %v957_v31 }
   0xe   :  { %854 = vmatmul.mubr.msk.f32.vlgmr.msra.gmra.mrb[0].mxu0 %vm54_vm0, %v27_v13  ;;  %950 = vmatprep.subr.bf16.mxu0 %v949_v11 }
   0xf   :  { %856 = vmatprep.mubr.msk.f32.mxu0 %vm54_vm0, %v28_v15  ;;  %952 = vmatpush3.bf16.msra.mxu0 %v949_v11 }
  0x10   :  { %954 = vmatprep.subr.bf16.mxu0 %v953_v14 }
  0x12   :  { %857 = vmatmul.mubr.msk.f32.gmra.mrb[2].mxu0 %vm54_vm0, %v29_v16 }
  0x13   :  { %859 = vmatprep.mubr.msk.f32.mxu0 %vm54_vm0, %v30_v17  ;;  %956 = vmatpush3.bf16.msra.mxu0 %v953_v14 }
  0x16   :  { %860 = vmatmul.mubr.msk.f32.gmra.mrb[4].mxu0 %vm54_vm0, %v31_v18 }
  0x17   :  { %862 = vmatprep.mubr.msk.f32.mxu0 %vm54_vm0, %v32_v19 }
  0x1a   :  { %863 = vmatmul.mubr.msk.f32.gmra.mrb[6].mxu0 %vm54_vm0, %v33_v20  ;;  %v748_v20 = vld [vmem:[%s1240_s4] ss:$0 sm:$0xff] }
  0x1b   :  { %865 = vmatprep.mubr.msk.f32.mxu0 %vm54_vm0, %v34_v21 }
  0x1e   :  { %866 = vmatmul.mubr.msk.f32.gmra.mrb[8].mxu0 %vm54_vm0, %v35_v22 }
  0x1f   :  { %868 = vmatprep.mubr.msk.f32.mxu0 %vm54_vm0, %v36_v23 }
  0x22   :  { %869 = vmatmul.mubr.msk.f32.gmra.mrb[10].mxu0 %vm54_vm0, %v37_v24 }
  0x23   :  { %871 = vmatprep.mubr.msk.f32.mxu0 %vm54_vm0, %v38_v25 }
  0x26   :  { %872 = vmatmul.mubr.msk.f32.gmra.mrb[12].mxu0 %vm54_vm0, %v39_v26 }
  0x27   :  { %874 = vmatprep.mubr.msk.f32.mxu0 %vm54_vm0, %v40_v27 }
  0x2a   :  { %875 = vmatmul.mubr.msk.f32.gmra.mrb[14].mxu0 %vm54_vm0, %v41_v28 }
  0xe1   :  { %v855_v33 = vpop.f32.mrb[0].mxu0 }
  0xe2   :  { %v179_v34 = vadd.f32 %v855_v33, %v1109_v32  ;;  %v173_v35 = vpop.f32.mrb[1].mxu0 }
  0xe3   :  { %v174_v36 = vadd.f32 %v1109_v32, %v173_v35 }
  0xe4   :  { %v253_v39 = vmax.f32 %v179_v34, 0.0 }
  0xe5   :  { %v252_v37 = vmax.f32 %v174_v36, 0.0  ;;  %v858_v38 = vpop.f32.mrb[2].mxu0 }
  0xe6   :  { %v189_v40 = vadd.f32 %v858_v38, %v1109_v32  ;;  %v183_v41 = vpop.f32.mrb[3].mxu0 }
  0xe7   :  { %v184_v42 = vadd.f32 %v1109_v32, %v183_v41  ;;  %885 = vmatprep.mubr.msk.f32.mxu0 %vm279_vm2, %v252_v37 }
  0xe8   :  { %886 = vmatmul.mubr.msk.f32.vlgmr.msra.gmra.mrb[16].mxu0 %vm279_vm2, %v253_v39  ;;  %v255_v45 = vmax.f32 %v189_v40, 0.0 }
  0xe9   :  { %v254_v43 = vmax.f32 %v184_v42, 0.0  ;;  %v861_v44 = vpop.f32.mrb[4].mxu0 }
  0xea   :  { %v199_v46 = vadd.f32 %v861_v44, %v1109_v32  ;;  %v193_v47 = vpop.f32.mrb[5].mxu0 }
  0xeb   :  { %v194_v48 = vadd.f32 %v1109_v32, %v193_v47  ;;  %888 = vmatprep.mubr.msk.f32.mxu0 %vm279_vm2, %v254_v43 }
  0xec   :  { %889 = vmatmul.mubr.msk.f32.gmra.mrb[18].mxu0 %vm279_vm2, %v255_v45  ;;  %v257_v51 = vmax.f32 %v199_v46, 0.0 }
  0xed   :  { %v256_v49 = vmax.f32 %v194_v48, 0.0  ;;  %v864_v50 = vpop.f32.mrb[6].mxu0 }
  0xee   :  { %v209_v52 = vadd.f32 %v864_v50, %v1109_v32  ;;  %v203_v53 = vpop.f32.mrb[7].mxu0 }
  0xef   :  { %v204_v54 = vadd.f32 %v1109_v32, %v203_v53  ;;  %891 = vmatprep.mubr.msk.f32.mxu0 %vm279_vm2, %v256_v49 }
  0xf0   :  { %892 = vmatmul.mubr.msk.f32.gmra.mrb[20].mxu0 %vm279_vm2, %v257_v51  ;;  %v259_v59 = vmax.f32 %v209_v52, 0.0 }
  0xf1   :  { %v258_v57 = vmax.f32 %v204_v54, 0.0  ;;  %v867_v58 = vpop.f32.mrb[8].mxu0 }
  0xf2   :  { %v219_v60 = vadd.f32 %v867_v58, %v1109_v32  ;;  %v213_v61 = vpop.f32.mrb[9].mxu0 }
  0xf3   :  { %v214_v63 = vadd.f32 %v1109_v32, %v213_v61  ;;  %894 = vmatprep.mubr.msk.f32.mxu1 %vm279_vm2, %v258_v57 }
  0xf4   :  { %895 = vmatmul.mubr.msk.f32.vlgmr.msra.gmra.mrb[0].mxu1 %vm279_vm2, %v259_v59  ;;  %v261_v2 = vmax.f32 %v219_v60, 0.0 }
  0xf5   :  { %v260_v0 = vmax.f32 %v214_v63, 0.0  ;;  %v870_v1 = vpop.f32.mrb[10].mxu0  ;;  %960 = vmatpush3.bf16.msra.mxu1 %v957_v31 }
  0xf6   :  { %v229_v3 = vadd.f32 %v870_v1, %v1109_v32  ;;  %v223_v4 = vpop.f32.mrb[11].mxu0  ;;  %962 = vmatprep.subr.bf16.mxu1 %v961_v62 }
  0xf7   :  { %v224_v5 = vadd.f32 %v1109_v32, %v223_v4  ;;  %897 = vmatprep.mubr.msk.f32.mxu1 %vm279_vm2, %v260_v0 }
  0xf8   :  { %898 = vmatmul.mubr.msk.f32.gmra.mrb[2].mxu1 %vm279_vm2, %v261_v2  ;;  %v263_v8 = vmax.f32 %v229_v3, 0.0 }
  0xf9   :  { %v262_v6 = vmax.f32 %v224_v5, 0.0  ;;  %v873_v7 = vpop.f32.mrb[12].mxu0  ;;  %964 = vmatpush3.bf16.msra.mxu1 %v961_v62  ;;  %v765_v5 = vld [vmem:[%s1241_s6] ss:$0 sm:$0xff] }
  0xfa   :  { %v239_v9 = vadd.f32 %v873_v7, %v1109_v32  ;;  %v233_v10 = vpop.f32.mrb[13].mxu0 }
  0xfb   :  { %v234_v11 = vadd.f32 %v1109_v32, %v233_v10  ;;  %900 = vmatprep.mubr.msk.f32.mxu1 %vm279_vm2, %v262_v6 }
  0xfc   :  { %901 = vmatmul.mubr.msk.f32.gmra.mrb[4].mxu1 %vm279_vm2, %v263_v8  ;;  %v265_v14 = vmax.f32 %v239_v9, 0.0 }
  0xfd   :  { %v264_v12 = vmax.f32 %v234_v11, 0.0  ;;  %v876_v13 = vpop.f32.mrb[14].mxu0 }
  0xfe   :  { %v249_v15 = vadd.f32 %v876_v13, %v1109_v32  ;;  %v243_v16 = vpop.f32.mrb[15].mxu0 }
  0xff   :  { %v244_v17 = vadd.f32 %v1109_v32, %v243_v16  ;;  %903 = vmatprep.mubr.msk.f32.mxu1 %vm279_vm2, %v264_v12 }
 0x100   :  { %904 = vmatmul.mubr.msk.f32.gmra.mrb[6].mxu1 %vm279_vm2, %v265_v14  ;;  %v267_v19 = vmax.f32 %v249_v15, 0.0 }
 0x101   :  { %v266_v18 = vmax.f32 %v244_v17, 0.0 }
 0x103   :  { %906 = vmatprep.mubr.msk.f32.mxu1 %vm279_vm2, %v266_v18 }
 0x104   :  { %907 = vmatmul.mubr.msk.f32.gmra.mrb[8].mxu1 %vm279_vm2, %v267_v19 }
 0x1bb   :  { %v887_v21 = vpop.f32.mrb[16].mxu0 }
 0x1bc   :  { %v400_v22 = vadd.f32 %v887_v21, %v748_v20  ;;  %v394_v23 = vpop.f32.mrb[17].mxu0 }
 0x1bd   :  { %v395_v24 = vadd.f32 %v748_v20, %v394_v23 }
 0x1be   :  { %v474_v27 = vmax.f32 %v400_v22, 0.0 }
 0x1bf   :  { %v473_v25 = vmax.f32 %v395_v24, 0.0  ;;  %v890_v26 = vpop.f32.mrb[18].mxu0 }
 0x1c0   :  { %v410_v28 = vadd.f32 %v890_v26, %v748_v20  ;;  %v404_v29 = vpop.f32.mrb[19].mxu0 }
 0x1c1   :  { %v405_v30 = vadd.f32 %v748_v20, %v404_v29  ;;  %917 = vmatprep.mubr.msk.f32.mxu1 %vm279_vm2, %v473_v25 }
 0x1c2   :  { %918 = vmatmul.mubr.msk.f32.vlgmr.msra.gmra.mrb[10].mxu1 %vm279_vm2, %v474_v27  ;;  %v476_v33 = vmax.f32 %v410_v28, 0.0 }
 0x1c3   :  { %v475_v31 = vmax.f32 %v405_v30, 0.0  ;;  %v893_v32 = vpop.f32.mrb[20].mxu0 }
 0x1c4   :  { %v420_v34 = vadd.f32 %v893_v32, %v748_v20  ;;  %v414_v35 = vpop.f32.mrb[21].mxu0 }
 0x1c5   :  { %v415_v36 = vadd.f32 %v748_v20, %v414_v35  ;;  %920 = vmatprep.mubr.msk.f32.mxu1 %vm279_vm2, %v475_v31 }
 0x1c6   :  { %921 = vmatmul.mubr.msk.f32.gmra.mrb[12].mxu1 %vm279_vm2, %v476_v33  ;;  %v478_v39 = vmax.f32 %v420_v34, 0.0 }
 0x1c7   :  { %v477_v37 = vmax.f32 %v415_v36, 0.0  ;;  %v896_v38 = vpop.f32.mrb[0].mxu1 }
 0x1c8   :  { %v430_v40 = vadd.f32 %v896_v38, %v748_v20  ;;  %v424_v41 = vpop.f32.mrb[1].mxu1 }
 0x1c9   :  { %v425_v42 = vadd.f32 %v748_v20, %v424_v41  ;;  %923 = vmatprep.mubr.msk.f32.mxu1 %vm279_vm2, %v477_v37 }
 0x1ca   :  { %924 = vmatmul.mubr.msk.f32.gmra.mrb[14].mxu1 %vm279_vm2, %v478_v39  ;;  %v480_v45 = vmax.f32 %v430_v40, 0.0 }
 0x1cb   :  { %v479_v43 = vmax.f32 %v425_v42, 0.0  ;;  %v899_v44 = vpop.f32.mrb[2].mxu1 }
 0x1cc   :  { %v440_v46 = vadd.f32 %v899_v44, %v748_v20  ;;  %v434_v47 = vpop.f32.mrb[3].mxu1 }
 0x1cd   :  { %v435_v48 = vadd.f32 %v748_v20, %v434_v47  ;;  %926 = vmatprep.mubr.msk.f32.mxu1 %vm279_vm2, %v479_v43 }
 0x1ce   :  { %927 = vmatmul.mubr.msk.f32.gmra.mrb[16].mxu1 %vm279_vm2, %v480_v45  ;;  %v482_v51 = vmax.f32 %v440_v46, 0.0 }
 0x1cf   :  { %v481_v49 = vmax.f32 %v435_v48, 0.0  ;;  %v902_v50 = vpop.f32.mrb[4].mxu1 }
 0x1d0   :  { %v450_v52 = vadd.f32 %v902_v50, %v748_v20  ;;  %v444_v53 = vpop.f32.mrb[5].mxu1 }
 0x1d1   :  { %v445_v54 = vadd.f32 %v748_v20, %v444_v53  ;;  %929 = vmatprep.mubr.msk.f32.mxu1 %vm279_vm2, %v481_v49 }
 0x1d2   :  { %930 = vmatmul.mubr.msk.f32.gmra.mrb[18].mxu1 %vm279_vm2, %v482_v51  ;;  %v484_v57 = vmax.f32 %v450_v52, 0.0 }
 0x1d3   :  { %v483_v55 = vmax.f32 %v445_v54, 0.0  ;;  %v905_v56 = vpop.f32.mrb[6].mxu1 }
 0x1d4   :  { %v460_v58 = vadd.f32 %v905_v56, %v748_v20  ;;  %v454_v59 = vpop.f32.mrb[7].mxu1 }
 0x1d5   :  { %v455_v60 = vadd.f32 %v748_v20, %v454_v59  ;;  %932 = vmatprep.mubr.msk.f32.mxu1 %vm279_vm2, %v483_v55 }
 0x1d6   :  { %933 = vmatmul.mubr.msk.f32.gmra.mrb[20].mxu1 %vm279_vm2, %v484_v57  ;;  %v486_v63 = vmax.f32 %v460_v58, 0.0 }
 0x1d7   :  { %v485_v61 = vmax.f32 %v455_v60, 0.0  ;;  %v908_v62 = vpop.f32.mrb[8].mxu1 }
 0x1d8   :  { %v470_v0 = vadd.f32 %v908_v62, %v748_v20  ;;  %v464_v1 = vpop.f32.mrb[9].mxu1 }
 0x1d9   :  { %v465_v2 = vadd.f32 %v748_v20, %v464_v1  ;;  %935 = vmatprep.mubr.msk.f32.mxu1 %vm279_vm2, %v485_v61 }
 0x1da   :  { %936 = vmatmul.mubr.msk.f32.gmra.mrb[22].mxu1 %vm279_vm2, %v486_v63  ;;  %v488_v4 = vmax.f32 %v470_v0, 0.0 }
 0x1db   :  { %v487_v3 = vmax.f32 %v465_v2, 0.0 }
 0x1dd   :  { %938 = vmatprep.mubr.msk.f32.mxu1 %vm279_vm2, %v487_v3 }
 0x1de   :  { %939 = vmatmul.mubr.msk.f32.gmra.mrb[24].mxu1 %vm279_vm2, %v488_v4 }
 0x295   :  { %v919_v6 = vpop.f32.mrb[10].mxu1 }
 0x296   :  { %v620_v7 = vadd.f32 %v919_v6, %v765_v5  ;;  %v614_v8 = vpop.f32.mrb[11].mxu1 }
 0x297   :  { %v615_v9 = vadd.f32 %v765_v5, %v614_v8 }
 0x298   :  { %v694_v10 = vmax.f32 %v620_v7, 0.0 }
 0x299   :  { %v693_v11 = vmax.f32 %v615_v9, 0.0  ;;  %v922_v12 = vpop.f32.mrb[12].mxu1 }
 0x29a   :  { %711 = vst.msk [vmem:[%s1242_s7 + $0x8] sm:$0xff] %vm709_vm3, %v694_v10  ;;  %v630_v13 = vadd.f32 %v922_v12, %v765_v5  ;;  %v624_v14 = vpop.f32.mrb[13].mxu1 }
 0x29b   :  { %710 = vst.msk [vmem:[%s1242_s7] sm:$0xff] %vm709_vm3, %v693_v11  ;;  %v625_v15 = vadd.f32 %v765_v5, %v624_v14 }
 0x29c   :  { %v696_v16 = vmax.f32 %v630_v13, 0.0 }
 0x29d   :  { %v695_v17 = vmax.f32 %v625_v15, 0.0  ;;  %v925_v18 = vpop.f32.mrb[14].mxu1 }
 0x29e   :  { %713 = vst.msk [vmem:[%s1242_s7 + $0x18] sm:$0xff] %vm709_vm3, %v696_v16  ;;  %v640_v19 = vadd.f32 %v925_v18, %v765_v5  ;;  %v634_v20 = vpop.f32.mrb[15].mxu1 }
 0x29f   :  { %712 = vst.msk [vmem:[%s1242_s7 + $0x10] sm:$0xff] %vm709_vm3, %v695_v17  ;;  %v635_v21 = vadd.f32 %v765_v5, %v634_v20 }
 0x2a0   :  { %v698_v22 = vmax.f32 %v640_v19, 0.0 }
 0x2a1   :  { %v697_v23 = vmax.f32 %v635_v21, 0.0  ;;  %v928_v24 = vpop.f32.mrb[16].mxu1 }
 0x2a2   :  { %715 = vst.msk [vmem:[%s1242_s7 + $0x28] sm:$0xff] %vm709_vm3, %v698_v22  ;;  %v650_v25 = vadd.f32 %v928_v24, %v765_v5  ;;  %v644_v26 = vpop.f32.mrb[17].mxu1 }
 0x2a3   :  { %714 = vst.msk [vmem:[%s1242_s7 + $0x20] sm:$0xff] %vm709_vm3, %v697_v23  ;;  %v645_v27 = vadd.f32 %v765_v5, %v644_v26 }
 0x2a4   :  { %v700_v28 = vmax.f32 %v650_v25, 0.0 }
 0x2a5   :  { %v699_v29 = vmax.f32 %v645_v27, 0.0  ;;  %v931_v30 = vpop.f32.mrb[18].mxu1 }
 0x2a6   :  { %717 = vst.msk [vmem:[%s1242_s7 + $0x38] sm:$0xff] %vm709_vm3, %v700_v28  ;;  %v660_v31 = vadd.f32 %v931_v30, %v765_v5  ;;  %v654_v32 = vpop.f32.mrb[19].mxu1 }
 0x2a7   :  { %716 = vst.msk [vmem:[%s1242_s7 + $0x30] sm:$0xff] %vm709_vm3, %v699_v29  ;;  %v655_v33 = vadd.f32 %v765_v5, %v654_v32 }
 0x2a8   :  { %v702_v34 = vmax.f32 %v660_v31, 0.0 }
 0x2a9   :  { %v701_v35 = vmax.f32 %v655_v33, 0.0  ;;  %v934_v36 = vpop.f32.mrb[20].mxu1 }
 0x2aa   :  { %719 = vst.msk [vmem:[%s1242_s7 + $0x48] sm:$0xff] %vm709_vm3, %v702_v34  ;;  %v670_v37 = vadd.f32 %v934_v36, %v765_v5  ;;  %v664_v38 = vpop.f32.mrb[21].mxu1 }
 0x2ab   :  { %718 = vst.msk [vmem:[%s1242_s7 + $0x40] sm:$0xff] %vm709_vm3, %v701_v35  ;;  %v665_v39 = vadd.f32 %v765_v5, %v664_v38 }
 0x2ac   :  { %v704_v40 = vmax.f32 %v670_v37, 0.0 }
 0x2ad   :  { %v703_v41 = vmax.f32 %v665_v39, 0.0  ;;  %v937_v42 = vpop.f32.mrb[22].mxu1 }
 0x2ae   :  { %721 = vst.msk [vmem:[%s1242_s7 + $0x58] sm:$0xff] %vm709_vm3, %v704_v40  ;;  %v680_v43 = vadd.f32 %v937_v42, %v765_v5  ;;  %v674_v44 = vpop.f32.mrb[23].mxu1 }
 0x2af   :  { %720 = vst.msk [vmem:[%s1242_s7 + $0x50] sm:$0xff] %vm709_vm3, %v703_v41  ;;  %v675_v45 = vadd.f32 %v765_v5, %v674_v44 }
 0x2b0   :  { %v706_v46 = vmax.f32 %v680_v43, 0.0 }
 0x2b1   :  { %v705_v47 = vmax.f32 %v675_v45, 0.0  ;;  %v940_v48 = vpop.f32.mrb[24].mxu1 }
 0x2b2   :  { %723 = vst.msk [vmem:[%s1242_s7 + $0x68] sm:$0xff] %vm709_vm3, %v706_v46  ;;  %v690_v49 = vadd.f32 %v940_v48, %v765_v5  ;;  %v684_v50 = vpop.f32.mrb[25].mxu1 }
 0x2b3   :  { %722 = vst.msk [vmem:[%s1242_s7 + $0x60] sm:$0xff] %vm709_vm3, %v705_v47  ;;  %v685_v51 = vadd.f32 %v765_v5, %v684_v50 }
 0x2b4   :  { %v708_v52 = vmax.f32 %v690_v49, 0.0 }
 0x2b5   :  { %v707_v53 = vmax.f32 %v685_v51, 0.0 }
 0x2b6   :  { %725 = vst.msk [vmem:[%s1242_s7 + $0x78] sm:$0xff] %vm709_vm3, %v708_v52 }
 0x2b7   :  { %724 = vst.msk [vmem:[%s1242_s7 + $0x70] sm:$0xff] %vm709_vm3, %v707_v53 }

// kernel: forward.17
= control target key start
LH: loop header
LB: loop body
LE: loop exit
PB: predicated region body
PF: predicated region fallthrough
CT: control target
= control target key end

     0   :  { %s3944_s0 = inlined_call_operand.vmem [shape: f32[2,64,16], index: 0, kind: input, shape index: {}]   ;;  %s3945_s1 = inlined_call_operand.vmem [shape: f32[16,16], index: 1, kind: input, shape index: {}]   ;;  %s3946_s2 = inlined_call_operand.vmem [shape: f32[1,16], index: 2, kind: input, shape index: {}]   ;;  %s3947_s3 = inlined_call_operand.vmem [shape: f32[16,16], index: 3, kind: input, shape index: {}]   ;;  %s3948_s4 = inlined_call_operand.vmem [shape: f32[1,16], index: 4, kind: input, shape index: {}]   ;;  %s3949_s5 = inlined_call_operand.vmem [shape: f32[16,1], index: 5, kind: input, shape index: {}]   ;;  %s3950_s6 = inlined_call_operand.<no memory space> [shape: f32[1,1], index: 6, kind: input, shape index: {}]   ;;  %s3951_s7 = inlined_call_operand.vmem [shape: f32[16,16], index: 7, kind: input, shape index: {}]   ;;  %s3952_s8 = inlined_call_operand.vmem [shape: f32[1,16], index: 8, kind: input, shape index: {}]   ;;  %s3953_s9 = inlined_call_operand.vmem [shape: f32[16,4], index: 9, kind: input, shape index: {}]   ;;  %s3954_s10 = inlined_call_operand.vmem [shape: f32[1,4], index: 10, kind: input, shape index: {}]   ;;  %s3955_s11 = inlined_call_operand.hbm [shape: f32[2,64,64], index: 11, kind: output, shape index: {0}]   ;;  %s3956_s12 = inlined_call_operand.vmem [shape: f32[2,64,1], index: 12, kind: output, shape index: {1}]   ;;  %s3957_s13 = inlined_call_operand.vmem [shape: f32[2,64,4], index: 13, kind: output, shape index: {2}]  }
   0x1   :  { %v19_v0 = vstv %s3950_s6 }
   0x2   :  { %20 = vst [vmem:[#allocation2] sm:$0x1] %v19_v0 }
   0x3   :  { %v44_v1 = vld [vmem:[%s3945_s1] sm:$0xff]  ;;  %v45_v2 = vld [vmem:[%s3945_s1 + $0x8] sm:$0xff]  ;;  %vm73_vm0 = vcmask 130048  }
   0x4   :  { %v3009_v3 = vld [vmem:[%s3944_s0] sm:$0xff]  ;;  %v3011_v4 = vpack.c.bf16 %v45_v2, %v44_v1  ;;  %v48_v6 = vld [vmem:[%s3947_s3 + $0x8] sm:$0xff] }
   0x5   :  { %2466 = vmatprep.mubr.msk.f32.mxu0 %vm73_vm0, %v3009_v3  ;;  %v47_v5 = vld [vmem:[%s3947_s3] sm:$0xff]  ;;  %v3026_v7 = vld [vmem:[%s3944_s0 + $0x8] sm:$0xff] }
   0x6   :  { %2679 = vmatprep.subr.bf16.mxu0 %v3011_v4  ;;  %v3028_v8 = vpack.c.bf16 %v48_v6, %v47_v5 }
   0x7   :  { %2681 = vmatpush3.bf16.msra.mxu0 %v3011_v4 }
   0x8   :  { %21 = vsyncpa [#allocation4], 0  ;;  %v3033_v9 = vld [vmem:[%s3944_s0 + $0x10] sm:$0xff]  ;;  %2707 = vmatprep.subr.bf16.mxu0 %v3028_v8  ;;  %v3043_v10 = vld [vmem:[%s3944_s0 + $0x18] sm:$0xff]  ;;  %vm743_vm2 = vcmask 7168   ;;  %vm432_vm3 = vcmask 523264  }
   0x9   :  { %v3049_v11 = vld [vmem:[%s3944_s0 + $0x20] sm:$0xff]  ;;  %v3058_v12 = vld [vmem:[%s3944_s0 + $0x28] sm:$0xff]  ;;  %v3063_v13 = vld [vmem:[%s3944_s0 + $0x30] sm:$0xff]  ;;  %vm1006_vm4 = vcmask 31744  }
   0xa   :  { %2467 = vmatmul.mubr.msk.f32.vlgmr.msra.gmra.mrb[0].mxu0 %vm73_vm0, %v3026_v7  ;;  %v3072_v14 = vld [vmem:[%s3944_s0 + $0x38] sm:$0xff]  ;;  %v50_v15 = vld [vmem:[%s3949_s5] sm:$0xff]  ;;  %v51_v16 = vld [vmem:[%s3949_s5 + $0x8] sm:$0xff] }
   0xb   :  { %2469 = vmatprep.mubr.msk.f32.mxu0 %vm73_vm0, %v3033_v9  ;;  %2709 = vmatpush3.bf16.msra.mxu0 %v3028_v8  ;;  %v3098_v17 = vpack.c.bf16 %v51_v16, %v50_v15  ;;  %v53_v18 = vld [vmem:[%s3951_s7] sm:$0xff]  ;;  %v54_v19 = vld [vmem:[%s3951_s7 + $0x8] sm:$0xff]  ;;  %vm3124_vm1 = vmpackc.low %vm73_vm0, %vm73_vm0 }
   0xc   :  { %v3108_v20 = vpack.c.bf16 %v54_v19, %v53_v18  ;;  %v3114_v21 = vld [vmem:[%s3946_s2] ss:$0 sm:$0xff] }
   0xd   :  { %2711 = vmatprep.subr.bf16.mxu0 %v3098_v17  ;;  %v3171_v52 = vld [vmem:[%s3948_s4] ss:$0 sm:$0xff] }
   0xe   :  { %2470 = vmatmul.mubr.msk.f32.gmra.mrb[2].mxu0 %vm73_vm0, %v3043_v10 }
   0xf   :  { %2472 = vmatprep.mubr.msk.f32.mxu0 %vm73_vm0, %v3049_v11 }
  0x12   :  { %2473 = vmatmul.mubr.msk.f32.gmra.mrb[4].mxu0 %vm73_vm0, %v3058_v12 }
  0x13   :  { %2475 = vmatprep.mubr.msk.f32.mxu0 %vm73_vm0, %v3063_v13 }
  0x16   :  { %2476 = vmatmul.mubr.msk.f32.gmra.mrb[6].mxu0 %vm73_vm0, %v3072_v14 }
  0x17   :  { %2510 = vmatprep.mubr.msk.f32.mxu0 %vm73_vm0, %v3009_v3 }
  0x1a   :  { %2511 = vmatmul.mubr.msk.f32.vlgmr.msra.gmra.mrb[8].mxu0 %vm73_vm0, %v3026_v7 }
  0x1b   :  { %2513 = vmatprep.mubr.msk.f32.mxu0 %vm73_vm0, %v3033_v9  ;;  %2713 = vmatpush3.bf16.msra.mxu0 %v3098_v17 }
  0x1c   :  { %2715 = vmatprep.subr.bf16.mxu0 %v3108_v20 }
  0x1e   :  { %2514 = vmatmul.mubr.msk.f32.gmra.mrb[10].mxu0 %vm73_vm0, %v3043_v10 }
  0x1f   :  { %2516 = vmatprep.mubr.msk.f32.mxu0 %vm73_vm0, %v3049_v11 }
  0x22   :  { %2517 = vmatmul.mubr.msk.f32.gmra.mrb[12].mxu0 %vm73_vm0, %v3058_v12 }
  0x23   :  { %2519 = vmatprep.mubr.msk.f32.mxu0 %vm73_vm0, %v3063_v13 }
  0x26   :  { %2520 = vmatmul.mubr.msk.f32.gmra.mrb[14].mxu0 %vm73_vm0, %v3072_v14 }
  0xdd   :  { %v2468_v22 = vpop.f32.mrb[0].mxu0 }
  0xde   :  { %v3117_v23 = vadd.f32 %v2468_v22, %v3114_v21  ;;  %v164_v24 = vpop.f32.mrb[1].mxu0 }
  0xdf   :  { %v165_v25 = vadd.f32 %v3114_v21, %v164_v24 }
  0xe0   :  { %v333_v26 = vmul.f32 %v3117_v23, %v3117_v23 }
  0xe1   :  { %v2471_v28 = vpop.f32.mrb[2].mxu0  ;;  %2494 = vmatprep.mubr.msk.f32.mxu1 %vm73_vm0, %v165_v25  ;;  %v2682_v29 = vpack.c.bf16 %v3117_v23, %v165_v25  ;;  %v332_v33 = vmul.f32 %v165_v25, %v165_v25 }
  0xe2   :  { %v3131_v30 = vadd.f32 %v2471_v28, %v3114_v21  ;;  %v343_v31 = vsel %vm73_vm0, %v333_v26, 0.0  ;;  %v174_v32 = vpop.f32.mrb[3].mxu0 }
  0xe3   :  { %344 = vadd.xlane.f32.xlu0 %v343_v31  ;;  %2684 = vmatprep.subr.msk.bf16.mxu1 %vm3124_vm1, %v2682_v29  ;;  %v3137_v34 = vadd.f32 %v3114_v21, %v174_v32  ;;  %v340_v40 = vsel %vm73_vm0, %v332_v33, 0.0 }
  0xe4   :  { %2687 = vmatpush3.bf16.xpose.msk.msra.mxu1 %vm3124_vm1, %v2682_v29  ;;  %v335_v35 = vmul.f32 %v3131_v30, %v3131_v30 }
  0xe5   :  { %v2688_v36 = vpack.c.bf16 %v3131_v30, %v3137_v34  ;;  %v2474_v37 = vpop.f32.mrb[4].mxu0  ;;  %v334_v38 = vmul.f32 %v3137_v34, %v3137_v34 }
  0xe6   :  { %v349_v39 = vsel %vm73_vm0, %v335_v35, 0.0  ;;  %v3150_v41 = vadd.f32 %v2474_v37, %v3114_v21  ;;  %v184_v42 = vpop.f32.mrb[5].mxu0 }
  0xe7   :  { %350 = vadd.xlane.f32.xlu1 %v349_v39  ;;  %341 = vadd.xlane.f32.xlu0 %v340_v40  ;;  %v3153_v43 = vadd.f32 %v3114_v21, %v184_v42  ;;  %v346_v44 = vsel %vm73_vm0, %v334_v38, 0.0  ;;  %v3351_v42 = vld [vmem:[#allocation2] ss:$0 sm:$0xff] }
  0xe8   :  { %2690 = vmatprep.subr.msk.bf16.mxu1 %vm3124_vm1, %v2688_v36  ;;  %v337_v45 = vmul.f32 %v3150_v41, %v3150_v41 }
  0xe9   :  { %v2694_v46 = vpack.c.bf16 %v3150_v41, %v3153_v43  ;;  %v2477_v47 = vpop.f32.mrb[6].mxu0  ;;  %v336_v48 = vmul.f32 %v3153_v43, %v3153_v43 }
  0xea   :  { %v3165_v49 = vadd.f32 %v2477_v47, %v3114_v21  ;;  %v194_v50 = vpop.f32.mrb[7].mxu0  ;;  %v355_v54 = vsel %vm73_vm0, %v337_v45, 0.0 }
  0xeb   :  { %347 = vadd.xlane.f32.xlu1 %v346_v44  ;;  %v195_v51 = vadd.f32 %v3114_v21, %v194_v50  ;;  %v352_v53 = vsel %vm73_vm0, %v336_v48, 0.0 }
  0xec   :  { %2693 = vmatpush3.bf16.xpose.msk.msra.mxu1 %vm3124_vm1, %v2688_v36  ;;  %353 = vadd.xlane.f32.xlu0 %v352_v53  ;;  %v339_v55 = vmul.f32 %v3165_v49, %v3165_v49 }
  0xed   :  { %v2700_v56 = vpack.c.bf16 %v3165_v49, %v195_v51  ;;  %v2512_v57 = vpop.f32.mrb[8].mxu0  ;;  %2696 = vmatprep.subr.msk.bf16.mxu1 %vm3124_vm1, %v2694_v46  ;;  %v338_v58 = vmul.f32 %v195_v51, %v195_v51 }
  0xee   :  { %v519_v59 = vadd.f32 %v2512_v57, %v3171_v52  ;;  %v513_v60 = vpop.f32.mrb[9].mxu0  ;;  %v361_v0 = vsel %vm73_vm0, %v339_v55, 0.0 }
  0xef   :  { %v514_v61 = vadd.f32 %v3171_v52, %v513_v60  ;;  %356 = vadd.xlane.f32.xlu1 %v355_v54  ;;  %v358_v62 = vsel %vm73_vm0, %v338_v58, 0.0 }
  0xf0   :  { %v553_v63 = vmax.f32 %v519_v59, 0.0  ;;  %359 = vadd.xlane.f32.xlu0 %v358_v62 }
  0xf1   :  { %v552_v1 = vmax.f32 %v514_v61, 0.0  ;;  %v2515_v2 = vpop.f32.mrb[10].mxu0 }
  0xf2   :  { %v529_v5 = vadd.f32 %v2515_v2, %v3171_v52  ;;  %v523_v6 = vpop.f32.mrb[11].mxu0 }
  0xf3   :  { %v524_v15 = vadd.f32 %v3171_v52, %v523_v6  ;;  %2526 = vmatprep.mubr.msk.f32.mxu0 %vm73_vm0, %v552_v1  ;;  %362 = vadd.xlane.f32.xlu1 %v361_v0 }
  0xf4   :  { %v555_v16 = vmax.f32 %v529_v5, 0.0  ;;  %2699 = vmatpush3.bf16.xpose.msk.msra.mxu1 %vm3124_vm1, %v2694_v46  ;;  %2527 = vmatmul.mubr.msk.f32.vlgmr.msra.gmra.mrb[16].mxu0 %vm73_vm0, %v553_v63 }
  0xf5   :  { %v554_v18 = vmax.f32 %v524_v15, 0.0  ;;  %v2518_v19 = vpop.f32.mrb[12].mxu0  ;;  %2702 = vmatprep.subr.msk.bf16.mxu1 %vm3124_vm1, %v2700_v56  ;;  %2717 = vmatpush3.bf16.msra.mxu0 %v3108_v20  ;;  %v3366_v15 = vld [vmem:[%s3952_s8] ss:$0 sm:$0xff] }
  0xf6   :  { %v539_v22 = vadd.f32 %v2518_v19, %v3171_v52  ;;  %v533_v24 = vpop.f32.mrb[13].mxu0 }
  0xf7   :  { %v534_v25 = vadd.f32 %v3171_v52, %v533_v24  ;;  %2529 = vmatprep.mubr.msk.f32.mxu0 %vm73_vm0, %v554_v18 }
  0xf8   :  { %v557_v26 = vmax.f32 %v539_v22, 0.0  ;;  %2530 = vmatmul.mubr.msk.f32.gmra.mrb[18].mxu0 %vm73_vm0, %v555_v16 }
  0xf9   :  { %v556_v28 = vmax.f32 %v534_v25, 0.0  ;;  %v2521_v29 = vpop.f32.mrb[14].mxu0 }
  0xfa   :  { %v549_v31 = vadd.f32 %v2521_v29, %v3171_v52  ;;  %v543_v32 = vpop.f32.mrb[15].mxu0 }
  0xfb   :  { %v544_v33 = vadd.f32 %v3171_v52, %v543_v32  ;;  %2532 = vmatprep.mubr.msk.f32.mxu0 %vm73_vm0, %v556_v28 }
  0xfc   :  { %v559_v35 = vmax.f32 %v549_v31, 0.0  ;;  %2705 = vmatpush3.bf16.xpose.msk.msra.mxu1 %vm3124_vm1, %v2700_v56  ;;  %2533 = vmatmul.mubr.msk.f32.gmra.mrb[20].mxu0 %vm73_vm0, %v557_v26 }
  0xfd   :  { %v558_v36 = vmax.f32 %v544_v33, 0.0  ;;  %2766 = vmatprep.subr.bf16.mxu1 %v3108_v20 }
  0xff   :  { %2535 = vmatprep.mubr.msk.f32.mxu0 %vm73_vm0, %v558_v36 }
 0x100   :  { %2536 = vmatmul.mubr.msk.f32.gmra.mrb[22].mxu0 %vm73_vm0, %v559_v35 }
 0x101   :  { %2542 = vmatprep.mubr.msk.f32.mxu0 %vm73_vm0, %v3009_v3  ;;  %v3242_v3 = vld [vmem:[%s3944_s0 + $0x40] sm:$0xff] }
 0x103   :  { %2495 = vmatmul.mubr.msk.f32.vlgmr.msra.gmra.mrb[0].mxu1 %vm73_vm0, %v3117_v23 }
 0x104   :  { %2497 = vmatprep.mubr.msk.f32.mxu1 %vm73_vm0, %v3137_v34  ;;  %2767 = vmatpush3.bf16.msra.mxu1 %v3108_v20 }
 0x105   :  { %2543 = vmatmul.mubr.msk.f32.vlgmr.msra.gmra.mrb[24].mxu0 %vm73_vm0, %v3026_v7  ;;  %2723 = vmatprep.subr.bf16.mxu1 %v3011_v4  ;;  %v3256_v7 = vld [vmem:[%s3944_s0 + $0x50] sm:$0xff] }
 0x107   :  { %2498 = vmatmul.mubr.msk.f32.gmra.mrb[2].mxu1 %vm73_vm0, %v3131_v30 }
 0x108   :  { %2500 = vmatprep.mubr.msk.f32.mxu1 %vm73_vm0, %v3153_v43 }
 0x10b   :  { %2501 = vmatmul.mubr.msk.f32.gmra.mrb[4].mxu1 %vm73_vm0, %v3150_v41 }
 0x10c   :  { %2503 = vmatprep.mubr.msk.f32.mxu1 %vm73_vm0, %v195_v51 }
 0x10f   :  { %2504 = vmatmul.mubr.msk.f32.gmra.mrb[6].mxu1 %vm73_vm0, %v3165_v49 }
 0x110   :  { %2545 = vmatprep.mubr.msk.f32.mxu1 %vm73_vm0, %v3033_v9  ;;  %v3265_v9 = vld [vmem:[%s3944_s0 + $0x58] sm:$0xff] }
 0x113   :  { %2546 = vmatmul.mubr.msk.f32.vlgmr.msra.gmra.mrb[8].mxu1 %vm73_vm0, %v3043_v10  ;;  %v3271_v10 = vld [vmem:[%s3944_s0 + $0x60] sm:$0xff] }
 0x114   :  { %2725 = vmatpush3.bf16.msra.mxu1 %v3011_v4  ;;  %2548 = vmatprep.mubr.msk.f32.mxu1 %vm73_vm0, %v3049_v11  ;;  %v3251_v4 = vld [vmem:[%s3944_s0 + $0x48] sm:$0xff] }
 0x115   :  { %2751 = vmatprep.subr.bf16.mxu1 %v3028_v8  ;;  %v3281_v11 = vld [vmem:[%s3944_s0 + $0x68] sm:$0xff] }
 0x117   :  { %2549 = vmatmul.mubr.msk.f32.gmra.mrb[10].mxu1 %vm73_vm0, %v3058_v12  ;;  %v3295_v12 = vld [vmem:[%s3944_s0 + $0x78] sm:$0xff] }
 0x118   :  { %2551 = vmatprep.mubr.msk.f32.mxu1 %vm73_vm0, %v3063_v13  ;;  %v56_v13 = vld [vmem:[%s3953_s9] sm:$0xff] }
 0x11b   :  { %2552 = vmatmul.mubr.msk.f32.gmra.mrb[12].mxu1 %vm73_vm0, %v3072_v14  ;;  %v57_v14 = vld [vmem:[%s3953_s9 + $0x8] sm:$0xff] }
 0x11c   :  { %2574 = vmatprep.mubr.msk.f32.mxu1 %vm73_vm0, %v3242_v3 }
 0x11f   :  { %2575 = vmatmul.mubr.msk.f32.vlgmr.msra.gmra.mrb[14].mxu1 %vm73_vm0, %v3251_v4 }
 0x120   :  { %2577 = vmatprep.mubr.msk.f32.mxu1 %vm73_vm0, %v3256_v7  ;;  %2753 = vmatpush3.bf16.msra.mxu1 %v3028_v8  ;;  %v3286_v8 = vld [vmem:[%s3944_s0 + $0x70] sm:$0xff] }
 0x121   :  { %2755 = vmatprep.subr.bf16.mxu1 %v3098_v17 }
 0x123   :  { %2578 = vmatmul.mubr.msk.f32.gmra.mrb[16].mxu1 %vm73_vm0, %v3265_v9 }
 0x124   :  { %2580 = vmatprep.mubr.msk.f32.mxu1 %vm73_vm0, %v3271_v10 }
 0x127   :  { %2581 = vmatmul.mubr.msk.f32.gmra.mrb[18].mxu1 %vm73_vm0, %v3281_v11 }
 0x128   :  { %2583 = vmatprep.mubr.msk.f32.mxu1 %vm73_vm0, %v3286_v8 }
 0x12b   :  { %2584 = vmatmul.mubr.msk.f32.gmra.mrb[20].mxu1 %vm73_vm0, %v3295_v12 }
 0x12c   :  { %2618 = vmatprep.mubr.msk.f32.mxu1 %vm73_vm0, %v3242_v3 }
 0x12f   :  { %2619 = vmatmul.mubr.msk.f32.vlgmr.msra.gmra.mrb[22].mxu1 %vm73_vm0, %v3251_v4 }
 0x130   :  { %2621 = vmatprep.mubr.msk.f32.mxu1 %vm73_vm0, %v3256_v7  ;;  %2757 = vmatpush3.bf16.msra.mxu1 %v3098_v17  ;;  %v3322_v17 = vpack.c.bf16 %v57_v14, %v56_v13 }
 0x132   :  { %2719 = vmatprep.subr.bf16.mxu0 %v3322_v17  ;;  %2763 = vmatprep.subr.bf16.mxu1 %v3322_v17 }
 0x133   :  { %2622 = vmatmul.mubr.msk.f32.gmra.mrb[24].mxu1 %vm73_vm0, %v3265_v9  ;;  %2721 = vmatpush3.bf16.msra.mxu0 %v3322_v17 }
 0x134   :  { %2624 = vmatprep.mubr.msk.f32.mxu1 %vm73_vm0, %v3271_v10 }
 0x137   :  { %2625 = vmatmul.mubr.msk.f32.gmra.mrb[26].mxu1 %vm73_vm0, %v3281_v11 }
 0x138   :  { %2627 = vmatprep.mubr.msk.f32.mxu1 %vm73_vm0, %v3286_v8 }
 0x13b   :  { %2628 = vmatmul.mubr.msk.f32.gmra.mrb[28].mxu1 %vm73_vm0, %v3295_v12 }
 0x170   :  { %v3327_v23 = vpop.xlane.xlu0 %344 }
 0x174   :  { %v3329_v30 = vpop.xlane.xlu0 %341  ;;  %v3332_v34 = vpop.xlane.xlu1 %350 }
 0x175   :  { %380 = vxpose.xlu0.b32.start [1/8] (short) (narrow) %v3329_v30, 8 }
 0x178   :  { %v3335_v37 = vpop.xlane.xlu1 %347 }
 0x179   :  { %381 = vxpose.xlu0.b32.cont [2/8] (short) (narrow) %v3327_v23, 8  ;;  %v3339_v38 = vpop.xlane.xlu0 %353 }
 0x17c   :  { %v3342_v39 = vpop.xlane.xlu1 %356 }
 0x17d   :  { %382 = vxpose.xlu0.b32.cont [3/8] (short) (narrow) %v3335_v37, 8  ;;  %v3345_v40 = vpop.xlane.xlu0 %359 }
 0x180   :  { %v3348_v41 = vpop.xlane.xlu1 %362 }
 0x181   :  { %383 = vxpose.xlu0.b32.cont [4/8] (short) (narrow) %v3332_v34, 8 }
 0x185   :  { %384 = vxpose.xlu0.b32.cont [5/8] (short) (narrow) %v3339_v38, 8 }
 0x189   :  { %385 = vxpose.xlu0.b32.cont [6/8] (short) (narrow) %v3342_v39, 8 }
 0x18d   :  { %386 = vxpose.xlu0.b32.cont [7/8] (short) (narrow) %v3345_v40, 8 }
 0x191   :  { %387 = vxpose.xlu0.b32.end [8/8] (short) (narrow) %v3348_v41, 8 }
 0x1c7   :  { %v2528_v43 = vpop.f32.mrb[16].mxu0 }
 0x1c8   :  { %v662_v44 = vadd.f32 %v2528_v43, %v3351_v42  ;;  %v656_v45 = vpop.f32.mrb[17].mxu0 }
 0x1c9   :  { %v657_v46 = vadd.f32 %v3351_v42, %v656_v45 }
 0x1ca   :  { %v2217_v47 = vmul.f32 -1.442695, %v662_v44 }
 0x1cb   :  { %v2216_v48 = vmul.f32 -1.442695, %v657_v46  ;;  %v2531_v49 = vpop.f32.mrb[18].mxu0 }
 0x1cc   :  { %2772 = vpow2.f32 %v2217_v47  ;;  %v672_v50 = vadd.f32 %v2531_v49, %v3351_v42  ;;  %v666_v51 = vpop.f32.mrb[19].mxu0 }
 0x1cd   :  { %2774 = vpow2.f32 %v2216_v48  ;;  %v667_v53 = vadd.f32 %v3351_v42, %v666_v51 }
 0x1ce   :  { %v2219_v54 = vmul.f32 -1.442695, %v672_v50 }
 0x1cf   :  { %v2218_v55 = vmul.f32 -1.442695, %v667_v53  ;;  %v2534_v56 = vpop.f32.mrb[20].mxu0 }
 0x1d0   :  { %2776 = vpow2.f32 %v2219_v54  ;;  %v682_v57 = vadd.f32 %v2534_v56, %v3351_v42  ;;  %v676_v58 = vpop.f32.mrb[21].mxu0 }
 0x1d1   :  { %2778 = vpow2.f32 %v2218_v55  ;;  %v677_v59 = vadd.f32 %v3351_v42, %v676_v58 }
 0x1d2   :  { %v2221_v60 = vmul.f32 -1.442695, %v682_v57 }
 0x1d3   :  { %v2220_v61 = vmul.f32 -1.442695, %v677_v59  ;;  %v2537_v62 = vpop.f32.mrb[22].mxu0 }
 0x1d4   :  { %2780 = vpow2.f32 %v2221_v60  ;;  %v692_v63 = vadd.f32 %v2537_v62, %v3351_v42  ;;  %v686_v0 = vpop.f32.mrb[23].mxu0 }
 0x1d5   :  { %2782 = vpow2.f32 %v2220_v61  ;;  %v687_v1 = vadd.f32 %v3351_v42, %v686_v0 }
 0x1d6   :  { %v2773_v2 = vpop.eup %2772  ;;  %v2223_v5 = vmul.f32 -1.442695, %v692_v63  ;;  %v3361_v6 = vpop.f32.mrb[0].mxu1 }
 0x1d7   :  { %v2775_v16 = vpop.eup %2774  ;;  %v720_v18 = vadd.f32 1.0, %v2773_v2  ;;  %v2222_v19 = vmul.f32 -1.442695, %v687_v1  ;;  %v3368_v22 = vpop.f32.mrb[1].mxu1 }
 0x1d8   :  { %v719_v24 = vadd.f32 1.0, %v2775_v16  ;;  %2784 = vpow2.f32 %v2223_v5  ;;  %v2544_v25 = vpop.f32.mrb[24].mxu0  ;;  %v412_v5 = vlaneseq }
 0x1d9   :  { %2786 = vrcp.f32 %v720_v18  ;;  %v830_v26 = vadd.f32 %v2544_v25, %v3366_v15  ;;  %v824_v28 = vpop.f32.mrb[25].mxu0 }
 0x1da   :  { %v2777_v29 = vpop.eup %2776  ;;  %2788 = vrcp.f32 %v719_v24  ;;  %v825_v31 = vadd.f32 %v3366_v15, %v824_v28  ;;  %v3372_v32 = vpop.f32.mrb[2].mxu1 }
 0x1db   :  { %v2779_v33 = vpop.eup %2778  ;;  %v722_v35 = vadd.f32 1.0, %v2777_v29  ;;  %2790 = vpow2.f32 %v2222_v19  ;;  %v864_v36 = vmax.f32 %v830_v26, 0.0  ;;  %v303_v13 = vpop.f32.mrb[3].mxu1 }
 0x1dc   :  { %v721_v14 = vadd.f32 1.0, %v2779_v33  ;;  %v863_v43 = vmax.f32 %v825_v31, 0.0  ;;  %v3406_v31 = vshrl.u32 %v412_v5, 7 }
 0x1dd   :  { %2792 = vrcp.f32 %v722_v35 }
 0x1de   :  { %v2781_v44 = vpop.eup %2780  ;;  %2794 = vrcp.f32 %v721_v14  ;;  %2558 = vmatprep.mubr.msk.f32.mxu0 %vm73_vm0, %v863_v43  ;;  %v2502_v45 = vpop.f32.mrb[4].mxu1  ;;  %v365_v43 = vmul.f32 2.0, %v3361_v6 }
 0x1df   :  { %v2783_v46 = vpop.eup %2782  ;;  %v724_v47 = vadd.f32 1.0, %v2781_v44  ;;  %2559 = vmatmul.mubr.msk.f32.vlgmr.msra.gmra.mrb[26].mxu0 %vm73_vm0, %v864_v36  ;;  %v313_v48 = vpop.f32.mrb[5].mxu1  ;;  %v364_v44 = vmul.f32 2.0, %v3368_v22 }
 0x1e0   :  { %v723_v49 = vadd.f32 1.0, %v2783_v46 }
 0x1e1   :  { %2796 = vrcp.f32 %v724_v47  ;;  %v367_v47 = vmul.f32 2.0, %v3372_v32 }
 0x1e2   :  { %v2785_v50 = vpop.eup %2784  ;;  %2798 = vrcp.f32 %v723_v49  ;;  %v2505_v51 = vpop.f32.mrb[6].mxu1  ;;  %v366_v49 = vmul.f32 2.0, %v303_v13 }
 0x1e3   :  { %v2787_v53 = vpop.eup %2786  ;;  %v726_v54 = vadd.f32 1.0, %v2785_v50  ;;  %v323_v55 = vpop.f32.mrb[7].mxu1  ;;  %v369_v50 = vmul.f32 2.0, %v2502_v45  ;;  %v373_v45 = vsub.f32 %v3327_v23, %v365_v43 }
 0x1e4   :  { %v2789_v56 = vpop.eup %2788  ;;  %745 = vst.msk [vmem:[%s3956_s12 + $0x8] sm:$0xff] %vm743_vm2, %v2787_v53  ;;  %v370_v6 = vmul.f32 2.0, %v323_v55 }
 0x1e5   :  { %v2791_v57 = vpop.eup %2790  ;;  %744 = vst.msk [vmem:[%s3956_s12] sm:$0xff] %vm743_vm2, %v2789_v56  ;;  %2800 = vrcp.f32 %v726_v54  ;;  %v368_v54 = vmul.f32 2.0, %v313_v48  ;;  %v371_v56 = vmul.f32 2.0, %v2505_v51  ;;  %v372_v48 = vsub.f32 %v3329_v30, %v364_v44 }
 0x1e6   :  { %v725_v58 = vadd.f32 1.0, %v2791_v57  ;;  %v2547_v59 = vpop.f32.mrb[8].mxu1  ;;  %v377_v55 = vsub.f32 %v3342_v39, %v369_v50 }
 0x1e7   :  { %v2793_v60 = vpop.eup %2792  ;;  %v840_v61 = vadd.f32 %v2547_v59, %v3366_v15  ;;  %v834_v62 = vpop.f32.mrb[9].mxu1  ;;  %v414_v59 = vsub.s32 0, %v3406_v31  ;;  %v376_v23 = vsub.f32 %v3339_v38, %v368_v54  ;;  %v379_v30 = vsub.f32 %v3348_v41, %v371_v56 }
 0x1e8   :  { %v2795_v63 = vpop.eup %2794  ;;  %747 = vst.msk [vmem:[%s3956_s12 + $0x18] sm:$0xff] %vm743_vm2, %v2793_v60  ;;  %2802 = vrcp.f32 %v725_v58  ;;  %v835_v0 = vadd.f32 %v3366_v15, %v834_v62  ;;  %v375_v60 = vsub.f32 %v3332_v34, %v367_v47 }
 0x1e9   :  { %746 = vst.msk [vmem:[%s3956_s12 + $0x10] sm:$0xff] %vm743_vm2, %v2795_v63  ;;  %v866_v18 = vmax.f32 %v840_v61, 0.0  ;;  %v374_v61 = vsub.f32 %v3335_v37, %v366_v49  ;;  %v378_v37 = vsub.f32 %v3345_v40, %v370_v6 }
 0x1ea   :  { %v865_v1 = vmax.f32 %v835_v0, 0.0  ;;  %v2550_v2 = vpop.f32.mrb[10].mxu1 }
 0x1eb   :  { %v2797_v16 = vpop.eup %2796  ;;  %v850_v19 = vadd.f32 %v2550_v2, %v3366_v15  ;;  %v844_v24 = vpop.f32.mrb[11].mxu1 }
 0x1ec   :  { %v2799_v25 = vpop.eup %2798  ;;  %749 = vst.msk [vmem:[%s3956_s12 + $0x28] sm:$0xff] %vm743_vm2, %v2797_v16  ;;  %v845_v26 = vadd.f32 %v3366_v15, %v844_v24  ;;  %2561 = vmatprep.mubr.msk.f32.mxu0 %vm73_vm0, %v865_v1 }
 0x1ed   :  { %748 = vst.msk [vmem:[%s3956_s12 + $0x20] sm:$0xff] %vm743_vm2, %v2799_v25  ;;  %2562 = vmatmul.mubr.msk.f32.gmra.mrb[28].mxu0 %vm73_vm0, %v866_v18  ;;  %v868_v35 = vmax.f32 %v850_v19, 0.0 }
 0x1ee   :  { %v867_v28 = vmax.f32 %v845_v26, 0.0  ;;  %v2553_v29 = vpop.f32.mrb[12].mxu1 }
 0x1ef   :  { %v2801_v33 = vpop.eup %2800  ;;  %v860_v36 = vadd.f32 %v2553_v29, %v3366_v15  ;;  %v854_v14 = vpop.f32.mrb[13].mxu1 }
 0x1f0   :  { %751 = vst.msk [vmem:[%s3956_s12 + $0x38] sm:$0xff] %vm743_vm2, %v2801_v33  ;;  %v855_v46 = vadd.f32 %v3366_v15, %v854_v14  ;;  %2564 = vmatprep.mubr.msk.f32.mxu0 %vm73_vm0, %v867_v28 }
 0x1f1   :  { %2565 = vmatmul.mubr.msk.f32.gmra.mrb[30].mxu0 %vm73_vm0, %v868_v35  ;;  %v870_v22 = vmax.f32 %v860_v36, 0.0 }
 0x1f2   :  { %v2803_v53 = vpop.eup %2802  ;;  %v869_v57 = vmax.f32 %v855_v46, 0.0  ;;  %v2576_v58 = vpop.f32.mrb[14].mxu1 }
 0x1f3   :  { %750 = vst.msk [vmem:[%s3956_s12 + $0x30] sm:$0xff] %vm743_vm2, %v2803_v53  ;;  %v3425_v32 = vadd.f32 %v2576_v58, %v3114_v21  ;;  %v1218_v13 = vpop.f32.mrb[15].mxu1 }
 0x1f4   :  { %v1219_v51 = vadd.f32 %v3114_v21, %v1218_v13  ;;  %2567 = vmatprep.mubr.msk.f32.mxu0 %vm73_vm0, %v869_v57 }
 0x1f5   :  { %v396_v62 = vpop.trf.xlu0  ;;  %2568 = vmatmul.mubr.msk.f32.gmra.mrb[32].mxu0 %vm73_vm0, %v870_v22  ;;  %v1387_v63 = vmul.f32 %v3425_v32, %v3425_v32 }
 0x1f6   :  { %v2726_v0 = vpack.c.bf16 %v3425_v32, %v1219_v51  ;;  %v415_v1 = vrot.slane %v396_v62, %v414_v59  ;;  %2602 = vmatprep.mubr.msk.f32.mxu0 %vm73_vm0, %v1219_v51  ;;  %v2579_v34 = vpop.f32.mrb[16].mxu1  ;;  %v1386_v16 = vmul.f32 %v1219_v51, %v1219_v51 }
 0x1f7   :  { %v1397_v39 = vsel %vm73_vm0, %v1387_v63, 0.0  ;;  %v3446_v2 = vadd.f32 %v2579_v34, %v3114_v21  ;;  %v1228_v5 = vpop.f32.mrb[17].mxu1 }
 0x1f8   :  { %v416_v38 = vadd.f32 %v415_v1, %v372_v48  ;;  %v417_v18 = vadd.f32 %v415_v1, %v373_v45  ;;  %v418_v41 = vadd.f32 %v415_v1, %v374_v61  ;;  %v419_v19 = vadd.f32 %v415_v1, %v375_v60  ;;  %1398 = vadd.xlane.f32.xlu1 %v1397_v39 }
 0x1f9   :  { %v420_v24 = vadd.f32 %v415_v1, %v376_v23  ;;  %v421_v25 = vadd.f32 %v415_v1, %v377_v55  ;;  %v422_v26 = vadd.f32 %v415_v1, %v378_v37  ;;  %v423_v28 = vadd.f32 %v415_v1, %v379_v30  ;;  %2728 = vmatprep.subr.msk.bf16.mxu0 %vm3124_vm1, %v2726_v0 }
 0x1fa   :  { %v424_v40 = vmax.f32 %v416_v38, 0.0  ;;  %v425_v29 = vmax.f32 %v417_v18, 0.0  ;;  %v426_v33 = vmax.f32 %v418_v41, 0.0  ;;  %v427_v35 = vmax.f32 %v419_v19, 0.0  ;;  %2731 = vmatpush3.bf16.xpose.msk.msra.mxu0 %vm3124_vm1, %v2726_v0  ;;  %v2582_v36 = vpop.f32.mrb[18].mxu1 }
 0x1fb   :  { %v428_v14 = vmax.f32 %v420_v24, 0.0  ;;  %v429_v43 = vmax.f32 %v421_v25, 0.0  ;;  %v430_v44 = vmax.f32 %v422_v26, 0.0  ;;  %v431_v46 = vmax.f32 %v423_v28, 0.0  ;;  %v1238_v47 = vpop.f32.mrb[19].mxu1 }
 0x1fc   :  { %433 = vst.msk [vmem:[#allocation3] sm:$0xff] %vm432_vm3, %v424_v40  ;;  %434 = vst.msk [vmem:[#allocation3 + $0x8] sm:$0xff] %vm432_vm3, %v425_v29  ;;  %v1229_v49 = vadd.f32 %v3114_v21, %v1228_v5  ;;  %v1394_v50 = vsel %vm73_vm0, %v1386_v16, 0.0  ;;  %v1389_v53 = vmul.f32 %v3446_v2, %v3446_v2  ;;  %v3461_v54 = vadd.f32 %v2582_v36, %v3114_v21  ;;  %v3543_v38 = vld [vmem:[%s3954_s10] ss:$0 sm:$0xff] }
 0x1fd   :  { %435 = vst.msk [vmem:[#allocation3 + $0x10] sm:$0xff] %vm432_vm3, %v426_v33  ;;  %436 = vst.msk [vmem:[#allocation3 + $0x18] sm:$0xff] %vm432_vm3, %v427_v35  ;;  %1395 = vadd.xlane.f32.xlu1 %v1394_v50  ;;  %v1239_v56 = vadd.f32 %v3114_v21, %v1238_v47 }
 0x1fe   :  { %437 = vst.msk [vmem:[#allocation3 + $0x20] sm:$0xff] %vm432_vm3, %v428_v14  ;;  %438 = vst.msk [vmem:[#allocation3 + $0x28] sm:$0xff] %vm432_vm3, %v429_v43  ;;  %v2732_v57 = vpack.c.bf16 %v3446_v2, %v1229_v49  ;;  %v1403_v58 = vsel %vm73_vm0, %v1389_v53, 0.0  ;;  %v1388_v6 = vmul.f32 %v1229_v49, %v1229_v49  ;;  %v2585_v22 = vpop.f32.mrb[20].mxu1 }
 0x1ff   :  { %439 = vst.msk [vmem:[#allocation3 + $0x30] sm:$0xff] %vm432_vm3, %v430_v44  ;;  %440 = vst.msk [vmem:[#allocation3 + $0x38] sm:$0xff] %vm432_vm3, %v431_v46  ;;  %1404 = vadd.xlane.f32.xlu0 %v1403_v58  ;;  %v2738_v13 = vpack.c.bf16 %v3461_v54, %v1239_v56  ;;  %v1390_v45 = vmul.f32 %v1239_v56, %v1239_v56  ;;  %v3472_v48 = vadd.f32 %v2585_v22, %v3114_v21  ;;  %v1248_v51 = vpop.f32.mrb[21].mxu1 }
 0x200   :  { %2734 = vmatprep.subr.msk.bf16.mxu0 %vm3124_vm1, %v2732_v57  ;;  %v1400_v60 = vsel %vm73_vm0, %v1388_v6, 0.0  ;;  %v3478_v61 = vadd.f32 %v3114_v21, %v1248_v51 }
 0x201   :  { %1401 = vadd.xlane.f32.xlu1 %v1400_v60  ;;  %v1406_v55 = vsel %vm73_vm0, %v1390_v45, 0.0 }
 0x202   :  { %2737 = vmatpush3.bf16.xpose.msk.msra.mxu0 %vm3124_vm1, %v2732_v57  ;;  %v2744_v62 = vpack.c.bf16 %v3472_v48, %v3478_v61 }
 0x203   :  { %2740 = vmatprep.subr.msk.bf16.mxu0 %vm3124_vm1, %v2738_v13 }
 0x205   :  { %1407 = vadd.xlane.f32.xlu1 %v1406_v55 }
 0x20a   :  { %2743 = vmatpush3.bf16.xpose.msk.msra.mxu0 %vm3124_vm1, %v2738_v13 }
 0x20b   :  { %2746 = vmatprep.subr.msk.bf16.mxu0 %vm3124_vm1, %v2744_v62 }
 0x212   :  { %2749 = vmatpush3.bf16.xpose.msk.msra.mxu0 %vm3124_vm1, %v2744_v62 }
 0x213   :  { %2759 = vmatprep.subr.bf16.mxu0 %v3108_v20 }
 0x219   :  { %2603 = vmatmul.mubr.msk.f32.vlgmr.msra.gmra.mrb[34].mxu0 %vm73_vm0, %v3425_v32 }
 0x21a   :  { %2605 = vmatprep.mubr.msk.f32.mxu0 %vm73_vm0, %v1229_v49  ;;  %2761 = vmatpush3.bf16.msra.mxu0 %v3108_v20  ;;  %v2620_v20 = vpop.f32.mrb[22].mxu1 }
 0x21b   :  { %v1567_v21 = vadd.f32 %v2620_v20, %v3171_v52  ;;  %v1561_v27 = vpop.f32.mrb[23].mxu1 }
 0x21d   :  { %2606 = vmatmul.mubr.msk.f32.gmra.mrb[36].mxu0 %vm73_vm0, %v3446_v2 }
 0x21e   :  { %2608 = vmatprep.mubr.msk.f32.mxu0 %vm73_vm0, %v1239_v56 }
 0x221   :  { %2609 = vmatmul.mubr.msk.f32.gmra.mrb[38].mxu0 %vm73_vm0, %v3461_v54 }
 0x222   :  { %2611 = vmatprep.mubr.msk.f32.mxu0 %vm73_vm0, %v3478_v61 }
 0x225   :  { %2612 = vmatmul.mubr.msk.f32.gmra.mrb[40].mxu0 %vm73_vm0, %v3472_v48 }
 0x226   :  { %2650 = vmatprep.mubr.msk.f32.mxu0 %vm73_vm0, %v3242_v3  ;;  %v1562_v3 = vadd.f32 %v3171_v52, %v1561_v27 }
 0x229   :  { %2651 = vmatmul.mubr.msk.f32.vlgmr.msra.gmra.mrb[42].mxu0 %vm73_vm0, %v3251_v4  ;;  %v1601_v4 = vmax.f32 %v1567_v21, 0.0 }
 0x22a   :  { %2653 = vmatprep.mubr.msk.f32.mxu0 %vm73_vm0, %v3256_v7  ;;  %v1600_v7 = vmax.f32 %v1562_v3, 0.0 }
 0x22c   :  { %2634 = vmatprep.mubr.msk.f32.mxu1 %vm73_vm0, %v1600_v7 }
 0x22d   :  { %2654 = vmatmul.mubr.msk.f32.gmra.mrb[44].mxu0 %vm73_vm0, %v3265_v9  ;;  %2635 = vmatmul.mubr.msk.f32.vlgmr.msra.gmra.mrb[30].mxu1 %vm73_vm0, %v1601_v4  ;;  %v2623_v9 = vpop.f32.mrb[24].mxu1 }
 0x22e   :  { %2656 = vmatprep.mubr.msk.f32.mxu0 %vm73_vm0, %v3271_v10  ;;  %2765 = vmatpush3.bf16.msra.mxu1 %v3322_v17  ;;  %v1577_v10 = vadd.f32 %v2623_v9, %v3171_v52 }
 0x231   :  { %2657 = vmatmul.mubr.msk.f32.gmra.mrb[46].mxu0 %vm73_vm0, %v3281_v11  ;;  %v1571_v11 = vpop.f32.mrb[25].mxu1 }
 0x232   :  { %2659 = vmatprep.mubr.msk.f32.mxu0 %vm73_vm0, %v3286_v8  ;;  %v1572_v8 = vadd.f32 %v3171_v52, %v1571_v11  ;;  %v2626_v63 = vpop.f32.mrb[26].mxu1 }
 0x233   :  { %v1587_v23 = vadd.f32 %v2626_v63, %v3171_v52  ;;  %v1581_v30 = vpop.f32.mrb[27].mxu1 }
 0x234   :  { %v1602_v32 = vmax.f32 %v1572_v8, 0.0  ;;  %v1582_v0 = vadd.f32 %v3171_v52, %v1581_v30  ;;  %v2629_v34 = vpop.f32.mrb[28].mxu1 }
 0x235   :  { %2660 = vmatmul.mubr.msk.f32.gmra.mrb[48].mxu0 %vm73_vm0, %v3295_v12  ;;  %v1603_v12 = vmax.f32 %v1577_v10, 0.0  ;;  %v1605_v1 = vmax.f32 %v1587_v23, 0.0  ;;  %v1597_v37 = vadd.f32 %v2629_v34, %v3171_v52  ;;  %v1591_v39 = vpop.f32.mrb[29].mxu1 }
 0x236   :  { %2637 = vmatprep.mubr.msk.f32.mxu1 %vm73_vm0, %v1602_v32  ;;  %v1604_v17 = vmax.f32 %v1582_v0, 0.0  ;;  %v1592_v2 = vadd.f32 %v3171_v52, %v1591_v39 }
 0x237   :  { %2638 = vmatmul.mubr.msk.f32.gmra.mrb[32].mxu1 %vm73_vm0, %v1603_v12  ;;  %v1607_v5 = vmax.f32 %v1597_v37, 0.0 }
 0x238   :  { %2640 = vmatprep.mubr.msk.f32.mxu1 %vm73_vm0, %v1604_v17  ;;  %v1606_v16 = vmax.f32 %v1592_v2, 0.0 }
 0x23b   :  { %2641 = vmatmul.mubr.msk.f32.gmra.mrb[34].mxu1 %vm73_vm0, %v1605_v1 }
 0x23c   :  { %2643 = vmatprep.mubr.msk.f32.mxu1 %vm73_vm0, %v1606_v16 }
 0x23f   :  { %2644 = vmatmul.mubr.msk.f32.gmra.mrb[36].mxu1 %vm73_vm0, %v1607_v5 }
 0x2b2   :  { %v2560_v18 = vpop.f32.mrb[26].mxu0 }
 0x2b3   :  { %v3546_v41 = vadd.f32 %v2560_v18, %v3543_v38  ;;  %v967_v52 = vpop.f32.mrb[27].mxu0 }
 0x2b4   :  { %v3549_v19 = vadd.f32 %v3543_v38, %v967_v52  ;;  %v3617_v52 = vpop.xlane.xlu1 %1398 }
 0x2b5   :  { %v1010_v24 = vsel %vm1006_vm4, %v3546_v41, -inf }
 0x2b6   :  { %1011 = vmax.xlane.f32.xlu1 %v1010_v24  ;;  %v1007_v25 = vsel %vm1006_vm4, %v3549_v19, -inf }
 0x2ba   :  { %1008 = vmax.xlane.f32.xlu1 %v1007_v25 }
 0x2c0   :  { %v2563_v26 = vpop.f32.mrb[28].mxu0 }
 0x2c1   :  { %v3556_v28 = vadd.f32 %v2563_v26, %v3543_v38  ;;  %v977_v40 = vpop.f32.mrb[29].mxu0 }
 0x2c2   :  { %v3559_v29 = vadd.f32 %v3543_v38, %v977_v40 }
 0x2c3   :  { %v1016_v33 = vsel %vm1006_vm4, %v3556_v28, -inf }
 0x2c4   :  { %1017 = vmax.xlane.f32.xlu1 %v1016_v33  ;;  %v2566_v35 = vpop.f32.mrb[30].mxu0  ;;  %v1013_v43 = vsel %vm1006_vm4, %v3559_v29, -inf }
 0x2c5   :  { %v987_v36 = vpop.f32.mrb[31].mxu0  ;;  %v3564_v14 = vadd.f32 %v2566_v35, %v3543_v38 }
 0x2c6   :  { %v3569_v47 = vadd.f32 %v3543_v38, %v987_v36 }
 0x2c7   :  { %v1022_v49 = vsel %vm1006_vm4, %v3564_v14, -inf }
 0x2c8   :  { %v2569_v44 = vpop.f32.mrb[32].mxu0  ;;  %1014 = vmax.xlane.f32.xlu1 %v1013_v43  ;;  %v1019_v53 = vsel %vm1006_vm4, %v3569_v47, -inf }
 0x2c9   :  { %v997_v46 = vpop.f32.mrb[33].mxu0  ;;  %v3574_v50 = vadd.f32 %v2569_v44, %v3543_v38 }
 0x2ca   :  { %v3579_v56 = vadd.f32 %v3543_v38, %v997_v46 }
 0x2cb   :  { %v1028_v57 = vsel %vm1006_vm4, %v3574_v50, -inf }
 0x2cc   :  { %1023 = vmax.xlane.f32.xlu1 %v1022_v49  ;;  %v1025_v58 = vsel %vm1006_vm4, %v3579_v56, -inf }
 0x2d0   :  { %1020 = vmax.xlane.f32.xlu1 %v1019_v53 }
 0x2d4   :  { %1029 = vmax.xlane.f32.xlu1 %v1028_v57 }
 0x2d8   :  { %1026 = vmax.xlane.f32.xlu1 %v1025_v58 }
 0x2ec   :  { %v3585_v6 = vpop.f32.mrb[34].mxu0 }
 0x2ed   :  { %v3587_v22 = vpop.f32.mrb[35].mxu0 }
 0x2f0   :  { %v3589_v13 = vpop.f32.mrb[36].mxu0 }
 0x2f1   :  { %v3591_v45 = vpop.f32.mrb[37].mxu0 }
 0x2f4   :  { %v3593_v51 = vpop.f32.mrb[38].mxu0 }
 0x2f5   :  { %v3595_v60 = vpop.f32.mrb[39].mxu0 }
 0x2f8   :  { %v3597_v55 = vpop.f32.mrb[40].mxu0 }
 0x2f9   :  { %v3599_v62 = vpop.f32.mrb[41].mxu0 }
 0x2fc   :  { %v2652_v20 = vpop.f32.mrb[42].mxu0 }
 0x2fd   :  { %v1866_v21 = vadd.f32 %v2652_v20, %v3366_v15  ;;  %v1860_v27 = vpop.f32.mrb[43].mxu0 }
 0x2fe   :  { %v1861_v3 = vadd.f32 %v3366_v15, %v1860_v27 }
 0x2ff   :  { %v1900_v9 = vmax.f32 %v1866_v21, 0.0 }
 0x300   :  { %v1899_v4 = vmax.f32 %v1861_v3, 0.0  ;;  %v2655_v7 = vpop.f32.mrb[44].mxu0  ;;  %v2636_v18 = vpop.f32.mrb[30].mxu1 }
 0x301   :  { %v1876_v10 = vadd.f32 %v2655_v7, %v3366_v15  ;;  %v1870_v11 = vpop.f32.mrb[45].mxu0  ;;  %v1704_v24 = vadd.f32 %v2636_v18, %v3351_v42  ;;  %v1698_v25 = vpop.f32.mrb[31].mxu1 }
 0x302   :  { %2666 = vmatprep.mubr.msk.f32.mxu1 %vm73_vm0, %v1899_v4  ;;  %v1871_v8 = vadd.f32 %v3366_v15, %v1870_v11  ;;  %v1699_v26 = vadd.f32 %v3351_v42, %v1698_v25 }
 0x303   :  { %v1902_v12 = vmax.f32 %v1876_v10, 0.0  ;;  %2667 = vmatmul.mubr.msk.f32.vlgmr.msra.gmra.mrb[38].mxu1 %vm73_vm0, %v1900_v9  ;;  %v2291_v40 = vmul.f32 -1.442695, %v1704_v24 }
 0x304   :  { %v1901_v32 = vmax.f32 %v1871_v8, 0.0  ;;  %v2658_v63 = vpop.f32.mrb[46].mxu0  ;;  %v2290_v33 = vmul.f32 -1.442695, %v1699_v26 }
 0x305   :  { %v1886_v23 = vadd.f32 %v2658_v63, %v3366_v15  ;;  %v1880_v30 = vpop.f32.mrb[47].mxu0  ;;  %2804 = vpow2.f32 %v2291_v40 }
 0x306   :  { %2669 = vmatprep.mubr.msk.f32.mxu1 %vm73_vm0, %v1901_v32  ;;  %v1881_v0 = vadd.f32 %v3366_v15, %v1880_v30  ;;  %2806 = vpow2.f32 %v2290_v33 }
 0x307   :  { %2670 = vmatmul.mubr.msk.f32.gmra.mrb[40].mxu1 %vm73_vm0, %v1902_v12  ;;  %v1904_v1 = vmax.f32 %v1886_v23, 0.0 }
 0x308   :  { %v1903_v17 = vmax.f32 %v1881_v0, 0.0  ;;  %v2661_v34 = vpop.f32.mrb[48].mxu0 }
 0x309   :  { %v1896_v37 = vadd.f32 %v2661_v34, %v3366_v15  ;;  %v1890_v39 = vpop.f32.mrb[49].mxu0 }
 0x30a   :  { %2672 = vmatprep.mubr.msk.f32.mxu1 %vm73_vm0, %v1903_v17  ;;  %v1891_v2 = vadd.f32 %v3366_v15, %v1890_v39  ;;  %v3621_v15 = vpop.xlane.xlu1 %1395  ;;  %v2639_v57 = vpop.f32.mrb[32].mxu1 }
 0x30b   :  { %2673 = vmatmul.mubr.msk.f32.gmra.mrb[42].mxu1 %vm73_vm0, %v1904_v1  ;;  %v1906_v5 = vmax.f32 %v1896_v37, 0.0  ;;  %v1714_v58 = vadd.f32 %v2639_v57, %v3351_v42  ;;  %v1708_v20 = vpop.f32.mrb[33].mxu1 }
 0x30c   :  { %v1905_v16 = vmax.f32 %v1891_v2, 0.0  ;;  %v1709_v21 = vadd.f32 %v3351_v42, %v1708_v20 }
 0x30d   :  { %v2293_v3 = vmul.f32 -1.442695, %v1714_v58 }
 0x30e   :  { %2675 = vmatprep.mubr.msk.f32.mxu1 %vm73_vm0, %v1905_v16  ;;  %v3623_v35 = vpop.xlane.xlu1 %1401  ;;  %v2292_v7 = vmul.f32 -1.442695, %v1709_v21  ;;  %v2642_v9 = vpop.f32.mrb[34].mxu1 }
 0x30f   :  { %2676 = vmatmul.mubr.msk.f32.gmra.mrb[44].mxu1 %vm73_vm0, %v1906_v5  ;;  %v2805_v36 = vpop.eup %2804  ;;  %v1724_v11 = vadd.f32 %v2642_v9, %v3351_v42  ;;  %v1718_v8 = vpop.f32.mrb[35].mxu1 }
 0x310   :  { %v2807_v43 = vpop.eup %2806  ;;  %v1762_v44 = vadd.f32 1.0, %v2805_v36  ;;  %v1719_v12 = vadd.f32 %v3351_v42, %v1718_v8 }
 0x311   :  { %v1761_v49 = vadd.f32 1.0, %v2807_v43  ;;  %v2295_v63 = vmul.f32 -1.442695, %v1724_v11 }
 0x312   :  { %v3625_v46 = vpop.xlane.xlu1 %1407  ;;  %2808 = vrcp.f32 %v1762_v44  ;;  %v2294_v23 = vmul.f32 -1.442695, %v1719_v12  ;;  %v2645_v30 = vpop.f32.mrb[36].mxu1 }
 0x313   :  { %2810 = vrcp.f32 %v1761_v49  ;;  %v1734_v0 = vadd.f32 %v2645_v30, %v3351_v42  ;;  %v1728_v1 = vpop.f32.mrb[37].mxu1 }
 0x314   :  { %2812 = vpow2.f32 %v2293_v3  ;;  %v1729_v17 = vadd.f32 %v3351_v42, %v1728_v1 }
 0x315   :  { %2814 = vpow2.f32 %v2292_v7  ;;  %v2297_v37 = vmul.f32 -1.442695, %v1734_v0 }
 0x316   :  { %2816 = vpow2.f32 %v2295_v63  ;;  %v2296_v39 = vmul.f32 -1.442695, %v1729_v17 }
 0x317   :  { %2818 = vpow2.f32 %v2294_v23 }
 0x318   :  { %2820 = vpow2.f32 %v2297_v37 }
 0x319   :  { %2822 = vpow2.f32 %v2296_v39 }
 0x31c   :  { %v2809_v4 = vpop.eup %2808 }
 0x31d   :  { %v2811_v10 = vpop.eup %2810  ;;  %2299 = vst.msk [vmem:[%s3956_s12 + $0x48] sm:$0xff] %vm743_vm2, %v2809_v4 }
 0x31e   :  { %2298 = vst.msk [vmem:[%s3956_s12 + $0x40] sm:$0xff] %vm743_vm2, %v2811_v10  ;;  %v2813_v2 = vpop.eup %2812 }
 0x31f   :  { %v2815_v16 = vpop.eup %2814  ;;  %v1764_v18 = vadd.f32 1.0, %v2813_v2 }
 0x320   :  { %v1763_v24 = vadd.f32 1.0, %v2815_v16  ;;  %v2817_v25 = vpop.eup %2816 }
 0x321   :  { %2824 = vrcp.f32 %v1764_v18  ;;  %v2819_v40 = vpop.eup %2818  ;;  %v1766_v33 = vadd.f32 1.0, %v2817_v25 }
 0x322   :  { %2826 = vrcp.f32 %v1763_v24  ;;  %v1765_v42 = vadd.f32 1.0, %v2819_v40  ;;  %v2821_v36 = vpop.eup %2820 }
 0x323   :  { %2828 = vrcp.f32 %v1766_v33  ;;  %v2823_v44 = vpop.eup %2822  ;;  %v1768_v57 = vadd.f32 1.0, %v2821_v36 }
 0x324   :  { %2830 = vrcp.f32 %v1765_v42  ;;  %v1767_v58 = vadd.f32 1.0, %v2823_v44 }
 0x325   :  { %2832 = vrcp.f32 %v1768_v57 }
 0x326   :  { %2834 = vrcp.f32 %v1767_v58 }
 0x32b   :  { %v2825_v21 = vpop.eup %2824 }
 0x32c   :  { %v2827_v3 = vpop.eup %2826  ;;  %2301 = vst.msk [vmem:[%s3956_s12 + $0x58] sm:$0xff] %vm743_vm2, %v2825_v21 }
 0x32d   :  { %2300 = vst.msk [vmem:[%s3956_s12 + $0x50] sm:$0xff] %vm743_vm2, %v2827_v3  ;;  %v2829_v4 = vpop.eup %2828 }
 0x32e   :  { %v2831_v7 = vpop.eup %2830  ;;  %2303 = vst.msk [vmem:[%s3956_s12 + $0x68] sm:$0xff] %vm743_vm2, %v2829_v4 }
 0x32f   :  { %2302 = vst.msk [vmem:[%s3956_s12 + $0x60] sm:$0xff] %vm743_vm2, %v2831_v7  ;;  %v2833_v9 = vpop.eup %2832 }
 0x330   :  { %v2835_v10 = vpop.eup %2834  ;;  %2305 = vst.msk [vmem:[%s3956_s12 + $0x78] sm:$0xff] %vm743_vm2, %v2833_v9  ;;  %v1391_v9 = vmul.f32 %v3461_v54, %v3461_v54 }
 0x331   :  { %2304 = vst.msk [vmem:[%s3956_s12 + $0x70] sm:$0xff] %vm743_vm2, %v2835_v10 }
 0x343   :  { %v3627_v53 = vpop.xlane.xlu1 %1011 }
 0x344   :  { %v1032_v3 = vsub.f32 %v3546_v41, %v3627_v53 }
 0x347   :  { %v3631_v27 = vpop.xlane.xlu1 %1008 }
 0x348   :  { %v1031_v58 = vsub.f32 %v3549_v19, %v3631_v27 }
 0x34a   :  { %v1039_v4 = vmul.f32 1.442695, %v1031_v58 }
 0x351   :  { %v3643_v32 = vpop.xlane.xlu1 %1017 }
 0x355   :  { %v3647_v34 = vpop.xlane.xlu1 %1014 }
 0x356   :  { %v1033_v10 = vsub.f32 %v3559_v29, %v3647_v34 }
 0x359   :  { %v3649_v5 = vpop.xlane.xlu1 %1023 }
 0x35d   :  { %v3651_v26 = vpop.xlane.xlu1 %1020 }
 0x361   :  { %v3653_v43 = vpop.xlane.xlu1 %1029 }
 0x362   :  { %v1038_v49 = vsub.f32 %v3574_v50, %v3653_v43 }
 0x364   :  { %v1053_v20 = vmul.f32 1.442695, %v1038_v49 }
 0x366   :  { %2836 = vpow2.f32 %v1053_v20 }
 0x367   :  { %2838 = vpow2.f32 %v1039_v4 }
 0x370   :  { %v2837_v11 = vpop.eup %2836 }
 0x371   :  { %v1076_v8 = vsel %vm1006_vm4, %v2837_v11, 0.0  ;;  %v1409_v11 = vsel %vm73_vm0, %v1391_v9, 0.0 }
 0x372   :  { %1077 = vadd.xlane.f32.xlu0 %v1076_v8  ;;  %v1392_v8 = vmul.f32 %v3478_v61, %v3478_v61  ;;  %v1035_v61 = vsub.f32 %v3569_v47, %v3651_v26 }
 0x374   :  { %v1412_v54 = vsel %vm73_vm0, %v1392_v8, 0.0 }
 0x3d6   :  { %v2668_v12 = vpop.f32.mrb[38].mxu1 }
 0x3d7   :  { %v3683_v63 = vadd.f32 %v2668_v12, %v3543_v38  ;;  %v1997_v23 = vpop.f32.mrb[39].mxu1  ;;  %v3733_v12 = vpop.xlane.xlu0 %1404 }
 0x3d8   :  { %v3686_v30 = vadd.f32 %v3543_v38, %v1997_v23  ;;  %v1043_v23 = vmul.f32 1.442695, %v1033_v10 }
 0x3d9   :  { %v2039_v0 = vsel %vm1006_vm4, %v3683_v63, -inf }
 0x3da   :  { %2040 = vmax.xlane.f32.xlu1 %v2039_v0  ;;  %v2671_v1 = vpop.f32.mrb[40].mxu1  ;;  %v2036_v39 = vsel %vm1006_vm4, %v3686_v30, -inf  ;;  %v1034_v0 = vsub.f32 %v3556_v28, %v3643_v32 }
 0x3db   :  { %v2007_v17 = vpop.f32.mrb[41].mxu1  ;;  %v3691_v37 = vadd.f32 %v2671_v1, %v3543_v38  ;;  %v1393_v1 = vmul.f32 %v3472_v48, %v3472_v48 }
 0x3dc   :  { %v3696_v18 = vadd.f32 %v3543_v38, %v2007_v17 }
 0x3dd   :  { %v2045_v24 = vsel %vm1006_vm4, %v3691_v37, -inf }
 0x3de   :  { %2037 = vmax.xlane.f32.xlu1 %v2036_v39  ;;  %v2674_v2 = vpop.f32.mrb[42].mxu1  ;;  %v2042_v42 = vsel %vm1006_vm4, %v3696_v18, -inf  ;;  %v1045_v39 = vmul.f32 1.442695, %v1034_v0 }
 0x3df   :  { %v2017_v16 = vpop.f32.mrb[43].mxu1  ;;  %v3701_v33 = vadd.f32 %v2674_v2, %v3543_v38  ;;  %v1415_v2 = vsel %vm73_vm0, %v1393_v1, 0.0 }
 0x3e0   :  { %v3706_v36 = vadd.f32 %v3543_v38, %v2017_v16  ;;  %v2839_v16 = vpop.eup %2838 }
 0x3e1   :  { %v2051_v44 = vsel %vm1006_vm4, %v3701_v33, -inf  ;;  %v1055_v48 = vsel %vm1006_vm4, %v2839_v16, 0.0 }
 0x3e2   :  { %2046 = vmax.xlane.f32.xlu1 %v2045_v24  ;;  %v2677_v25 = vpop.f32.mrb[44].mxu1  ;;  %v2048_v57 = vsel %vm1006_vm4, %v3706_v36, -inf  ;;  %v1036_v24 = vsub.f32 %v3564_v14, %v3649_v5 }
 0x3e3   :  { %v2027_v40 = vpop.f32.mrb[45].mxu1  ;;  %v3711_v49 = vadd.f32 %v2677_v25, %v3543_v38  ;;  %v1047_v25 = vmul.f32 1.442695, %v1035_v61 }
 0x3e4   :  { %v3718_v20 = vadd.f32 %v3543_v38, %v2027_v40  ;;  %v1041_v38 = vmul.f32 1.442695, %v1032_v3  ;;  %v3745_v40 = vpop.xlane.xlu1 %1026 }
 0x3e5   :  { %v2057_v21 = vsel %vm1006_vm4, %v3711_v49, -inf }
 0x3e6   :  { %2043 = vmax.xlane.f32.xlu1 %v2042_v42  ;;  %v2054_v7 = vsel %vm1006_vm4, %v3718_v20, -inf  ;;  %2840 = vpow2.f32 %v1041_v38 }
 0x3e7   :  { %2842 = vpow2.f32 %v1043_v23 }
 0x3ea   :  { %2052 = vmax.xlane.f32.xlu1 %v2051_v44  ;;  %v1049_v44 = vmul.f32 1.442695, %v1036_v24 }
 0x3ee   :  { %2049 = vmax.xlane.f32.xlu1 %v2048_v57  ;;  %v1037_v57 = vsub.f32 %v3579_v56, %v3745_v40 }
 0x3f0   :  { %v2841_v42 = vpop.eup %2840 }
 0x3f1   :  { %v2843_v58 = vpop.eup %2842 }
 0x3f2   :  { %2058 = vmax.xlane.f32.xlu1 %v2057_v21  ;;  %v1058_v21 = vsel %vm1006_vm4, %v2841_v42, 0.0  ;;  %v1061_v10 = vsel %vm1006_vm4, %v2843_v58, 0.0 }
 0x3f6   :  { %2055 = vmax.xlane.f32.xlu1 %v2054_v7  ;;  %v1051_v7 = vmul.f32 1.442695, %v1037_v57 }
 0x3fa   :  { %1410 = vadd.xlane.f32.xlu1 %v1409_v11 }
 0x3fe   :  { %1413 = vadd.xlane.f32.xlu1 %v1412_v54 }
 0x3ff   :  { %v1078_v17 = vpop.xlane.xlu0 %1077 }
 0x400   :  { %2844 = vlog2.f32 %v1078_v17 }
 0x401   :  { %2846 = vpow2.f32 %v1045_v39 }
 0x402   :  { %1416 = vadd.xlane.f32.xlu1 %v1415_v2  ;;  %2848 = vpow2.f32 %v1047_v25 }
 0x403   :  { %2850 = vpow2.f32 %v1049_v44 }
 0x404   :  { %2852 = vpow2.f32 %v1051_v7 }
 0x406   :  { %1056 = vadd.xlane.f32.xlu1 %v1055_v48 }
 0x40a   :  { %v2845_v3 = vpop.eup %2844  ;;  %1059 = vadd.xlane.f32.xlu1 %v1058_v21 }
 0x40b   :  { %v1094_v4 = vmul.f32 0.6931472, %v2845_v3  ;;  %v2847_v38 = vpop.eup %2846 }
 0x40c   :  { %v1064_v8 = vsel %vm1006_vm4, %v2847_v38, 0.0  ;;  %v2849_v23 = vpop.eup %2848 }
 0x40d   :  { %v1102_v9 = vadd.f32 %v1094_v4, %v3653_v43  ;;  %v1067_v0 = vsel %vm1006_vm4, %v2849_v23, 0.0  ;;  %v2851_v54 = vpop.eup %2850 }
 0x40e   :  { %1062 = vadd.xlane.f32.xlu1 %v1061_v10  ;;  %v1070_v43 = vsel %vm1006_vm4, %v2851_v54, 0.0  ;;  %v2853_v1 = vpop.eup %2852 }
 0x40f   :  { %v1110_v11 = vsub.f32 %v3574_v50, %v1102_v9  ;;  %v1073_v50 = vsel %vm1006_vm4, %v2853_v1, 0.0 }
 0x411   :  { %1118 = vst.msk [vmem:[%s3957_s13 + $0x38] sm:$0xff] %vm1006_vm4, %v1110_v11 }
 0x412   :  { %1065 = vadd.xlane.f32.xlu1 %v1064_v8 }
 0x416   :  { %1068 = vadd.xlane.f32.xlu1 %v1067_v0 }
 0x41a   :  { %1071 = vadd.xlane.f32.xlu1 %v1070_v43 }
 0x41e   :  { %1074 = vadd.xlane.f32.xlu1 %v1073_v50 }
 0x467   :  { %v3762_v17 = vpop.xlane.xlu1 %2040 }
 0x468   :  { %v2061_v39 = vsub.f32 %v3683_v63, %v3762_v17 }
 0x46a   :  { %v2070_v61 = vmul.f32 1.442695, %v2061_v39 }
 0x46b   :  { %v3766_v2 = vpop.xlane.xlu1 %2037 }
 0x46c   :  { %2854 = vpow2.f32 %v2070_v61  ;;  %v2060_v16 = vsub.f32 %v3686_v30, %v3766_v2 }
 0x46e   :  { %v2068_v24 = vmul.f32 1.442695, %v2060_v16 }
 0x46f   :  { %v3770_v25 = vpop.xlane.xlu1 %2046 }
 0x470   :  { %2856 = vpow2.f32 %v2068_v24  ;;  %v2063_v48 = vsub.f32 %v3691_v37, %v3770_v25 }
 0x472   :  { %v2074_v42 = vmul.f32 1.442695, %v2063_v48 }
 0x473   :  { %v3774_v44 = vpop.xlane.xlu1 %2043 }
 0x474   :  { %2858 = vpow2.f32 %v2074_v42  ;;  %v2062_v57 = vsub.f32 %v3696_v18, %v3774_v44 }
 0x476   :  { %v2855_v58 = vpop.eup %2854  ;;  %v2072_v21 = vmul.f32 1.442695, %v2062_v57 }
 0x477   :  { %v3778_v3 = vpop.xlane.xlu1 %2052  ;;  %v2087_v4 = vsel %vm1006_vm4, %v2855_v58, 0.0 }
 0x478   :  { %2860 = vpow2.f32 %v2072_v21  ;;  %v2065_v7 = vsub.f32 %v3701_v33, %v3778_v3  ;;  %2088 = vadd.xlane.f32.xlu0 %v2087_v4 }
 0x47a   :  { %v2857_v9 = vpop.eup %2856  ;;  %v2078_v10 = vmul.f32 1.442695, %v2065_v7 }
 0x47b   :  { %v3783_v38 = vpop.xlane.xlu1 %2049  ;;  %v2084_v11 = vsel %vm1006_vm4, %v2857_v9, 0.0 }
 0x47c   :  { %2862 = vpow2.f32 %v2078_v10  ;;  %v2064_v8 = vsub.f32 %v3706_v36, %v3783_v38  ;;  %2085 = vadd.xlane.f32.xlu1 %v2084_v11 }
 0x47e   :  { %v2859_v23 = vpop.eup %2858  ;;  %v2076_v0 = vmul.f32 1.442695, %v2064_v8 }
 0x47f   :  { %v3788_v54 = vpop.xlane.xlu1 %2058  ;;  %v2093_v43 = vsel %vm1006_vm4, %v2859_v23, 0.0 }
 0x480   :  { %2864 = vpow2.f32 %v2076_v0  ;;  %v2067_v1 = vsub.f32 %v3711_v49, %v3788_v54  ;;  %2094 = vadd.xlane.f32.xlu0 %v2093_v43 }
 0x482   :  { %v2861_v50 = vpop.eup %2860  ;;  %v2082_v39 = vmul.f32 1.442695, %v2067_v1 }
 0x483   :  { %v3793_v61 = vpop.xlane.xlu1 %2055  ;;  %v2090_v16 = vsel %vm1006_vm4, %v2861_v50, 0.0 }
 0x484   :  { %2866 = vpow2.f32 %v2082_v39  ;;  %v2066_v24 = vsub.f32 %v3718_v20, %v3793_v61  ;;  %2091 = vadd.xlane.f32.xlu1 %v2090_v16 }
 0x486   :  { %v2863_v48 = vpop.eup %2862  ;;  %v2080_v42 = vmul.f32 1.442695, %v2066_v24 }
 0x487   :  { %v3798_v57 = vpop.xlane.xlu1 %1410  ;;  %v2099_v58 = vsel %vm1006_vm4, %v2863_v48, 0.0 }
 0x488   :  { %2868 = vpow2.f32 %v2080_v42  ;;  %2100 = vadd.xlane.f32.xlu0 %v2099_v58 }
 0x48a   :  { %v2865_v21 = vpop.eup %2864 }
 0x48b   :  { %v3801_v4 = vpop.xlane.xlu1 %1413  ;;  %v2096_v7 = vsel %vm1006_vm4, %v2865_v21, 0.0 }
 0x48c   :  { %2097 = vadd.xlane.f32.xlu1 %v2096_v7 }
 0x48e   :  { %v2867_v9 = vpop.eup %2866 }
 0x48f   :  { %v3804_v10 = vpop.xlane.xlu1 %1416  ;;  %v2105_v11 = vsel %vm1006_vm4, %v2867_v9, 0.0 }
 0x490   :  { %2106 = vadd.xlane.f32.xlu0 %v2105_v11 }
 0x492   :  { %v2869_v8 = vpop.eup %2868 }
 0x493   :  { %v1057_v23 = vpop.xlane.xlu1 %1056  ;;  %v2102_v0 = vsel %vm1006_vm4, %v2869_v8, 0.0 }
 0x494   :  { %2870 = vlog2.f32 %v1057_v23  ;;  %2103 = vadd.xlane.f32.xlu1 %v2102_v0 }
 0x497   :  { %v1060_v43 = vpop.xlane.xlu1 %1059 }
 0x498   :  { %2872 = vlog2.f32 %v1060_v43 }
 0x49b   :  { %v1063_v1 = vpop.xlane.xlu1 %1062 }
 0x49c   :  { %2874 = vlog2.f32 %v1063_v1 }
 0x49e   :  { %v2871_v50 = vpop.eup %2870 }
 0x49f   :  { %v1080_v39 = vmul.f32 0.6931472, %v2871_v50  ;;  %v1066_v16 = vpop.xlane.xlu1 %1065 }
 0x4a0   :  { %2876 = vlog2.f32 %v1066_v16 }
 0x4a1   :  { %v1095_v24 = vadd.f32 %v1080_v39, %v3631_v27 }
 0x4a2   :  { %v2873_v48 = vpop.eup %2872 }
 0x4a3   :  { %v1103_v42 = vsub.f32 %v3549_v19, %v1095_v24  ;;  %v1082_v58 = vmul.f32 0.6931472, %v2873_v48  ;;  %v1069_v21 = vpop.xlane.xlu1 %1068 }
 0x4a4   :  { %2878 = vlog2.f32 %v1069_v21 }
 0x4a5   :  { %1111 = vst.msk [vmem:[%s3957_s13] sm:$0xff] %vm1006_vm4, %v1103_v42  ;;  %v1096_v7 = vadd.f32 %v1082_v58, %v3627_v53 }
 0x4a6   :  { %v2875_v9 = vpop.eup %2874 }
 0x4a7   :  { %v1104_v11 = vsub.f32 %v3546_v41, %v1096_v7  ;;  %v1084_v8 = vmul.f32 0.6931472, %v2875_v9  ;;  %v1072_v23 = vpop.xlane.xlu1 %1071 }
 0x4a8   :  { %2880 = vlog2.f32 %v1072_v23 }
 0x4a9   :  { %1112 = vst.msk [vmem:[%s3957_s13 + $0x8] sm:$0xff] %vm1006_vm4, %v1104_v11  ;;  %v1097_v19 = vadd.f32 %v1084_v8, %v3647_v34 }
 0x4aa   :  { %v2877_v27 = vpop.eup %2876 }
 0x4ab   :  { %v1105_v0 = vsub.f32 %v3559_v29, %v1097_v19  ;;  %v1086_v43 = vmul.f32 0.6931472, %v2877_v27  ;;  %v1075_v1 = vpop.xlane.xlu1 %1074 }
 0x4ac   :  { %2882 = vlog2.f32 %v1075_v1 }
 0x4ad   :  { %1113 = vst.msk [vmem:[%s3957_s13 + $0x10] sm:$0xff] %vm1006_vm4, %v1105_v0  ;;  %v1098_v41 = vadd.f32 %v1086_v43, %v3643_v32 }
 0x4ae   :  { %v2879_v53 = vpop.eup %2878 }
 0x4af   :  { %v1106_v50 = vsub.f32 %v3556_v28, %v1098_v41  ;;  %v1088_v39 = vmul.f32 0.6931472, %v2879_v53 }
 0x4b1   :  { %1114 = vst.msk [vmem:[%s3957_s13 + $0x18] sm:$0xff] %vm1006_vm4, %v1106_v50  ;;  %v1099_v29 = vadd.f32 %v1088_v39, %v3651_v26 }
 0x4b2   :  { %v2881_v34 = vpop.eup %2880 }
 0x4b3   :  { %v1107_v16 = vsub.f32 %v3569_v47, %v1099_v29  ;;  %v1090_v24 = vmul.f32 0.6931472, %v2881_v34 }
 0x4b5   :  { %1115 = vst.msk [vmem:[%s3957_s13 + $0x20] sm:$0xff] %vm1006_vm4, %v1107_v16  ;;  %v1100_v32 = vadd.f32 %v1090_v24, %v3649_v5 }
 0x4b6   :  { %v2883_v28 = vpop.eup %2882 }
 0x4b7   :  { %v1108_v48 = vsub.f32 %v3564_v14, %v1100_v32  ;;  %v1092_v42 = vmul.f32 0.6931472, %v2883_v28 }
 0x4b9   :  { %1116 = vst.msk [vmem:[%s3957_s13 + $0x28] sm:$0xff] %vm1006_vm4, %v1108_v48  ;;  %v1101_v26 = vadd.f32 %v1092_v42, %v3745_v40 }
 0x4bb   :  { %v1109_v47 = vsub.f32 %v3579_v56, %v1101_v26  ;;  %v1418_v26 = vmul.f32 2.0, %v3587_v22 }
 0x4bd   :  { %1117 = vst.msk [vmem:[%s3957_s13 + $0x30] sm:$0xff] %vm1006_vm4, %v1109_v47  ;;  %v1420_v47 = vmul.f32 2.0, %v3591_v45 }
 0x4bf   :  { %v1428_v22 = vsub.f32 %v3623_v35, %v1420_v47 }
 0x4c7   :  { %1434 = vxpose.xlu1.b32.start [1/8] (short) (narrow) %v3621_v15, 8 }
 0x4cb   :  { %1435 = vxpose.xlu1.b32.cont [2/8] (short) (narrow) %v3617_v52, 8 }
 0x4cf   :  { %1436 = vxpose.xlu1.b32.cont [3/8] (short) (narrow) %v3623_v35, 8 }
 0x4d3   :  { %1437 = vxpose.xlu1.b32.cont [4/8] (short) (narrow) %v3733_v12, 8 }
 0x4d7   :  { %1438 = vxpose.xlu1.b32.cont [5/8] (short) (narrow) %v3625_v46, 8 }
 0x4db   :  { %1439 = vxpose.xlu1.b32.cont [6/8] (short) (narrow) %v3798_v57, 8 }
 0x4df   :  { %1440 = vxpose.xlu1.b32.cont [7/8] (short) (narrow) %v3801_v4, 8 }
 0x4e3   :  { %1441 = vxpose.xlu1.b32.end [8/8] (short) (narrow) %v3804_v10, 8 }
 0x505   :  { %v2089_v14 = vpop.xlane.xlu0 %2088 }
 0x506   :  { %2884 = vlog2.f32 %v2089_v14  ;;  %v1422_v14 = vmul.f32 2.0, %v3595_v60 }
 0x508   :  { %v1430_v45 = vsub.f32 %v3625_v46, %v1422_v14 }
 0x509   :  { %v2086_v56 = vpop.xlane.xlu1 %2085 }
 0x50a   :  { %2886 = vlog2.f32 %v2086_v56 }
 0x50d   :  { %v2095_v5 = vpop.xlane.xlu0 %2094 }
 0x50e   :  { %2888 = vlog2.f32 %v2095_v5  ;;  %v1424_v5 = vmul.f32 2.0, %v3599_v62 }
 0x510   :  { %v2885_v40 = vpop.eup %2884 }
 0x511   :  { %v2111_v58 = vmul.f32 0.6931472, %v2885_v40  ;;  %v2092_v21 = vpop.xlane.xlu1 %2091 }
 0x512   :  { %2890 = vlog2.f32 %v2092_v21 }
 0x513   :  { %v2125_v7 = vadd.f32 %v2111_v58, %v3762_v17  ;;  %v1426_v58 = vsub.f32 %v3621_v15, %v1418_v26 }
 0x514   :  { %v2887_v9 = vpop.eup %2886 }
 0x515   :  { %v2133_v11 = vsub.f32 %v3683_v63, %v2125_v7  ;;  %v2109_v8 = vmul.f32 0.6931472, %v2887_v9  ;;  %v2101_v23 = vpop.xlane.xlu0 %2100 }
 0x516   :  { %2892 = vlog2.f32 %v2101_v23 }
 0x517   :  { %2323 = vst.msk [vmem:[%s3957_s13 + $0x48] sm:$0xff] %vm1006_vm4, %v2133_v11  ;;  %v2124_v19 = vadd.f32 %v2109_v8, %v3766_v2 }
 0x518   :  { %v2889_v27 = vpop.eup %2888 }
 0x519   :  { %v2132_v0 = vsub.f32 %v3686_v30, %v2124_v19  ;;  %v2115_v43 = vmul.f32 0.6931472, %v2889_v27  ;;  %v2098_v1 = vpop.xlane.xlu1 %2097 }
 0x51a   :  { %2894 = vlog2.f32 %v2098_v1 }
 0x51b   :  { %2322 = vst.msk [vmem:[%s3957_s13 + $0x40] sm:$0xff] %vm1006_vm4, %v2132_v0  ;;  %v2127_v63 = vadd.f32 %v2115_v43, %v3770_v25 }
 0x51c   :  { %v2891_v17 = vpop.eup %2890 }
 0x51d   :  { %v2135_v41 = vsub.f32 %v3691_v37, %v2127_v63  ;;  %v2113_v53 = vmul.f32 0.6931472, %v2891_v17  ;;  %v2107_v50 = vpop.xlane.xlu0 %2106 }
 0x51e   :  { %2896 = vlog2.f32 %v2107_v50 }
 0x51f   :  { %2325 = vst.msk [vmem:[%s3957_s13 + $0x58] sm:$0xff] %vm1006_vm4, %v2135_v41  ;;  %v2126_v30 = vadd.f32 %v2113_v53, %v3774_v44 }
 0x520   :  { %v2893_v2 = vpop.eup %2892 }
 0x521   :  { %v2134_v39 = vsub.f32 %v3696_v18, %v2126_v30  ;;  %v2119_v29 = vmul.f32 0.6931472, %v2893_v2  ;;  %v2104_v34 = vpop.xlane.xlu1 %2103 }
 0x522   :  { %2898 = vlog2.f32 %v2104_v34 }
 0x523   :  { %2324 = vst.msk [vmem:[%s3957_s13 + $0x50] sm:$0xff] %vm1006_vm4, %v2134_v39  ;;  %v2129_v37 = vadd.f32 %v2119_v29, %v3778_v3 }
 0x524   :  { %v2895_v25 = vpop.eup %2894 }
 0x525   :  { %v2137_v16 = vsub.f32 %v3701_v33, %v2129_v37  ;;  %v2117_v24 = vmul.f32 0.6931472, %v2895_v25 }
 0x527   :  { %2327 = vst.msk [vmem:[%s3957_s13 + $0x68] sm:$0xff] %vm1006_vm4, %v2137_v16  ;;  %v2128_v18 = vadd.f32 %v2117_v24, %v3783_v38 }
 0x528   :  { %v2897_v44 = vpop.eup %2896 }
 0x529   :  { %v2136_v32 = vsub.f32 %v3706_v36, %v2128_v18  ;;  %v2123_v28 = vmul.f32 0.6931472, %v2897_v44 }
 0x52b   :  { %2326 = vst.msk [vmem:[%s3957_s13 + $0x60] sm:$0xff] %vm1006_vm4, %v2136_v32  ;;  %v2131_v3 = vadd.f32 %v2123_v28, %v3788_v54  ;;  %v1419_v54 = vmul.f32 2.0, %v3585_v6 }
 0x52c   :  { %v2899_v33 = vpop.eup %2898 }
 0x52d   :  { %v2139_v48 = vsub.f32 %v3711_v49, %v2131_v3  ;;  %v2121_v42 = vmul.f32 0.6931472, %v2899_v33  ;;  %v1421_v49 = vmul.f32 2.0, %v3589_v13  ;;  %v1427_v56 = vsub.f32 %v3617_v52, %v1419_v54 }
 0x52f   :  { %2329 = vst.msk [vmem:[%s3957_s13 + $0x78] sm:$0xff] %vm1006_vm4, %v2139_v48  ;;  %v2130_v38 = vadd.f32 %v2121_v42, %v3793_v61  ;;  %v1423_v61 = vmul.f32 2.0, %v3593_v51  ;;  %v1429_v6 = vsub.f32 %v3733_v12, %v1421_v49  ;;  %v1432_v51 = vsub.f32 %v3801_v4, %v1424_v5 }
 0x531   :  { %v2138_v36 = vsub.f32 %v3718_v20, %v2130_v38  ;;  %v1425_v20 = vmul.f32 2.0, %v3597_v55  ;;  %v1431_v60 = vsub.f32 %v3798_v57, %v1423_v61 }
 0x533   :  { %2328 = vst.msk [vmem:[%s3957_s13 + $0x70] sm:$0xff] %vm1006_vm4, %v2138_v36  ;;  %v1433_v55 = vsub.f32 %v3804_v10, %v1425_v20  ;;  %s2924_s13 = smov [#allocation3]  }
 0x534   :  { %s2154_s22 = sshll.u32 %s2924_s13, 4  ;;  %s2155_s22 = int_to_ptr.vmem [resolvable:$true] %s2154_s22 }
 0x535   :  { %s2900_s23 = scalar_lea.vmem %s2155_s22, 2048  ;;  %p2905_p1 = scmp.lt.s32.totalorder %s2155_s22, %s2155_s22 }
 0x536   :  { %p2901_p0 = scmp.ne.s32.totalorder %s2155_s22, %s2900_s23  ;;  %p2906_p2 = scmp.lt.s32.totalorder %s2900_s23, %s2900_s23 }
 0x538   :  { %p2907_p3 = por %p2906_p2, %p2905_p1 }
 0x53a   :  { %p2908_p4 = pnand %p2907_p3, %p2901_p0 }
 0x547   :  { %v1450_v40 = vpop.trf.xlu1 }
 0x548   :  { %v1469_v13 = vrot.slane %v1450_v40, %v414_v59 }
 0x54a   :  { %v1470_v52 = vadd.f32 %v1469_v13, %v1426_v58  ;;  %v1471_v62 = vadd.f32 %v1469_v13, %v1427_v56  ;;  %v1472_v21 = vadd.f32 %v1469_v13, %v1428_v22  ;;  %v1473_v7 = vadd.f32 %v1469_v13, %v1429_v6 }
 0x54b   :  { %v1474_v15 = vadd.f32 %v1469_v13, %v1430_v45  ;;  %v1475_v12 = vadd.f32 %v1469_v13, %v1431_v60  ;;  %v1476_v35 = vadd.f32 %v1469_v13, %v1432_v51  ;;  %v1477_v9 = vadd.f32 %v1469_v13, %v1433_v55 }
 0x54c   :  { %v1478_v31 = vmax.f32 %v1470_v52, 0.0  ;;  %v1479_v59 = vmax.f32 %v1471_v62, 0.0  ;;  %v1480_v11 = vmax.f32 %v1472_v21, 0.0  ;;  %v1481_v46 = vmax.f32 %v1473_v7, 0.0 }
 0x54d   :  { %v1482_v8 = vmax.f32 %v1474_v15, 0.0  ;;  %v1483_v57 = vmax.f32 %v1475_v12, 0.0  ;;  %v1484_v23 = vmax.f32 %v1476_v35, 0.0  ;;  %v1485_v4 = vmax.f32 %v1477_v9, 0.0 }
 0x54e   :  { %1487 = vst.msk [vmem:[#allocation3 + $0x40] sm:$0xff] %vm432_vm3, %v1478_v31  ;;  %1488 = vst.msk [vmem:[#allocation3 + $0x48] sm:$0xff] %vm432_vm3, %v1479_v59 }
 0x54f   :  { %1489 = vst.msk [vmem:[#allocation3 + $0x50] sm:$0xff] %vm432_vm3, %v1480_v11  ;;  %1490 = vst.msk [vmem:[#allocation3 + $0x58] sm:$0xff] %vm432_vm3, %v1481_v46 }
 0x550   :  { %1491 = vst.msk [vmem:[#allocation3 + $0x60] sm:$0xff] %vm432_vm3, %v1482_v8  ;;  %1492 = vst.msk [vmem:[#allocation3 + $0x68] sm:$0xff] %vm432_vm3, %v1483_v57 }
 0x551   :  { %1493 = vst.msk [vmem:[#allocation3 + $0x70] sm:$0xff] %vm432_vm3, %v1484_v23  ;;  %1494 = vst.msk [vmem:[#allocation3 + $0x78] sm:$0xff] %vm432_vm3, %v1485_v4 }
 0x552   :  { %2911 = shalt.err (!%p2908_p4)
}
 0x553   :  { %s2912_s26 = scalar_lea.hbm %s3955_s11, 2048 }
 0x554   :  { %p2913_p5 = scmp.ne.s32.totalorder %s3955_s11, %s2912_s26  ;;  %p2916_p6 = scmp.lt.u32.totalorder %s2912_s26, %s3955_s11 }
 0x556   :  { %p2918_p7 = pnand %p2916_p6, %p2913_p5 }
 0x558   :  { %2921 = shalt.err (!%p2918_p7)
}
 0x559   :  { %s2925_s14 = smov 128   ;;  %s2926_s10 = smov 8  }
 0x55a   :  { %2160 = dma.vmem_to_hbm [thread:$0]  %s2155_s22, 2048, %s3955_s11, [#allocation4], %s2925_s14, %s2925_s14, %s2926_s10  }
 0x55b   :  { %2922 = dma.done.wait [#allocation4], 2048  }
 0x55c   :  { %2923 = vsyncadd [#allocation4], 4294965248 }
 0x55d   :  { %2172 = vsyncpa [#allocation4], 1 }

</bundles_post_ra>
